<compile_context>
chip_gen: v7x
topology: tpu7x:2x2x1
jax: 0.10.0
libtpu: 0.0.40
codegen_flags: <defaults>
</compile_context>

<pallas_src>
import functools

import jax
import jax.numpy as jnp
from jax.experimental import pallas as pl
from jax.experimental.pallas import tpu as pltpu


# ----------------------------------------------------------------------------
# Fused kernel: 1x1 conv + BN(train) + ReLU + grouped 3x3 conv
# ----------------------------------------------------------------------------
def fused_kernel(x_ref, w1_ref, gamma_ref, beta_ref, w2hbm_ref,
                 o_ref, ypad_ref, w2v_ref, dma_sem,
                 *, eps, n, h, w, wp, top_pad, bot_pad, ch_splits):
    # x_ref:      (N*H*WP, Cin)        bf16   (width zero-padded 14->16)
    # w1_ref:     (Cin, C)             bf16
    # gamma/beta: (1, C)               f32
    # w2hbm_ref:  (9, C, 128)          bf16   block-diag grouped weights (HBM)
    # o_ref:      (N, H*WP, C)         f32
    # ypad_ref:   (N, top+H*WP+bot, C) bf16   scratch
    # w2v_ref:    (9, C, 128)          bf16   scratch (DMA target)
    hwp = h * wp
    rows = n * hwp
    valid = n * h * w                    # BN statistics are over real pixels
    pad_rows = rows - valid
    cmid = ypad_ref.shape[2]

    # Kick off the (largest) weight DMA first so it overlaps stage 1.
    w2_copy = pltpu.make_async_copy(w2hbm_ref, w2v_ref, dma_sem)
    w2_copy.start()

    # ---- stage 1: 1x1 conv (bf16 MXU matmul, f32 accum) + BN(train) + ReLU ----
    y = jnp.dot(x_ref[...], w1_ref[...], preferred_element_type=jnp.float32)
    mean = jnp.sum(y, axis=0, keepdims=True) * (1.0 / valid)
    d = y - mean
    ssd = jnp.sum(d * d, axis=0, keepdims=True)
    # Width-pad rows hold y == 0 exactly (zero input -> zero conv output); drop
    # their (0 - mean)^2 contribution so var matches the unpadded batch.
    var = (ssd - float(pad_rows) * mean * mean) * (1.0 / valid)
    scale = gamma_ref[...] * jax.lax.rsqrt(var + eps)
    shift = beta_ref[...] - mean * scale
    col = jax.lax.broadcasted_iota(jnp.int32, (rows, 1), 0) % wp
    z = jnp.where(col < w, jnp.maximum(y * scale + shift, 0.0), 0.0)
    z = z.astype(jnp.bfloat16)

    # ---- scatter into per-sample vertically padded scratch (zero pads only) ---
    for b in range(n):
        ypad_ref[b, 0:top_pad, :] = jnp.zeros((top_pad, cmid), jnp.bfloat16)
        ypad_ref[b, top_pad + hwp:top_pad + hwp + bot_pad, :] = jnp.zeros(
            (bot_pad, cmid), jnp.bfloat16)
        ypad_ref[b, top_pad:top_pad + hwp, :] = z[b * hwp:(b + 1) * hwp, :]

    # Grouped-conv weights must be resident before stage 2 starts.
    w2_copy.wait()

    # ---- stage 2: grouped 3x3 conv, channel-tile outermost ---------------------
    # 9 shifted-slice matmuls per (sample, channel tile); exactly ONE f32
    # accumulator is live at any time.  No wrap masks: the width-16 layout's
    # zero pad columns play the role of the conv's horizontal zero padding.
    base = top_pad - wp - 1
    for b in range(n):
        for (off, width) in ch_splits:
            acc = None
            for kh in range(3):
                for kw in range(3):
                    start = base + kh * wp + kw
                    patch = ypad_ref[b, start:start + hwp, off:off + width]
                    wt = w2v_ref[kh * 3 + kw, off:off + width, 0:width]
                    c = jnp.dot(patch, wt, preferred_element_type=jnp.float32)
                    acc = c if acc is None else acc + c
            o_ref[b, :, off:off + width] = acc


# ----------------------------------------------------------------------------
# One-time parameter packing (hoisted out of the per-forward path)
# ----------------------------------------------------------------------------
def precompute_params(w1, gamma, beta, w2, groups):
    c_out = w2.shape[0]
    cg = w2.shape[1]                           # input channels per group
    assert c_out % groups == 0 and c_out // groups == cg, \
        "kernel assumes square per-group blocks"

    w1t = jnp.asarray(w1[:, :, 0, 0].T, jnp.bfloat16)           # (Cin, Cout)
    gamma2 = jnp.asarray(gamma, jnp.float32).reshape(1, -1)
    beta2 = jnp.asarray(beta, jnp.float32).reshape(1, -1)

    # Block-diagonal lane tiles of <=128 output channels (8 groups x 16ch), all
    # taps stacked in one (9, Cin, 128) array so a single manual DMA fetches it.
    gpt = max(1, 128 // cg)                     # groups per lane tile
    tile_w = gpt * cg
    w2x = jnp.zeros((9, groups * cg, tile_w), jnp.float32)
    for g in range(groups):
        wg = w2[g * cg:(g + 1) * cg].astype(jnp.float32)        # (cg_o, cg_i, 3, 3)
        blk = jnp.transpose(wg, (2, 3, 1, 0)).reshape(9, cg, cg)  # (9, in, out)
        jb = (g % gpt) * cg
        w2x = w2x.at[:, g * cg:(g + 1) * cg, jb:jb + cg].set(blk)

    splits = []
    n_tiles = (groups + gpt - 1) // gpt
    for t in range(n_tiles):
        g0, g1 = t * gpt, min(groups, (t + 1) * gpt)
        splits.append((g0 * cg, (g1 - g0) * cg))

    return {"w1t": w1t, "gamma": gamma2, "beta": beta2,
            "w2x": w2x.astype(jnp.bfloat16),
            "ch_splits": tuple(splits), "c_out": c_out}


# ----------------------------------------------------------------------------
# Model forward (wrapper; NCHW in / NCHW out to match the PyTorch module)
# ----------------------------------------------------------------------------
def model_forward(x_nchw, params, *, eps=1e-5):
    n, c_in, h, w = x_nchw.shape
    c_mid = params["w1t"].shape[1]                 # channels after 1x1 conv
    c_out = params["c_out"]
    wp = ((w + 1 + 7) // 8) * 8                    # padded width (14 -> 16)
    hwp = h * wp
    top_pad = ((wp + 1 + 15) // 16) * 16           # >= wp+1, bf16-pack aligned
    bot_pad = top_pad

    # NCHW -> (N*H*WP, Cin), width zero-padded, bf16 for the MXU.
    # TODO(synk): if the surrounding model is channels-last, accept NHWC here and
    # drop this transpose/pad/cast fusion entirely.
    x_nhwc = jnp.transpose(x_nchw, (0, 2, 3, 1))
    x_pad = jnp.pad(x_nhwc, ((0, 0), (0, 0), (0, wp - w), (0, 0)))
    x_flat = x_pad.reshape(n * hwp, c_in).astype(jnp.bfloat16)

    kernel = functools.partial(
        fused_kernel, eps=eps, n=n, h=h, w=w, wp=wp,
        top_pad=top_pad, bot_pad=bot_pad, ch_splits=params["ch_splits"])

    out = pl.pallas_call(
        kernel,
        out_shape=jax.ShapeDtypeStruct((n, hwp, c_out), jnp.float32),
        in_specs=[
            pl.BlockSpec(memory_space=pltpu.MemorySpace.VMEM),   # x
            pl.BlockSpec(memory_space=pltpu.MemorySpace.VMEM),   # w1t
            pl.BlockSpec(memory_space=pltpu.MemorySpace.VMEM),   # gamma
            pl.BlockSpec(memory_space=pltpu.MemorySpace.VMEM),   # beta
            pl.BlockSpec(memory_space=pl.ANY),                   # w2x (stays in HBM)
        ],
        out_specs=pl.BlockSpec(memory_space=pltpu.MemorySpace.VMEM),
        scratch_shapes=[
            pltpu.VMEM((n, top_pad + hwp + bot_pad, c_mid), jnp.bfloat16),
            pltpu.VMEM(params["w2x"].shape, jnp.bfloat16),
            pltpu.SemaphoreType.DMA,
        ],
    )(x_flat, params["w1t"], params["gamma"], params["beta"], params["w2x"])

    out = out.reshape(n, h, wp, c_out)[:, :, :w, :]              # drop pad cols
    return jnp.transpose(out, (0, 3, 1, 2))                      # NCHW


# ----------------------------------------------------------------------------
# Pure-JAX reference (mirrors PyTorch forward, training-mode BN, f32)
# ----------------------------------------------------------------------------
def reference_forward(x, w1, gamma, beta, w2, *, groups=20, eps=1e-5):
    y = jax.lax.conv_general_dilated(
        x, w1, (1, 1), 'VALID', dimension_numbers=('NCHW', 'OIHW', 'NCHW'))
    mean = jnp.mean(y, axis=(0, 2, 3), keepdims=True)
    var = jnp.var(y, axis=(0, 2, 3), keepdims=True)              # biased
    y = (y - mean) / jnp.sqrt(var + eps)
    y = y * gamma.reshape(1, -1, 1, 1) + beta.reshape(1, -1, 1, 1)
    y = jnp.maximum(y, 0.0)
    out = jax.lax.conv_general_dilated(
        y, w2, (1, 1), ((1, 1), (1, 1)),
        dimension_numbers=('NCHW', 'OIHW', 'NCHW'),
        feature_group_count=groups)
    return out


if __name__ == "__main__":
    # Shapes implied by the module: C=320 (fixed by the conv weights), 20 groups.
    N, C, H, W = 1, 320, 14, 14
    GROUPS = 20
    CG = C // GROUPS

    key = jax.random.PRNGKey(0)
    kx, kw1, kw2 = jax.random.split(key, 3)

    x = jax.random.normal(kx, (N, C, H, W), dtype=jnp.float32)
    w1 = jax.random.normal(kw1, (C, C, 1, 1), dtype=jnp.float32) / jnp.sqrt(C)
    w2 = jax.random.normal(kw2, (C, CG, 3, 3), dtype=jnp.float32) / jnp.sqrt(CG * 9.0)
    gamma = jnp.ones((C,), jnp.float32)   # BatchNorm2d default affine init
    beta = jnp.zeros((C,), jnp.float32)

    params = precompute_params(w1, gamma, beta, w2, GROUPS)   # one-time packing
    out = jax.block_until_ready(model_forward(x, params, eps=1e-5))

    ref = jax.block_until_ready(
        reference_forward(x, w1, gamma, beta, w2, groups=GROUPS, eps=1e-5))

    assert out.shape == (N, C, H, W), out.shape
    assert bool(jnp.all(jnp.isfinite(out)))
    max_err = float(jnp.max(jnp.abs(out - ref)))
    assert bool(jnp.allclose(out, ref, atol=5e-2, rtol=5e-2)), max_err

    print("KERNEL_OK")
</pallas_src>

<mosaic_0001>
module attributes {stable_mosaic.version = 11 : i64} {
  func.func @fused_kernel(%arg0: memref<224x320xbf16, #tpu.memory_space<vmem>>, %arg1: memref<320x320xbf16, #tpu.memory_space<vmem>>, %arg2: memref<1x320xf32, #tpu.memory_space<vmem>>, %arg3: memref<1x320xf32, #tpu.memory_space<vmem>>, %arg4: memref<9x320x128xbf16, #tpu.memory_space<any>>, %arg5: memref<1x224x320xf32, #tpu.memory_space<vmem>>, %arg6: memref<1x288x320xbf16, #tpu.memory_space<vmem>>, %arg7: memref<9x320x128xbf16, #tpu.memory_space<vmem>>, %arg8: memref<!tpu.dma_semaphore, #tpu.memory_space<semaphore_mem>>) attributes {dimension_semantics = [], scalar_prefetch = 0 : i64, scratch_operands = 3 : i64, tpu.core_type = #tpu.core_type<tc>} {
    tpu.enqueue_dma source(%arg4 : memref<9x320x128xbf16, #tpu.memory_space<any>>) target(%arg7 : memref<9x320x128xbf16, #tpu.memory_space<vmem>>) target_semaphore(%arg8 : memref<!tpu.dma_semaphore, #tpu.memory_space<semaphore_mem>>)
    %c0 = arith.constant 0 : index
    %c0_0 = arith.constant 0 : index
    %0 = vector.load %arg0[%c0, %c0_0] : memref<224x320xbf16, #tpu.memory_space<vmem>>, vector<224x320xbf16>
    %c0_1 = arith.constant 0 : index
    %c0_2 = arith.constant 0 : index
    %1 = vector.load %arg1[%c0_1, %c0_2] : memref<320x320xbf16, #tpu.memory_space<vmem>>, vector<320x320xbf16>
    %cst = arith.constant dense<0.000000e+00> : vector<224x320xf32>
    %2 = tpu.matmul %0, %1, %cst {dimension_numbers = #tpu.dot_dimension_numbers<[1], [0], [0], [1], [0, 0, 1, 1], [], []>} : vector<224x320xbf16>, vector<320x320xbf16>, vector<224x320xf32> -> vector<224x320xf32>
    %cst_3 = arith.constant dense<0.000000e+00> : vector<320xf32>
    %3 = vector.multi_reduction <add>, %2, %cst_3 [0] : vector<224x320xf32> to vector<320xf32>
    %4 = vector.shape_cast %3 : vector<320xf32> to vector<1x320xf32>
    %cst_4 = arith.constant 0.00510204071 : f32
    %5 = vector.broadcast %cst_4 : f32 to vector<1x320xf32>
    %6 = arith.mulf %4, %5 : vector<1x320xf32>
    %7 = vector.broadcast %6 : vector<1x320xf32> to vector<224x320xf32>
    %8 = arith.subf %2, %7 : vector<224x320xf32>
    %9 = arith.mulf %8, %8 : vector<224x320xf32>
    %cst_5 = arith.constant dense<0.000000e+00> : vector<320xf32>
    %10 = vector.multi_reduction <add>, %9, %cst_5 [0] : vector<224x320xf32> to vector<320xf32>
    %11 = vector.shape_cast %10 : vector<320xf32> to vector<1x320xf32>
    %cst_6 = arith.constant 2.800000e+01 : f32
    %12 = vector.broadcast %cst_6 : f32 to vector<1x320xf32>
    %13 = arith.mulf %12, %6 : vector<1x320xf32>
    %14 = arith.mulf %13, %6 : vector<1x320xf32>
    %15 = arith.subf %11, %14 : vector<1x320xf32>
    %cst_7 = arith.constant 0.00510204071 : f32
    %16 = vector.broadcast %cst_7 : f32 to vector<1x320xf32>
    %17 = arith.mulf %15, %16 : vector<1x320xf32>
    %c0_8 = arith.constant 0 : index
    %c0_9 = arith.constant 0 : index
    %18 = vector.load %arg2[%c0_8, %c0_9] : memref<1x320xf32, #tpu.memory_space<vmem>>, vector<1x320xf32>
    %cst_10 = arith.constant 9.99999974E-6 : f32
    %19 = vector.broadcast %cst_10 : f32 to vector<1x320xf32>
    %20 = arith.addf %17, %19 : vector<1x320xf32>
    %21 = math.rsqrt %20 : vector<1x320xf32>
    %22 = arith.mulf %18, %21 : vector<1x320xf32>
    %c0_11 = arith.constant 0 : index
    %c0_12 = arith.constant 0 : index
    %23 = vector.load %arg3[%c0_11, %c0_12] : memref<1x320xf32, #tpu.memory_space<vmem>>, vector<1x320xf32>
    %24 = arith.mulf %6, %22 : vector<1x320xf32>
    %25 = arith.subf %23, %24 : vector<1x320xf32>
    %26 = tpu.iota {dimensions = array<i32: 0>} : vector<224x1xi32>
    %c16_i32 = arith.constant 16 : i32
    %c0_i32 = arith.constant 0 : i32
    %27 = arith.cmpi eq, %c16_i32, %c0_i32 : i32
    %c1_i32 = arith.constant 1 : i32
    %28 = arith.select %27, %c1_i32, %c16_i32 : i32
    %29 = vector.broadcast %28 : i32 to vector<224x1xi32>
    %30 = arith.remsi %26, %29 : vector<224x1xi32>
    %c0_i32_13 = arith.constant 0 : i32
    %31 = vector.broadcast %c0_i32_13 : i32 to vector<224x1xi32>
    %32 = arith.cmpi ne, %30, %31 : vector<224x1xi32>
    %c0_i32_14 = arith.constant 0 : i32
    %33 = vector.broadcast %c0_i32_14 : i32 to vector<224x1xi32>
    %34 = arith.cmpi slt, %30, %33 : vector<224x1xi32>
    %c0_i32_15 = arith.constant 0 : i32
    %35 = arith.cmpi slt, %28, %c0_i32_15 : i32
    %36 = vector.broadcast %35 : i1 to vector<224x1xi1>
    %37 = vector.broadcast %36 : vector<224x1xi1> to vector<224x1xi1>
    %38 = arith.xori %34, %37 : vector<224x1xi1>
    %39 = arith.andi %38, %32 : vector<224x1xi1>
    %40 = vector.broadcast %28 : i32 to vector<224x1xi32>
    %41 = arith.addi %30, %40 : vector<224x1xi32>
    %42 = arith.select %39, %41, %30 : vector<224x1xi1>, vector<224x1xi32>
    %c14_i32 = arith.constant 14 : i32
    %43 = vector.broadcast %c14_i32 : i32 to vector<224x1xi32>
    %44 = arith.cmpi slt, %42, %43 : vector<224x1xi32>
    %45 = vector.broadcast %22 : vector<1x320xf32> to vector<224x320xf32>
    %46 = arith.mulf %2, %45 : vector<224x320xf32>
    %47 = vector.broadcast %25 : vector<1x320xf32> to vector<224x320xf32>
    %48 = arith.addf %46, %47 : vector<224x320xf32>
    %cst_16 = arith.constant 0.000000e+00 : f32
    %49 = vector.broadcast %cst_16 : f32 to vector<224x320xf32>
    %50 = arith.maximumf %48, %49 : vector<224x320xf32>
    %cst_17 = arith.constant 0.000000e+00 : f32
    %51 = vector.shape_cast %44 : vector<224x1xi1> to vector<224x1xi1>
    %52 = vector.broadcast %51 : vector<224x1xi1> to vector<224x320xi1>
    %53 = vector.broadcast %cst_17 : f32 to vector<224x320xf32>
    %54 = arith.select %52, %50, %53 : vector<224x320xi1>, vector<224x320xf32>
    %55 = arith.truncf %54 : vector<224x320xf32> to vector<224x320xbf16>
    %cst_18 = arith.constant 0.000000e+00 : bf16
    %56 = vector.broadcast %cst_18 : bf16 to vector<32x320xbf16>
    %c0_19 = arith.constant 0 : index
    %c0_20 = arith.constant 0 : index
    %c0_21 = arith.constant 0 : index
    %57 = vector.load %arg6[%c0_19, %c0_20, %c0_21] : memref<1x288x320xbf16, #tpu.memory_space<vmem>>, vector<1x32x320xbf16>
    %58 = vector.shape_cast %57 : vector<1x32x320xbf16> to vector<32x320xbf16>
    %59 = vector.shape_cast %56 : vector<32x320xbf16> to vector<1x32x320xbf16>
    tpu.vector_store %arg6[%c0_19, %c0_20, %c0_21], %59 {strides = array<i32>} : memref<1x288x320xbf16, #tpu.memory_space<vmem>>, vector<1x32x320xbf16>,
    %cst_22 = arith.constant 0.000000e+00 : bf16
    %60 = vector.broadcast %cst_22 : bf16 to vector<32x320xbf16>
    %c0_23 = arith.constant 0 : index
    %c256 = arith.constant 256 : index
    %c0_24 = arith.constant 0 : index
    %61 = vector.load %arg6[%c0_23, %c256, %c0_24] : memref<1x288x320xbf16, #tpu.memory_space<vmem>>, vector<1x32x320xbf16>
    %62 = vector.shape_cast %61 : vector<1x32x320xbf16> to vector<32x320xbf16>
    %63 = vector.shape_cast %60 : vector<32x320xbf16> to vector<1x32x320xbf16>
    tpu.vector_store %arg6[%c0_23, %c256, %c0_24], %63 {strides = array<i32>} : memref<1x288x320xbf16, #tpu.memory_space<vmem>>, vector<1x32x320xbf16>,
    %c0_25 = arith.constant 0 : index
    %c32 = arith.constant 32 : index
    %c0_26 = arith.constant 0 : index
    %64 = vector.load %arg6[%c0_25, %c32, %c0_26] : memref<1x288x320xbf16, #tpu.memory_space<vmem>>, vector<1x224x320xbf16>
    %65 = vector.shape_cast %64 : vector<1x224x320xbf16> to vector<224x320xbf16>
    %66 = vector.shape_cast %55 : vector<224x320xbf16> to vector<1x224x320xbf16>
    tpu.vector_store %arg6[%c0_25, %c32, %c0_26], %66 {strides = array<i32>} : memref<1x288x320xbf16, #tpu.memory_space<vmem>>, vector<1x224x320xbf16>,
    tpu.wait_dma2 semaphore(%arg8 : memref<!tpu.dma_semaphore, #tpu.memory_space<semaphore_mem>>) src(%arg4 : memref<9x320x128xbf16, #tpu.memory_space<any>>) dst(%arg7 : memref<9x320x128xbf16, #tpu.memory_space<vmem>>)
    %c0_27 = arith.constant 0 : index
    %c15 = arith.constant 15 : index
    %c0_28 = arith.constant 0 : index
    %67 = vector.load %arg6[%c0_27, %c15, %c0_28] : memref<1x288x320xbf16, #tpu.memory_space<vmem>>, vector<1x224x128xbf16>
    %68 = vector.shape_cast %67 : vector<1x224x128xbf16> to vector<224x128xbf16>
    %c0_29 = arith.constant 0 : index
    %c0_30 = arith.constant 0 : index
    %c0_31 = arith.constant 0 : index
    %69 = vector.load %arg7[%c0_29, %c0_30, %c0_31] : memref<9x320x128xbf16, #tpu.memory_space<vmem>>, vector<1x128x128xbf16>
    %70 = vector.shape_cast %69 : vector<1x128x128xbf16> to vector<128x128xbf16>
    %cst_32 = arith.constant dense<0.000000e+00> : vector<224x128xf32>
    %71 = tpu.matmul %68, %70, %cst_32 {dimension_numbers = #tpu.dot_dimension_numbers<[1], [0], [0], [1], [0, 0, 1, 1], [], []>} : vector<224x128xbf16>, vector<128x128xbf16>, vector<224x128xf32> -> vector<224x128xf32>
    %c0_33 = arith.constant 0 : index
    %c16 = arith.constant 16 : index
    %c0_34 = arith.constant 0 : index
    %72 = vector.load %arg6[%c0_33, %c16, %c0_34] : memref<1x288x320xbf16, #tpu.memory_space<vmem>>, vector<1x224x128xbf16>
    %73 = vector.shape_cast %72 : vector<1x224x128xbf16> to vector<224x128xbf16>
    %c1 = arith.constant 1 : index
    %c0_35 = arith.constant 0 : index
    %c0_36 = arith.constant 0 : index
    %74 = vector.load %arg7[%c1, %c0_35, %c0_36] : memref<9x320x128xbf16, #tpu.memory_space<vmem>>, vector<1x128x128xbf16>
    %75 = vector.shape_cast %74 : vector<1x128x128xbf16> to vector<128x128xbf16>
    %cst_37 = arith.constant dense<0.000000e+00> : vector<224x128xf32>
    %76 = tpu.matmul %73, %75, %cst_37 {dimension_numbers = #tpu.dot_dimension_numbers<[1], [0], [0], [1], [0, 0, 1, 1], [], []>} : vector<224x128xbf16>, vector<128x128xbf16>, vector<224x128xf32> -> vector<224x128xf32>
    %77 = arith.addf %71, %76 : vector<224x128xf32>
    %c0_38 = arith.constant 0 : index
    %c17 = arith.constant 17 : index
    %c0_39 = arith.constant 0 : index
    %78 = vector.load %arg6[%c0_38, %c17, %c0_39] : memref<1x288x320xbf16, #tpu.memory_space<vmem>>, vector<1x224x128xbf16>
    %79 = vector.shape_cast %78 : vector<1x224x128xbf16> to vector<224x128xbf16>
    %c2 = arith.constant 2 : index
    %c0_40 = arith.constant 0 : index
    %c0_41 = arith.constant 0 : index
    %80 = vector.load %arg7[%c2, %c0_40, %c0_41] : memref<9x320x128xbf16, #tpu.memory_space<vmem>>, vector<1x128x128xbf16>
    %81 = vector.shape_cast %80 : vector<1x128x128xbf16> to vector<128x128xbf16>
    %cst_42 = arith.constant dense<0.000000e+00> : vector<224x128xf32>
    %82 = tpu.matmul %79, %81, %cst_42 {dimension_numbers = #tpu.dot_dimension_numbers<[1], [0], [0], [1], [0, 0, 1, 1], [], []>} : vector<224x128xbf16>, vector<128x128xbf16>, vector<224x128xf32> -> vector<224x128xf32>
    %83 = arith.addf %77, %82 : vector<224x128xf32>
    %c0_43 = arith.constant 0 : index
    %c31 = arith.constant 31 : index
    %c0_44 = arith.constant 0 : index
    %84 = vector.load %arg6[%c0_43, %c31, %c0_44] : memref<1x288x320xbf16, #tpu.memory_space<vmem>>, vector<1x224x128xbf16>
    %85 = vector.shape_cast %84 : vector<1x224x128xbf16> to vector<224x128xbf16>
    %c3 = arith.constant 3 : index
    %c0_45 = arith.constant 0 : index
    %c0_46 = arith.constant 0 : index
    %86 = vector.load %arg7[%c3, %c0_45, %c0_46] : memref<9x320x128xbf16, #tpu.memory_space<vmem>>, vector<1x128x128xbf16>
    %87 = vector.shape_cast %86 : vector<1x128x128xbf16> to vector<128x128xbf16>
    %cst_47 = arith.constant dense<0.000000e+00> : vector<224x128xf32>
    %88 = tpu.matmul %85, %87, %cst_47 {dimension_numbers = #tpu.dot_dimension_numbers<[1], [0], [0], [1], [0, 0, 1, 1], [], []>} : vector<224x128xbf16>, vector<128x128xbf16>, vector<224x128xf32> -> vector<224x128xf32>
    %89 = arith.addf %83, %88 : vector<224x128xf32>
    %c0_48 = arith.constant 0 : index
    %c32_49 = arith.constant 32 : index
    %c0_50 = arith.constant 0 : index
    %90 = vector.load %arg6[%c0_48, %c32_49, %c0_50] : memref<1x288x320xbf16, #tpu.memory_space<vmem>>, vector<1x224x128xbf16>
    %91 = vector.shape_cast %90 : vector<1x224x128xbf16> to vector<224x128xbf16>
    %c4 = arith.constant 4 : index
    %c0_51 = arith.constant 0 : index
    %c0_52 = arith.constant 0 : index
    %92 = vector.load %arg7[%c4, %c0_51, %c0_52] : memref<9x320x128xbf16, #tpu.memory_space<vmem>>, vector<1x128x128xbf16>
    %93 = vector.shape_cast %92 : vector<1x128x128xbf16> to vector<128x128xbf16>
    %cst_53 = arith.constant dense<0.000000e+00> : vector<224x128xf32>
    %94 = tpu.matmul %91, %93, %cst_53 {dimension_numbers = #tpu.dot_dimension_numbers<[1], [0], [0], [1], [0, 0, 1, 1], [], []>} : vector<224x128xbf16>, vector<128x128xbf16>, vector<224x128xf32> -> vector<224x128xf32>
    %95 = arith.addf %89, %94 : vector<224x128xf32>
    %c0_54 = arith.constant 0 : index
    %c33 = arith.constant 33 : index
    %c0_55 = arith.constant 0 : index
    %96 = vector.load %arg6[%c0_54, %c33, %c0_55] : memref<1x288x320xbf16, #tpu.memory_space<vmem>>, vector<1x224x128xbf16>
    %97 = vector.shape_cast %96 : vector<1x224x128xbf16> to vector<224x128xbf16>
    %c5 = arith.constant 5 : index
    %c0_56 = arith.constant 0 : index
    %c0_57 = arith.constant 0 : index
    %98 = vector.load %arg7[%c5, %c0_56, %c0_57] : memref<9x320x128xbf16, #tpu.memory_space<vmem>>, vector<1x128x128xbf16>
    %99 = vector.shape_cast %98 : vector<1x128x128xbf16> to vector<128x128xbf16>
    %cst_58 = arith.constant dense<0.000000e+00> : vector<224x128xf32>
    %100 = tpu.matmul %97, %99, %cst_58 {dimension_numbers = #tpu.dot_dimension_numbers<[1], [0], [0], [1], [0, 0, 1, 1], [], []>} : vector<224x128xbf16>, vector<128x128xbf16>, vector<224x128xf32> -> vector<224x128xf32>
    %101 = arith.addf %95, %100 : vector<224x128xf32>
    %c0_59 = arith.constant 0 : index
    %c47 = arith.constant 47 : index
    %c0_60 = arith.constant 0 : index
    %102 = vector.load %arg6[%c0_59, %c47, %c0_60] : memref<1x288x320xbf16, #tpu.memory_space<vmem>>, vector<1x224x128xbf16>
    %103 = vector.shape_cast %102 : vector<1x224x128xbf16> to vector<224x128xbf16>
    %c6 = arith.constant 6 : index
    %c0_61 = arith.constant 0 : index
    %c0_62 = arith.constant 0 : index
    %104 = vector.load %arg7[%c6, %c0_61, %c0_62] : memref<9x320x128xbf16, #tpu.memory_space<vmem>>, vector<1x128x128xbf16>
    %105 = vector.shape_cast %104 : vector<1x128x128xbf16> to vector<128x128xbf16>
    %cst_63 = arith.constant dense<0.000000e+00> : vector<224x128xf32>
    %106 = tpu.matmul %103, %105, %cst_63 {dimension_numbers = #tpu.dot_dimension_numbers<[1], [0], [0], [1], [0, 0, 1, 1], [], []>} : vector<224x128xbf16>, vector<128x128xbf16>, vector<224x128xf32> -> vector<224x128xf32>
    %107 = arith.addf %101, %106 : vector<224x128xf32>
    %c0_64 = arith.constant 0 : index
    %c48 = arith.constant 48 : index
    %c0_65 = arith.constant 0 : index
    %108 = vector.load %arg6[%c0_64, %c48, %c0_65] : memref<1x288x320xbf16, #tpu.memory_space<vmem>>, vector<1x224x128xbf16>
    %109 = vector.shape_cast %108 : vector<1x224x128xbf16> to vector<224x128xbf16>
    %c7 = arith.constant 7 : index
    %c0_66 = arith.constant 0 : index
    %c0_67 = arith.constant 0 : index
    %110 = vector.load %arg7[%c7, %c0_66, %c0_67] : memref<9x320x128xbf16, #tpu.memory_space<vmem>>, vector<1x128x128xbf16>
    %111 = vector.shape_cast %110 : vector<1x128x128xbf16> to vector<128x128xbf16>
    %cst_68 = arith.constant dense<0.000000e+00> : vector<224x128xf32>
    %112 = tpu.matmul %109, %111, %cst_68 {dimension_numbers = #tpu.dot_dimension_numbers<[1], [0], [0], [1], [0, 0, 1, 1], [], []>} : vector<224x128xbf16>, vector<128x128xbf16>, vector<224x128xf32> -> vector<224x128xf32>
    %113 = arith.addf %107, %112 : vector<224x128xf32>
    %c0_69 = arith.constant 0 : index
    %c49 = arith.constant 49 : index
    %c0_70 = arith.constant 0 : index
    %114 = vector.load %arg6[%c0_69, %c49, %c0_70] : memref<1x288x320xbf16, #tpu.memory_space<vmem>>, vector<1x224x128xbf16>
    %115 = vector.shape_cast %114 : vector<1x224x128xbf16> to vector<224x128xbf16>
    %c8 = arith.constant 8 : index
    %c0_71 = arith.constant 0 : index
    %c0_72 = arith.constant 0 : index
    %116 = vector.load %arg7[%c8, %c0_71, %c0_72] : memref<9x320x128xbf16, #tpu.memory_space<vmem>>, vector<1x128x128xbf16>
    %117 = vector.shape_cast %116 : vector<1x128x128xbf16> to vector<128x128xbf16>
    %cst_73 = arith.constant dense<0.000000e+00> : vector<224x128xf32>
    %118 = tpu.matmul %115, %117, %cst_73 {dimension_numbers = #tpu.dot_dimension_numbers<[1], [0], [0], [1], [0, 0, 1, 1], [], []>} : vector<224x128xbf16>, vector<128x128xbf16>, vector<224x128xf32> -> vector<224x128xf32>
    %119 = arith.addf %113, %118 : vector<224x128xf32>
    %c0_74 = arith.constant 0 : index
    %c0_75 = arith.constant 0 : index
    %c0_76 = arith.constant 0 : index
    %120 = vector.load %arg5[%c0_74, %c0_75, %c0_76] : memref<1x224x320xf32, #tpu.memory_space<vmem>>, vector<1x224x128xf32>
    %121 = vector.shape_cast %120 : vector<1x224x128xf32> to vector<224x128xf32>
    %122 = vector.shape_cast %119 : vector<224x128xf32> to vector<1x224x128xf32>
    tpu.vector_store %arg5[%c0_74, %c0_75, %c0_76], %122 {strides = array<i32>} : memref<1x224x320xf32, #tpu.memory_space<vmem>>, vector<1x224x128xf32>,
    %c0_77 = arith.constant 0 : index
    %c15_78 = arith.constant 15 : index
    %c128 = arith.constant 128 : index
    %123 = vector.load %arg6[%c0_77, %c15_78, %c128] : memref<1x288x320xbf16, #tpu.memory_space<vmem>>, vector<1x224x128xbf16>
    %124 = vector.shape_cast %123 : vector<1x224x128xbf16> to vector<224x128xbf16>
    %c0_79 = arith.constant 0 : index
    %c128_80 = arith.constant 128 : index
    %c0_81 = arith.constant 0 : index
    %125 = vector.load %arg7[%c0_79, %c128_80, %c0_81] : memref<9x320x128xbf16, #tpu.memory_space<vmem>>, vector<1x128x128xbf16>
    %126 = vector.shape_cast %125 : vector<1x128x128xbf16> to vector<128x128xbf16>
    %cst_82 = arith.constant dense<0.000000e+00> : vector<224x128xf32>
    %127 = tpu.matmul %124, %126, %cst_82 {dimension_numbers = #tpu.dot_dimension_numbers<[1], [0], [0], [1], [0, 0, 1, 1], [], []>} : vector<224x128xbf16>, vector<128x128xbf16>, vector<224x128xf32> -> vector<224x128xf32>
    %c0_83 = arith.constant 0 : index
    %c16_84 = arith.constant 16 : index
    %c128_85 = arith.constant 128 : index
    %128 = vector.load %arg6[%c0_83, %c16_84, %c128_85] : memref<1x288x320xbf16, #tpu.memory_space<vmem>>, vector<1x224x128xbf16>
    %129 = vector.shape_cast %128 : vector<1x224x128xbf16> to vector<224x128xbf16>
    %c1_86 = arith.constant 1 : index
    %c128_87 = arith.constant 128 : index
    %c0_88 = arith.constant 0 : index
    %130 = vector.load %arg7[%c1_86, %c128_87, %c0_88] : memref<9x320x128xbf16, #tpu.memory_space<vmem>>, vector<1x128x128xbf16>
    %131 = vector.shape_cast %130 : vector<1x128x128xbf16> to vector<128x128xbf16>
    %cst_89 = arith.constant dense<0.000000e+00> : vector<224x128xf32>
    %132 = tpu.matmul %129, %131, %cst_89 {dimension_numbers = #tpu.dot_dimension_numbers<[1], [0], [0], [1], [0, 0, 1, 1], [], []>} : vector<224x128xbf16>, vector<128x128xbf16>, vector<224x128xf32> -> vector<224x128xf32>
    %133 = arith.addf %127, %132 : vector<224x128xf32>
    %c0_90 = arith.constant 0 : index
    %c17_91 = arith.constant 17 : index
    %c128_92 = arith.constant 128 : index
    %134 = vector.load %arg6[%c0_90, %c17_91, %c128_92] : memref<1x288x320xbf16, #tpu.memory_space<vmem>>, vector<1x224x128xbf16>
    %135 = vector.shape_cast %134 : vector<1x224x128xbf16> to vector<224x128xbf16>
    %c2_93 = arith.constant 2 : index
    %c128_94 = arith.constant 128 : index
    %c0_95 = arith.constant 0 : index
    %136 = vector.load %arg7[%c2_93, %c128_94, %c0_95] : memref<9x320x128xbf16, #tpu.memory_space<vmem>>, vector<1x128x128xbf16>
    %137 = vector.shape_cast %136 : vector<1x128x128xbf16> to vector<128x128xbf16>
    %cst_96 = arith.constant dense<0.000000e+00> : vector<224x128xf32>
    %138 = tpu.matmul %135, %137, %cst_96 {dimension_numbers = #tpu.dot_dimension_numbers<[1], [0], [0], [1], [0, 0, 1, 1], [], []>} : vector<224x128xbf16>, vector<128x128xbf16>, vector<224x128xf32> -> vector<224x128xf32>
    %139 = arith.addf %133, %138 : vector<224x128xf32>
    %c0_97 = arith.constant 0 : index
    %c31_98 = arith.constant 31 : index
    %c128_99 = arith.constant 128 : index
    %140 = vector.load %arg6[%c0_97, %c31_98, %c128_99] : memref<1x288x320xbf16, #tpu.memory_space<vmem>>, vector<1x224x128xbf16>
    %141 = vector.shape_cast %140 : vector<1x224x128xbf16> to vector<224x128xbf16>
    %c3_100 = arith.constant 3 : index
    %c128_101 = arith.constant 128 : index
    %c0_102 = arith.constant 0 : index
    %142 = vector.load %arg7[%c3_100, %c128_101, %c0_102] : memref<9x320x128xbf16, #tpu.memory_space<vmem>>, vector<1x128x128xbf16>
    %143 = vector.shape_cast %142 : vector<1x128x128xbf16> to vector<128x128xbf16>
    %cst_103 = arith.constant dense<0.000000e+00> : vector<224x128xf32>
    %144 = tpu.matmul %141, %143, %cst_103 {dimension_numbers = #tpu.dot_dimension_numbers<[1], [0], [0], [1], [0, 0, 1, 1], [], []>} : vector<224x128xbf16>, vector<128x128xbf16>, vector<224x128xf32> -> vector<224x128xf32>
    %145 = arith.addf %139, %144 : vector<224x128xf32>
    %c0_104 = arith.constant 0 : index
    %c32_105 = arith.constant 32 : index
    %c128_106 = arith.constant 128 : index
    %146 = vector.load %arg6[%c0_104, %c32_105, %c128_106] : memref<1x288x320xbf16, #tpu.memory_space<vmem>>, vector<1x224x128xbf16>
    %147 = vector.shape_cast %146 : vector<1x224x128xbf16> to vector<224x128xbf16>
    %c4_107 = arith.constant 4 : index
    %c128_108 = arith.constant 128 : index
    %c0_109 = arith.constant 0 : index
    %148 = vector.load %arg7[%c4_107, %c128_108, %c0_109] : memref<9x320x128xbf16, #tpu.memory_space<vmem>>, vector<1x128x128xbf16>
    %149 = vector.shape_cast %148 : vector<1x128x128xbf16> to vector<128x128xbf16>
    %cst_110 = arith.constant dense<0.000000e+00> : vector<224x128xf32>
    %150 = tpu.matmul %147, %149, %cst_110 {dimension_numbers = #tpu.dot_dimension_numbers<[1], [0], [0], [1], [0, 0, 1, 1], [], []>} : vector<224x128xbf16>, vector<128x128xbf16>, vector<224x128xf32> -> vector<224x128xf32>
    %151 = arith.addf %145, %150 : vector<224x128xf32>
    %c0_111 = arith.constant 0 : index
    %c33_112 = arith.constant 33 : index
    %c128_113 = arith.constant 128 : index
    %152 = vector.load %arg6[%c0_111, %c33_112, %c128_113] : memref<1x288x320xbf16, #tpu.memory_space<vmem>>, vector<1x224x128xbf16>
    %153 = vector.shape_cast %152 : vector<1x224x128xbf16> to vector<224x128xbf16>
    %c5_114 = arith.constant 5 : index
    %c128_115 = arith.constant 128 : index
    %c0_116 = arith.constant 0 : index
    %154 = vector.load %arg7[%c5_114, %c128_115, %c0_116] : memref<9x320x128xbf16, #tpu.memory_space<vmem>>, vector<1x128x128xbf16>
    %155 = vector.shape_cast %154 : vector<1x128x128xbf16> to vector<128x128xbf16>
    %cst_117 = arith.constant dense<0.000000e+00> : vector<224x128xf32>
    %156 = tpu.matmul %153, %155, %cst_117 {dimension_numbers = #tpu.dot_dimension_numbers<[1], [0], [0], [1], [0, 0, 1, 1], [], []>} : vector<224x128xbf16>, vector<128x128xbf16>, vector<224x128xf32> -> vector<224x128xf32>
    %157 = arith.addf %151, %156 : vector<224x128xf32>
    %c0_118 = arith.constant 0 : index
    %c47_119 = arith.constant 47 : index
    %c128_120 = arith.constant 128 : index
    %158 = vector.load %arg6[%c0_118, %c47_119, %c128_120] : memref<1x288x320xbf16, #tpu.memory_space<vmem>>, vector<1x224x128xbf16>
    %159 = vector.shape_cast %158 : vector<1x224x128xbf16> to vector<224x128xbf16>
    %c6_121 = arith.constant 6 : index
    %c128_122 = arith.constant 128 : index
    %c0_123 = arith.constant 0 : index
    %160 = vector.load %arg7[%c6_121, %c128_122, %c0_123] : memref<9x320x128xbf16, #tpu.memory_space<vmem>>, vector<1x128x128xbf16>
    %161 = vector.shape_cast %160 : vector<1x128x128xbf16> to vector<128x128xbf16>
    %cst_124 = arith.constant dense<0.000000e+00> : vector<224x128xf32>
    %162 = tpu.matmul %159, %161, %cst_124 {dimension_numbers = #tpu.dot_dimension_numbers<[1], [0], [0], [1], [0, 0, 1, 1], [], []>} : vector<224x128xbf16>, vector<128x128xbf16>, vector<224x128xf32> -> vector<224x128xf32>
    %163 = arith.addf %157, %162 : vector<224x128xf32>
    %c0_125 = arith.constant 0 : index
    %c48_126 = arith.constant 48 : index
    %c128_127 = arith.constant 128 : index
    %164 = vector.load %arg6[%c0_125, %c48_126, %c128_127] : memref<1x288x320xbf16, #tpu.memory_space<vmem>>, vector<1x224x128xbf16>
    %165 = vector.shape_cast %164 : vector<1x224x128xbf16> to vector<224x128xbf16>
    %c7_128 = arith.constant 7 : index
    %c128_129 = arith.constant 128 : index
    %c0_130 = arith.constant 0 : index
    %166 = vector.load %arg7[%c7_128, %c128_129, %c0_130] : memref<9x320x128xbf16, #tpu.memory_space<vmem>>, vector<1x128x128xbf16>
    %167 = vector.shape_cast %166 : vector<1x128x128xbf16> to vector<128x128xbf16>
    %cst_131 = arith.constant dense<0.000000e+00> : vector<224x128xf32>
    %168 = tpu.matmul %165, %167, %cst_131 {dimension_numbers = #tpu.dot_dimension_numbers<[1], [0], [0], [1], [0, 0, 1, 1], [], []>} : vector<224x128xbf16>, vector<128x128xbf16>, vector<224x128xf32> -> vector<224x128xf32>
    %169 = arith.addf %163, %168 : vector<224x128xf32>
    %c0_132 = arith.constant 0 : index
    %c49_133 = arith.constant 49 : index
    %c128_134 = arith.constant 128 : index
    %170 = vector.load %arg6[%c0_132, %c49_133, %c128_134] : memref<1x288x320xbf16, #tpu.memory_space<vmem>>, vector<1x224x128xbf16>
    %171 = vector.shape_cast %170 : vector<1x224x128xbf16> to vector<224x128xbf16>
    %c8_135 = arith.constant 8 : index
    %c128_136 = arith.constant 128 : index
    %c0_137 = arith.constant 0 : index
    %172 = vector.load %arg7[%c8_135, %c128_136, %c0_137] : memref<9x320x128xbf16, #tpu.memory_space<vmem>>, vector<1x128x128xbf16>
    %173 = vector.shape_cast %172 : vector<1x128x128xbf16> to vector<128x128xbf16>
    %cst_138 = arith.constant dense<0.000000e+00> : vector<224x128xf32>
    %174 = tpu.matmul %171, %173, %cst_138 {dimension_numbers = #tpu.dot_dimension_numbers<[1], [0], [0], [1], [0, 0, 1, 1], [], []>} : vector<224x128xbf16>, vector<128x128xbf16>, vector<224x128xf32> -> vector<224x128xf32>
    %175 = arith.addf %169, %174 : vector<224x128xf32>
    %c0_139 = arith.constant 0 : index
    %c0_140 = arith.constant 0 : index
    %c128_141 = arith.constant 128 : index
    %176 = vector.load %arg5[%c0_139, %c0_140, %c128_141] : memref<1x224x320xf32, #tpu.memory_space<vmem>>, vector<1x224x128xf32>
    %177 = vector.shape_cast %176 : vector<1x224x128xf32> to vector<224x128xf32>
    %178 = vector.shape_cast %175 : vector<224x128xf32> to vector<1x224x128xf32>
    tpu.vector_store %arg5[%c0_139, %c0_140, %c128_141], %178 {strides = array<i32>} : memref<1x224x320xf32, #tpu.memory_space<vmem>>, vector<1x224x128xf32>,
    %c0_142 = arith.constant 0 : index
    %c15_143 = arith.constant 15 : index
    %c256_144 = arith.constant 256 : index
    %179 = vector.load %arg6[%c0_142, %c15_143, %c256_144] : memref<1x288x320xbf16, #tpu.memory_space<vmem>>, vector<1x224x64xbf16>
    %180 = vector.shape_cast %179 : vector<1x224x64xbf16> to vector<224x64xbf16>
    %c0_145 = arith.constant 0 : index
    %c256_146 = arith.constant 256 : index
    %c0_147 = arith.constant 0 : index
    %181 = vector.load %arg7[%c0_145, %c256_146, %c0_147] : memref<9x320x128xbf16, #tpu.memory_space<vmem>>, vector<1x64x64xbf16>
    %182 = vector.shape_cast %181 : vector<1x64x64xbf16> to vector<64x64xbf16>
    %cst_148 = arith.constant dense<0.000000e+00> : vector<224x64xf32>
    %183 = tpu.matmul %180, %182, %cst_148 {dimension_numbers = #tpu.dot_dimension_numbers<[1], [0], [0], [1], [0, 0, 1, 1], [], []>} : vector<224x64xbf16>, vector<64x64xbf16>, vector<224x64xf32> -> vector<224x64xf32>
    %c0_149 = arith.constant 0 : index
    %c16_150 = arith.constant 16 : index
    %c256_151 = arith.constant 256 : index
    %184 = vector.load %arg6[%c0_149, %c16_150, %c256_151] : memref<1x288x320xbf16, #tpu.memory_space<vmem>>, vector<1x224x64xbf16>
    %185 = vector.shape_cast %184 : vector<1x224x64xbf16> to vector<224x64xbf16>
    %c1_152 = arith.constant 1 : index
    %c256_153 = arith.constant 256 : index
    %c0_154 = arith.constant 0 : index
    %186 = vector.load %arg7[%c1_152, %c256_153, %c0_154] : memref<9x320x128xbf16, #tpu.memory_space<vmem>>, vector<1x64x64xbf16>
    %187 = vector.shape_cast %186 : vector<1x64x64xbf16> to vector<64x64xbf16>
    %cst_155 = arith.constant dense<0.000000e+00> : vector<224x64xf32>
    %188 = tpu.matmul %185, %187, %cst_155 {dimension_numbers = #tpu.dot_dimension_numbers<[1], [0], [0], [1], [0, 0, 1, 1], [], []>} : vector<224x64xbf16>, vector<64x64xbf16>, vector<224x64xf32> -> vector<224x64xf32>
    %189 = arith.addf %183, %188 : vector<224x64xf32>
    %c0_156 = arith.constant 0 : index
    %c17_157 = arith.constant 17 : index
    %c256_158 = arith.constant 256 : index
    %190 = vector.load %arg6[%c0_156, %c17_157, %c256_158] : memref<1x288x320xbf16, #tpu.memory_space<vmem>>, vector<1x224x64xbf16>
    %191 = vector.shape_cast %190 : vector<1x224x64xbf16> to vector<224x64xbf16>
    %c2_159 = arith.constant 2 : index
    %c256_160 = arith.constant 256 : index
    %c0_161 = arith.constant 0 : index
    %192 = vector.load %arg7[%c2_159, %c256_160, %c0_161] : memref<9x320x128xbf16, #tpu.memory_space<vmem>>, vector<1x64x64xbf16>
    %193 = vector.shape_cast %192 : vector<1x64x64xbf16> to vector<64x64xbf16>
    %cst_162 = arith.constant dense<0.000000e+00> : vector<224x64xf32>
    %194 = tpu.matmul %191, %193, %cst_162 {dimension_numbers = #tpu.dot_dimension_numbers<[1], [0], [0], [1], [0, 0, 1, 1], [], []>} : vector<224x64xbf16>, vector<64x64xbf16>, vector<224x64xf32> -> vector<224x64xf32>
    %195 = arith.addf %189, %194 : vector<224x64xf32>
    %c0_163 = arith.constant 0 : index
    %c31_164 = arith.constant 31 : index
    %c256_165 = arith.constant 256 : index
    %196 = vector.load %arg6[%c0_163, %c31_164, %c256_165] : memref<1x288x320xbf16, #tpu.memory_space<vmem>>, vector<1x224x64xbf16>
    %197 = vector.shape_cast %196 : vector<1x224x64xbf16> to vector<224x64xbf16>
    %c3_166 = arith.constant 3 : index
    %c256_167 = arith.constant 256 : index
    %c0_168 = arith.constant 0 : index
    %198 = vector.load %arg7[%c3_166, %c256_167, %c0_168] : memref<9x320x128xbf16, #tpu.memory_space<vmem>>, vector<1x64x64xbf16>
    %199 = vector.shape_cast %198 : vector<1x64x64xbf16> to vector<64x64xbf16>
    %cst_169 = arith.constant dense<0.000000e+00> : vector<224x64xf32>
    %200 = tpu.matmul %197, %199, %cst_169 {dimension_numbers = #tpu.dot_dimension_numbers<[1], [0], [0], [1], [0, 0, 1, 1], [], []>} : vector<224x64xbf16>, vector<64x64xbf16>, vector<224x64xf32> -> vector<224x64xf32>
    %201 = arith.addf %195, %200 : vector<224x64xf32>
    %c0_170 = arith.constant 0 : index
    %c32_171 = arith.constant 32 : index
    %c256_172 = arith.constant 256 : index
    %202 = vector.load %arg6[%c0_170, %c32_171, %c256_172] : memref<1x288x320xbf16, #tpu.memory_space<vmem>>, vector<1x224x64xbf16>
    %203 = vector.shape_cast %202 : vector<1x224x64xbf16> to vector<224x64xbf16>
    %c4_173 = arith.constant 4 : index
    %c256_174 = arith.constant 256 : index
    %c0_175 = arith.constant 0 : index
    %204 = vector.load %arg7[%c4_173, %c256_174, %c0_175] : memref<9x320x128xbf16, #tpu.memory_space<vmem>>, vector<1x64x64xbf16>
    %205 = vector.shape_cast %204 : vector<1x64x64xbf16> to vector<64x64xbf16>
    %cst_176 = arith.constant dense<0.000000e+00> : vector<224x64xf32>
    %206 = tpu.matmul %203, %205, %cst_176 {dimension_numbers = #tpu.dot_dimension_numbers<[1], [0], [0], [1], [0, 0, 1, 1], [], []>} : vector<224x64xbf16>, vector<64x64xbf16>, vector<224x64xf32> -> vector<224x64xf32>
    %207 = arith.addf %201, %206 : vector<224x64xf32>
    %c0_177 = arith.constant 0 : index
    %c33_178 = arith.constant 33 : index
    %c256_179 = arith.constant 256 : index
    %208 = vector.load %arg6[%c0_177, %c33_178, %c256_179] : memref<1x288x320xbf16, #tpu.memory_space<vmem>>, vector<1x224x64xbf16>
    %209 = vector.shape_cast %208 : vector<1x224x64xbf16> to vector<224x64xbf16>
    %c5_180 = arith.constant 5 : index
    %c256_181 = arith.constant 256 : index
    %c0_182 = arith.constant 0 : index
    %210 = vector.load %arg7[%c5_180, %c256_181, %c0_182] : memref<9x320x128xbf16, #tpu.memory_space<vmem>>, vector<1x64x64xbf16>
    %211 = vector.shape_cast %210 : vector<1x64x64xbf16> to vector<64x64xbf16>
    %cst_183 = arith.constant dense<0.000000e+00> : vector<224x64xf32>
    %212 = tpu.matmul %209, %211, %cst_183 {dimension_numbers = #tpu.dot_dimension_numbers<[1], [0], [0], [1], [0, 0, 1, 1], [], []>} : vector<224x64xbf16>, vector<64x64xbf16>, vector<224x64xf32> -> vector<224x64xf32>
    %213 = arith.addf %207, %212 : vector<224x64xf32>
    %c0_184 = arith.constant 0 : index
    %c47_185 = arith.constant 47 : index
    %c256_186 = arith.constant 256 : index
    %214 = vector.load %arg6[%c0_184, %c47_185, %c256_186] : memref<1x288x320xbf16, #tpu.memory_space<vmem>>, vector<1x224x64xbf16>
    %215 = vector.shape_cast %214 : vector<1x224x64xbf16> to vector<224x64xbf16>
    %c6_187 = arith.constant 6 : index
    %c256_188 = arith.constant 256 : index
    %c0_189 = arith.constant 0 : index
    %216 = vector.load %arg7[%c6_187, %c256_188, %c0_189] : memref<9x320x128xbf16, #tpu.memory_space<vmem>>, vector<1x64x64xbf16>
    %217 = vector.shape_cast %216 : vector<1x64x64xbf16> to vector<64x64xbf16>
    %cst_190 = arith.constant dense<0.000000e+00> : vector<224x64xf32>
    %218 = tpu.matmul %215, %217, %cst_190 {dimension_numbers = #tpu.dot_dimension_numbers<[1], [0], [0], [1], [0, 0, 1, 1], [], []>} : vector<224x64xbf16>, vector<64x64xbf16>, vector<224x64xf32> -> vector<224x64xf32>
    %219 = arith.addf %213, %218 : vector<224x64xf32>
    %c0_191 = arith.constant 0 : index
    %c48_192 = arith.constant 48 : index
    %c256_193 = arith.constant 256 : index
    %220 = vector.load %arg6[%c0_191, %c48_192, %c256_193] : memref<1x288x320xbf16, #tpu.memory_space<vmem>>, vector<1x224x64xbf16>
    %221 = vector.shape_cast %220 : vector<1x224x64xbf16> to vector<224x64xbf16>
    %c7_194 = arith.constant 7 : index
    %c256_195 = arith.constant 256 : index
    %c0_196 = arith.constant 0 : index
    %222 = vector.load %arg7[%c7_194, %c256_195, %c0_196] : memref<9x320x128xbf16, #tpu.memory_space<vmem>>, vector<1x64x64xbf16>
    %223 = vector.shape_cast %222 : vector<1x64x64xbf16> to vector<64x64xbf16>
    %cst_197 = arith.constant dense<0.000000e+00> : vector<224x64xf32>
    %224 = tpu.matmul %221, %223, %cst_197 {dimension_numbers = #tpu.dot_dimension_numbers<[1], [0], [0], [1], [0, 0, 1, 1], [], []>} : vector<224x64xbf16>, vector<64x64xbf16>, vector<224x64xf32> -> vector<224x64xf32>
    %225 = arith.addf %219, %224 : vector<224x64xf32>
    %c0_198 = arith.constant 0 : index
    %c49_199 = arith.constant 49 : index
    %c256_200 = arith.constant 256 : index
    %226 = vector.load %arg6[%c0_198, %c49_199, %c256_200] : memref<1x288x320xbf16, #tpu.memory_space<vmem>>, vector<1x224x64xbf16>
    %227 = vector.shape_cast %226 : vector<1x224x64xbf16> to vector<224x64xbf16>
    %c8_201 = arith.constant 8 : index
    %c256_202 = arith.constant 256 : index
    %c0_203 = arith.constant 0 : index
    %228 = vector.load %arg7[%c8_201, %c256_202, %c0_203] : memref<9x320x128xbf16, #tpu.memory_space<vmem>>, vector<1x64x64xbf16>
    %229 = vector.shape_cast %228 : vector<1x64x64xbf16> to vector<64x64xbf16>
    %cst_204 = arith.constant dense<0.000000e+00> : vector<224x64xf32>
    %230 = tpu.matmul %227, %229, %cst_204 {dimension_numbers = #tpu.dot_dimension_numbers<[1], [0], [0], [1], [0, 0, 1, 1], [], []>} : vector<224x64xbf16>, vector<64x64xbf16>, vector<224x64xf32> -> vector<224x64xf32>
    %231 = arith.addf %225, %230 : vector<224x64xf32>
    %c0_205 = arith.constant 0 : index
    %c0_206 = arith.constant 0 : index
    %c256_207 = arith.constant 256 : index
    %232 = vector.load %arg5[%c0_205, %c0_206, %c256_207] : memref<1x224x320xf32, #tpu.memory_space<vmem>>, vector<1x224x64xf32>
    %233 = vector.shape_cast %232 : vector<1x224x64xf32> to vector<224x64xf32>
    %234 = vector.shape_cast %231 : vector<224x64xf32> to vector<1x224x64xf32>
    tpu.vector_store %arg5[%c0_205, %c0_206, %c256_207], %234 {strides = array<i32>} : memref<1x224x320xf32, #tpu.memory_space<vmem>>, vector<1x224x64xf32>,
    return
  }
}

</mosaic_0001>

<bundles_post_ra>
// kernel: tpu_custom_call.1
= control target key start
LH: loop header
LB: loop body
LE: loop exit
PB: predicated region body
PF: predicated region fallthrough
CT: control target
= control target key end

     0   :  { %vm696_vm0 = vcmask 523264   ;;  %v13013_v26 = vmov 0   ;;  %s17639_s1 = inlined_call_operand.vmem [shape: bf16[320,320], index: 1, kind: input, shape index: {}]   ;;  %s17640_s0 = inlined_call_operand.vmem [shape: bf16[224,320], index: 0, kind: input, shape index: {}]   ;;  %s17641_s4 = inlined_call_operand.hbm [shape: bf16[9,320,128], index: 4, kind: input, shape index: {}]   ;;  %s17642_s5 = inlined_call_operand.vmem [shape: f32[1,224,320], index: 5, kind: output, shape index: {}]   ;;  %s17643_s2 = inlined_call_operand.vmem [shape: f32[1,320], index: 2, kind: input, shape index: {}]   ;;  %s17644_s3 = inlined_call_operand.vmem [shape: f32[1,320], index: 3, kind: input, shape index: {}]  }
   0x1   :  { %v12810_v0 = vld [vmem:[%s17639_s1 + $0x4] ss:$12 sps:$4 sm:$0xff]   ;;  %v12812_v1 = vld [vmem:[%s17639_s1] ss:$12 sps:$4 sm:$0xff]   ;;  %v12813_v2 = vld [vmem:[%s17639_s1 + $0x1c] ss:$12 sps:$4 sm:$0xff]  }
   0x2   :  { %739 = vmatprep.subr.bf16.mxu0 %v12810_v0  ;;  %v12815_v3 = vld [vmem:[%s17639_s1 + $0x18] ss:$12 sps:$4 sm:$0xff]   ;;  %v12816_v4 = vld [vmem:[%s17639_s1 + $0x34] ss:$12 sps:$4 sm:$0xff]   ;;  %v12818_v5 = vld [vmem:[%s17639_s1 + $0x30] ss:$12 sps:$4 sm:$0xff]  }
   0x3   :  { %740 = vmatpush1.bf16.msra.mxu0 %v12812_v1  ;;  %v12819_v6 = vld [vmem:[%s17639_s1 + $0x4c] ss:$12 sps:$4 sm:$0xff]   ;;  %v12821_v7 = vld [vmem:[%s17639_s1 + $0x48] ss:$12 sps:$4 sm:$0xff]   ;;  %v12822_v8 = vld [vmem:[%s17639_s1 + $0x64] ss:$12 sps:$4 sm:$0xff]  }
   0x4   :  { %741 = vmatprep.subr.bf16.mxu0 %v12813_v2  ;;  %v12824_v9 = vld [vmem:[%s17639_s1 + $0x60] ss:$12 sps:$4 sm:$0xff]   ;;  %v12825_v10 = vld [vmem:[%s17639_s1 + $0x7c] ss:$12 sps:$4 sm:$0xff]   ;;  %v12827_v11 = vld [vmem:[%s17639_s1 + $0x78] ss:$12 sps:$4 sm:$0xff]  }
   0x5   :  { %v12828_v12 = vld [vmem:[%s17639_s1 + $0x94] ss:$12 sps:$4 sm:$0xff]   ;;  %v13088_v13 = vld [vmem:[%s17640_s0 + $0x4] ss:$12 sps:$4 sm:$0xff]   ;;  %v12831_v15 = vld [vmem:[%s17639_s1 + $0xac] ss:$12 sps:$4 sm:$0xff]  }
   0x6   :  { %v12830_v14 = vld [vmem:[%s17639_s1 + $0x90] ss:$12 sps:$4 sm:$0xff]   ;;  %771 = vmatprep.mubr.bf16.mxu0 %v13088_v13  ;;  %v12833_v16 = vld [vmem:[%s17639_s1 + $0xa8] ss:$12 sps:$4 sm:$0xff]   ;;  %v12836_v18 = vld [vmem:[%s17639_s1 + $0xc0] ss:$12 sps:$4 sm:$0xff]  }
   0x7   :  { %742 = vmatpush1.bf16.msra.mxu0 %v12815_v3  ;;  %v12834_v17 = vld [vmem:[%s17639_s1 + $0xc4] ss:$12 sps:$4 sm:$0xff]   ;;  %v12837_v19 = vld [vmem:[%s17639_s1 + $0xdc] ss:$12 sps:$4 sm:$0xff]   ;;  %v12840_v21 = vld [vmem:[%s17639_s1 + $0xf4] ss:$12 sps:$4 sm:$0xff]  }
   0x8   :  { %743 = vmatprep.subr.bf16.mxu0 %v12816_v4  ;;  %v12839_v20 = vld [vmem:[%s17639_s1 + $0xd8] ss:$12 sps:$4 sm:$0xff]   ;;  %v12842_v22 = vld [vmem:[%s17639_s1 + $0xf0] ss:$12 sps:$4 sm:$0xff]   ;;  %v12845_v24 = vld [vmem:[%s17639_s1 + $0x108] ss:$12 sps:$4 sm:$0xff]  }
   0x9   :  { %v12843_v23 = vld [vmem:[%s17639_s1 + $0x10c] ss:$12 sps:$4 sm:$0xff]   ;;  %v12846_v25 = vld [vmem:[%s17639_s1 + $0x124] ss:$12 sps:$4 sm:$0xff]   ;;  %2738 = vst [vmem:[#allocation2] sm:$0xff] %v13013_v26  ;;  %2739 = vst [vmem:[#allocation2 + $0x8] sm:$0xff] %v13013_v26 }
   0xa   :  { %2740 = vst.msk [vmem:[#allocation2 + $0x10] sm:$0xff] %vm696_vm0, %v13013_v26  ;;  %2741 = vst [vmem:[#allocation2 + $0x18] sm:$0xff] %v13013_v26  ;;  %v12848_v27 = vld [vmem:[%s17639_s1 + $0x120] ss:$12 sps:$4 sm:$0xff]   ;;  %v12849_v28 = vld [vmem:[%s17639_s1 + $0x13c] ss:$12 sps:$4 sm:$0xff]  }
   0xb   :  { %744 = vmatpush1.bf16.msra.mxu0 %v12818_v5  ;;  %2742 = vst [vmem:[#allocation2 + $0x20] sm:$0xff] %v13013_v26  ;;  %2743 = vst.msk [vmem:[#allocation2 + $0x28] sm:$0xff] %vm696_vm0, %v13013_v26  ;;  %v13152_v29 = vld [vmem:[%s17640_s0 + $0x8] ss:$12 sps:$4 sm:$0xff]   ;;  %v12851_v30 = vld [vmem:[%s17639_s1 + $0x138] ss:$12 sps:$4 sm:$0xff]  }
   0xc   :  { %745 = vmatprep.subr.bf16.mxu0 %v12819_v6  ;;  %2744 = vst [vmem:[#allocation2 + $0x180] sm:$0xff] %v13013_v26  ;;  %2745 = vst [vmem:[#allocation2 + $0x188] sm:$0xff] %v13013_v26  ;;  %10919 = vmatprep.mubr.msk.bf16.mxu1 %vm696_vm0, %v13152_v29  ;;  %v12852_v31 = vld [vmem:[%s17639_s1 + $0x154] ss:$12 sps:$4 sm:$0xff]   ;;  %v12854_v32 = vld [vmem:[%s17639_s1 + $0x150] ss:$12 sps:$4 sm:$0xff]  }
   0xd   :  { %2746 = vst.msk [vmem:[#allocation2 + $0x190] sm:$0xff] %vm696_vm0, %v13013_v26  ;;  %2747 = vst [vmem:[#allocation2 + $0x198] sm:$0xff] %v13013_v26  ;;  %v12855_v33 = vld [vmem:[%s17639_s1 + $0x16c] ss:$12 sps:$4 sm:$0xff]   ;;  %v12857_v34 = vld [vmem:[%s17639_s1 + $0x168] ss:$12 sps:$4 sm:$0xff]  }
   0xe   :  { %2748 = vst [vmem:[#allocation2 + $0x1a0] sm:$0xff] %v13013_v26  ;;  %2749 = vst.msk [vmem:[#allocation2 + $0x1a8] sm:$0xff] %vm696_vm0, %v13013_v26  ;;  %v12863_v35 = vld [vmem:[%s17639_s1 + $0x184] ss:$12 sps:$4 sm:$0xff]   ;;  %v13177_v36 = vld [vmem:[%s17640_s0] ss:$12 sps:$4 sm:$0xff]  }
   0xf   :  { %746 = vmatpush1.bf16.msra.mxu0 %v12821_v7  ;;  %v12861_v37 = vld [vmem:[%s17639_s1 + $0x180] ss:$12 sps:$4 sm:$0xff]   ;;  %v13185_v38 = vld [vmem:[%s17640_s0 + $0x1c] ss:$12 sps:$4 sm:$0xff]   ;;  %v12873_v40 = vld [vmem:[%s17639_s1 + $0x198] ss:$12 sps:$4 sm:$0xff]  }
  0x10   :  { %747 = vmatprep.subr.bf16.mxu0 %v12822_v8  ;;  %v12875_v39 = vld [vmem:[%s17639_s1 + $0x19c] ss:$12 sps:$4 sm:$0xff]   ;;  %v12890_v41 = vld [vmem:[%s17639_s1 + $0x1b4] ss:$12 sps:$4 sm:$0xff]   ;;  %v13201_v42 = vld [vmem:[%s17640_s0 + $0x18] ss:$12 sps:$4 sm:$0xff]  }
  0x11   :  { %v13206_v43 = vld [vmem:[%s17640_s0 + $0x34] ss:$12 sps:$4 sm:$0xff]   ;;  %v12888_v44 = vld [vmem:[%s17639_s1 + $0x1b0] ss:$12 sps:$4 sm:$0xff]   ;;  %v12902_v45 = vld [vmem:[%s17639_s1 + $0x1cc] ss:$12 sps:$4 sm:$0xff]  }
  0x12   :  { %v12900_v46 = vld [vmem:[%s17639_s1 + $0x1c8] ss:$12 sps:$4 sm:$0xff]   ;;  %v13225_v48 = vld [vmem:[%s17640_s0 + $0x30] ss:$12 sps:$4 sm:$0xff]   ;;  %v13230_v49 = vld [vmem:[%s17640_s0 + $0x4c] ss:$12 sps:$4 sm:$0xff]  }
  0x13   :  { %748 = vmatpush1.bf16.msra.mxu0 %v12824_v9  ;;  %v12913_v47 = vld [vmem:[%s17639_s1 + $0xc8] ss:$12 sps:$4 sm:$0xff]   ;;  %v13242_v51 = vld [vmem:[%s17640_s0 + $0x64] ss:$12 sps:$4 sm:$0xff]   ;;  %v13249_v52 = vld [vmem:[%s17640_s0 + $0x60] ss:$12 sps:$4 sm:$0xff]  }
  0x14   :  { %749 = vmatprep.subr.bf16.mxu0 %v12825_v10  ;;  %v13237_v50 = vld [vmem:[%s17640_s0 + $0x48] ss:$12 sps:$4 sm:$0xff]   ;;  %v13261_v54 = vld [vmem:[%s17640_s0 + $0x78] ss:$12 sps:$4 sm:$0xff]   ;;  %v13273_v56 = vld [vmem:[%s17640_s0 + $0x90] ss:$12 sps:$4 sm:$0xff]  }
  0x15   :  { %v13254_v53 = vld [vmem:[%s17640_s0 + $0x7c] ss:$12 sps:$4 sm:$0xff]   ;;  %v13266_v55 = vld [vmem:[%s17640_s0 + $0x94] ss:$12 sps:$4 sm:$0xff]   ;;  %v13278_v57 = vld [vmem:[%s17640_s0 + $0xac] ss:$12 sps:$4 sm:$0xff]  }
  0x16   :  { %v13285_v58 = vld [vmem:[%s17640_s0 + $0xa8] ss:$12 sps:$4 sm:$0xff]   ;;  %v13290_v59 = vld [vmem:[%s17640_s0 + $0xc4] ss:$12 sps:$4 sm:$0xff]   ;;  %v13297_v60 = vld [vmem:[%s17640_s0 + $0xc0] ss:$12 sps:$4 sm:$0xff]  }
  0x17   :  { %750 = vmatpush1.bf16.msra.mxu0 %v12827_v11  ;;  %v13302_v61 = vld [vmem:[%s17640_s0 + $0xdc] ss:$12 sps:$4 sm:$0xff]   ;;  %v13309_v62 = vld [vmem:[%s17640_s0 + $0xd8] ss:$12 sps:$4 sm:$0xff]   ;;  %v13314_v63 = vld [vmem:[%s17640_s0 + $0xf4] ss:$12 sps:$4 sm:$0xff]  }
  0x18   :  { %751 = vmatprep.subr.bf16.mxu0 %v12828_v12  ;;  %v13321_v0 = vld [vmem:[%s17640_s0 + $0xf0] ss:$12 sps:$4 sm:$0xff]   ;;  %v13326_v1 = vld [vmem:[%s17640_s0 + $0x10c] ss:$12 sps:$4 sm:$0xff]   ;;  %v12940_v2 = vld [vmem:[%s17639_s1 + $0x188] ss:$12 sps:$4 sm:$0xff]  }
  0x19   :  { %v12942_v3 = vld [vmem:[%s17639_s1 + $0x1a0] ss:$12 sps:$4 sm:$0xff]   ;;  %10911 = vmatprep.subr.bf16.mxu1 %v12940_v2  ;;  %v13339_v4 = vld [vmem:[%s17640_s0 + $0x108] ss:$12 sps:$4 sm:$0xff]   ;;  %v13344_v5 = vld [vmem:[%s17640_s0 + $0x124] ss:$12 sps:$4 sm:$0xff]  }
  0x1a   :  { %10912 = vmatpush3.bf16.msra.mxu1 %v12940_v2  ;;  %v12944_v6 = vld [vmem:[%s17639_s1 + $0x1b8] ss:$12 sps:$4 sm:$0xff]   ;;  %v12945_v7 = vld [vmem:[%s17639_s1 + $0x1d0] ss:$12 sps:$4 sm:$0xff]   ;;  %v13357_v8 = vld [vmem:[%s17640_s0 + $0x120] ss:$12 sps:$4 sm:$0xff]  }
  0x1b   :  { %752 = vmatpush1.bf16.msra.mxu0 %v12830_v14  ;;  %10913 = vmatprep.subr.bf16.mxu1 %v12942_v3  ;;  %v13362_v9 = vld [vmem:[%s17640_s0 + $0x13c] ss:$12 sps:$4 sm:$0xff]   ;;  %v12915_v10 = vld [vmem:[%s17640_s0 + $0x20] ss:$12 sps:$4 sm:$0xff]   ;;  %v12918_v11 = vld [vmem:[%s17640_s0 + $0x38] ss:$12 sps:$4 sm:$0xff]  }
  0x1c   :  { %753 = vmatprep.subr.bf16.mxu0 %v12831_v15  ;;  %v13377_v12 = vld [vmem:[%s17640_s0 + $0x138] ss:$12 sps:$4 sm:$0xff]   ;;  %v12919_v14 = vld [vmem:[%s17640_s0 + $0x50] ss:$12 sps:$4 sm:$0xff]   ;;  %v12922_v15 = vld [vmem:[%s17640_s0 + $0x68] ss:$12 sps:$4 sm:$0xff]  }
  0x1d   :  { %s12989_s24 = scalar_lea.hbm %s17641_s4, 23040 }
  0x1e   :  { %10914 = vmatpush3.bf16.msra.mxu1 %v12942_v3  ;;  %p12990_p0 = scmp.ne.s32.totalorder %s17641_s4, %s12989_s24  ;;  %p12993_p1 = scmp.lt.u32.totalorder %s12989_s24, %s17641_s4 }
  0x1f   :  { %754 = vmatpush1.bf16.msra.mxu0 %v12833_v16  ;;  %10915 = vmatprep.subr.bf16.mxu1 %v12944_v6  ;;  %v12914_v16 = vld [vmem:[%s17639_s1 + $0x8] ss:$12 sps:$4 sm:$0xff]  }
  0x20   :  { %755 = vmatprep.subr.bf16.mxu0 %v12834_v17  ;;  %v12916_v17 = vld [vmem:[%s17639_s1 + $0xe0] ss:$12 sps:$4 sm:$0xff]   ;;  %p12995_p2 = pnand %p12993_p1, %p12990_p0 }
  0x22   :  { %10916 = vmatpush3.bf16.msra.mxu1 %v12944_v6 }
  0x23   :  { %756 = vmatpush1.bf16.msra.mxu0 %v12836_v18  ;;  %10917 = vmatprep.subr.bf16.mxu1 %v12945_v7  ;;  %v12923_v18 = vld [vmem:[%s17640_s0 + $0x80] ss:$12 sps:$4 sm:$0xff]  }
  0x24   :  { %757 = vmatprep.subr.bf16.mxu0 %v12837_v19  ;;  %v12917_v19 = vld [vmem:[%s17639_s1 + $0x20] ss:$12 sps:$4 sm:$0xff]  }
  0x26   :  { %10918 = vmatpush3.bf16.msra.mxu1 %v12945_v7 }
  0x27   :  { %758 = vmatpush1.bf16.msra.mxu0 %v12839_v20  ;;  %v12926_v20 = vld [vmem:[%s17640_s0 + $0x98] ss:$12 sps:$4 sm:$0xff]  }
  0x28   :  { %759 = vmatprep.subr.bf16.mxu0 %v12840_v21  ;;  %v12920_v21 = vld [vmem:[%s17639_s1 + $0xf8] ss:$12 sps:$4 sm:$0xff]  }
  0x29   :  { %10920 = vmatmul.mubr.msk.bf16.vlgmr.msra.gmra.mrb[0].mxu1 %vm696_vm0, %v12915_v10 }
  0x2a   :  { %10923 = vmatprep.mubr.msk.bf16.mxu1 %vm696_vm0, %v12918_v11 }
  0x2b   :  { %760 = vmatpush1.bf16.msra.mxu0 %v12842_v22  ;;  %v12921_v22 = vld [vmem:[%s17639_s1 + $0x38] ss:$12 sps:$4 sm:$0xff]  }
  0x2c   :  { %761 = vmatprep.subr.bf16.mxu0 %v12843_v23  ;;  %v12924_v23 = vld [vmem:[%s17639_s1 + $0x110] ss:$12 sps:$4 sm:$0xff]  }
  0x2f   :  { %762 = vmatpush1.bf16.msra.mxu0 %v12845_v24  ;;  %v12927_v24 = vld [vmem:[%s17640_s0 + $0xb0] ss:$12 sps:$4 sm:$0xff]  }
  0x30   :  { %763 = vmatprep.subr.bf16.mxu0 %v12846_v25  ;;  %v12925_v25 = vld [vmem:[%s17639_s1 + $0x50] ss:$12 sps:$4 sm:$0xff]  }
  0x31   :  { %10924 = vmatmul.mubr.msk.bf16.gmra.mrb[4].mxu1 %vm696_vm0, %v12919_v14 }
  0x32   :  { %10927 = vmatprep.mubr.msk.bf16.mxu1 %vm696_vm0, %v12922_v15 }
  0x33   :  { %764 = vmatpush1.bf16.msra.mxu0 %v12848_v27  ;;  %v12930_v27 = vld [vmem:[%s17640_s0 + $0xc8] ss:$12 sps:$4 sm:$0xff]  }
  0x34   :  { %765 = vmatprep.subr.bf16.mxu0 %v12849_v28  ;;  %v12928_v28 = vld [vmem:[%s17639_s1 + $0x128] ss:$12 sps:$4 sm:$0xff]  }
  0x37   :  { %766 = vmatpush1.bf16.msra.mxu0 %v12851_v30  ;;  %v12931_v30 = vld [vmem:[%s17639_s1 + $0x140] ss:$12 sps:$4 sm:$0xff]  }
  0x38   :  { %767 = vmatprep.subr.bf16.mxu0 %v12852_v31  ;;  %v12933_v31 = vld [vmem:[%s17640_s0 + $0xe0] ss:$12 sps:$4 sm:$0xff]  }
  0x39   :  { %10928 = vmatmul.mubr.msk.bf16.gmra.mrb[8].mxu1 %vm696_vm0, %v12923_v18 }
  0x3a   :  { %10931 = vmatprep.mubr.msk.bf16.mxu1 %vm696_vm0, %v12926_v20 }
  0x3b   :  { %768 = vmatpush1.bf16.msra.mxu0 %v12854_v32  ;;  %v12932_v32 = vld [vmem:[%s17639_s1 + $0x80] ss:$12 sps:$4 sm:$0xff]  }
  0x3c   :  { %769 = vmatprep.subr.bf16.mxu0 %v12855_v33  ;;  %v12934_v33 = vld [vmem:[%s17640_s0 + $0xf8] ss:$12 sps:$4 sm:$0xff]  }
  0x3f   :  { %770 = vmatpush1.bf16.msra.mxu0 %v12857_v34  ;;  %v12935_v34 = vld [vmem:[%s17639_s1 + $0x158] ss:$12 sps:$4 sm:$0xff]  }
  0x40   :  { %912 = vmatprep.subr.bf16.mxu0 %v12863_v35  ;;  %v12936_v35 = vld [vmem:[%s17639_s1 + $0x98] ss:$12 sps:$4 sm:$0xff]  }
  0x41   :  { %10932 = vmatmul.mubr.msk.bf16.gmra.mrb[12].mxu1 %vm696_vm0, %v12927_v24 }
  0x42   :  { %772 = vmatmul.mubr.bf16.vlgmr.msra.gmra.mrb[0].mxu0 %v13177_v36  ;;  %10935 = vmatprep.mubr.msk.bf16.mxu1 %vm696_vm0, %v12930_v27 }
  0x43   :  { %913 = vmatpush1.bf16.msra.mxu0 %v12861_v37  ;;  %781 = vmatprep.mubr.bf16.mxu0 %v13185_v38  ;;  %v12939_v37 = vld [vmem:[%s17639_s1 + $0x170] ss:$12 sps:$4 sm:$0xff]  }
  0x44   :  { %914 = vmatprep.subr.bf16.mxu0 %v12875_v39  ;;  %v12937_v39 = vld [vmem:[%s17640_s0 + $0x110] ss:$12 sps:$4 sm:$0xff]  }
  0x47   :  { %915 = vmatpush1.bf16.msra.mxu0 %v12873_v40  ;;  %v12938_v40 = vld [vmem:[%s17640_s0 + $0x128] ss:$12 sps:$4 sm:$0xff]  }
  0x48   :  { %916 = vmatprep.subr.bf16.mxu0 %v12890_v41  ;;  %v12941_v41 = vld [vmem:[%s17639_s1 + $0xb0] ss:$12 sps:$4 sm:$0xff]  }
  0x49   :  { %10936 = vmatmul.mubr.msk.bf16.gmra.mrb[16].mxu1 %vm696_vm0, %v12933_v31 }
  0x4a   :  { %782 = vmatmul.mubr.bf16.gmra.mrb[4].mxu0 %v13201_v42  ;;  %10939 = vmatprep.mubr.msk.bf16.mxu1 %vm696_vm0, %v12934_v33 }
  0x4b   :  { %791 = vmatprep.mubr.bf16.mxu0 %v13206_v43  ;;  %917 = vmatpush1.bf16.msra.mxu0 %v12888_v44  ;;  %v12943_v44 = vld [vmem:[%s17640_s0 + $0x140] ss:$12 sps:$4 sm:$0xff]   ;;  %s13014_s0 = smov [#allocation3]  }
  0x4c   :  { %918 = vmatprep.subr.bf16.mxu0 %v12902_v45 }
  0x4f   :  { %919 = vmatpush1.bf16.msra.mxu0 %v12900_v46 }
  0x50   :  { %10235 = vmatprep.subr.bf16.mxu0 %v12913_v47 }
  0x51   :  { %10940 = vmatmul.mubr.msk.bf16.gmra.mrb[20].mxu1 %vm696_vm0, %v12937_v39 }
  0x52   :  { %792 = vmatmul.mubr.bf16.gmra.mrb[8].mxu0 %v13225_v48  ;;  %10943 = vmatprep.mubr.msk.bf16.mxu1 %vm696_vm0, %v12938_v40 }
  0x53   :  { %801 = vmatprep.mubr.bf16.mxu0 %v13230_v49 }
  0x59   :  { %10944 = vmatmul.mubr.msk.bf16.gmra.mrb[24].mxu1 %vm696_vm0, %v12943_v44 }
  0x5a   :  { %802 = vmatmul.mubr.bf16.gmra.mrb[12].mxu0 %v13237_v50 }
  0x5b   :  { %811 = vmatprep.mubr.bf16.mxu0 %v13242_v51 }
  0x62   :  { %812 = vmatmul.mubr.bf16.gmra.mrb[16].mxu0 %v13249_v52 }
  0x63   :  { %821 = vmatprep.mubr.bf16.mxu0 %v13254_v53 }
  0x6a   :  { %822 = vmatmul.mubr.bf16.gmra.mrb[20].mxu0 %v13261_v54 }
  0x6b   :  { %831 = vmatprep.mubr.bf16.mxu0 %v13266_v55 }
  0x72   :  { %832 = vmatmul.mubr.bf16.gmra.mrb[24].mxu0 %v13273_v56 }
  0x73   :  { %841 = vmatprep.mubr.bf16.mxu0 %v13278_v57 }
  0x7a   :  { %842 = vmatmul.mubr.bf16.gmra.mrb[28].mxu0 %v13285_v58 }
  0x7b   :  { %851 = vmatprep.mubr.bf16.mxu0 %v13290_v59 }
  0x82   :  { %852 = vmatmul.mubr.bf16.gmra.mrb[32].mxu0 %v13297_v60 }
  0x83   :  { %861 = vmatprep.mubr.bf16.mxu0 %v13302_v61 }
  0x8a   :  { %862 = vmatmul.mubr.bf16.gmra.mrb[36].mxu0 %v13309_v62 }
  0x8b   :  { %871 = vmatprep.mubr.bf16.mxu0 %v13314_v63 }
  0x92   :  { %872 = vmatmul.mubr.bf16.gmra.mrb[40].mxu0 %v13321_v0 }
  0x93   :  { %881 = vmatprep.mubr.bf16.mxu0 %v13326_v1 }
  0x9a   :  { %882 = vmatmul.mubr.bf16.gmra.mrb[44].mxu0 %v13339_v4 }
  0x9b   :  { %891 = vmatprep.mubr.bf16.mxu0 %v13344_v5 }
  0xa2   :  { %892 = vmatmul.mubr.bf16.gmra.mrb[48].mxu0 %v13357_v8 }
  0xa3   :  { %901 = vmatprep.mubr.bf16.mxu0 %v13362_v9 }
  0xaa   :  { %902 = vmatmul.mubr.bf16.gmra.mrb[52].mxu0 %v13377_v12 }
  0xab   :  { %944 = vmatprep.mubr.bf16.mxu0 %v13013_v26 }
  0xb2   :  { %10080 = vmatmul.mubr.msk.bf16.vlgmr.msra.gmra.mrb[0].mxu0 %vm696_vm0, %v13152_v29  ;;  %v12929_v29 = vld [vmem:[%s17639_s1 + $0x68] ss:$12 sps:$4 sm:$0xff]   ;;  %s26_s1 = sshll.u32 %s13014_s0, 4  ;;  %s27_s1 = int_to_ptr.vmem [resolvable:$true] %s26_s1 }
  0xb3   :  { %10236 = vmatpush3.bf16.msra.mxu0 %v12914_v16  ;;  %954 = vmatprep.mubr.bf16.mxu0 %v13013_v26 }
  0xb4   :  { %10237 = vmatprep.subr.bf16.mxu0 %v12916_v17 }
  0xb7   :  { %10238 = vmatpush3.bf16.msra.mxu0 %v12917_v19 }
  0xb8   :  { %10239 = vmatprep.subr.bf16.mxu0 %v12920_v21 }
  0xba   :  { %10081 = vmatmul.mubr.msk.bf16.gmra.mrb[4].mxu0 %vm696_vm0, %v12915_v10 }
  0xbb   :  { %964 = vmatprep.mubr.bf16.mxu0 %v13013_v26  ;;  %10240 = vmatpush3.bf16.msra.mxu0 %v12921_v22 }
  0xbc   :  { %10241 = vmatprep.subr.bf16.mxu0 %v12924_v23 }
  0xbf   :  { %10242 = vmatpush3.bf16.msra.mxu0 %v12925_v25 }
  0xc0   :  { %10243 = vmatprep.subr.bf16.mxu0 %v12928_v28 }
  0xc2   :  { %10082 = vmatmul.mubr.msk.bf16.gmra.mrb[8].mxu0 %vm696_vm0, %v12918_v11 }
  0xc3   :  { %974 = vmatprep.mubr.bf16.mxu0 %v13013_v26  ;;  %10244 = vmatpush3.bf16.msra.mxu0 %v12929_v29 }
  0xc4   :  { %10245 = vmatprep.subr.bf16.mxu0 %v12931_v30 }
  0xc7   :  { %10246 = vmatpush3.bf16.msra.mxu0 %v12932_v32 }
  0xc8   :  { %10247 = vmatprep.subr.bf16.mxu0 %v12935_v34 }
  0xca   :  { %10083 = vmatmul.mubr.msk.bf16.gmra.mrb[12].mxu0 %vm696_vm0, %v12919_v14 }
  0xcb   :  { %984 = vmatprep.mubr.bf16.mxu0 %v13013_v26  ;;  %10248 = vmatpush3.bf16.msra.mxu0 %v12936_v35 }
  0xcc   :  { %10249 = vmatprep.subr.bf16.mxu0 %v12939_v37 }
  0xcf   :  { %10250 = vmatpush3.bf16.msra.mxu0 %v12941_v41 }
  0xd2   :  { %10084 = vmatmul.mubr.msk.bf16.gmra.mrb[16].mxu0 %vm696_vm0, %v12922_v15 }
  0xd3   :  { %994 = vmatprep.mubr.bf16.mxu0 %v13013_v26 }
  0xda   :  { %10085 = vmatmul.mubr.msk.bf16.gmra.mrb[20].mxu0 %vm696_vm0, %v12923_v18 }
  0xdb   :  { %1004 = vmatprep.mubr.bf16.mxu0 %v13013_v26 }
  0xe2   :  { %10086 = vmatmul.mubr.msk.bf16.gmra.mrb[24].mxu0 %vm696_vm0, %v12926_v20 }
  0xe3   :  { %1014 = vmatprep.mubr.bf16.mxu0 %v13013_v26 }
  0xea   :  { %10087 = vmatmul.mubr.msk.bf16.gmra.mrb[28].mxu0 %vm696_vm0, %v12927_v24 }
  0xeb   :  { %1024 = vmatprep.mubr.bf16.mxu0 %v13013_v26 }
  0xf2   :  { %10088 = vmatmul.mubr.msk.bf16.gmra.mrb[32].mxu0 %vm696_vm0, %v12930_v27 }
  0xf3   :  { %1034 = vmatprep.mubr.bf16.mxu0 %v13013_v26 }
  0xfa   :  { %10089 = vmatmul.mubr.msk.bf16.gmra.mrb[36].mxu0 %vm696_vm0, %v12933_v31 }
  0xfb   :  { %1044 = vmatprep.mubr.bf16.mxu0 %v13013_v26 }
 0x102   :  { %10090 = vmatmul.mubr.msk.bf16.gmra.mrb[40].mxu0 %vm696_vm0, %v12934_v33 }
 0x103   :  { %1054 = vmatprep.mubr.bf16.mxu0 %v13013_v26 }
 0x10a   :  { %10091 = vmatmul.mubr.msk.bf16.gmra.mrb[44].mxu0 %vm696_vm0, %v12937_v39 }
 0x10b   :  { %1064 = vmatprep.mubr.bf16.mxu0 %v13013_v26 }
 0x112   :  { %10092 = vmatmul.mubr.msk.bf16.gmra.mrb[48].mxu0 %vm696_vm0, %v12938_v40 }
 0x113   :  { %1074 = vmatprep.mubr.bf16.mxu0 %v13013_v26 }
 0x11a   :  { %10093 = vmatmul.mubr.msk.bf16.gmra.mrb[52].mxu0 %vm696_vm0, %v12943_v44 }
 0x11b   :  { %1117 = vmatprep.mubr.bf16.mxu0 %v13088_v13 }
 0x122   :  { %1118 = vmatmul.mubr.bf16.vlgmr.msra.gmra.mrb[56].mxu0 %v13177_v36 }
 0x123   :  { %1125 = vmatprep.mubr.bf16.mxu0 %v13185_v38 }
 0x12a   :  { %1126 = vmatmul.mubr.bf16.gmra.mrb[60].mxu0 %v13201_v42 }
 0x12b   :  { %1133 = vmatprep.mubr.bf16.mxu0 %v13206_v43 }
 0x132   :  { %1134 = vmatmul.mubr.bf16.gmra.mrb[64].mxu0 %v13225_v48 }
 0x133   :  { %1141 = vmatprep.mubr.bf16.mxu0 %v13230_v49 }
 0x13a   :  { %1142 = vmatmul.mubr.bf16.gmra.mrb[68].mxu0 %v13237_v50 }
 0x13b   :  { %1149 = vmatprep.mubr.bf16.mxu0 %v13242_v51 }
 0x142   :  { %1150 = vmatmul.mubr.bf16.gmra.mrb[72].mxu0 %v13249_v52 }
 0x143   :  { %1157 = vmatprep.mubr.bf16.mxu0 %v13254_v53 }
 0x14a   :  { %1158 = vmatmul.mubr.bf16.gmra.mrb[76].mxu0 %v13261_v54 }
 0x14b   :  { %1165 = vmatprep.mubr.bf16.mxu0 %v13266_v55 }
 0x152   :  { %1166 = vmatmul.mubr.bf16.gmra.mrb[80].mxu0 %v13273_v56 }
 0x153   :  { %1173 = vmatprep.mubr.bf16.mxu0 %v13278_v57 }
 0x15a   :  { %1174 = vmatmul.mubr.bf16.gmra.mrb[84].mxu0 %v13285_v58 }
 0x15b   :  { %1181 = vmatprep.mubr.bf16.mxu0 %v13290_v59 }
 0x162   :  { %1182 = vmatmul.mubr.bf16.gmra.mrb[88].mxu0 %v13297_v60 }
 0x163   :  { %1189 = vmatprep.mubr.bf16.mxu0 %v13302_v61 }
 0x16a   :  { %1190 = vmatmul.mubr.bf16.gmra.mrb[92].mxu0 %v13309_v62 }
 0x16b   :  { %1197 = vmatprep.mubr.bf16.mxu0 %v13314_v63 }
 0x172   :  { %1198 = vmatmul.mubr.bf16.gmra.mrb[96].mxu0 %v13321_v0 }
 0x173   :  { %1205 = vmatprep.mubr.bf16.mxu0 %v13326_v1 }
 0x17a   :  { %1206 = vmatmul.mubr.bf16.gmra.mrb[100].mxu0 %v13339_v4 }
 0x17b   :  { %1213 = vmatprep.mubr.bf16.mxu0 %v13344_v5  ;;  %v13574_v5 = vpop.f32.mrb[0].mxu1 }
 0x17c   :  { %17873 = vst [vmem:[#allocation25_spill] sm:$0xff] %v13574_v5  ;;  %v13576_v6 = vpop.f32.mrb[1].mxu1 }
 0x17d   :  { %17874 = vst [vmem:[#allocation26_spill] sm:$0xff] %v13576_v6  ;;  %v13578_v7 = vpop.f32.mrb[2].mxu1 }
 0x17e   :  { %17875 = vst [vmem:[#allocation27_spill] sm:$0xff] %v13578_v7 }
 0x182   :  { %1214 = vmatmul.mubr.bf16.gmra.mrb[104].mxu0 %v13357_v8  ;;  %v13580_v8 = vpop.f32.mrb[3].mxu1 }
 0x183   :  { %1221 = vmatprep.mubr.bf16.mxu0 %v13362_v9  ;;  %17876 = vst [vmem:[#allocation28_spill] sm:$0xff] %v13580_v8  ;;  %v13606_v27 = vpop.f32.mrb[4].mxu1 }
 0x184   :  { %17885 = vst [vmem:[#allocation37_spill] sm:$0xff] %v13606_v27  ;;  %v13608_v28 = vpop.f32.mrb[5].mxu1 }
 0x185   :  { %v13525_v13 = vpop.f32.mrb[0].mxu0  ;;  %17886 = vst [vmem:[#allocation38_spill] sm:$0xff] %v13608_v28  ;;  %v13610_v29 = vpop.f32.mrb[6].mxu1 }
 0x186   :  { %17858 = vst [vmem:[#allocation10_spill] sm:$0xff] %v13525_v13  ;;  %v13527_v26 = vpop.f32.mrb[1].mxu0  ;;  %17887 = vst [vmem:[#allocation39_spill] sm:$0xff] %v13610_v29  ;;  %v13612_v30 = vpop.f32.mrb[7].mxu1 }
 0x187   :  { %17859 = vst [vmem:[#allocation11_spill] sm:$0xff] %v13527_v26  ;;  %v13529_v36 = vpop.f32.mrb[2].mxu0  ;;  %17888 = vst [vmem:[#allocation40_spill] sm:$0xff] %v13612_v30 }
 0x188   :  { %17860 = vst [vmem:[#allocation12_spill] sm:$0xff] %v13529_v36  ;;  %v1375_v38 = vadd.f32 %v13529_v36, %v13525_v13  ;;  %v13533_v42 = vpop.f32.mrb[3].mxu0 }
 0x189   :  { %17861 = vst [vmem:[#allocation13_spill] sm:$0xff] %v13533_v42  ;;  %v1408_v43 = vadd.f32 %v13533_v42, %v13527_v26 }
 0x18a   :  { %1222 = vmatmul.mubr.bf16.gmra.mrb[108].mxu0 %v13377_v12 }
 0x18d   :  { %v13538_v45 = vpop.f32.mrb[4].mxu0 }
 0x18e   :  { %17862 = vst [vmem:[#allocation14_spill] sm:$0xff] %v13538_v45  ;;  %v1376_v46 = vadd.f32 %v1375_v38, %v13538_v45  ;;  %v13541_v47 = vpop.f32.mrb[5].mxu0 }
 0x18f   :  { %v1409_v48 = vadd.f32 %v1408_v43, %v13541_v47  ;;  %v13544_v49 = vpop.f32.mrb[6].mxu0 }
 0x190   :  { %17863 = vst [vmem:[#allocation15_spill] sm:$0xff] %v13544_v49  ;;  %v1377_v50 = vadd.f32 %v1376_v46, %v13544_v49  ;;  %v13547_v51 = vpop.f32.mrb[7].mxu0 }
 0x191   :  { %17864 = vst [vmem:[#allocation16_spill] sm:$0xff] %v13547_v51  ;;  %v1410_v52 = vadd.f32 %v1409_v48, %v13547_v51 }
 0x195   :  { %v13550_v53 = vpop.f32.mrb[8].mxu0 }
 0x196   :  { %17865 = vst [vmem:[#allocation17_spill] sm:$0xff] %v13550_v53  ;;  %v1378_v54 = vadd.f32 %v1377_v50, %v13550_v53  ;;  %v13553_v55 = vpop.f32.mrb[9].mxu0 }
 0x197   :  { %17866 = vst [vmem:[#allocation18_spill] sm:$0xff] %v13553_v55  ;;  %v1411_v56 = vadd.f32 %v1410_v52, %v13553_v55  ;;  %v13556_v57 = vpop.f32.mrb[10].mxu0 }
 0x198   :  { %17867 = vst [vmem:[#allocation19_spill] sm:$0xff] %v13556_v57  ;;  %v1379_v58 = vadd.f32 %v1378_v54, %v13556_v57  ;;  %v13559_v59 = vpop.f32.mrb[11].mxu0  ;;  %v13638_v54 = vpop.f32.mrb[8].mxu1 }
 0x199   :  { %17868 = vst [vmem:[#allocation20_spill] sm:$0xff] %v13559_v59  ;;  %v1412_v60 = vadd.f32 %v1411_v56, %v13559_v59  ;;  %17897 = vst [vmem:[#allocation49_spill] sm:$0xff] %v13638_v54  ;;  %v13640_v56 = vpop.f32.mrb[9].mxu1 }
 0x19a   :  { %17898 = vst [vmem:[#allocation50_spill] sm:$0xff] %v13640_v56 }
 0x19d   :  { %v13562_v61 = vpop.f32.mrb[12].mxu0 }
 0x19e   :  { %17869 = vst [vmem:[#allocation21_spill] sm:$0xff] %v13562_v61  ;;  %v1380_v62 = vadd.f32 %v1379_v58, %v13562_v61  ;;  %v13565_v63 = vpop.f32.mrb[13].mxu0  ;;  %v13642_v58 = vpop.f32.mrb[10].mxu1 }
 0x19f   :  { %17870 = vst [vmem:[#allocation22_spill] sm:$0xff] %v13565_v63  ;;  %v1413_v0 = vadd.f32 %v1412_v60, %v13565_v63  ;;  %v13568_v1 = vpop.f32.mrb[14].mxu0  ;;  %17899 = vst [vmem:[#allocation51_spill] sm:$0xff] %v13642_v58  ;;  %v13644_v60 = vpop.f32.mrb[11].mxu1 }
 0x1a0   :  { %17871 = vst [vmem:[#allocation23_spill] sm:$0xff] %v13568_v1  ;;  %v1381_v2 = vadd.f32 %v1380_v62, %v13568_v1  ;;  %v13571_v3 = vpop.f32.mrb[15].mxu0  ;;  %17900 = vst [vmem:[#allocation52_spill] sm:$0xff] %v13644_v60 }
 0x1a1   :  { %17872 = vst [vmem:[#allocation24_spill] sm:$0xff] %v13571_v3  ;;  %v1414_v4 = vadd.f32 %v1413_v0, %v13571_v3 }
 0x1a5   :  { %v13582_v9 = vpop.f32.mrb[16].mxu0 }
 0x1a6   :  { %17877 = vst [vmem:[#allocation29_spill] sm:$0xff] %v13582_v9  ;;  %v1382_v10 = vadd.f32 %v1381_v2, %v13582_v9  ;;  %v13585_v11 = vpop.f32.mrb[17].mxu0 }
 0x1a7   :  { %17878 = vst [vmem:[#allocation30_spill] sm:$0xff] %v13585_v11  ;;  %v1415_v12 = vadd.f32 %v1414_v4, %v13585_v11  ;;  %v13588_v14 = vpop.f32.mrb[18].mxu0 }
 0x1a8   :  { %17879 = vst [vmem:[#allocation31_spill] sm:$0xff] %v13588_v14  ;;  %v1383_v15 = vadd.f32 %v1382_v10, %v13588_v14  ;;  %v13591_v16 = vpop.f32.mrb[19].mxu0 }
 0x1a9   :  { %17880 = vst [vmem:[#allocation32_spill] sm:$0xff] %v13591_v16  ;;  %v1416_v17 = vadd.f32 %v1415_v12, %v13591_v16 }
 0x1ad   :  { %v13594_v18 = vpop.f32.mrb[20].mxu0 }
 0x1ae   :  { %17881 = vst [vmem:[#allocation33_spill] sm:$0xff] %v13594_v18  ;;  %v1384_v19 = vadd.f32 %v1383_v15, %v13594_v18  ;;  %v13597_v20 = vpop.f32.mrb[21].mxu0 }
 0x1af   :  { %17882 = vst [vmem:[#allocation34_spill] sm:$0xff] %v13597_v20  ;;  %v1417_v21 = vadd.f32 %v1416_v17, %v13597_v20  ;;  %v13600_v22 = vpop.f32.mrb[22].mxu0 }
 0x1b0   :  { %17883 = vst [vmem:[#allocation35_spill] sm:$0xff] %v13600_v22  ;;  %v1385_v23 = vadd.f32 %v1384_v19, %v13600_v22  ;;  %v13603_v24 = vpop.f32.mrb[23].mxu0 }
 0x1b1   :  { %17884 = vst [vmem:[#allocation36_spill] sm:$0xff] %v13603_v24  ;;  %v1418_v25 = vadd.f32 %v1417_v21, %v13603_v24 }
 0x1b5   :  { %v13614_v31 = vpop.f32.mrb[24].mxu0 }
 0x1b6   :  { %17889 = vst [vmem:[#allocation41_spill] sm:$0xff] %v13614_v31  ;;  %v1386_v32 = vadd.f32 %v1385_v23, %v13614_v31  ;;  %v13617_v33 = vpop.f32.mrb[25].mxu0 }
 0x1b7   :  { %17890 = vst [vmem:[#allocation42_spill] sm:$0xff] %v13617_v33  ;;  %v1419_v34 = vadd.f32 %v1418_v25, %v13617_v33  ;;  %v13620_v35 = vpop.f32.mrb[26].mxu0 }
 0x1b8   :  { %17891 = vst [vmem:[#allocation43_spill] sm:$0xff] %v13620_v35  ;;  %v1387_v37 = vadd.f32 %v1386_v32, %v13620_v35  ;;  %v13623_v39 = vpop.f32.mrb[27].mxu0 }
 0x1b9   :  { %17892 = vst [vmem:[#allocation44_spill] sm:$0xff] %v13623_v39  ;;  %v1420_v40 = vadd.f32 %v1419_v34, %v13623_v39 }
 0x1bd   :  { %v13626_v41 = vpop.f32.mrb[28].mxu0 }
 0x1be   :  { %17893 = vst [vmem:[#allocation45_spill] sm:$0xff] %v13626_v41  ;;  %v1388_v44 = vadd.f32 %v1387_v37, %v13626_v41  ;;  %v13629_v38 = vpop.f32.mrb[29].mxu0 }
 0x1bf   :  { %17894 = vst [vmem:[#allocation46_spill] sm:$0xff] %v13629_v38  ;;  %v1421_v43 = vadd.f32 %v1420_v40, %v13629_v38  ;;  %v13632_v46 = vpop.f32.mrb[30].mxu0 }
 0x1c0   :  { %17895 = vst [vmem:[#allocation47_spill] sm:$0xff] %v13632_v46  ;;  %v1389_v48 = vadd.f32 %v1388_v44, %v13632_v46  ;;  %v13635_v50 = vpop.f32.mrb[31].mxu0  ;;  %v13670_v44 = vpop.f32.mrb[12].mxu1 }
 0x1c1   :  { %17896 = vst [vmem:[#allocation48_spill] sm:$0xff] %v13635_v50  ;;  %v1422_v52 = vadd.f32 %v1421_v43, %v13635_v50  ;;  %17909 = vst [vmem:[#allocation61_spill] sm:$0xff] %v13670_v44  ;;  %v13672_v43 = vpop.f32.mrb[13].mxu1 }
 0x1c2   :  { %17910 = vst [vmem:[#allocation62_spill] sm:$0xff] %v13672_v43 }
 0x1c5   :  { %v13646_v62 = vpop.f32.mrb[32].mxu0 }
 0x1c6   :  { %17901 = vst [vmem:[#allocation53_spill] sm:$0xff] %v13646_v62  ;;  %v1390_v0 = vadd.f32 %v1389_v48, %v13646_v62  ;;  %v13649_v2 = vpop.f32.mrb[33].mxu0  ;;  %v13674_v48 = vpop.f32.mrb[14].mxu1 }
 0x1c7   :  { %17902 = vst [vmem:[#allocation54_spill] sm:$0xff] %v13649_v2  ;;  %v1423_v4 = vadd.f32 %v1422_v52, %v13649_v2  ;;  %v13652_v10 = vpop.f32.mrb[34].mxu0  ;;  %17911 = vst [vmem:[#allocation63_spill] sm:$0xff] %v13674_v48  ;;  %v13676_v52 = vpop.f32.mrb[15].mxu1 }
 0x1c8   :  { %17903 = vst [vmem:[#allocation55_spill] sm:$0xff] %v13652_v10  ;;  %v1391_v12 = vadd.f32 %v1390_v0, %v13652_v10  ;;  %v13655_v15 = vpop.f32.mrb[35].mxu0  ;;  %17912 = vst [vmem:[#allocation64_spill] sm:$0xff] %v13676_v52  ;;  %v13702_v44 = vpop.f32.mrb[16].mxu1 }
 0x1c9   :  { %17904 = vst [vmem:[#allocation56_spill] sm:$0xff] %v13655_v15  ;;  %v1424_v17 = vadd.f32 %v1423_v4, %v13655_v15  ;;  %17921 = vst [vmem:[#allocation73_spill] sm:$0xff] %v13702_v44  ;;  %v13704_v52 = vpop.f32.mrb[17].mxu1 }
 0x1ca   :  { %17922 = vst [vmem:[#allocation74_spill] sm:$0xff] %v13704_v52 }
 0x1cd   :  { %v13658_v19 = vpop.f32.mrb[36].mxu0 }
 0x1ce   :  { %17905 = vst [vmem:[#allocation57_spill] sm:$0xff] %v13658_v19  ;;  %v1392_v21 = vadd.f32 %v1391_v12, %v13658_v19  ;;  %v13661_v23 = vpop.f32.mrb[37].mxu0 }
 0x1cf   :  { %17906 = vst [vmem:[#allocation58_spill] sm:$0xff] %v13661_v23  ;;  %v1425_v25 = vadd.f32 %v1424_v17, %v13661_v23  ;;  %v13664_v32 = vpop.f32.mrb[38].mxu0 }
 0x1d0   :  { %17907 = vst [vmem:[#allocation59_spill] sm:$0xff] %v13664_v32  ;;  %v1393_v34 = vadd.f32 %v1392_v21, %v13664_v32  ;;  %v13667_v37 = vpop.f32.mrb[39].mxu0 }
 0x1d1   :  { %17908 = vst [vmem:[#allocation60_spill] sm:$0xff] %v13667_v37  ;;  %v1426_v40 = vadd.f32 %v1425_v25, %v13667_v37 }
 0x1d5   :  { %v13678_v0 = vpop.f32.mrb[40].mxu0 }
 0x1d6   :  { %17913 = vst [vmem:[#allocation65_spill] sm:$0xff] %v13678_v0  ;;  %v1394_v4 = vadd.f32 %v1393_v34, %v13678_v0  ;;  %v13681_v12 = vpop.f32.mrb[41].mxu0 }
 0x1d7   :  { %17914 = vst [vmem:[#allocation66_spill] sm:$0xff] %v13681_v12  ;;  %v1427_v17 = vadd.f32 %v1426_v40, %v13681_v12  ;;  %v13684_v21 = vpop.f32.mrb[42].mxu0 }
 0x1d8   :  { %17915 = vst [vmem:[#allocation67_spill] sm:$0xff] %v13684_v21  ;;  %v1395_v25 = vadd.f32 %v1394_v4, %v13684_v21  ;;  %v13687_v37 = vpop.f32.mrb[43].mxu0 }
 0x1d9   :  { %17916 = vst [vmem:[#allocation68_spill] sm:$0xff] %v13687_v37  ;;  %v1428_v23 = vadd.f32 %v1427_v17, %v13687_v37  ;;  %v13706_v17 = vpop.f32.mrb[18].mxu1 }
 0x1da   :  { %17923 = vst [vmem:[#allocation75_spill] sm:$0xff] %v13706_v17  ;;  %v13708_v37 = vpop.f32.mrb[19].mxu1 }
 0x1db   :  { %17924 = vst [vmem:[#allocation76_spill] sm:$0xff] %v13708_v37  ;;  %v13734_v54 = vpop.f32.mrb[20].mxu1 }
 0x1dc   :  { %17933 = vst [vmem:[#allocation85_spill] sm:$0xff] %v13734_v54 }
 0x1dd   :  { %v13690_v15 = vpop.f32.mrb[44].mxu0 }
 0x1de   :  { %17917 = vst [vmem:[#allocation69_spill] sm:$0xff] %v13690_v15  ;;  %v1396_v2 = vadd.f32 %v1395_v25, %v13690_v15  ;;  %v13693_v48 = vpop.f32.mrb[45].mxu0 }
 0x1df   :  { %17918 = vst [vmem:[#allocation70_spill] sm:$0xff] %v13693_v48  ;;  %v1429_v34 = vadd.f32 %v1428_v23, %v13693_v48  ;;  %v13696_v50 = vpop.f32.mrb[46].mxu0 }
 0x1e0   :  { %17919 = vst [vmem:[#allocation71_spill] sm:$0xff] %v13696_v50  ;;  %v1397_v40 = vadd.f32 %v1396_v2, %v13696_v50  ;;  %v13699_v12 = vpop.f32.mrb[47].mxu0 }
 0x1e1   :  { %17920 = vst [vmem:[#allocation72_spill] sm:$0xff] %v13699_v12  ;;  %v1430_v4 = vadd.f32 %v1429_v34, %v13699_v12 }
 0x1e5   :  { %v13710_v25 = vpop.f32.mrb[48].mxu0 }
 0x1e6   :  { %17925 = vst [vmem:[#allocation77_spill] sm:$0xff] %v13710_v25  ;;  %v1398_v23 = vadd.f32 %v1397_v40, %v13710_v25  ;;  %v13713_v48 = vpop.f32.mrb[49].mxu0 }
 0x1e7   :  { %17926 = vst [vmem:[#allocation78_spill] sm:$0xff] %v13713_v48  ;;  %v1431_v2 = vadd.f32 %v1430_v4, %v13713_v48  ;;  %v13716_v43 = vpop.f32.mrb[50].mxu0 }
 0x1e8   :  { %17927 = vst [vmem:[#allocation79_spill] sm:$0xff] %v13716_v43  ;;  %v1399_v34 = vadd.f32 %v1398_v23, %v13716_v43  ;;  %v13719_v12 = vpop.f32.mrb[51].mxu0 }
 0x1e9   :  { %17928 = vst [vmem:[#allocation80_spill] sm:$0xff] %v13719_v12  ;;  %v1432_v44 = vadd.f32 %v1431_v2, %v13719_v12  ;;  %v13736_v2 = vpop.f32.mrb[21].mxu1 }
 0x1ea   :  { %17934 = vst [vmem:[#allocation86_spill] sm:$0xff] %v13736_v2  ;;  %v13738_v12 = vpop.f32.mrb[22].mxu1 }
 0x1eb   :  { %17935 = vst [vmem:[#allocation87_spill] sm:$0xff] %v13738_v12  ;;  %v13740_v56 = vpop.f32.mrb[23].mxu1 }
 0x1ec   :  { %17936 = vst [vmem:[#allocation88_spill] sm:$0xff] %v13740_v56 }
 0x1ed   :  { %v13722_v52 = vpop.f32.mrb[52].mxu0 }
 0x1ee   :  { %17929 = vst [vmem:[#allocation81_spill] sm:$0xff] %v13722_v52  ;;  %v1400_v17 = vadd.f32 %v1399_v34, %v13722_v52  ;;  %v13725_v37 = vpop.f32.mrb[53].mxu0 }
 0x1ef   :  { %17930 = vst [vmem:[#allocation82_spill] sm:$0xff] %v13725_v37  ;;  %v1433_v40 = vadd.f32 %v1432_v44, %v13725_v37  ;;  %v13728_v58 = vpop.f32.mrb[54].mxu0  ;;  %v13744_v44 = vpop.f32.mrb[24].mxu1 }
 0x1f0   :  { %17931 = vst [vmem:[#allocation83_spill] sm:$0xff] %v13728_v58  ;;  %v1401_v4 = vadd.f32 %v1400_v17, %v13728_v58  ;;  %v13731_v48 = vpop.f32.mrb[55].mxu0  ;;  %17937 = vst [vmem:[#allocation89_spill] sm:$0xff] %v13744_v44  ;;  %v13748_v30 = vpop.f32.mrb[25].mxu1 }
 0x1f1   :  { %17932 = vst [vmem:[#allocation84_spill] sm:$0xff] %v13731_v48  ;;  %v1434_v23 = vadd.f32 %v1433_v40, %v13731_v48  ;;  %17938 = vst [vmem:[#allocation90_spill] sm:$0xff] %v13748_v30  ;;  %v13752_v54 = vpop.f32.mrb[26].mxu1 }
 0x1f2   :  { %v1402_v60 = vrot.slane %v1401_v4, 4  ;;  %17939 = vst [vmem:[#allocation91_spill] sm:$0xff] %v13752_v54 }
 0x1f3   :  { %v1435_v17 = vrot.slane %v1434_v23, 4 }
 0x1f4   :  { %v1403_v34 = vadd.f32 %v1402_v60, %v1401_v4  ;;  %v13756_v60 = vpop.f32.mrb[27].mxu1 }
 0x1f5   :  { %v13742_v29 = vpop.f32.mrb[56].mxu0  ;;  %17940 = vst [vmem:[#allocation92_spill] sm:$0xff] %v13756_v60  ;;  %v1436_v12 = vadd.f32 %v1435_v17, %v1434_v23 }
 0x1f6   :  { %v1404_v37 = vrot.slane %v1403_v34, 2  ;;  %v13746_v27 = vpop.f32.mrb[57].mxu0 }
 0x1f7   :  { %v13750_v40 = vpop.f32.mrb[58].mxu0  ;;  %v1437_v28 = vrot.slane %v1436_v12, 2 }
 0x1f8   :  { %v1405_v48 = vadd.f32 %v1404_v37, %v1403_v34  ;;  %v13754_v2 = vpop.f32.mrb[59].mxu0 }
 0x1f9   :  { %v1438_v54 = vadd.f32 %v1437_v28, %v1436_v12 }
 0x1fa   :  { %v1406_v4 = vrot.slane %v1405_v48, 1 }
 0x1fb   :  { %v1439_v17 = vrot.slane %v1438_v54, 1 }
 0x1fc   :  { %v1407_v44 = vadd.f32 %v1406_v4, %v1405_v48 }
 0x1fd   :  { %v13758_v56 = vpop.f32.mrb[60].mxu0  ;;  %v1440_v12 = vadd.f32 %v1439_v17, %v1438_v54 }
 0x1fe   :  { %v13760_v7 = vpop.f32.mrb[61].mxu0  ;;  %v13766_v8 = vmul.f32 0.0051020407, %v1407_v44 }
 0x1ff   :  { %v13762_v5 = vpop.f32.mrb[62].mxu0  ;;  %v13788_v6 = vmul.f32 0.0051020407, %v1440_v12 }
 0x200   :  { %17941 = vst [vmem:[#allocation93_spill] sm:$0xff] %v13762_v5  ;;  %v13764_v30 = vpop.f32.mrb[63].mxu0  ;;  %17943 = vst [vmem:[#allocation95_spill] sm:$0xff] %v13766_v8  ;;  %v1505_v34 = vsub.f32 %v13525_v13, %v13766_v8  ;;  %v1508_v23 = vsub.f32 %v13529_v36, %v13766_v8  ;;  %v1511_v44 = vsub.f32 %v13538_v45, %v13766_v8 }
 0x201   :  { %17942 = vst [vmem:[#allocation94_spill] sm:$0xff] %v13764_v30  ;;  %v1517_v36 = vsub.f32 %v13550_v53, %v13766_v8  ;;  %v1520_v45 = vsub.f32 %v13556_v57, %v13766_v8  ;;  %v1523_v54 = vsub.f32 %v13562_v61, %v13766_v8  ;;  %v1538_v61 = vsub.f32 %v13600_v22, %v13766_v8 }
 0x202   :  { %v1589_v30 = vmul.f32 %v1505_v34, %v1505_v34  ;;  %v1592_v28 = vmul.f32 %v1508_v23, %v1508_v23  ;;  %v1595_v5 = vmul.f32 %v1511_v44, %v1511_v44  ;;  %v1526_v34 = vsub.f32 %v13568_v1, %v13766_v8 }
 0x203   :  { %v1529_v23 = vsub.f32 %v13582_v9, %v13766_v8  ;;  %v1535_v44 = vsub.f32 %v13594_v18, %v13766_v8  ;;  %v1541_v1 = vsub.f32 %v13614_v31, %v13766_v8  ;;  %v1544_v9 = vsub.f32 %v13620_v35, %v13766_v8 }
 0x204   :  { %v1547_v53 = vsub.f32 %v13626_v41, %v13766_v8  ;;  %v1556_v22 = vsub.f32 %v13652_v10, %v13766_v8  ;;  %v1559_v31 = vsub.f32 %v13658_v19, %v13766_v8  ;;  %v1562_v35 = vsub.f32 %v13664_v32, %v13766_v8 }
 0x205   :  { %v13768_v37 = vpop.f32.mrb[64].mxu0  ;;  %v1565_v41 = vsub.f32 %v13678_v0, %v13766_v8  ;;  %v13838_v10 = vsub.f32 %v13696_v50, %v13766_v8  ;;  %v13842_v32 = vsub.f32 %v13710_v25, %v13766_v8  ;;  %v13846_v0 = vsub.f32 %v13716_v43, %v13766_v8 }
 0x206   :  { %17944 = vst [vmem:[#allocation96_spill] sm:$0xff] %v13768_v37  ;;  %v13774_v48 = vpop.f32.mrb[65].mxu0  ;;  %v1514_v37 = vsub.f32 %v13544_v49, %v13766_v8  ;;  %v1509_v50 = vsub.f32 %v13533_v42, %v13788_v6  ;;  %v13862_v43 = vsub.f32 %v13728_v58, %v13766_v8  ;;  %v1610_v19 = vmul.f32 %v1526_v34, %v1526_v34 }
 0x207   :  { %17945 = vst [vmem:[#allocation97_spill] sm:$0xff] %v13774_v48  ;;  %v13776_v4 = vpop.f32.mrb[66].mxu0  ;;  %v1673_v48 = vadd.f32 %v1592_v28, %v1589_v30  ;;  %v1532_v30 = vsub.f32 %v13588_v14, %v13766_v8  ;;  %v1550_v14 = vsub.f32 %v13632_v46, %v13766_v8  ;;  %v13830_v46 = vsub.f32 %v13684_v21, %v13766_v8 }
 0x208   :  { %17946 = vst [vmem:[#allocation98_spill] sm:$0xff] %v13776_v4  ;;  %v13778_v60 = vpop.f32.mrb[67].mxu0  ;;  %v1598_v28 = vmul.f32 %v1514_v37, %v1514_v37  ;;  %v1601_v37 = vmul.f32 %v1517_v36, %v1517_v36  ;;  %v13834_v36 = vsub.f32 %v13690_v15, %v13766_v8  ;;  %17947 = vst [vmem:[#allocation99_spill] sm:$0xff] %v13842_v32 }
 0x209   :  { %v1674_v12 = vadd.f32 %v1673_v48, %v1595_v5  ;;  %v1553_v5 = vsub.f32 %v13646_v62, %v13766_v8  ;;  %17948 = vst [vmem:[#allocation100_spill] sm:$0xff] %v13846_v0  ;;  %v13850_v21 = vsub.f32 %v13722_v52, %v13766_v8  ;;  %v1613_v62 = vmul.f32 %v1529_v23, %v1529_v23 }
 0x20a   :  { %v1616_v52 = vmul.f32 %v1532_v30, %v1532_v30  ;;  %v1619_v49 = vmul.f32 %v1535_v44, %v1535_v44  ;;  %v13868_v0 = vmul.f32 %v1547_v53, %v1547_v53  ;;  %v13870_v42 = vmul.f32 %v1550_v14, %v1550_v14 }
 0x20b   :  { %v1675_v48 = vadd.f32 %v1674_v12, %v1598_v28  ;;  %v1604_v28 = vmul.f32 %v1520_v45, %v1520_v45  ;;  %17949 = vst [vmem:[#allocation101_spill] sm:$0xff] %v13850_v21  ;;  %v1607_v45 = vmul.f32 %v1523_v54, %v1523_v54  ;;  %v1622_v54 = vmul.f32 %v1538_v61, %v1538_v61 }
 0x20c   :  { %v13872_v32 = vmul.f32 %v1553_v5, %v1553_v5  ;;  %v1512_v34 = vsub.f32 %v13541_v47, %v13788_v6  ;;  %v1593_v30 = vmul.f32 %v1509_v50, %v1509_v50  ;;  %v13876_v8 = vmul.f32 %v1556_v22, %v1556_v22 }
 0x20d   :  { %v13784_v13 = vpop.f32.mrb[68].mxu0  ;;  %v1676_v12 = vadd.f32 %v1675_v48, %v1601_v37  ;;  %v1506_v48 = vsub.f32 %v13527_v26, %v13788_v6  ;;  %v1628_v26 = vmul.f32 %v1544_v9, %v1544_v9  ;;  %v13878_v61 = vmul.f32 %v1559_v31, %v1559_v31 }
 0x20e   :  { %v13790_v4 = vpop.f32.mrb[69].mxu0  ;;  %v13882_v44 = vmul.f32 %v1565_v41, %v1565_v41  ;;  %v1515_v9 = vsub.f32 %v13547_v51, %v13788_v6  ;;  %v1518_v14 = vsub.f32 %v13553_v55, %v13788_v6  ;;  %v1524_v22 = vsub.f32 %v13565_v63, %v13788_v6  ;;  %v17950_v51 = vld [vmem:[#allocation26_spill] sm:$0xff] }
 0x20f   :  { %v13800_v17 = vpop.f32.mrb[70].mxu0  ;;  %v1677_v37 = vadd.f32 %v1676_v12, %v1604_v28  ;;  %v1625_v28 = vmul.f32 %v1541_v1, %v1541_v1  ;;  %v1590_v23 = vmul.f32 %v1506_v48, %v1506_v48  ;;  %v13880_v1 = vmul.f32 %v1562_v35, %v1562_v35 }
 0x210   :  { %v13806_v57 = vpop.f32.mrb[71].mxu0  ;;  %v1527_v31 = vsub.f32 %v13571_v3, %v13788_v6  ;;  %v1530_v35 = vsub.f32 %v13585_v11, %v13788_v6  ;;  %v13898_v41 = vsub.f32 %v13591_v16, %v13788_v6  ;;  %v1596_v5 = vmul.f32 %v1512_v34, %v1512_v34 }
 0x211   :  { %v1678_v12 = vadd.f32 %v1677_v37, %v1607_v45  ;;  %v1706_v45 = vadd.f32 %v1593_v30, %v1590_v23  ;;  %v13906_v48 = vsub.f32 %v13603_v24, %v13788_v6  ;;  %v13914_v16 = vsub.f32 %v13623_v39, %v13788_v6 }
 0x212   :  { %v1599_v23 = vmul.f32 %v1515_v9, %v1515_v9  ;;  %v1602_v30 = vmul.f32 %v1518_v14, %v1518_v14  ;;  %v1608_v3 = vmul.f32 %v1524_v22, %v1524_v22  ;;  %v1611_v63 = vmul.f32 %v1527_v31, %v1527_v31  ;;  %v17951_v9 = vld [vmem:[#allocation93_spill] sm:$0xff]  ;;  %v17952_v14 = vld [vmem:[#allocation94_spill] sm:$0xff] }
 0x213   :  { %v1679_v58 = vadd.f32 %v1678_v12, %v1610_v19  ;;  %v1521_v19 = vsub.f32 %v13559_v59, %v13788_v6  ;;  %v13910_v12 = vsub.f32 %v13617_v33, %v13788_v6  ;;  %v10253_v33 = vadd.f32 %v13746_v27, %v13742_v29  ;;  %v17954_v22 = vld [vmem:[#allocation97_spill] sm:$0xff] }
 0x214   :  { %v10256_v55 = vadd.f32 %v13754_v2, %v13750_v40  ;;  %v17957_v2 = vld [vmem:[#allocation25_spill] sm:$0xff] }
 0x215   :  { %v13852_v15 = vpop.f32.mrb[72].mxu0  ;;  %v1680_v53 = vadd.f32 %v1679_v58, %v1613_v62  ;;  %v13902_v62 = vsub.f32 %v13597_v20, %v13788_v6  ;;  %v1707_v20 = vadd.f32 %v1706_v45, %v1596_v5  ;;  %v1605_v11 = vmul.f32 %v1521_v19, %v1521_v19  ;;  %v17953_v19 = vld [vmem:[#allocation96_spill] sm:$0xff]  ;;  %v17955_v5 = vld [vmem:[#allocation98_spill] sm:$0xff] }
 0x216   :  { %v13858_v25 = vpop.f32.mrb[73].mxu0  ;;  %v10265_v31 = vadd.f32 %v17954_v22, %v17953_v19  ;;  %v10268_v27 = vadd.f32 %v13778_v60, %v17955_v5  ;;  %v10274_v5 = vadd.f32 %v13806_v57, %v13800_v17  ;;  %v17963_v57 = vld [vmem:[#allocation50_spill] sm:$0xff] }
 0x217   :  { %v13864_v18 = vpop.f32.mrb[74].mxu0  ;;  %v1681_v58 = vadd.f32 %v1680_v53, %v1616_v52  ;;  %v13918_v52 = vsub.f32 %v13629_v38, %v13788_v6  ;;  %v1708_v39 = vadd.f32 %v1707_v20, %v1599_v23  ;;  %v10259_v38 = vadd.f32 %v13760_v7, %v13758_v56  ;;  %v17958_v7 = vld [vmem:[#allocation27_spill] sm:$0xff]  ;;  %v17959_v56 = vld [vmem:[#allocation38_spill] sm:$0xff]  ;;  %v17960_v23 = vld [vmem:[#allocation40_spill] sm:$0xff] }
 0x218   :  { %v13866_v21 = vpop.f32.mrb[75].mxu0 }
 0x219   :  { %v1682_v34 = vadd.f32 %v1681_v58, %v1619_v49  ;;  %v13929_v49 = vadd.f32 %v10253_v33, %v17950_v51  ;;  %v10262_v58 = vadd.f32 %v17952_v14, %v17951_v9  ;;  %v1709_v20 = vadd.f32 %v1708_v39, %v1602_v30 }
 0x21a   :  { %v13941_v40 = vadd.f32 %v17957_v2, %v10259_v38  ;;  %v13952_v9 = vadd.f32 %v10268_v27, %v17960_v23  ;;  %v1614_v30 = vmul.f32 %v1530_v35, %v1530_v35  ;;  %v10277_v35 = vadd.f32 %v13858_v25, %v13852_v15  ;;  %v17965_v15 = vld [vmem:[#allocation49_spill] sm:$0xff] }
 0x21b   :  { %v1683_v59 = vadd.f32 %v1682_v34, %v1622_v54  ;;  %v17956_v54 = vld [vmem:[#allocation28_spill] sm:$0xff]  ;;  %v1441_v51 = vsel %vm696_vm0, %v13929_v49, 0.0  ;;  %v13946_v33 = vadd.f32 %v17958_v7, %v10262_v58  ;;  %v13949_v34 = vadd.f32 %v10265_v31, %v17959_v56  ;;  %v17962_v7 = vld [vmem:[#allocation39_spill] sm:$0xff] }
 0x21c   :  { %v13938_v45 = vadd.f32 %v10256_v55, %v17956_v54  ;;  %v1710_v60 = vadd.f32 %v1709_v20, %v1605_v11  ;;  %v1444_v38 = vsel %vm696_vm0, %v13941_v40, 0.0  ;;  %v10271_v11 = vadd.f32 %v13790_v4, %v13784_v13  ;;  %v17964_v56 = vld [vmem:[#allocation52_spill] sm:$0xff] }
 0x21d   :  { %v10281_v50 = vpop.f32.mrb[76].mxu0  ;;  %v1684_v29 = vadd.f32 %v1683_v59, %v1625_v28  ;;  %v1446_v58 = vsel %vm696_vm0, %v13946_v33, 0.0  ;;  %v1448_v19 = vsel %vm696_vm0, %v13949_v34, 0.0  ;;  %v10280_v20 = vadd.f32 %v13866_v21, %v13864_v18 }
 0x21e   :  { %v10282_v37 = vpop.f32.mrb[77].mxu0  ;;  %v1442_v55 = vsel %vm696_vm0, %v13938_v45, 0.0  ;;  %v13976_v13 = vadd.f32 %v17962_v7, %v10274_v5  ;;  %v13979_v17 = vadd.f32 %v10277_v35, %v17963_v57  ;;  %v1450_v21 = vsel %vm696_vm0, %v13952_v9, 0.0  ;;  %v17966_v5 = vld [vmem:[#allocation51_spill] sm:$0xff]  ;;  %v17967_v35 = vld [vmem:[#allocation62_spill] sm:$0xff]  ;;  %v17970_v7 = vld [vmem:[#allocation48_spill] sm:$0xff] }
 0x21f   :  { %v13920_v53 = vpop.f32.mrb[78].mxu0  ;;  %v1685_v39 = vadd.f32 %v1684_v29, %v1628_v26  ;;  %v1443_v14 = vadd.f32 %v1442_v55, %v1441_v51  ;;  %v1711_v26 = vadd.f32 %v1710_v60, %v1608_v3  ;;  %v10283_v54 = vadd.f32 %v10282_v37, %v10281_v50 }
 0x220   :  { %v10285_v24 = vpop.f32.mrb[79].mxu0  ;;  %v13982_v23 = vadd.f32 %v10280_v20, %v17964_v56  ;;  %v1620_v50 = vmul.f32 %v13902_v62, %v13902_v62  ;;  %v1623_v37 = vmul.f32 %v13906_v48, %v13906_v48  ;;  %v17971_v56 = vld [vmem:[#allocation63_spill] sm:$0xff] }
 0x221   :  { %v1686_v31 = vadd.f32 %v1685_v39, %v13868_v0  ;;  %v1445_v29 = vadd.f32 %v1444_v38, %v1443_v14  ;;  %v1712_v51 = vadd.f32 %v1711_v26, %v1611_v63  ;;  %v17961_v0 = vld [vmem:[#allocation37_spill] sm:$0xff]  ;;  %v13985_v25 = vadd.f32 %v17965_v15, %v10283_v54 }
 0x222   :  { %v13973_v3 = vadd.f32 %v17961_v0, %v10271_v11  ;;  %v1652_v0 = vmul.f32 %v13830_v46, %v13830_v46  ;;  %v1658_v46 = vmul.f32 %v13838_v10, %v13838_v10 }
 0x223   :  { %v1687_v2 = vadd.f32 %v1686_v31, %v13870_v42  ;;  %v1447_v4 = vadd.f32 %v1446_v58, %v1445_v29  ;;  %v1617_v42 = vmul.f32 %v13898_v41, %v13898_v41  ;;  %v1713_v63 = vadd.f32 %v1712_v51, %v1614_v30 }
 0x224   :  { %v1452_v60 = vsel %vm696_vm0, %v13973_v3, 0.0  ;;  %v10286_v41 = vadd.f32 %v10285_v24, %v13920_v53  ;;  %v1454_v31 = vsel %vm696_vm0, %v13976_v13, 0.0  ;;  %v17968_v53 = vld [vmem:[#allocation64_spill] sm:$0xff]  ;;  %v1456_v51 = vsel %vm696_vm0, %v13979_v17, 0.0 }
 0x225   :  { %v10287_v59 = vpop.f32.mrb[80].mxu0  ;;  %v1688_v18 = vadd.f32 %v1687_v2, %v13872_v32  ;;  %v1449_v39 = vadd.f32 %v1448_v19, %v1447_v4  ;;  %v1714_v38 = vadd.f32 %v1713_v63, %v1617_v42  ;;  %v1551_v4 = vsub.f32 %v17970_v7, %v13788_v6 }
 0x226   :  { %v10288_v28 = vpop.f32.mrb[81].mxu0  ;;  %v14004_v29 = vadd.f32 %v17966_v5, %v10286_v41  ;;  %v1458_v42 = vsel %vm696_vm0, %v13982_v23, 0.0  ;;  %v1655_v63 = vmul.f32 %v13834_v36, %v13834_v36  ;;  %v17974_v41 = vld [vmem:[#allocation56_spill] sm:$0xff] }
 0x227   :  { %v10290_v22 = vpop.f32.mrb[82].mxu0  ;;  %v1689_v32 = vadd.f32 %v1688_v18, %v13876_v8  ;;  %v10289_v30 = vadd.f32 %v10288_v28, %v10287_v59  ;;  %v1451_v58 = vadd.f32 %v1450_v21, %v1449_v39  ;;  %v1715_v19 = vadd.f32 %v1714_v38, %v1620_v50  ;;  %v17969_v28 = vld [vmem:[#allocation61_spill] sm:$0xff]  ;;  %v17972_v21 = vld [vmem:[#allocation54_spill] sm:$0xff]  ;;  %v17973_v38 = vld [vmem:[#allocation99_spill] sm:$0xff] }
 0x228   :  { %v10291_v27 = vpop.f32.mrb[83].mxu0  ;;  %v1554_v50 = vsub.f32 %v17972_v21, %v13788_v6  ;;  %v1661_v36 = vmul.f32 %v17973_v38, %v17973_v38  ;;  %v1557_v10 = vsub.f32 %v17974_v41, %v13788_v6 }
 0x229   :  { %v10292_v62 = vadd.f32 %v10291_v27, %v10290_v22  ;;  %v1690_v48 = vadd.f32 %v1689_v32, %v13878_v61  ;;  %v14007_v8 = vadd.f32 %v10289_v30, %v17967_v35  ;;  %v1453_v24 = vadd.f32 %v1452_v60, %v1451_v58 }
 0x22a   :  { %v1626_v61 = vmul.f32 %v13910_v12, %v13910_v12  ;;  %v1716_v2 = vadd.f32 %v1715_v19, %v1623_v37 }
 0x22b   :  { %v14010_v59 = vadd.f32 %v10292_v62, %v17968_v53  ;;  %v1691_v27 = vadd.f32 %v1690_v48, %v13880_v1  ;;  %v1455_v57 = vadd.f32 %v1454_v31, %v1453_v24  ;;  %v1629_v1 = vmul.f32 %v13914_v16, %v13914_v16  ;;  %v17975_v48 = vld [vmem:[#allocation58_spill] sm:$0xff] }
 0x22c   :  { %v1717_v12 = vadd.f32 %v1716_v2, %v1626_v61  ;;  %v1635_v62 = vmul.f32 %v1551_v4, %v1551_v4  ;;  %v1560_v19 = vsub.f32 %v17975_v48, %v13788_v6  ;;  %v17977_v61 = vld [vmem:[#allocation100_spill] sm:$0xff] }
 0x22d   :  { %v10293_v55 = vpop.f32.mrb[84].mxu0  ;;  %v1692_v18 = vadd.f32 %v1691_v27, %v13882_v44  ;;  %v1457_v37 = vadd.f32 %v1456_v51, %v1455_v57  ;;  %v1632_v44 = vmul.f32 %v13918_v52, %v13918_v52  ;;  %v1462_v52 = vsel %vm696_vm0, %v14004_v29, 0.0  ;;  %v17978_v51 = vld [vmem:[#allocation60_spill] sm:$0xff] }
 0x22e   :  { %v10294_v14 = vpop.f32.mrb[85].mxu0  ;;  %v1718_v16 = vadd.f32 %v1717_v12, %v1629_v1  ;;  %v1464_v27 = vsel %vm696_vm0, %v14007_v8, 0.0  ;;  %v1664_v2 = vmul.f32 %v17977_v61, %v17977_v61  ;;  %v17979_v57 = vld [vmem:[#allocation76_spill] sm:$0xff]  ;;  %v1641_v1 = vmul.f32 %v1557_v10, %v1557_v10 }
 0x22f   :  { %v10295_v26 = vadd.f32 %v10294_v14, %v10293_v55  ;;  %v10296_v11 = vpop.f32.mrb[86].mxu0  ;;  %v1693_v60 = vadd.f32 %v1692_v18, %v1652_v0  ;;  %v1460_v55 = vsel %vm696_vm0, %v13985_v25, 0.0  ;;  %v1459_v30 = vadd.f32 %v1458_v42, %v1457_v37 }
 0x230   :  { %v10297_v20 = vpop.f32.mrb[87].mxu0  ;;  %v1563_v0 = vsub.f32 %v17978_v51, %v13788_v6  ;;  %v1466_v42 = vsel %vm696_vm0, %v14010_v59, 0.0 }
 0x231   :  { %v14013_v54 = vadd.f32 %v17969_v28, %v10295_v26  ;;  %v10298_v22 = vadd.f32 %v10297_v20, %v10296_v11  ;;  %v1694_v31 = vadd.f32 %v1693_v60, %v1655_v63  ;;  %v1719_v26 = vadd.f32 %v1718_v16, %v1632_v44  ;;  %v17976_v20 = vld [vmem:[#allocation74_spill] sm:$0xff]  ;;  %v17980_v63 = vld [vmem:[#allocation101_spill] sm:$0xff] }
 0x232   :  { %v1461_v5 = vadd.f32 %v1460_v55, %v1459_v30  ;;  %v1638_v28 = vmul.f32 %v1554_v50, %v1554_v50  ;;  %v17981_v50 = vld [vmem:[#allocation66_spill] sm:$0xff]  ;;  %v1644_v16 = vmul.f32 %v1560_v19, %v1560_v19 }
 0x233   :  { %v14025_v15 = vadd.f32 %v17971_v56, %v10298_v22  ;;  %v1695_v53 = vadd.f32 %v1694_v31, %v1658_v46  ;;  %v1720_v22 = vadd.f32 %v1719_v26, %v1635_v62  ;;  %v1667_v46 = vmul.f32 %v17980_v63, %v17980_v63  ;;  %v17982_v31 = vld [vmem:[#allocation68_spill] sm:$0xff] }
 0x234   :  { %v1463_v4 = vadd.f32 %v1462_v52, %v1461_v5  ;;  %v1566_v37 = vsub.f32 %v17981_v50, %v13788_v6  ;;  %v1569_v62 = vsub.f32 %v17982_v31, %v13788_v6  ;;  %v1647_v26 = vmul.f32 %v1563_v0, %v1563_v0 }
 0x235   :  { %v10299_v39 = vpop.f32.mrb[88].mxu0  ;;  %v1696_v18 = vadd.f32 %v1695_v53, %v1661_v36  ;;  %v1721_v12 = vadd.f32 %v1720_v22, %v1638_v28  ;;  %v1670_v36 = vmul.f32 %v13862_v43, %v13862_v43  ;;  %v1470_v19 = vsel %vm696_vm0, %v14025_v15, 0.0  ;;  %v17984_v43 = vld [vmem:[#allocation70_spill] sm:$0xff] }
 0x236   :  { %v10300_v32 = vpop.f32.mrb[89].mxu0  ;;  %v1572_v22 = vsub.f32 %v17984_v43, %v13788_v6 }
 0x237   :  { %v10301_v14 = vadd.f32 %v10300_v32, %v10299_v39  ;;  %v10302_v58 = vpop.f32.mrb[90].mxu0  ;;  %v1465_v39 = vadd.f32 %v1464_v27, %v1463_v4  ;;  %v1697_v44 = vadd.f32 %v1696_v18, %v1664_v2  ;;  %v1722_v55 = vadd.f32 %v1721_v12, %v1641_v1  ;;  %v17985_v2 = vld [vmem:[#allocation72_spill] sm:$0xff] }
 0x238   :  { %v10303_v11 = vpop.f32.mrb[91].mxu0  ;;  %v1468_v32 = vsel %vm696_vm0, %v14013_v54, 0.0  ;;  %v1650_v27 = vmul.f32 %v1566_v37, %v1566_v37  ;;  %v1575_v4 = vsub.f32 %v17985_v2, %v13788_v6  ;;  %v1653_v12 = vmul.f32 %v1569_v62, %v1569_v62 }
 0x239   :  { %v10304_v35 = vadd.f32 %v10303_v11, %v10302_v58  ;;  %v14051_v24 = vadd.f32 %v10301_v14, %v17976_v20  ;;  %v1467_v10 = vadd.f32 %v1466_v42, %v1465_v39  ;;  %v1698_v58 = vadd.f32 %v1697_v44, %v1667_v46  ;;  %v17987_v46 = vld [vmem:[#allocation78_spill] sm:$0xff] }
 0x23a   :  { %v1723_v52 = vadd.f32 %v1722_v55, %v1644_v16  ;;  %v1578_v39 = vsub.f32 %v17987_v46, %v13788_v6  ;;  %v1656_v37 = vmul.f32 %v1572_v22, %v1572_v22  ;;  %v1659_v62 = vmul.f32 %v1575_v4, %v1575_v4 }
 0x23b   :  { %v14060_v56 = vadd.f32 %v10304_v35, %v17979_v57  ;;  %v1469_v5 = vadd.f32 %v1468_v32, %v1467_v10  ;;  %v17983_v35 = vld [vmem:[#allocation73_spill] sm:$0xff]  ;;  %v1699_v28 = vadd.f32 %v1698_v58, %v1670_v36  ;;  %v1472_v0 = vsel %vm696_vm0, %v14051_v24, 0.0  ;;  %v17986_v57 = vld [vmem:[#allocation75_spill] sm:$0xff] }
 0x23c   :  { %v1724_v61 = vadd.f32 %v1723_v52, %v1647_v26  ;;  %v1662_v22 = vmul.f32 %v1578_v39, %v1578_v39 }
 0x23d   :  { %v10305_v60 = vpop.f32.mrb[92].mxu0  ;;  %v1700_v1 = vrot.slane %v1699_v28, 4  ;;  %v1471_v63 = vadd.f32 %v1470_v19, %v1469_v5  ;;  %v17989_v19 = vld [vmem:[#allocation86_spill] sm:$0xff] }
 0x23e   :  { %v10306_v38 = vpop.f32.mrb[93].mxu0  ;;  %v1725_v42 = vadd.f32 %v1724_v61, %v1650_v27 }
 0x23f   :  { %v10307_v30 = vadd.f32 %v10306_v38, %v10305_v60  ;;  %v10308_v14 = vpop.f32.mrb[94].mxu0  ;;  %v1701_v44 = vadd.f32 %v1700_v1, %v1699_v28  ;;  %v1473_v55 = vadd.f32 %v1472_v0, %v1471_v63  ;;  %v1474_v38 = vsel %vm696_vm0, %v14060_v56, 0.0  ;;  %v17991_v0 = vld [vmem:[#allocation84_spill] sm:$0xff] }
 0x240   :  { %v10309_v11 = vpop.f32.mrb[95].mxu0  ;;  %v1726_v16 = vadd.f32 %v1725_v42, %v1653_v12  ;;  %v17992_v1 = vld [vmem:[#allocation88_spill] sm:$0xff] }
 0x241   :  { %v14077_v20 = vadd.f32 %v17983_v35, %v10307_v30  ;;  %v10310_v53 = vadd.f32 %v10309_v11, %v10308_v14  ;;  %v1702_v30 = vrot.slane %v1701_v44, 2  ;;  %v17988_v14 = vld [vmem:[#allocation80_spill] sm:$0xff]  ;;  %v1475_v61 = vadd.f32 %v1474_v38, %v1473_v55 }
 0x242   :  { %v1581_v58 = vsub.f32 %v17988_v14, %v13788_v6  ;;  %v1727_v26 = vadd.f32 %v1726_v16, %v1656_v37 }
 0x243   :  { %v14086_v18 = vadd.f32 %v17986_v57, %v10310_v53  ;;  %v1476_v11 = vsel %vm696_vm0, %v14077_v20, 0.0  ;;  %v17990_v53 = vld [vmem:[#allocation82_spill] sm:$0xff]  ;;  %v1587_v57 = vsub.f32 %v17991_v0, %v13788_v6  ;;  %v1703_v12 = vadd.f32 %v1702_v30, %v1701_v44  ;;  %v17993_v30 = vld [vmem:[#allocation85_spill] sm:$0xff] }
 0x244   :  { %v1584_v28 = vsub.f32 %v17990_v53, %v13788_v6  ;;  %v1728_v27 = vadd.f32 %v1727_v26, %v1659_v62  ;;  %v1665_v42 = vmul.f32 %v1581_v58, %v1581_v58  ;;  %v18002_v0 = vld [vmem:[#allocation89_spill] sm:$0xff] }
 0x245   :  { %v10311_v60 = vpop.f32.mrb[96].mxu0  ;;  %v1478_v37 = vsel %vm696_vm0, %v14086_v18, 0.0  ;;  %v1704_v62 = vrot.slane %v1703_v12, 1  ;;  %v1671_v26 = vmul.f32 %v1587_v57, %v1587_v57 }
 0x246   :  { %v10312_v32 = vpop.f32.mrb[97].mxu0  ;;  %v1729_v63 = vadd.f32 %v1728_v27, %v1662_v22 }
 0x247   :  { %v10313_v36 = vadd.f32 %v10312_v32, %v10311_v60  ;;  %v10314_v10 = vpop.f32.mrb[98].mxu0  ;;  %v1477_v60 = vadd.f32 %v1476_v11, %v1475_v61  ;;  %v1668_v32 = vmul.f32 %v1584_v28, %v1584_v28 }
 0x248   :  { %v10315_v52 = vpop.f32.mrb[99].mxu0 }
 0x249   :  { %v10316_v5 = vadd.f32 %v10315_v52, %v10314_v10  ;;  %v14097_v35 = vadd.f32 %v10313_v36, %v17989_v19  ;;  %v1730_v36 = vadd.f32 %v1729_v63, %v1665_v42  ;;  %v17995_v19 = vld [vmem:[#allocation95_spill] sm:$0xff]  ;;  %v1705_v63 = vadd.f32 %v1704_v62, %v1703_v12  ;;  %v17998_v62 = vld [vmem:[#allocation90_spill] sm:$0xff] }
 0x24a   :  { %v1800_v22 = vmul.f32 28.0, %v17995_v19 }
 0x24b   :  { %v14104_v4 = vadd.f32 %v10316_v5, %v17992_v1  ;;  %v1480_v39 = vsel %vm696_vm0, %v14097_v35, 0.0  ;;  %v1731_v52 = vadd.f32 %v1730_v36, %v1668_v32  ;;  %v1479_v5 = vadd.f32 %v1478_v37, %v1477_v60  ;;  %v17996_v1 = vld [vmem:[#allocation87_spill] sm:$0xff] }
 0x24c   :  { %v1803_v37 = vmul.f32 %v1800_v22, %v17995_v19 }
 0x24d   :  { %v10317_v16 = vpop.f32.mrb[100].mxu0  ;;  %v1732_v27 = vadd.f32 %v1731_v52, %v1671_v26  ;;  %v1481_v28 = vadd.f32 %v1480_v39, %v1479_v5  ;;  %v1482_v61 = vsel %vm696_vm0, %v14104_v4, 0.0 }
 0x24e   :  { %v10318_v10 = vpop.f32.mrb[101].mxu0  ;;  %v1806_v39 = vsub.f32 %v1705_v63, %v1803_v37 }
 0x24f   :  { %v10319_v55 = vadd.f32 %v10318_v10, %v10317_v16  ;;  %v10320_v38 = vpop.f32.mrb[102].mxu0  ;;  %v1733_v16 = vrot.slane %v1732_v27, 4  ;;  %v1483_v36 = vadd.f32 %v1482_v61, %v1481_v28 }
 0x250   :  { %v10321_v44 = vpop.f32.mrb[103].mxu0  ;;  %v1809_v61 = vmul.f32 0.0051020407, %v1806_v39 }
 0x251   :  { %v14111_v58 = vadd.f32 %v17993_v30, %v10319_v55  ;;  %v10322_v11 = vadd.f32 %v10321_v44, %v10320_v38  ;;  %v1734_v32 = vadd.f32 %v1733_v16, %v1732_v27  ;;  %v18000_v27 = vld [vmem:[#allocation92_spill] sm:$0xff] }
 0x253   :  { %17994 = vst [vmem:[#allocation26_spill] sm:$0xff] %v14111_v58  ;;  %v14117_v42 = vadd.f32 %v17996_v1, %v10322_v11  ;;  %v1484_v57 = vsel %vm696_vm0, %v14111_v58, 0.0  ;;  %v1735_v26 = vrot.slane %v1734_v32, 2  ;;  %v1801_v1 = vmul.f32 28.0, %v13788_v6 }
 0x254   :  { %v1485_v52 = vadd.f32 %v1484_v57, %v1483_v36 }
 0x255   :  { %17997 = vst [vmem:[#allocation93_spill] sm:$0xff] %v14117_v42  ;;  %v10323_v60 = vpop.f32.mrb[104].mxu0  ;;  %v1486_v44 = vsel %vm696_vm0, %v14117_v42, 0.0  ;;  %v1736_v11 = vadd.f32 %v1735_v26, %v1734_v32  ;;  %v1804_v37 = vmul.f32 %v1801_v1, %v13788_v6  ;;  %v1813_v26 = vadd.f32 1e-05, %v1809_v61 }
 0x256   :  { %v10324_v10 = vpop.f32.mrb[105].mxu0  ;;  %v1487_v16 = vadd.f32 %v1486_v44, %v1485_v52 }
 0x257   :  { %v10325_v55 = vadd.f32 %v10324_v10, %v10323_v60  ;;  %v10326_v38 = vpop.f32.mrb[106].mxu0  ;;  %v1737_v63 = vrot.slane %v1736_v11, 1  ;;  %12946 = vrsqrt.f32 %v1813_v26 }
 0x258   :  { %v10327_v5 = vpop.f32.mrb[107].mxu0 }
 0x259   :  { %v10328_v12 = vadd.f32 %v10327_v5, %v10326_v38  ;;  %v14125_v30 = vadd.f32 %v10325_v55, %v17998_v62  ;;  %v1738_v60 = vadd.f32 %v1737_v63, %v1736_v11  ;;  %v18004_v11 = vld [vmem:[#allocation91_spill] sm:$0xff] }
 0x25b   :  { %17999 = vst [vmem:[#allocation94_spill] sm:$0xff] %v14125_v30  ;;  %v1488_v22 = vsel %vm696_vm0, %v14125_v30, 0.0  ;;  %v14131_v28 = vadd.f32 %v10328_v12, %v18000_v27  ;;  %v1807_v5 = vsub.f32 %v1738_v60, %v1804_v37 }
 0x25c   :  { %v1489_v36 = vadd.f32 %v1488_v22, %v1487_v16 }
 0x25d   :  { %18001 = vst [vmem:[#allocation96_spill] sm:$0xff] %v14131_v28  ;;  %v10329_v57 = vpop.f32.mrb[108].mxu0  ;;  %v1490_v32 = vsel %vm696_vm0, %v14131_v28, 0.0  ;;  %v1810_v27 = vmul.f32 0.0051020407, %v1807_v5 }
 0x25e   :  { %v10330_v10 = vpop.f32.mrb[109].mxu0  ;;  %v1491_v52 = vadd.f32 %v1490_v32, %v1489_v36 }
 0x25f   :  { %v10331_v55 = vadd.f32 %v10330_v10, %v10329_v57  ;;  %v10332_v38 = vpop.f32.mrb[110].mxu0  ;;  %v1814_v22 = vadd.f32 1e-05, %v1810_v27 }
 0x260   :  { %v10333_v62 = vpop.f32.mrb[111].mxu0 }
 0x261   :  { %v14137_v12 = vadd.f32 %v18002_v0, %v10331_v55  ;;  %v10334_v39 = vadd.f32 %v10333_v62, %v10332_v38  ;;  %12948 = vrsqrt.f32 %v1814_v22  ;;  %v14146_v37 = vpop.eup %12946 }
 0x263   :  { %18003 = vst [vmem:[#allocation97_spill] sm:$0xff] %v14137_v12  ;;  %v1492_v44 = vsel %vm696_vm0, %v14137_v12, 0.0  ;;  %v14142_v1 = vadd.f32 %v18004_v11, %v10334_v39 }
 0x264   :  { %v1493_v63 = vadd.f32 %v1492_v44, %v1491_v52 }
 0x265   :  { %18005 = vst [vmem:[#allocation98_spill] sm:$0xff] %v14142_v1  ;;  %v1494_v61 = vsel %vm696_vm0, %v14142_v1, 0.0 }
 0x266   :  { %v1495_v16 = vadd.f32 %v1494_v61, %v1493_v63 }
 0x268   :  { %v1496_v57 = vrot.slane %v1495_v16, 4 }
 0x26a   :  { %v1497_v0 = vadd.f32 %v1496_v57, %v1495_v16 }
 0x26b   :  { %v14148_v10 = vpop.eup %12948 }
 0x26c   :  { %v1498_v60 = vrot.slane %v1497_v0, 2 }
 0x26e   :  { %v1499_v36 = vadd.f32 %v1498_v60, %v1497_v0 }
 0x270   :  { %v1500_v32 = vrot.slane %v1499_v36, 1 }
 0x272   :  { %v1501_v38 = vadd.f32 %v1500_v32, %v1499_v36 }
 0x274   :  { %v14152_v26 = vmul.f32 0.0051020407, %v1501_v38 }
 0x276   :  { %v1507_v5 = vsub.f32 %v13929_v49, %v14152_v26  ;;  %v1510_v62 = vsub.f32 %v13938_v45, %v14152_v26  ;;  %v1513_v39 = vsub.f32 %v13941_v40, %v14152_v26  ;;  %v1516_v27 = vsub.f32 %v13946_v33, %v14152_v26 }
 0x277   :  { %v1519_v11 = vsub.f32 %v13949_v34, %v14152_v26  ;;  %v1522_v63 = vsub.f32 %v13952_v9, %v14152_v26  ;;  %v1525_v60 = vsub.f32 %v13973_v3, %v14152_v26 }
 0x278   :  { %v1591_v52 = vmul.f32 %v1507_v5, %v1507_v5  ;;  %v1594_v44 = vmul.f32 %v1510_v62, %v1510_v62  ;;  %v1597_v22 = vmul.f32 %v1513_v39, %v1513_v39  ;;  %v1600_v61 = vmul.f32 %v1516_v27, %v1516_v27 }
 0x279   :  { %v1603_v36 = vmul.f32 %v1519_v11, %v1519_v11  ;;  %v1528_v5 = vsub.f32 %v13976_v13, %v14152_v26  ;;  %v1606_v62 = vmul.f32 %v1522_v63, %v1522_v63  ;;  %v1531_v27 = vsub.f32 %v13979_v17, %v14152_v26 }
 0x27a   :  { %v1739_v16 = vsel %vm696_vm0, %v1591_v52, 0.0  ;;  %v1740_v57 = vsel %vm696_vm0, %v1594_v44, 0.0  ;;  %v1742_v32 = vsel %vm696_vm0, %v1597_v22, 0.0  ;;  %v1744_v39 = vsel %vm696_vm0, %v1600_v61, 0.0 }
 0x27b   :  { %v1741_v0 = vadd.f32 %v1740_v57, %v1739_v16  ;;  %v1609_v52 = vmul.f32 %v1525_v60, %v1525_v60  ;;  %v1746_v44 = vsel %vm696_vm0, %v1603_v36, 0.0  ;;  %v1534_v11 = vsub.f32 %v13982_v23, %v14152_v26 }
 0x27c   :  { %v1612_v57 = vmul.f32 %v1528_v5, %v1528_v5  ;;  %v1748_v22 = vsel %vm696_vm0, %v1606_v62, 0.0  ;;  %v1537_v63 = vsub.f32 %v13985_v25, %v14152_v26  ;;  %v1540_v60 = vsub.f32 %v14004_v29, %v14152_v26 }
 0x27d   :  { %v1743_v38 = vadd.f32 %v1742_v32, %v1741_v0  ;;  %v1615_v32 = vmul.f32 %v1531_v27, %v1531_v27  ;;  %v1750_v61 = vsel %vm696_vm0, %v1609_v52, 0.0  ;;  %v1543_v5 = vsub.f32 %v14007_v8, %v14152_v26 }
 0x27e   :  { %v1546_v27 = vsub.f32 %v14010_v59, %v14152_v26 }
 0x27f   :  { %v1745_v55 = vadd.f32 %v1744_v39, %v1743_v38  ;;  %v1618_v39 = vmul.f32 %v1534_v11, %v1534_v11  ;;  %v1754_v62 = vsel %vm696_vm0, %v1615_v32, 0.0  ;;  %v1549_v11 = vsub.f32 %v14013_v54, %v14152_v26 }
 0x281   :  { %v1747_v16 = vadd.f32 %v1746_v44, %v1745_v55  ;;  %v1752_v55 = vsel %vm696_vm0, %v1612_v57, 0.0  ;;  %v1621_v44 = vmul.f32 %v1537_v63, %v1537_v63  ;;  %v1756_v52 = vsel %vm696_vm0, %v1618_v39, 0.0 }
 0x282   :  { %v1552_v63 = vsub.f32 %v14025_v15, %v14152_v26 }
 0x283   :  { %v1749_v0 = vadd.f32 %v1748_v22, %v1747_v16  ;;  %v1624_v22 = vmul.f32 %v1540_v60, %v1540_v60  ;;  %v1758_v57 = vsel %vm696_vm0, %v1621_v44, 0.0  ;;  %v1555_v60 = vsub.f32 %v14051_v24, %v14152_v26 }
 0x285   :  { %v1751_v38 = vadd.f32 %v1750_v61, %v1749_v0  ;;  %v1627_v61 = vmul.f32 %v1543_v5, %v1543_v5  ;;  %v1760_v32 = vsel %vm696_vm0, %v1624_v22, 0.0  ;;  %v1558_v5 = vsub.f32 %v14060_v56, %v14152_v26 }
 0x287   :  { %v1753_v36 = vadd.f32 %v1752_v55, %v1751_v38  ;;  %v1630_v55 = vmul.f32 %v1546_v27, %v1546_v27  ;;  %v1762_v39 = vsel %vm696_vm0, %v1627_v61, 0.0  ;;  %v1561_v27 = vsub.f32 %v14077_v20, %v14152_v26 }
 0x289   :  { %v1755_v16 = vadd.f32 %v1754_v62, %v1753_v36  ;;  %v1633_v62 = vmul.f32 %v1549_v11, %v1549_v11  ;;  %v1764_v44 = vsel %vm696_vm0, %v1630_v55, 0.0  ;;  %v1564_v11 = vsub.f32 %v14086_v18, %v14152_v26 }
 0x28b   :  { %v1757_v0 = vadd.f32 %v1756_v52, %v1755_v16  ;;  %v1636_v52 = vmul.f32 %v1552_v63, %v1552_v63  ;;  %v1766_v22 = vsel %vm696_vm0, %v1633_v62, 0.0  ;;  %v1567_v63 = vsub.f32 %v14097_v35, %v14152_v26 }
 0x28d   :  { %v1759_v38 = vadd.f32 %v1758_v57, %v1757_v0  ;;  %v1639_v57 = vmul.f32 %v1555_v60, %v1555_v60  ;;  %v1768_v61 = vsel %vm696_vm0, %v1636_v52, 0.0  ;;  %v1570_v60 = vsub.f32 %v14104_v4, %v14152_v26 }
 0x28f   :  { %v1761_v36 = vadd.f32 %v1760_v32, %v1759_v38  ;;  %v1642_v32 = vmul.f32 %v1558_v5, %v1558_v5  ;;  %v1770_v55 = vsel %vm696_vm0, %v1639_v57, 0.0  ;;  %v1573_v5 = vsub.f32 %v14111_v58, %v14152_v26 }
 0x291   :  { %v1763_v16 = vadd.f32 %v1762_v39, %v1761_v36  ;;  %v1645_v39 = vmul.f32 %v1561_v27, %v1561_v27  ;;  %v1772_v62 = vsel %vm696_vm0, %v1642_v32, 0.0  ;;  %v1576_v27 = vsub.f32 %v14117_v42, %v14152_v26 }
 0x293   :  { %v1765_v0 = vadd.f32 %v1764_v44, %v1763_v16  ;;  %v1648_v44 = vmul.f32 %v1564_v11, %v1564_v11  ;;  %v1774_v52 = vsel %vm696_vm0, %v1645_v39, 0.0  ;;  %v1579_v11 = vsub.f32 %v14125_v30, %v14152_v26 }
 0x295   :  { %v1767_v38 = vadd.f32 %v1766_v22, %v1765_v0  ;;  %v1651_v22 = vmul.f32 %v1567_v63, %v1567_v63  ;;  %v1776_v57 = vsel %vm696_vm0, %v1648_v44, 0.0  ;;  %v1582_v63 = vsub.f32 %v14131_v28, %v14152_v26 }
 0x297   :  { %v1769_v36 = vadd.f32 %v1768_v61, %v1767_v38  ;;  %v1654_v61 = vmul.f32 %v1570_v60, %v1570_v60  ;;  %v1778_v32 = vsel %vm696_vm0, %v1651_v22, 0.0  ;;  %v1585_v60 = vsub.f32 %v14137_v12, %v14152_v26 }
 0x299   :  { %v1771_v16 = vadd.f32 %v1770_v55, %v1769_v36  ;;  %v1657_v55 = vmul.f32 %v1573_v5, %v1573_v5  ;;  %v1780_v39 = vsel %vm696_vm0, %v1654_v61, 0.0  ;;  %v1588_v5 = vsub.f32 %v14142_v1, %v14152_v26 }
 0x29b   :  { %v1773_v0 = vadd.f32 %v1772_v62, %v1771_v16  ;;  %v1660_v62 = vmul.f32 %v1576_v27, %v1576_v27  ;;  %v1782_v44 = vsel %vm696_vm0, %v1657_v55, 0.0  ;;  %v1672_v61 = vmul.f32 %v1588_v5, %v1588_v5 }
 0x29d   :  { %v1775_v38 = vadd.f32 %v1774_v52, %v1773_v0  ;;  %v1663_v52 = vmul.f32 %v1579_v11, %v1579_v11  ;;  %v1784_v22 = vsel %vm696_vm0, %v1660_v62, 0.0  ;;  %v1792_v55 = vsel %vm696_vm0, %v1672_v61, 0.0 }
 0x29f   :  { %v1777_v36 = vadd.f32 %v1776_v57, %v1775_v38  ;;  %v1666_v57 = vmul.f32 %v1582_v63, %v1582_v63  ;;  %v1786_v27 = vsel %vm696_vm0, %v1663_v52, 0.0 }
 0x2a1   :  { %v1779_v16 = vadd.f32 %v1778_v32, %v1777_v36  ;;  %v1669_v32 = vmul.f32 %v1585_v60, %v1585_v60 }
 0x2a3   :  { %v1781_v0 = vadd.f32 %v1780_v39, %v1779_v16  ;;  %v1788_v16 = vsel %vm696_vm0, %v1666_v57, 0.0  ;;  %v1790_v11 = vsel %vm696_vm0, %v1669_v32, 0.0 }
 0x2a5   :  { %v1783_v38 = vadd.f32 %v1782_v44, %v1781_v0 }
 0x2a7   :  { %v1785_v36 = vadd.f32 %v1784_v22, %v1783_v38 }
 0x2a9   :  { %v1787_v28 = vadd.f32 %v1786_v27, %v1785_v36 }
 0x2ab   :  { %v1789_v39 = vadd.f32 %v1788_v16, %v1787_v28 }
 0x2ad   :  { %v1791_v12 = vadd.f32 %v1790_v11, %v1789_v39 }
 0x2af   :  { %v1793_v0 = vadd.f32 %v1792_v55, %v1791_v12 }
 0x2b1   :  { %v1794_v63 = vrot.slane %v1793_v0, 4 }
 0x2b2   :  { %12998 = shalt.err (!%p12995_p2)  }
 0x2b3   :  { %s12999_s29 = scalar_lea.vmem %s27_s1, 23040  ;;  %p13004_p4 = scmp.lt.s32.totalorder %s27_s1, %s27_s1 }
 0x2b4   :  { %p13000_p3 = scmp.ne.s32.totalorder %s27_s1, %s12999_s29  ;;  %p13005_p5 = scmp.lt.s32.totalorder %s12999_s29, %s12999_s29 }
 0x2b6   :  { %p13006_p6 = por %p13005_p5, %p13004_p4 }
 0x2b8   :  { %p13007_p7 = pnand %p13006_p6, %p13000_p3 }
 0x2ba   :  { %13010 = shalt.err (!%p13007_p7)  }
 0x2bb   :  { %29 = dma.hbm_to_vmem [thread:$0]  %s17641_s4, 23040, %s27_s1, [#allocation4]  ;;  %v1795_v28 = vadd.f32 %v1794_v63, %v1793_v0  ;;  %v1802_v60 = vmul.f32 28.0, %v14152_v26  ;;  %v13015_v36 = vmov 1966171168   ;;  %v1826_v27 = vlaneseq }
 0x2bc   :  { %v1824_v32 = vunpack.c.l.s4 %v13015_v36  ;;  %v18006_v55 = vcombine.low %v14146_v37, %v14148_v10 }
 0x2bd   :  { %v1796_v12 = vrot.slane %v1795_v28, 2  ;;  %v1805_v38 = vmul.f32 %v1802_v60, %v14152_v26  ;;  %v14252_v16 = vshrl.u32 %v1826_v27, 7 }
 0x2be   :  { %v1825_v61 = vunpack.c.0.s8 %v1824_v32 }
 0x2bf   :  { %v1797_v62 = vadd.f32 %v1796_v12, %v1795_v28  ;;  %v14263_v28 = vadd.s32 8, %v14252_v16  ;;  %v14266_v12 = vadd.s32 24, %v14252_v16  ;;  %v14272_v60 = vadd.s32 56, %v14252_v16 }
 0x2c0   :  { %v14255_v39 = vsub.s32 %v1825_v61, %v14252_v16  ;;  %v14278_v37 = vadd.s32 88, %v14252_v16  ;;  %v14281_v10 = vadd.s32 104, %v14252_v16  ;;  %v14294_v27 = vadd.s32 136, %v14252_v16 }
 0x2c1   :  { %v1798_v52 = vrot.slane %v1797_v62, 1  ;;  %18007 = vst [vmem:[#allocation28_spill] sm:$0xff] %v14263_v28  ;;  %18008 = vst [vmem:[#allocation25_spill] sm:$0xff] %v14266_v12  ;;  %v14297_v61 = vadd.s32 152, %v14252_v16  ;;  %v18020_v53 = vsub.s32 0, %v14252_v16  ;;  %v18021_v14 = vsub.s32 1, %v14252_v16 }
 0x2c2   :  { %v1829_v0 = vrot.slane %v18006_v55, %v14255_v39  ;;  %18010 = vst [vmem:[#allocation38_spill] sm:$0xff] %v14272_v60  ;;  %18012 = vst [vmem:[#allocation37_spill] sm:$0xff] %v14278_v37  ;;  %v14303_v55 = vadd.s32 184, %v14252_v16  ;;  %v14331_v42 = vadd.s32 216, %v14252_v16  ;;  %v18036_v37 = vld [vmem:[#allocation22_spill] sm:$0xff] }
 0x2c3   :  { %v1799_v44 = vadd.f32 %v1798_v52, %v1797_v62  ;;  %v14269_v62 = vadd.s32 40, %v14252_v16  ;;  %18013 = vst [vmem:[#allocation39_spill] sm:$0xff] %v14281_v10  ;;  %18015 = vst [vmem:[#allocation52_spill] sm:$0xff] %v14294_v27  ;;  %v18049_v28 = vld [vmem:[#allocation34_spill] sm:$0xff] }
 0x2c4   :  { %18016 = vst [vmem:[#allocation49_spill] sm:$0xff] %v14297_v61  ;;  %18018 = vst [vmem:[#allocation62_spill] sm:$0xff] %v14303_v55  ;;  %v18035_v55 = vld [vmem:[#allocation21_spill] sm:$0xff] }
 0x2c5   :  { %v1808_v5 = vsub.f32 %v1799_v44, %v1805_v38  ;;  %18009 = vst [vmem:[#allocation27_spill] sm:$0xff] %v14269_v62  ;;  %v14275_v44 = vadd.s32 72, %v14252_v16  ;;  %v14284_v38 = vadd.s32 120, %v14252_v16  ;;  %18023 = vst [vmem:[#allocation61_spill] sm:$0xff] %v14331_v42  ;;  %v18033_v42 = vld [vmem:[#allocation19_spill] sm:$0xff] }
 0x2c7   :  { %v1811_v57 = vmul.f32 0.0051020407, %v1808_v5  ;;  %18011 = vst [vmem:[#allocation40_spill] sm:$0xff] %v14275_v44  ;;  %18014 = vst [vmem:[#allocation50_spill] sm:$0xff] %v14284_v38  ;;  %v1812_v5 = vld [vmem:[%s17643_s2] sm:$0x7] }
 0x2c8   :  { %v18028_v38 = vld [vmem:[#allocation14_spill] sm:$0xff]  ;;  %v18037_v44 = vld [vmem:[#allocation23_spill] sm:$0xff] }
 0x2c9   :  { %v1815_v22 = vadd.f32 1e-05, %v1811_v57 }
 0x2cb   :  { %12950 = vrsqrt.f32 %v1815_v22  ;;  %v18025_v22 = vld [vmem:[#allocation11_spill] sm:$0xff] }
 0x2d5   :  { %v12951_v11 = vpop.eup %12950 }
 0x2d6   :  { %v1836_v63 = vrot.slane %v12951_v11, %v14255_v39  ;;  %v14300_v11 = vadd.s32 168, %v14252_v16 }
 0x2d8   :  { %v1837_v52 = vcombine.low %v1829_v0, %v1836_v63  ;;  %18017 = vst [vmem:[#allocation51_spill] sm:$0xff] %v14300_v11  ;;  %v14306_v0 = vadd.s32 200, %v14252_v16 }
 0x2da   :  { %v1844_v57 = vrot.slane %v1837_v52, %v14255_v39  ;;  %18019 = vst [vmem:[#allocation64_spill] sm:$0xff] %v14306_v0  ;;  %v18026_v52 = vld [vmem:[#allocation12_spill] sm:$0xff] }
 0x2dc   :  { %v1846_v32 = vmul.f32 %v1844_v57, %v1812_v5  ;;  %v18022_v5 = vsub.s32 2, %v14252_v16 }
 0x2de   :  { %v14317_v58 = vrot.slane %v1846_v32, %v18020_v53  ;;  %v14321_v63 = vrot.slane %v1846_v32, %v18021_v14  ;;  %v14325_v57 = vrot.slane %v1846_v32, %v18022_v5  ;;  %v18024_v32 = vld [vmem:[#allocation10_spill] sm:$0xff] }
 0x2e0   :  { %v1864_v53 = vmul.f32 %v14317_v58, %v17995_v19  ;;  %v1865_v14 = vmul.f32 %v14321_v63, %v13788_v6  ;;  %v1866_v36 = vmul.f32 %v14325_v57, %v14152_v26  ;;  %v14341_v5 = vmul.f32 %v14317_v58, %v18024_v32  ;;  %v18027_v19 = vld [vmem:[#allocation13_spill] sm:$0xff] }
 0x2e1   :  { %v14346_v30 = vmul.f32 %v14321_v63, %v18025_v22  ;;  %v14350_v61 = vmul.f32 %v14317_v58, %v18026_v52  ;;  %v14354_v6 = vmul.f32 %v14321_v63, %v18027_v19  ;;  %v14360_v1 = vmul.f32 %v14317_v58, %v18028_v38  ;;  %v18029_v52 = vld [vmem:[#allocation15_spill] sm:$0xff]  ;;  %v18030_v19 = vld [vmem:[#allocation16_spill] sm:$0xff]  ;;  %v18031_v38 = vld [vmem:[#allocation17_spill] sm:$0xff] }
 0x2e2   :  { %v1870_v32 = vcombine.low %v1864_v53, %v1865_v14  ;;  %v14365_v11 = vmul.f32 %v14321_v63, %v13541_v47  ;;  %v14369_v10 = vmul.f32 %v14317_v58, %v18029_v52  ;;  %v14373_v26 = vmul.f32 %v14321_v63, %v18030_v19  ;;  %v18032_v22 = vld [vmem:[#allocation18_spill] sm:$0xff] }
 0x2e3   :  { %v1884_v14 = vrot.slane %v1866_v36, %v14255_v39  ;;  %v14379_v27 = vmul.f32 %v14317_v58, %v18031_v38  ;;  %v14383_v47 = vmul.f32 %v14321_v63, %v18032_v22  ;;  %v14387_v52 = vmul.f32 %v14325_v57, %v13929_v49  ;;  %v18034_v36 = vld [vmem:[#allocation20_spill] sm:$0xff] }
 0x2e4   :  { %v1877_v53 = vrot.slane %v1870_v32, %v14255_v39  ;;  %v14391_v19 = vmul.f32 %v14325_v57, %v13938_v45  ;;  %v14395_v32 = vmul.f32 %v14317_v58, %v18033_v42  ;;  %v14399_v38 = vmul.f32 %v14321_v63, %v18034_v36 }
 0x2e5   :  { %v14403_v22 = vmul.f32 %v14325_v57, %v13941_v40  ;;  %v14407_v49 = vmul.f32 %v14317_v58, %v18035_v55  ;;  %v14411_v45 = vmul.f32 %v14321_v63, %v18036_v37  ;;  %v14415_v42 = vmul.f32 %v14325_v57, %v13946_v33  ;;  %v18041_v33 = vld [vmem:[#allocation30_spill] sm:$0xff] }
 0x2e6   :  { %v1885_v0 = vcombine.low %v1877_v53, %v1884_v14  ;;  %v14419_v36 = vmul.f32 %v14317_v58, %v18037_v44  ;;  %v18038_v53 = vld [vmem:[#allocation24_spill] sm:$0xff]  ;;  %v18039_v14 = vld [vmem:[#allocation29_spill] sm:$0xff]  ;;  %v14432_v37 = vmul.f32 %v14325_v57, %v13949_v34  ;;  %v14436_v62 = vmul.f32 %v14321_v63, %v18041_v33  ;;  %v18043_v44 = vld [vmem:[#allocation31_spill] sm:$0xff] }
 0x2e7   :  { %v14423_v40 = vmul.f32 %v14321_v63, %v18038_v53  ;;  %v14427_v55 = vmul.f32 %v14317_v58, %v18039_v14  ;;  %v14440_v12 = vmul.f32 %v14317_v58, %v18043_v44  ;;  %v1847_v53 = vld [vmem:[%s17644_s3] sm:$0x7]  ;;  %v14447_v14 = vmul.f32 %v14325_v57, %v13952_v9 }
 0x2e8   :  { %v1892_v60 = vrot.slane %v1885_v0, %v14255_v39  ;;  %18042 = vst [vmem:[#allocation63_spill] sm:$0xff] %v14436_v62  ;;  %v18045_v39 = vld [vmem:[#allocation32_spill] sm:$0xff]  ;;  %v18047_v0 = vld [vmem:[#allocation33_spill] sm:$0xff]  ;;  %v14459_v44 = vmul.f32 %v14321_v63, %v18049_v28  ;;  %v14467_v9 = vmul.f32 %v14325_v57, %v13976_v13  ;;  %v18051_v62 = vld [vmem:[#allocation35_spill] sm:$0xff]  ;;  %v14479_v28 = vmul.f32 %v14325_v57, %v13979_v17 }
 0x2e9   :  { %18040 = vst [vmem:[#allocation48_spill] sm:$0xff] %v14427_v55  ;;  %18044 = vst [vmem:[#allocation54_spill] sm:$0xff] %v14440_v12  ;;  %v14451_v34 = vmul.f32 %v14321_v63, %v18045_v39  ;;  %v14455_v33 = vmul.f32 %v14317_v58, %v18047_v0  ;;  %v14463_v12 = vmul.f32 %v14325_v57, %v13973_v3  ;;  %v18059_v55 = vld [vmem:[#allocation43_spill] sm:$0xff] }
 0x2ea   :  { %18050 = vst [vmem:[#allocation58_spill] sm:$0xff] %v14459_v44  ;;  %v14471_v39 = vmul.f32 %v14317_v58, %v18051_v62  ;;  %18055 = vst [vmem:[#allocation60_spill] sm:$0xff] %v14479_v28  ;;  %v14483_v3 = vmul.f32 %v14325_v57, %v13982_v23  ;;  %v18056_v44 = vld [vmem:[#allocation41_spill] sm:$0xff] }
 0x2eb   :  { %18046 = vst [vmem:[#allocation99_spill] sm:$0xff] %v14451_v34  ;;  %18048 = vst [vmem:[#allocation56_spill] sm:$0xff] %v14455_v33  ;;  %v18053_v34 = vld [vmem:[#allocation36_spill] sm:$0xff]  ;;  %v14487_v13 = vmul.f32 %v14317_v58, %v18056_v44  ;;  %v18058_v33 = vld [vmem:[#allocation42_spill] sm:$0xff]  ;;  %v14507_v44 = vmul.f32 %v14325_v57, %v13985_v25  ;;  %v14527_v25 = vmul.f32 %v14325_v57, %v14007_v8 }
 0x2ec   :  { %18052 = vst [vmem:[#allocation74_spill] sm:$0xff] %v14471_v39  ;;  %v14475_v0 = vmul.f32 %v14321_v63, %v18053_v34  ;;  %v14491_v62 = vmul.f32 %v14321_v63, %v18058_v33  ;;  %v1894_v39 = vsub.f32 %v1847_v53, %v1892_v60  ;;  %v14495_v34 = vmul.f32 %v14317_v58, %v18059_v55  ;;  %v18061_v28 = vld [vmem:[#allocation45_spill] sm:$0xff]  ;;  %v18063_v60 = vld [vmem:[#allocation47_spill] sm:$0xff] }
 0x2ed   :  { %18057 = vst [vmem:[#allocation76_spill] sm:$0xff] %v14487_v13  ;;  %v14503_v23 = vmul.f32 %v14317_v58, %v18061_v28  ;;  %v18062_v13 = vld [vmem:[#allocation46_spill] sm:$0xff]  ;;  %v14515_v55 = vmul.f32 %v14317_v58, %v18063_v60  ;;  %v14519_v53 = vmul.f32 %v14321_v63, %v17970_v7  ;;  %v18066_v28 = vld [vmem:[#allocation53_spill] sm:$0xff]  ;;  %v14535_v60 = vmul.f32 %v14321_v63, %v17972_v21 }
 0x2ee   :  { %18054 = vst [vmem:[#allocation100_spill] sm:$0xff] %v14475_v0  ;;  %v18060_v0 = vld [vmem:[#allocation44_spill] sm:$0xff]  ;;  %v14511_v33 = vmul.f32 %v14321_v63, %v18062_v13  ;;  %v14531_v13 = vmul.f32 %v14317_v58, %v18066_v28  ;;  %v14539_v7 = vmul.f32 %v14325_v57, %v14010_v59  ;;  %v14547_v8 = vmul.f32 %v14321_v63, %v17974_v41 }
 0x2ef   :  { %v14499_v17 = vmul.f32 %v14321_v63, %v18060_v0  ;;  %18064 = vst [vmem:[#allocation101_spill] sm:$0xff] %v14515_v55  ;;  %18065 = vst [vmem:[#allocation66_spill] sm:$0xff] %v14519_v53  ;;  %v14523_v0 = vmul.f32 %v14325_v57, %v14004_v29  ;;  %v18068_v53 = vld [vmem:[#allocation55_spill] sm:$0xff]  ;;  %v18069_v55 = vld [vmem:[#allocation57_spill] sm:$0xff]  ;;  %v14555_v21 = vmul.f32 %v14325_v57, %v14013_v54 }
 0x2f0   :  { %18067 = vst [vmem:[#allocation68_spill] sm:$0xff] %v14535_v60  ;;  %v14543_v29 = vmul.f32 %v14317_v58, %v18068_v53  ;;  %v14551_v28 = vmul.f32 %v14317_v58, %v18069_v55  ;;  %v14559_v59 = vmul.f32 %v14321_v63, %v17975_v48  ;;  %v18071_v60 = vld [vmem:[#allocation59_spill] sm:$0xff]  ;;  %v14567_v41 = vmul.f32 %v14321_v63, %v17978_v51 }
 0x2f1   :  { %v14563_v53 = vmul.f32 %v14317_v58, %v18071_v60  ;;  %v14571_v55 = vmul.f32 %v14325_v57, %v14025_v15  ;;  %v14575_v54 = vmul.f32 %v14325_v57, %v14051_v24  ;;  %v14583_v60 = vmul.f32 %v14321_v63, %v17981_v50 }
 0x2f2   :  { %18070 = vst [vmem:[#allocation73_spill] sm:$0xff] %v14551_v28  ;;  %18073 = vst [vmem:[#allocation72_spill] sm:$0xff] %v14567_v41  ;;  %v18074_v28 = vld [vmem:[#allocation65_spill] sm:$0xff]  ;;  %v14587_v51 = vmul.f32 %v14325_v57, %v14060_v56  ;;  %v18076_v41 = vld [vmem:[#allocation67_spill] sm:$0xff]  ;;  %v14595_v24 = vmul.f32 %v14321_v63, %v17982_v31  ;;  %v14603_v50 = vmul.f32 %v14325_v57, %v14077_v20 }
 0x2f3   :  { %18072 = vst [vmem:[#allocation70_spill] sm:$0xff] %v14563_v53  ;;  %v14579_v48 = vmul.f32 %v14317_v58, %v18074_v28  ;;  %18075 = vst [vmem:[#allocation75_spill] sm:$0xff] %v14583_v60  ;;  %v14591_v15 = vmul.f32 %v14317_v58, %v18076_v41  ;;  %v18077_v53 = vld [vmem:[#allocation69_spill] sm:$0xff]  ;;  %v14607_v56 = vmul.f32 %v14321_v63, %v17984_v43  ;;  %v18080_v60 = vld [vmem:[#allocation71_spill] sm:$0xff] }
 0x2f4   :  { %v14599_v28 = vmul.f32 %v14317_v58, %v18077_v53  ;;  %v14611_v41 = vmul.f32 %v14317_v58, %v18080_v60  ;;  %v14615_v31 = vmul.f32 %v14321_v63, %v17985_v2  ;;  %v14619_v53 = vmul.f32 %v14325_v57, %v14086_v18 }
 0x2f5   :  { %18079 = vst [vmem:[#allocation86_spill] sm:$0xff] %v14607_v56  ;;  %v14623_v20 = vmul.f32 %v14325_v57, %v14097_v35  ;;  %v14631_v60 = vmul.f32 %v14321_v63, %v17987_v46  ;;  %v14635_v2 = vmul.f32 %v14325_v57, %v14104_v4  ;;  %v18091_v56 = vld [vmem:[#allocation81_spill] sm:$0xff] }
 0x2f6   :  { %18078 = vst [vmem:[#allocation78_spill] sm:$0xff] %v14599_v28  ;;  %18081 = vst [vmem:[#allocation88_spill] sm:$0xff] %v14611_v41  ;;  %v18083_v28 = vld [vmem:[#allocation77_spill] sm:$0xff]  ;;  %v18089_v41 = vld [vmem:[#allocation80_spill] sm:$0xff] }
 0x2f7   :  { %18082 = vst [vmem:[#allocation85_spill] sm:$0xff] %v14615_v31  ;;  %v14627_v43 = vmul.f32 %v14317_v58, %v18083_v28  ;;  %18085 = vst [vmem:[#allocation87_spill] sm:$0xff] %v14631_v60  ;;  %v18087_v31 = vld [vmem:[#allocation79_spill] sm:$0xff]  ;;  %v14643_v35 = vmul.f32 %v14321_v63, %v18089_v41  ;;  %v14647_v28 = vmul.f32 %v14317_v58, %v18091_v56  ;;  %v18095_v60 = vld [vmem:[#allocation82_spill] sm:$0xff] }
 0x2f8   :  { %18086 = vst [vmem:[#allocation90_spill] sm:$0xff] %v14635_v2  ;;  %v14639_v18 = vmul.f32 %v14317_v58, %v18087_v31  ;;  %v14655_v4 = vmul.f32 %v14321_v63, %v18095_v60  ;;  %v18097_v2 = vld [vmem:[#allocation83_spill] sm:$0xff] }
 0x2f9   :  { %18084 = vst [vmem:[#allocation95_spill] sm:$0xff] %v14627_v43  ;;  %18090 = vst [vmem:[#allocation89_spill] sm:$0xff] %v14643_v35  ;;  %v18093_v43 = vld [vmem:[#allocation26_spill] sm:$0xff]  ;;  %v14659_v31 = vmul.f32 %v14317_v58, %v18097_v2  ;;  %v18101_v35 = vld [vmem:[#allocation93_spill] sm:$0xff] }
 0x2fa   :  { %18088 = vst [vmem:[#allocation92_spill] sm:$0xff] %v14639_v18  ;;  %18092 = vst [vmem:[#allocation91_spill] sm:$0xff] %v14647_v28  ;;  %v14651_v46 = vmul.f32 %v14325_v57, %v18093_v43  ;;  %v18099_v18 = vld [vmem:[#allocation84_spill] sm:$0xff]  ;;  %v14667_v56 = vmul.f32 %v14325_v57, %v18101_v35  ;;  %v18102_v28 = vsub.s32 0, %v14252_v16  ;;  %v18105_v2 = vld [vmem:[#allocation94_spill] sm:$0xff] }
 0x2fb   :  { %18096 = vst [vmem:[#allocation11_spill] sm:$0xff] %v14655_v4  ;;  %18098 = vst [vmem:[#allocation12_spill] sm:$0xff] %v14659_v31  ;;  %v14663_v41 = vmul.f32 %v14321_v63, %v18099_v18  ;;  %v18104_v4 = vsub.s32 2, %v14252_v16  ;;  %v14683_v63 = vmul.f32 %v14325_v57, %v18105_v2  ;;  %v18106_v18 = vld [vmem:[#allocation96_spill] sm:$0xff]  ;;  %v18108_v31 = vld [vmem:[#allocation98_spill] sm:$0xff] }
 0x2fc   :  { %18094 = vst [vmem:[#allocation10_spill] sm:$0xff] %v14651_v46  ;;  %v14671_v43 = vrot.slane %v1894_v39, %v18102_v28  ;;  %v18103_v46 = vsub.s32 1, %v14252_v16  ;;  %v14687_v35 = vmul.f32 %v14325_v57, %v18106_v18  ;;  %v18125_v2 = vld [vmem:[#allocation63_spill] sm:$0xff]  ;;  %v18127_v18 = vld [vmem:[#allocation60_spill] sm:$0xff] }
 0x2fd   :  { %18100 = vst [vmem:[#allocation13_spill] sm:$0xff] %v14663_v41  ;;  %v14679_v58 = vrot.slane %v1894_v39, %v18104_v4  ;;  %v18107_v41 = vld [vmem:[#allocation97_spill] sm:$0xff] }
 0x2fe   :  { %v14675_v60 = vrot.slane %v1894_v39, %v18103_v46  ;;  %v14691_v28 = vmul.f32 %v14325_v57, %v18107_v41  ;;  %v14695_v46 = vmul.f32 %v14325_v57, %v18108_v31  ;;  %v14699_v16 = vadd.f32 %v14671_v43, %v14341_v5  ;;  %v18123_v31 = vld [vmem:[#allocation48_spill] sm:$0xff] }
 0x2ff   :  { %v14707_v4 = vadd.f32 %v14679_v58, %v14387_v52  ;;  %v14711_v41 = vadd.f32 %v14671_v43, %v14350_v61  ;;  %v14719_v5 = vadd.f32 %v14679_v58, %v14391_v19  ;;  %v14731_v61 = vadd.f32 %v14679_v58, %v14403_v22 }
 0x300   :  { %18109 = vst [vmem:[#allocation14_spill] sm:$0xff] %v14699_v16  ;;  %v14703_v39 = vadd.f32 %v14675_v60, %v14346_v30  ;;  %v14715_v57 = vadd.f32 %v14675_v60, %v14354_v6  ;;  %v14723_v30 = vadd.f32 %v14671_v43, %v14360_v1  ;;  %v14727_v52 = vadd.f32 %v14675_v60, %v14365_v11 }
 0x301   :  { %18111 = vst [vmem:[#allocation16_spill] sm:$0xff] %v14707_v4  ;;  %18114 = vst [vmem:[#allocation19_spill] sm:$0xff] %v14731_v61  ;;  %v14735_v6 = vadd.f32 %v14671_v43, %v14369_v10  ;;  %v14739_v19 = vadd.f32 %v14675_v60, %v14373_v26  ;;  %v14743_v1 = vadd.f32 %v14679_v58, %v14415_v42 }
 0x302   :  { %18110 = vst [vmem:[#allocation15_spill] sm:$0xff] %v14703_v39  ;;  %18112 = vst [vmem:[#allocation17_spill] sm:$0xff] %v14723_v30  ;;  %v14747_v11 = vadd.f32 %v14671_v43, %v14379_v27  ;;  %v14751_v22 = vadd.f32 %v14675_v60, %v14383_v47  ;;  %v14755_v10 = vadd.f32 %v14679_v58, %v14432_v37 }
 0x303   :  { %18113 = vst [vmem:[#allocation18_spill] sm:$0xff] %v14727_v52  ;;  %v14759_v26 = vadd.f32 %v14671_v43, %v14395_v32  ;;  %v14763_v42 = vadd.f32 %v14675_v60, %v14399_v38  ;;  %v14767_v27 = vadd.f32 %v14679_v58, %v14447_v14  ;;  %v14771_v47 = vadd.f32 %v14671_v43, %v14407_v49 }
 0x304   :  { %18115 = vst [vmem:[#allocation20_spill] sm:$0xff] %v14747_v11  ;;  %18116 = vst [vmem:[#allocation21_spill] sm:$0xff] %v14751_v22  ;;  %v14775_v37 = vadd.f32 %v14675_v60, %v14411_v45  ;;  %v14779_v32 = vadd.f32 %v14679_v58, %v14463_v12  ;;  %v14783_v38 = vadd.f32 %v14671_v43, %v14419_v36  ;;  %v18240_v22 = vld [vmem:[#allocation50_spill] sm:$0xff] }
 0x305   :  { %18117 = vst [vmem:[#allocation22_spill] sm:$0xff] %v14755_v10  ;;  %18118 = vst [vmem:[#allocation23_spill] sm:$0xff] %v14771_v47  ;;  %v14787_v14 = vadd.f32 %v14675_v60, %v14423_v40  ;;  %v14791_v49 = vadd.f32 %v14679_v58, %v14467_v9  ;;  %v14795_v45 = vadd.f32 %v14671_v43, %v18123_v31  ;;  %v18205_v10 = vld [vmem:[#allocation28_spill] sm:$0xff] }
 0x306   :  { %18119 = vst [vmem:[#allocation24_spill] sm:$0xff] %v14775_v37  ;;  %18120 = vst [vmem:[#allocation29_spill] sm:$0xff] %v14779_v32  ;;  %v14799_v12 = vadd.f32 %v14675_v60, %v18125_v2  ;;  %v14803_v36 = vadd.f32 %v14679_v58, %v18127_v18  ;;  %v14815_v31 = vadd.f32 %v14679_v58, %v14483_v3  ;;  %v18269_v32 = vmov 0 }
 0x307   :  { %18121 = vst [vmem:[#allocation30_spill] sm:$0xff] %v14783_v38  ;;  %18122 = vst [vmem:[#allocation31_spill] sm:$0xff] %v14787_v14  ;;  %v18129_v38 = vld [vmem:[#allocation54_spill] sm:$0xff]  ;;  %v18131_v14 = vld [vmem:[#allocation99_spill] sm:$0xff] }
 0x308   :  { %18124 = vst [vmem:[#allocation32_spill] sm:$0xff] %v14795_v45  ;;  %18126 = vst [vmem:[#allocation33_spill] sm:$0xff] %v14799_v12  ;;  %v14807_v40 = vadd.f32 %v14671_v43, %v18129_v38  ;;  %v14811_v9 = vadd.f32 %v14675_v60, %v18131_v14  ;;  %v18133_v45 = vld [vmem:[#allocation56_spill] sm:$0xff]  ;;  %v18135_v12 = vld [vmem:[#allocation58_spill] sm:$0xff]  ;;  %v14827_v38 = vadd.f32 %v14679_v58, %v14507_v44 }
 0x309   :  { %18128 = vst [vmem:[#allocation34_spill] sm:$0xff] %v14803_v36  ;;  %v14819_v2 = vadd.f32 %v14671_v43, %v18133_v45  ;;  %v14823_v18 = vadd.f32 %v14675_v60, %v18135_v12  ;;  %v14839_v45 = vadd.f32 %v14679_v58, %v14523_v0  ;;  %v14847_v44 = vadd.f32 %v14675_v60, %v14491_v62 }
 0x30a   :  { %18130 = vst [vmem:[#allocation35_spill] sm:$0xff] %v14807_v40  ;;  %18132 = vst [vmem:[#allocation36_spill] sm:$0xff] %v14811_v9  ;;  %v18138_v40 = vld [vmem:[#allocation74_spill] sm:$0xff]  ;;  %v18139_v9 = vld [vmem:[#allocation100_spill] sm:$0xff]  ;;  %v14859_v0 = vadd.f32 %v14675_v60, %v14499_v17  ;;  %v14867_v62 = vadd.f32 %v14671_v43, %v14503_v23  ;;  %v14887_v23 = vadd.f32 %v14679_v58, %v14571_v55 }
 0x30b   :  { %18134 = vst [vmem:[#allocation41_spill] sm:$0xff] %v14819_v2  ;;  %18136 = vst [vmem:[#allocation42_spill] sm:$0xff] %v14823_v18  ;;  %v14831_v14 = vadd.f32 %v14671_v43, %v18138_v40  ;;  %v14835_v3 = vadd.f32 %v14675_v60, %v18139_v9  ;;  %v18140_v2 = vld [vmem:[#allocation76_spill] sm:$0xff]  ;;  %v14851_v40 = vadd.f32 %v14679_v58, %v14527_v25 }
 0x30c   :  { %18137 = vst [vmem:[#allocation43_spill] sm:$0xff] %v14827_v38  ;;  %v14843_v12 = vadd.f32 %v14671_v43, %v18140_v2  ;;  %18142 = vst [vmem:[#allocation45_spill] sm:$0xff] %v14847_v44  ;;  %v14855_v9 = vadd.f32 %v14671_v43, %v14495_v34  ;;  %v14863_v2 = vadd.f32 %v14679_v58, %v14539_v7  ;;  %v18215_v44 = vld [vmem:[#allocation27_spill] sm:$0xff]  ;;  %v18219_v38 = vld [vmem:[#allocation38_spill] sm:$0xff] }
 0x30d   :  { %18143 = vst [vmem:[#allocation46_spill] sm:$0xff] %v14851_v40  ;;  %18145 = vst [vmem:[#allocation53_spill] sm:$0xff] %v14859_v0  ;;  %v14871_v25 = vadd.f32 %v14675_v60, %v14511_v33  ;;  %v14875_v34 = vadd.f32 %v14679_v58, %v14555_v21  ;;  %v18150_v0 = vld [vmem:[#allocation66_spill] sm:$0xff]  ;;  %v14891_v33 = vadd.f32 %v14671_v43, %v14531_v13 }
 0x30e   :  { %18141 = vst [vmem:[#allocation44_spill] sm:$0xff] %v14843_v12  ;;  %18144 = vst [vmem:[#allocation47_spill] sm:$0xff] %v14855_v9  ;;  %v18149_v9 = vld [vmem:[#allocation101_spill] sm:$0xff]  ;;  %v14883_v7 = vadd.f32 %v14675_v60, %v18150_v0  ;;  %v14903_v0 = vadd.f32 %v14671_v43, %v14543_v29  ;;  %v14907_v55 = vadd.f32 %v14675_v60, %v14547_v8  ;;  %v18198_v61 = vld [vmem:[#allocation31_spill] sm:$0xff] }
 0x30f   :  { %18146 = vst [vmem:[#allocation55_spill] sm:$0xff] %v14867_v62  ;;  %18147 = vst [vmem:[#allocation57_spill] sm:$0xff] %v14871_v25  ;;  %v14879_v17 = vadd.f32 %v14671_v43, %v18149_v9  ;;  %v18152_v25 = vld [vmem:[#allocation68_spill] sm:$0xff]  ;;  %v14899_v9 = vadd.f32 %v14679_v58, %v14575_v54  ;;  %v14911_v13 = vadd.f32 %v14679_v58, %v14587_v51 }
 0x310   :  { %18148 = vst [vmem:[#allocation59_spill] sm:$0xff] %v14875_v34  ;;  %18151 = vst [vmem:[#allocation65_spill] sm:$0xff] %v14891_v33  ;;  %v14895_v21 = vadd.f32 %v14675_v60, %v18152_v25  ;;  %v18157_v33 = vld [vmem:[#allocation73_spill] sm:$0xff]  ;;  %v14919_v54 = vadd.f32 %v14675_v60, %v14559_v59  ;;  %v14923_v29 = vadd.f32 %v14679_v58, %v14603_v50  ;;  %v18225_v34 = vld [vmem:[#allocation40_spill] sm:$0xff] }
 0x311   :  { %18154 = vst [vmem:[#allocation69_spill] sm:$0xff] %v14899_v9  ;;  %18155 = vst [vmem:[#allocation71_spill] sm:$0xff] %v14903_v0  ;;  %v14915_v25 = vadd.f32 %v14671_v43, %v18157_v33  ;;  %v18161_v0 = vld [vmem:[#allocation70_spill] sm:$0xff]  ;;  %v14935_v33 = vadd.f32 %v14679_v58, %v14619_v53  ;;  %v14939_v59 = vadd.f32 %v14671_v43, %v14579_v48  ;;  %v18201_v11 = vld [vmem:[#allocation35_spill] sm:$0xff] }
 0x312   :  { %18153 = vst [vmem:[#allocation67_spill] sm:$0xff] %v14895_v21  ;;  %18156 = vst [vmem:[#allocation77_spill] sm:$0xff] %v14907_v55  ;;  %v14927_v8 = vadd.f32 %v14671_v43, %v18161_v0  ;;  %v18162_v55 = vld [vmem:[#allocation72_spill] sm:$0xff]  ;;  %v14947_v0 = vadd.f32 %v14679_v58, %v14623_v20  ;;  %v14955_v53 = vadd.f32 %v14675_v60, %v14595_v24  ;;  %v18235_v21 = vld [vmem:[#allocation39_spill] sm:$0xff] }
 0x313   :  { %18158 = vst [vmem:[#allocation79_spill] sm:$0xff] %v14915_v25  ;;  %18159 = vst [vmem:[#allocation80_spill] sm:$0xff] %v14919_v54  ;;  %v14931_v51 = vadd.f32 %v14675_v60, %v18162_v55  ;;  %v18165_v54 = vld [vmem:[#allocation75_spill] sm:$0xff]  ;;  %v14951_v55 = vadd.f32 %v14671_v43, %v14591_v15  ;;  %v18202_v52 = vld [vmem:[#allocation36_spill] sm:$0xff] }
 0x314   :  { %18160 = vst [vmem:[#allocation81_spill] sm:$0xff] %v14923_v29  ;;  %18163 = vst [vmem:[#allocation26_spill] sm:$0xff] %v14935_v33  ;;  %v14943_v50 = vadd.f32 %v14675_v60, %v18165_v54  ;;  %v18170_v33 = vld [vmem:[#allocation90_spill] sm:$0xff]  ;;  %v18248_v29 = vld [vmem:[#allocation52_spill] sm:$0xff] }
 0x315   :  { %18164 = vst [vmem:[#allocation82_spill] sm:$0xff] %v14939_v59  ;;  %18167 = vst [vmem:[#allocation84_spill] sm:$0xff] %v14947_v0  ;;  %v14959_v48 = vadd.f32 %v14679_v58, %v18170_v33  ;;  %v18171_v59 = vld [vmem:[#allocation78_spill] sm:$0xff]  ;;  %v18204_v36 = vld [vmem:[#allocation47_spill] sm:$0xff] }
 0x316   :  { %18166 = vst [vmem:[#allocation83_spill] sm:$0xff] %v14943_v50  ;;  %18168 = vst [vmem:[#allocation93_spill] sm:$0xff] %v14951_v55  ;;  %v14963_v54 = vadd.f32 %v14671_v43, %v18171_v59  ;;  %v18173_v50 = vld [vmem:[#allocation86_spill] sm:$0xff]  ;;  %v18177_v55 = vld [vmem:[#allocation88_spill] sm:$0xff]  ;;  %v14983_v59 = vadd.f32 %v14679_v58, %v14667_v56 }
 0x317   :  { %18169 = vst [vmem:[#allocation94_spill] sm:$0xff] %v14955_v53  ;;  %v14967_v20 = vadd.f32 %v14675_v60, %v18173_v50  ;;  %v18175_v0 = vld [vmem:[#allocation10_spill] sm:$0xff]  ;;  %v14975_v24 = vadd.f32 %v14671_v43, %v18177_v55  ;;  %v18179_v53 = vld [vmem:[#allocation85_spill] sm:$0xff]  ;;  %v14995_v55 = vadd.f32 %v14679_v58, %v14683_v63  ;;  %v2537_v9 = vmax.f32 %v14959_v48, 0.0 }
 0x318   :  { %18172 = vst [vmem:[#allocation96_spill] sm:$0xff] %v14963_v54  ;;  %v14971_v15 = vadd.f32 %v14679_v58, %v18175_v0  ;;  %v14979_v33 = vadd.f32 %v14675_v60, %v18179_v53  ;;  %v18181_v54 = vld [vmem:[#allocation95_spill] sm:$0xff] }
 0x319   :  { %18174 = vst [vmem:[#allocation97_spill] sm:$0xff] %v14967_v20  ;;  %18178 = vst [vmem:[#allocation48_spill] sm:$0xff] %v14975_v24  ;;  %v14987_v50 = vadd.f32 %v14671_v43, %v18181_v54  ;;  %v18183_v20 = vld [vmem:[#allocation87_spill] sm:$0xff]  ;;  %v18186_v24 = vld [vmem:[#allocation92_spill] sm:$0xff]  ;;  %v15007_v54 = vadd.f32 %v14679_v58, %v14687_v35 }
 0x31a   :  { %18176 = vst [vmem:[#allocation98_spill] sm:$0xff] %v14971_v15  ;;  %18180 = vst [vmem:[#allocation63_spill] sm:$0xff] %v14979_v33  ;;  %v14991_v0 = vadd.f32 %v14675_v60, %v18183_v20  ;;  %v14999_v53 = vadd.f32 %v14671_v43, %v18186_v24  ;;  %v18188_v33 = vld [vmem:[#allocation89_spill] sm:$0xff]  ;;  %v15019_v24 = vadd.f32 %v14679_v58, %v14691_v28  ;;  %v18197_v28 = vld [vmem:[#allocation30_spill] sm:$0xff] }
 0x31b   :  { %18182 = vst [vmem:[#allocation60_spill] sm:$0xff] %v14987_v50  ;;  %18185 = vst [vmem:[#allocation99_spill] sm:$0xff] %v14995_v55  ;;  %v15003_v56 = vadd.f32 %v14675_v60, %v18188_v33  ;;  %v18190_v50 = vld [vmem:[#allocation91_spill] sm:$0xff]  ;;  %v18233_v18 = vld [vmem:[#allocation77_spill] sm:$0xff]  ;;  %v2549_v25 = vmax.f32 %v15007_v54, 0.0 }
 0x31c   :  { %18184 = vst [vmem:[#allocation54_spill] sm:$0xff] %v14991_v0  ;;  %18187 = vst [vmem:[#allocation56_spill] sm:$0xff] %v14999_v53  ;;  %v15011_v20 = vadd.f32 %v14671_v43, %v18190_v50  ;;  %v18192_v0 = vld [vmem:[#allocation11_spill] sm:$0xff]  ;;  %v18195_v53 = vld [vmem:[#allocation12_spill] sm:$0xff]  ;;  %v15031_v50 = vadd.f32 %v14679_v58, %v14695_v46  ;;  %v18206_v46 = vand.u32 15, %v18205_v10  ;;  %v18216_v10 = vand.u32 15, %v18215_v44 }
 0x31d   :  { %18189 = vst [vmem:[#allocation58_spill] sm:$0xff] %v15003_v56  ;;  %v15015_v63 = vadd.f32 %v14675_v60, %v18192_v0  ;;  %18194 = vst [vmem:[#allocation76_spill] sm:$0xff] %v15019_v24  ;;  %v15023_v33 = vadd.f32 %v14671_v43, %v18195_v53  ;;  %v18196_v56 = vld [vmem:[#allocation13_spill] sm:$0xff]  ;;  %v18224_v62 = vld [vmem:[#allocation71_spill] sm:$0xff]  ;;  %v2530_v58 = vmax.f32 %v14931_v51, 0.0 }
 0x31e   :  { %18191 = vst [vmem:[#allocation74_spill] sm:$0xff] %v15011_v20  ;;  %v15027_v35 = vadd.f32 %v14675_v60, %v18196_v56  ;;  %vm15075_vm1 = vcmp.lt.s32.totalorder %v18206_v46, 14  ;;  %v18213_v43 = vld [vmem:[#allocation53_spill] sm:$0xff]  ;;  %vm15091_vm3 = vcmp.lt.s32.totalorder %v18216_v10, 14  ;;  %v18220_v60 = vand.u32 15, %v18219_v38  ;;  %v18239_v37 = vld [vmem:[#allocation26_spill] sm:$0xff] }
 0x31f   :  { %18193 = vst [vmem:[#allocation100_spill] sm:$0xff] %v15015_v63  ;;  %v18209_v63 = vld [vmem:[#allocation25_spill] sm:$0xff]  ;;  %v2531_v44 = vmax.f32 %v18239_v37, 0.0  ;;  %v18241_v10 = vand.u32 15, %v18240_v22  ;;  %v18257_v30 = vld [vmem:[#allocation94_spill] sm:$0xff]  ;;  %v18275_v15 = vld [vmem:[#allocation64_spill] sm:$0xff] }
 0x320   :  { %v18210_v20 = vand.u32 15, %v18209_v63  ;;  %vm15101_vm4 = vcmp.lt.s32.totalorder %v18220_v60, 14  ;;  %v18229_v53 = vld [vmem:[#allocation37_spill] sm:$0xff]  ;;  %v18260_v63 = vld [vmem:[#allocation51_spill] sm:$0xff] }
 0x321   :  { %v18230_v38 = vand.u32 15, %v18229_v53  ;;  %vm15137_vm8 = vcmp.lt.s32.totalorder %v18241_v10, 14  ;;  %v18247_v47 = vld [vmem:[#allocation93_spill] sm:$0xff]  ;;  %v18254_v10 = vmov 0  ;;  %v18266_v39 = vld [vmem:[#allocation63_spill] sm:$0xff] }
 0x322   :  { %vm15081_vm2 = vcmp.lt.s32.totalorder %v18210_v20, 14  ;;  %v18226_v20 = vand.u32 15, %v18225_v34  ;;  %v18236_v34 = vand.u32 15, %v18235_v21  ;;  %v2535_v53 = vmax.f32 %v18247_v47, 0.0  ;;  %v18252_v37 = vld [vmem:[#allocation49_spill] sm:$0xff] }
 0x323   :  { %vm15117_vm6 = vcmp.lt.s32.totalorder %v18230_v38, 14  ;;  %v2529_v38 = vmax.f32 %v14927_v8, 0.0  ;;  %v18249_v8 = vand.u32 15, %v18248_v29  ;;  %v18253_v22 = vand.u32 15, %v18252_v37 }
 0x324   :  { %vm15111_vm5 = vcmp.lt.s32.totalorder %v18226_v20, 14  ;;  %vm15127_vm7 = vcmp.lt.s32.totalorder %v18236_v34, 14  ;;  %v2536_v21 = vmax.f32 %v18257_v30, 0.0  ;;  %v18261_v29 = vand.u32 15, %v18260_v63 }
 0x325   :  { %vm15147_vm9 = vcmp.lt.s32.totalorder %v18249_v8, 14  ;;  %vm15153_vm10 = vcmp.lt.s32.totalorder %v18253_v22, 14  ;;  %v18262_v8 = vmov 0  ;;  %v18265_v22 = vld [vmem:[#allocation48_spill] sm:$0xff]  ;;  %v2542_v16 = vmax.f32 %v18266_v39, 0.0 }
 0x326   :  { %v18255_v10 = vsel %vm15153_vm10, 4294967295, %v18254_v10  ;;  %vm15163_vm11 = vcmp.lt.s32.totalorder %v18261_v29, 14  ;;  %v2541_v4 = vmax.f32 %v18265_v22, 0.0  ;;  %v2543_v30 = vmax.f32 %v14983_v59, 0.0  ;;  %v18280_v59 = vld [vmem:[#allocation61_spill] sm:$0xff]  ;;  %v18286_v29 = vld [vmem:[#allocation74_spill] sm:$0xff] }
 0x327   :  { %18256 = vst [vmem:[#allocation101_spill] sm:$0xff] %v18255_v10  ;;  %v18263_v8 = vsel %vm15163_vm11, 4294967295, %v18262_v8  ;;  %v18267_v10 = vld [vmem:[#allocation62_spill] sm:$0xff]  ;;  %v18276_v22 = vand.u32 15, %v18275_v15  ;;  %v18277_v39 = vmov 0  ;;  %v18287_v55 = vld [vmem:[#allocation100_spill] sm:$0xff] }
 0x328   :  { %18264 = vst [vmem:[#allocation66_spill] sm:$0xff] %v18263_v8  ;;  %v18268_v48 = vand.u32 15, %v18267_v10  ;;  %v18274_v8 = vld [vmem:[#allocation56_spill] sm:$0xff]  ;;  %v18281_v10 = vand.u32 15, %v18280_v59  ;;  %v2555_v59 = vmax.f32 %v15031_v50, 0.0  ;;  %v2670_v40 = vsel %vm15153_vm10, %v2530_v58, 0.0 }
 0x329   :  { %v2547_v37 = vmax.f32 %v18274_v8, 0.0  ;;  %vm15183_vm13 = vcmp.lt.s32.totalorder %v18276_v22, 14  ;;  %v2553_v22 = vmax.f32 %v15023_v33, 0.0  ;;  %v18291_v8 = vmax.f32 %v14719_v5, 0.0 }
 0x32a   :  { %vm15173_vm12 = vcmp.lt.s32.totalorder %v18268_v48, 14  ;;  %v18278_v39 = vsel %vm15183_vm13, 4294967295, %v18277_v39  ;;  %vm15189_vm14 = vcmp.lt.s32.totalorder %v18281_v10, 14  ;;  %v18282_v48 = vmov 0 }
 0x32b   :  { %v18270_v32 = vsel %vm15173_vm12, 4294967295, %v18269_v32  ;;  %18279 = vst [vmem:[#allocation73_spill] sm:$0xff] %v18278_v39  ;;  %v18283_v48 = vsel %vm15189_vm14, 4294967295, %v18282_v48  ;;  %v2554_v39 = vmax.f32 %v15027_v35, 0.0  ;;  %v18289_v10 = vmax.f32 %v14711_v41, 0.0 }
 0x32c   :  { %18271 = vst [vmem:[#allocation68_spill] sm:$0xff] %v18270_v32  ;;  %18284 = vst [vmem:[#allocation70_spill] sm:$0xff] %v18283_v48  ;;  %v18285_v32 = vld [vmem:[#allocation58_spill] sm:$0xff]  ;;  %v2617_v15 = vsel %vm15075_vm1, %v18291_v8, 0.0  ;;  %v18292_v33 = vmax.f32 %v14735_v6, 0.0  ;;  %v18293_v41 = vmax.f32 %v14739_v19, 0.0 }
 0x32d   :  { %v2548_v63 = vmax.f32 %v18285_v32, 0.0  ;;  %v2615_v48 = vsel %vm15075_vm1, %v18289_v10, 0.0  ;;  %v18290_v32 = vmax.f32 %v14715_v57, 0.0  ;;  %v18294_v57 = vmax.f32 %v14743_v1, 0.0 }
 0x32e   :  { %v2621_v35 = vsel %vm15081_vm2, %v18292_v33, 0.0  ;;  %v2622_v50 = vsel %vm15081_vm2, %v18293_v41, 0.0  ;;  %v18295_v5 = vmax.f32 %v14759_v26, 0.0  ;;  %v18296_v6 = vmax.f32 %v14763_v42, 0.0 }
 0x32f   :  { %v2616_v54 = vsel %vm15075_vm1, %v18290_v32, 0.0  ;;  %v2623_v10 = vsel %vm15081_vm2, %v18294_v57, 0.0  ;;  %v18297_v19 = vmax.f32 %v14767_v27, 0.0  ;;  %v18298_v1 = vmax.f32 %v18197_v28, 0.0 }
 0x330   :  { %v2627_v0 = vsel %vm15091_vm3, %v18295_v5, 0.0  ;;  %v2628_v8 = vsel %vm15091_vm3, %v18296_v6, 0.0  ;;  %v18299_v26 = vmax.f32 %v18198_v61, 0.0  ;;  %v18300_v42 = vmax.f32 %v14791_v49, 0.0 }
 0x331   :  { %v2629_v32 = vsel %vm15091_vm3, %v18297_v19, 0.0  ;;  %v2633_v24 = vsel %vm15101_vm4, %v18298_v1, 0.0  ;;  %v18301_v27 = vmax.f32 %v18201_v11, 0.0  ;;  %v18302_v28 = vmax.f32 %v18202_v52, 0.0 }
 0x332   :  { %v2634_v33 = vsel %vm15101_vm4, %v18299_v26, 0.0  ;;  %v2635_v41 = vsel %vm15101_vm4, %v18300_v42, 0.0  ;;  %v18303_v61 = vmax.f32 %v14815_v31, 0.0  ;;  %v18304_v49 = vmax.f32 %v14831_v14, 0.0 }
 0x333   :  { %v2639_v46 = vsel %vm15111_vm5, %v18301_v27, 0.0  ;;  %v2640_v57 = vsel %vm15111_vm5, %v18302_v28, 0.0  ;;  %v18305_v11 = vmax.f32 %v14835_v3, 0.0  ;;  %v18306_v52 = vmax.f32 %v14839_v45, 0.0 }
 0x334   :  { %v2641_v5 = vsel %vm15111_vm5, %v18303_v61, 0.0  ;;  %v2645_v56 = vsel %vm15117_vm6, %v18304_v49, 0.0  ;;  %v18307_v31 = vmax.f32 %v18204_v36, 0.0  ;;  %v18308_v14 = vmax.f32 %v18213_v43, 0.0 }
 0x335   :  { %v2646_v6 = vsel %vm15117_vm6, %v18305_v11, 0.0  ;;  %v2647_v19 = vsel %vm15117_vm6, %v18306_v52, 0.0  ;;  %v18309_v3 = vmax.f32 %v14863_v2, 0.0  ;;  %v18310_v45 = vmax.f32 %v14879_v17, 0.0  ;;  %v18330_v11 = vld [vmem:[#allocation18_spill] sm:$0xff] }
 0x336   :  { %v2651_v12 = vsel %vm15127_vm7, %v18307_v31, 0.0  ;;  %v2652_v1 = vsel %vm15127_vm7, %v18308_v14, 0.0  ;;  %v18311_v36 = vmax.f32 %v14883_v7, 0.0  ;;  %v18312_v43 = vmax.f32 %v14887_v23, 0.0  ;;  %v18322_v14 = vld [vmem:[#allocation14_spill] sm:$0xff] }
 0x337   :  { %v2653_v26 = vsel %vm15127_vm7, %v18309_v3, 0.0  ;;  %v2657_v60 = vsel %vm15137_vm8, %v18310_v45, 0.0  ;;  %v18313_v2 = vmax.f32 %v18224_v62, 0.0  ;;  %v18314_v17 = vmax.f32 %v18233_v18, 0.0  ;;  %v18324_v45 = vld [vmem:[#allocation15_spill] sm:$0xff] }
 0x338   :  { %v2658_v42 = vsel %vm15137_vm8, %v18311_v36, 0.0  ;;  %v2659_v27 = vsel %vm15137_vm8, %v18312_v43, 0.0  ;;  %v18315_v7 = vmax.f32 %v14911_v13, 0.0  ;;  %v2669_v23 = vsel %vm15153_vm10, %v2529_v38, 0.0 }
 0x339   :  { %v2663_v20 = vsel %vm15147_vm9, %v18313_v2, 0.0  ;;  %v2664_v28 = vsel %vm15147_vm9, %v18314_v17, 0.0  ;;  %v2671_v62 = vsel %vm15153_vm10, %v2531_v44, 0.0  ;;  %v15317_v18 = vsel %vm15163_vm11, %v2535_v53, 0.0  ;;  %v18332_v53 = vld [vmem:[#allocation19_spill] sm:$0xff] }
 0x33a   :  { %v2665_v61 = vsel %vm15147_vm9, %v18315_v7, 0.0  ;;  %v15321_v52 = vsel %vm15163_vm11, %v2536_v21, 0.0  ;;  %v15325_v13 = vsel %vm15163_vm11, %v2537_v9, 0.0  ;;  %v15329_v38 = vsel %vm15173_vm12, %v2541_v4, 0.0  ;;  %v18328_v7 = vld [vmem:[#allocation17_spill] sm:$0xff] }
 0x33b   :  { %v15333_v58 = vsel %vm15173_vm12, %v2542_v16, 0.0  ;;  %v15337_v44 = vsel %vm15173_vm12, %v2543_v30, 0.0  ;;  %v15341_v21 = vsel %vm15183_vm13, %v2547_v37, 0.0  ;;  %v15345_v9 = vsel %vm15183_vm13, %v2548_v63, 0.0 }
 0x33c   :  { %v15349_v4 = vsel %vm15183_vm13, %v2549_v25, 0.0  ;;  %v15353_v16 = vsel %vm15189_vm14, %v2553_v22, 0.0  ;;  %v15357_v30 = vsel %vm15189_vm14, %v2554_v39, 0.0  ;;  %v15361_v37 = vsel %vm15189_vm14, %v2555_v59, 0.0  ;;  %v18326_v25 = vld [vmem:[#allocation16_spill] sm:$0xff] }
 0x33d   :  { %18321 = vst [vmem:[#allocation72_spill] sm:$0xff] %v15361_v37  ;;  %v18323_v3 = vmax.f32 %v18322_v14, 0.0  ;;  %v18325_v36 = vmax.f32 %v18324_v45, 0.0  ;;  %v18327_v2 = vmax.f32 %v18326_v25, 0.0  ;;  %v18329_v22 = vmax.f32 %v18328_v7, 0.0  ;;  %v18334_v59 = vld [vmem:[#allocation20_spill] sm:$0xff] }
 0x33e   :  { %v18331_v51 = vmax.f32 %v18330_v11, 0.0  ;;  %v18333_v34 = vmax.f32 %v18332_v53, 0.0  ;;  %v18335_v37 = vmax.f32 %v18334_v59, 0.0  ;;  %v18336_v14 = vld [vmem:[#allocation21_spill] sm:$0xff]  ;;  %v18338_v45 = vld [vmem:[#allocation22_spill] sm:$0xff]  ;;  %v18340_v25 = vld [vmem:[#allocation23_spill] sm:$0xff] }
 0x33f   :  { %v2696_v63 = vpack.c.bf16 %v2615_v48, %v18323_v3  ;;  %v2697_v43 = vpack.c.bf16 %v2616_v54, %v18325_v36  ;;  %v2698_v17 = vpack.c.bf16 %v2617_v15, %v18327_v2  ;;  %v2699_v49 = vpack.c.bf16 %v2621_v35, %v18329_v22  ;;  %v18342_v35 = vld [vmem:[#allocation24_spill] sm:$0xff]  ;;  %v18344_v22 = vld [vmem:[#allocation29_spill] sm:$0xff] }
 0x340   :  { %v2700_v39 = vpack.c.bf16 %v2622_v50, %v18331_v51  ;;  %v2701_v31 = vpack.c.bf16 %v2623_v10, %v18333_v34  ;;  %v2702_v47 = vpack.c.bf16 %v2627_v0, %v18335_v37  ;;  %v18337_v48 = vmax.f32 %v18336_v14, 0.0  ;;  %v18346_v10 = vld [vmem:[#allocation32_spill] sm:$0xff]  ;;  %v18348_v37 = vld [vmem:[#allocation33_spill] sm:$0xff]  ;;  %v18354_v14 = vld [vmem:[#allocation42_spill] sm:$0xff] }
 0x341   :  { %v18339_v54 = vmax.f32 %v18338_v45, 0.0  ;;  %v18341_v15 = vmax.f32 %v18340_v25, 0.0  ;;  %2750 = vst [vmem:[#allocation2 + $0x30] sm:$0xff] %v2696_v63  ;;  %2751 = vst [vmem:[#allocation2 + $0x38] sm:$0xff] %v2697_v43  ;;  %v18343_v7 = vmax.f32 %v18342_v35, 0.0  ;;  %v18345_v11 = vmax.f32 %v18344_v22, 0.0 }
 0x342   :  { %v2703_v3 = vpack.c.bf16 %v2628_v8, %v18337_v48  ;;  %v18347_v51 = vmax.f32 %v18346_v10, 0.0  ;;  %v18349_v53 = vmax.f32 %v18348_v37, 0.0  ;;  %2752 = vst.msk [vmem:[#allocation2 + $0x40] sm:$0xff] %vm696_vm0, %v2698_v17  ;;  %2753 = vst [vmem:[#allocation2 + $0x48] sm:$0xff] %v2699_v49  ;;  %v18352_v43 = vld [vmem:[#allocation41_spill] sm:$0xff]  ;;  %v18356_v45 = vld [vmem:[#allocation43_spill] sm:$0xff] }
 0x343   :  { %v2704_v36 = vpack.c.bf16 %v2629_v32, %v18339_v54  ;;  %v2705_v2 = vpack.c.bf16 %v2633_v24, %v18341_v15  ;;  %v2706_v50 = vpack.c.bf16 %v2634_v33, %v18343_v7  ;;  %v2707_v34 = vpack.c.bf16 %v2635_v41, %v18345_v11  ;;  %2754 = vst [vmem:[#allocation2 + $0x50] sm:$0xff] %v2700_v39  ;;  %v18350_v32 = vld [vmem:[#allocation34_spill] sm:$0xff]  ;;  %v18360_v39 = vld [vmem:[#allocation45_spill] sm:$0xff]  ;;  %v18364_v35 = vld [vmem:[#allocation55_spill] sm:$0xff] }
 0x344   :  { %v2708_v0 = vpack.c.bf16 %v2639_v46, %v18347_v51  ;;  %v2709_v8 = vpack.c.bf16 %v2640_v57, %v18349_v53  ;;  %2755 = vst.msk [vmem:[#allocation2 + $0x58] sm:$0xff] %vm696_vm0, %v2701_v31  ;;  %v18351_v24 = vmax.f32 %v18350_v32, 0.0  ;;  %v18353_v33 = vmax.f32 %v18352_v43, 0.0  ;;  %2756 = vst [vmem:[#allocation2 + $0x60] sm:$0xff] %v2702_v47  ;;  %v18358_v57 = vld [vmem:[#allocation44_spill] sm:$0xff]  ;;  %v18362_v25 = vld [vmem:[#allocation46_spill] sm:$0xff] }
 0x345   :  { %v18355_v41 = vmax.f32 %v18354_v14, 0.0  ;;  %v18357_v46 = vmax.f32 %v18356_v45, 0.0  ;;  %2757 = vst [vmem:[#allocation2 + $0x68] sm:$0xff] %v2703_v3  ;;  %2758 = vst.msk [vmem:[#allocation2 + $0x70] sm:$0xff] %vm696_vm0, %v2704_v36  ;;  %v18359_v17 = vmax.f32 %v18358_v57, 0.0  ;;  %v18361_v31 = vmax.f32 %v18360_v39, 0.0 }
 0x346   :  { %v2710_v63 = vpack.c.bf16 %v2641_v5, %v18351_v24  ;;  %v2711_v59 = vpack.c.bf16 %v2645_v56, %v18353_v33  ;;  %2759 = vst [vmem:[#allocation2 + $0x78] sm:$0xff] %v2705_v2  ;;  %v18363_v15 = vmax.f32 %v18362_v25, 0.0  ;;  %v18365_v7 = vmax.f32 %v18364_v35, 0.0  ;;  %2760 = vst [vmem:[#allocation2 + $0x80] sm:$0xff] %v2706_v50  ;;  %v18366_v47 = vld [vmem:[#allocation57_spill] sm:$0xff]  ;;  %v18368_v36 = vld [vmem:[#allocation59_spill] sm:$0xff] }
 0x347   :  { %v2712_v48 = vpack.c.bf16 %v2646_v6, %v18355_v41  ;;  %v2713_v54 = vpack.c.bf16 %v2647_v19, %v18357_v46  ;;  %v2714_v49 = vpack.c.bf16 %v2651_v12, %v18359_v17  ;;  %v2715_v5 = vpack.c.bf16 %v2652_v1, %v18361_v31  ;;  %2761 = vst.msk [vmem:[#allocation2 + $0x88] sm:$0xff] %vm696_vm0, %v2707_v34  ;;  %v18370_v22 = vld [vmem:[#allocation65_spill] sm:$0xff]  ;;  %v18372_v10 = vld [vmem:[#allocation67_spill] sm:$0xff]  ;;  %v18378_v53 = vld [vmem:[#allocation80_spill] sm:$0xff] }
 0x348   :  { %v2716_v56 = vpack.c.bf16 %v2653_v26, %v18363_v15  ;;  %v2717_v6 = vpack.c.bf16 %v2657_v60, %v18365_v7  ;;  %2762 = vst [vmem:[#allocation2 + $0x90] sm:$0xff] %v2708_v0  ;;  %2763 = vst [vmem:[#allocation2 + $0x98] sm:$0xff] %v2709_v8  ;;  %v18367_v19 = vmax.f32 %v18366_v47, 0.0  ;;  %v18369_v2 = vmax.f32 %v18368_v36, 0.0  ;;  %v18374_v60 = vld [vmem:[#allocation69_spill] sm:$0xff]  ;;  %v18376_v0 = vld [vmem:[#allocation79_spill] sm:$0xff] }
 0x349   :  { %v18371_v11 = vmax.f32 %v18370_v22, 0.0  ;;  %v18373_v51 = vmax.f32 %v18372_v10, 0.0  ;;  %2764 = vst.msk [vmem:[#allocation2 + $0xa0] sm:$0xff] %vm696_vm0, %v2710_v63  ;;  %2765 = vst [vmem:[#allocation2 + $0xa8] sm:$0xff] %v2711_v59  ;;  %v18375_v50 = vmax.f32 %v18374_v60, 0.0  ;;  %v18380_v32 = vld [vmem:[#allocation81_spill] sm:$0xff] }
 0x34a   :  { %v2718_v3 = vpack.c.bf16 %v2658_v42, %v18367_v19  ;;  %v2719_v12 = vpack.c.bf16 %v2659_v27, %v18369_v2  ;;  %2766 = vst [vmem:[#allocation2 + $0xb0] sm:$0xff] %v2712_v48  ;;  %2767 = vst.msk [vmem:[#allocation2 + $0xb8] sm:$0xff] %vm696_vm0, %v2713_v54  ;;  %v18377_v42 = vmax.f32 %v18376_v0, 0.0  ;;  %v18379_v27 = vmax.f32 %v18378_v53, 0.0  ;;  %v18384_v33 = vld [vmem:[#allocation83_spill] sm:$0xff]  ;;  %v18388_v41 = vld [vmem:[#allocation96_spill] sm:$0xff] }
 0x34b   :  { %v2720_v1 = vpack.c.bf16 %v2663_v20, %v18371_v11  ;;  %v2721_v26 = vpack.c.bf16 %v2664_v28, %v18373_v51  ;;  %v2722_v34 = vpack.c.bf16 %v2665_v61, %v18375_v50  ;;  %v18381_v20 = vmax.f32 %v18380_v32, 0.0  ;;  %2768 = vst [vmem:[#allocation2 + $0xc0] sm:$0xff] %v2714_v49  ;;  %2769 = vst [vmem:[#allocation2 + $0xc8] sm:$0xff] %v2715_v5  ;;  %v18382_v28 = vld [vmem:[#allocation82_spill] sm:$0xff]  ;;  %v18390_v45 = vld [vmem:[#allocation97_spill] sm:$0xff] }
 0x34c   :  { %v2723_v37 = vpack.c.bf16 %v2669_v23, %v18377_v42  ;;  %v2724_v8 = vpack.c.bf16 %v2670_v40, %v18379_v27  ;;  %2770 = vst.msk [vmem:[#allocation2 + $0xd0] sm:$0xff] %vm696_vm0, %v2716_v56  ;;  %2771 = vst [vmem:[#allocation2 + $0xd8] sm:$0xff] %v2717_v6  ;;  %v18383_v63 = vmax.f32 %v18382_v28, 0.0  ;;  %v18385_v61 = vmax.f32 %v18384_v33, 0.0  ;;  %v18386_v23 = vld [vmem:[#allocation84_spill] sm:$0xff]  ;;  %v18392_v54 = vld [vmem:[#allocation98_spill] sm:$0xff] }
 0x34d   :  { %v2725_v24 = vpack.c.bf16 %v2671_v62, %v18381_v20  ;;  %v18387_v14 = vmax.f32 %v18386_v23, 0.0  ;;  %v18389_v48 = vmax.f32 %v18388_v41, 0.0  ;;  %2772 = vst [vmem:[#allocation2 + $0xe0] sm:$0xff] %v2718_v3  ;;  %2773 = vst.msk [vmem:[#allocation2 + $0xe8] sm:$0xff] %vm696_vm0, %v2719_v12  ;;  %v18391_v46 = vmax.f32 %v18390_v45, 0.0  ;;  %v18394_v17 = vld [vmem:[#allocation60_spill] sm:$0xff] }
 0x34e   :  { %v2726_v43 = vpack.c.bf16 %v15317_v18, %v18383_v63  ;;  %v2727_v59 = vpack.c.bf16 %v15321_v52, %v18385_v61  ;;  %2774 = vst [vmem:[#allocation2 + $0xf0] sm:$0xff] %v2720_v1  ;;  %2775 = vst [vmem:[#allocation2 + $0xf8] sm:$0xff] %v2721_v26  ;;  %v18393_v57 = vmax.f32 %v18392_v54, 0.0  ;;  %v18395_v49 = vmax.f32 %v18394_v17, 0.0  ;;  %v18396_v39 = vld [vmem:[#allocation54_spill] sm:$0xff]  ;;  %v18398_v5 = vld [vmem:[#allocation99_spill] sm:$0xff] }
 0x34f   :  { %v2728_v40 = vpack.c.bf16 %v15325_v13, %v18387_v14  ;;  %v2729_v62 = vpack.c.bf16 %v15329_v38, %v18389_v48  ;;  %v2730_v18 = vpack.c.bf16 %v15333_v58, %v18391_v46  ;;  %v18397_v31 = vmax.f32 %v18396_v39, 0.0  ;;  %2776 = vst.msk [vmem:[#allocation2 + $0x100] sm:$0xff] %vm696_vm0, %v2722_v34  ;;  %2777 = vst [vmem:[#allocation2 + $0x108] sm:$0xff] %v2723_v37  ;;  %v18402_v35 = vld [vmem:[#allocation76_spill] sm:$0xff] }
 0x350   :  { %v2731_v52 = vpack.c.bf16 %v15337_v44, %v18393_v57  ;;  %v2732_v13 = vpack.c.bf16 %v15341_v21, %v18395_v49  ;;  %2778 = vst [vmem:[#allocation2 + $0x110] sm:$0xff] %v2724_v8  ;;  %2779 = vst.msk [vmem:[#allocation2 + $0x118] sm:$0xff] %vm696_vm0, %v2725_v24  ;;  %v18399_v58 = vmax.f32 %v18398_v5, 0.0  ;;  %v18400_v44 = vmax.f32 %v18286_v29, 0.0  ;;  %v18404_v7 = vld [vmem:[#allocation72_spill] sm:$0xff] }
 0x351   :  { %v2733_v38 = vpack.c.bf16 %v15345_v9, %v18397_v31  ;;  %v18401_v21 = vmax.f32 %v18287_v55, 0.0  ;;  %v18403_v9 = vmax.f32 %v18402_v35, 0.0  ;;  %2780 = vst [vmem:[#allocation2 + $0x120] sm:$0xff] %v2726_v43  ;;  %2781 = vst [vmem:[#allocation2 + $0x128] sm:$0xff] %v2727_v59 }
 0x352   :  { %v2734_v25 = vpack.c.bf16 %v15349_v4, %v18399_v58  ;;  %v2735_v15 = vpack.c.bf16 %v15353_v16, %v18400_v44  ;;  %2782 = vst.msk [vmem:[#allocation2 + $0x130] sm:$0xff] %vm696_vm0, %v2728_v40  ;;  %2783 = vst [vmem:[#allocation2 + $0x138] sm:$0xff] %v2729_v62 }
 0x353   :  { %v2736_v56 = vpack.c.bf16 %v15357_v30, %v18401_v21  ;;  %v2737_v6 = vpack.c.bf16 %v18404_v7, %v18403_v9  ;;  %2784 = vst [vmem:[#allocation2 + $0x140] sm:$0xff] %v2730_v18  ;;  %2785 = vst.msk [vmem:[#allocation2 + $0x148] sm:$0xff] %vm696_vm0, %v2731_v52 }
 0x354   :  { %2786 = vst [vmem:[#allocation2 + $0x150] sm:$0xff] %v2732_v13  ;;  %2787 = vst [vmem:[#allocation2 + $0x158] sm:$0xff] %v2733_v38 }
 0x355   :  { %2788 = vst.msk [vmem:[#allocation2 + $0x160] sm:$0xff] %vm696_vm0, %v2734_v25  ;;  %2789 = vst [vmem:[#allocation2 + $0x168] sm:$0xff] %v2735_v15 }
 0x356   :  { %2790 = vst [vmem:[#allocation2 + $0x170] sm:$0xff] %v2736_v56  ;;  %2791 = vst.msk [vmem:[#allocation2 + $0x178] sm:$0xff] %vm696_vm0, %v2737_v6 }
 0x357   :  { %13011 = dma.done.wait [#allocation4], 23040 }
 0x358   :  { %13012 = vsyncadd [#allocation4], 4294944256  ;;  %v2821_v55 = vld [vmem:[#allocation3 + $0xa0] sm:$0xff]  ;;  %v2822_v4 = vld [vmem:[#allocation3 + $0xa8] sm:$0xff]  ;;  %vm2974_vm15 = vsmask.f32 256 }
 0x359   :  { %v2812_v29 = vld [vmem:[#allocation3] sm:$0xff]  ;;  %10947 = vmatprep.subr.bf16.mxu0 %v2821_v55  ;;  %v2813_v16 = vld [vmem:[#allocation3 + $0x8] sm:$0xff]  ;;  %v2823_v30 = vld [vmem:[#allocation3 + $0xb0] sm:$0xff]  ;;  %vm3274_vm1 = vsmask.f32 7424 }
 0x35a   :  { %10991 = vmatprep.subr.bf16.mxu1 %v2812_v29  ;;  %10948 = vmatpush3.bf16.msra.mxu0 %v2821_v55  ;;  %v2814_v47 = vld [vmem:[#allocation3 + $0x10] sm:$0xff]  ;;  %v2798_v19 = vld [vmem:[#allocation2 + $0x18] sm:$0xff]  ;;  %v2824_v22 = vld [vmem:[#allocation3 + $0xb8] sm:$0xff] }
 0x35b   :  { %10992 = vmatpush3.bf16.msra.mxu1 %v2812_v29  ;;  %10949 = vmatprep.subr.bf16.mxu0 %v2822_v4  ;;  %v2797_v3 = vld [vmem:[#allocation2] sm:$0x80]  ;;  %v2980_v36 = vshrl.u32 %v2798_v19, 16  ;;  %v2983_v2 = vshll.u32 %v2798_v19, 16  ;;  %v2815_v11 = vld [vmem:[#allocation3 + $0x18] sm:$0xff]  ;;  %v2825_v26 = vld [vmem:[#allocation3 + $0xc0] sm:$0xff] }
 0x35c   :  { %10993 = vmatprep.subr.bf16.mxu1 %v2813_v16  ;;  %v2976_v12 = vshrl.u32 %v2797_v3, 16  ;;  %10963 = vmatprep.mubr.bf16.mxu0 %v2798_v19  ;;  %v2816_v60 = vld [vmem:[#allocation3 + $0x20] sm:$0xff]  ;;  %v2826_v0 = vld [vmem:[#allocation3 + $0xc8] sm:$0xff]  ;;  %v15476_v37 = vld [vmem:[#allocation2 + $0x48] sm:$0xff] }
 0x35d   :  { %v2982_v1 = vrot.slane %v2980_v36, 7  ;;  %v15474_v34 = vld [vmem:[#allocation2 + $0x30] sm:$0xff]  ;;  %v2817_v42 = vld [vmem:[#allocation3 + $0x28] sm:$0xff]  ;;  %v2827_v27 = vld [vmem:[#allocation3 + $0xd0] sm:$0xff]  ;;  %v2996_v32 = vshrl.u32 %v15476_v37, 16  ;;  %v3280_v28 = vrot.slane %v2983_v2, 1 }
 0x35e   :  { %10950 = vmatpush3.bf16.msra.mxu0 %v2822_v4  ;;  %v2978_v10 = vrot.slane %v2976_v12, 7  ;;  %v2988_v53 = vshrl.u32 %v15474_v34, 16  ;;  %v2818_v8 = vld [vmem:[#allocation3 + $0x30] sm:$0xff]  ;;  %v2991_v24 = vshll.u32 %v15474_v34, 16  ;;  %v2828_v43 = vld [vmem:[#allocation3 + $0xd8] sm:$0xff]  ;;  %v2999_v59 = vshll.u32 %v15476_v37, 16 }
 0x35f   :  { %10994 = vmatpush3.bf16.msra.mxu1 %v2813_v16  ;;  %10951 = vmatprep.subr.bf16.mxu0 %v2823_v30  ;;  %v2985_v51 = vor.u32 %v2983_v2, %v2982_v1  ;;  %v15483_v63 = vld [vmem:[#allocation2 + $0x60] sm:$0xff]  ;;  %v2819_v33 = vld [vmem:[#allocation3 + $0x38] sm:$0xff]  ;;  %v2998_v61 = vrot.slane %v2996_v32, 7  ;;  %v15488_v23 = vld [vmem:[#allocation2 + $0x78] sm:$0xff]  ;;  %v15490_v14 = vor.u32 %v3280_v28, %v2980_v36 }
 0x360   :  { %10995 = vmatprep.subr.bf16.mxu1 %v2814_v47  ;;  %v2990_v20 = vrot.slane %v2988_v53, 7  ;;  %v3004_v41 = vshrl.u32 %v15483_v63, 16  ;;  %v3012_v48 = vshrl.u32 %v15488_v23, 16  ;;  %v3266_v62 = vld [vmem:[#allocation3 + $0x140] sm:$0xff]  ;;  %v3007_v57 = vshll.u32 %v15483_v63, 16  ;;  %v3267_v39 = vld [vmem:[#allocation3 + $0x148] sm:$0xff] }
 0x361   :  { %v2986_v50 = vsel %vm2974_vm15, %v2978_v10, %v2985_v51  ;;  %v3001_v45 = vor.u32 %v2999_v59, %v2998_v61  ;;  %v4783_v46 = vld [vmem:[#allocation3 + $0x500] sm:$0xff]  ;;  %v3015_v17 = vshll.u32 %v15488_v23, 16  ;;  %v15513_v31 = vld [vmem:[#allocation2 + $0xa8] sm:$0xff]  ;;  %v4784_v58 = vld [vmem:[#allocation3 + $0x508] sm:$0xff] }
 0x362   :  { %10952 = vmatpush3.bf16.msra.mxu0 %v2823_v30  ;;  %11007 = vmatprep.mubr.bf16.mxu1 %v2986_v50  ;;  %v15494_v40 = vor.u32 %v2991_v24, %v2990_v20  ;;  %v3006_v54 = vrot.slane %v3004_v41, 7  ;;  %v3014_v52 = vrot.slane %v3012_v48, 7  ;;  %v15508_v49 = vld [vmem:[#allocation2 + $0x90] sm:$0xff]  ;;  %v3028_v44 = vshrl.u32 %v15513_v31, 16  ;;  %v3268_v15 = vld [vmem:[#allocation3 + $0x150] sm:$0xff]  ;;  %v15538_v29 = vld [vmem:[#allocation2 + $0xd8] sm:$0xff] }
 0x363   :  { %10996 = vmatpush3.bf16.msra.mxu1 %v2814_v47  ;;  %10953 = vmatprep.subr.bf16.mxu0 %v2824_v22  ;;  %v15511_v13 = vsel %vm2974_vm15, %v2990_v20, %v3001_v45  ;;  %v3020_v5 = vshrl.u32 %v15508_v49, 16  ;;  %v3023_v35 = vshll.u32 %v15508_v49, 16  ;;  %v3031_v6 = vshll.u32 %v15513_v31, 16  ;;  %v15536_v55 = vld [vmem:[#allocation2 + $0xc0] sm:$0xff]  ;;  %v3269_v16 = vld [vmem:[#allocation3 + $0x158] sm:$0xff]  ;;  %v3270_v2 = vld [vmem:[#allocation3 + $0x160] sm:$0xff] }
 0x364   :  { %10997 = vmatprep.subr.bf16.mxu1 %v2815_v11  ;;  %v2994_v18 = vsel %vm2974_vm15, %v2982_v1, %v15494_v40  ;;  %v3009_v38 = vor.u32 %v3007_v57, %v3006_v54  ;;  %v3017_v25 = vor.u32 %v3015_v17, %v3014_v52  ;;  %v3030_v7 = vrot.slane %v3028_v44, 7  ;;  %v4785_v4 = vld [vmem:[#allocation3 + $0x510] sm:$0xff]  ;;  %v4786_v19 = vld [vmem:[#allocation3 + $0x518] sm:$0xff]  ;;  %v15556_v1 = vld [vmem:[#allocation2 + $0xf0] sm:$0xff] }
 0x365   :  { %v3022_v56 = vrot.slane %v3020_v5, 7  ;;  %v3036_v47 = vshrl.u32 %v15536_v55, 16  ;;  %v3044_v36 = vshrl.u32 %v15538_v29, 16  ;;  %v4787_v50 = vld [vmem:[#allocation3 + $0x520] sm:$0xff]  ;;  %v4788_v20 = vld [vmem:[#allocation3 + $0x528] sm:$0xff]  ;;  %v3272_v45 = vld [vmem:[#allocation3 + $0x170] sm:$0xff] }
 0x366   :  { %10954 = vmatpush3.bf16.msra.mxu0 %v2824_v22  ;;  %v15525_v21 = vsel %vm2974_vm15, %v2998_v61, %v3009_v38  ;;  %v15531_v9 = vsel %vm2974_vm15, %v3006_v54, %v3017_v25  ;;  %v3033_v3 = vor.u32 %v3031_v6, %v3030_v7  ;;  %v4789_v25 = vld [vmem:[#allocation3 + $0x530] sm:$0xff] }
 0x367   :  { %10998 = vmatpush3.bf16.msra.mxu1 %v2815_v11  ;;  %10955 = vmatprep.subr.bf16.mxu0 %v2825_v26  ;;  %v3025_v30 = vor.u32 %v3023_v35, %v3022_v56  ;;  %v3038_v22 = vrot.slane %v3036_v47, 7  ;;  %v3039_v11 = vshll.u32 %v15536_v55, 16  ;;  %v3046_v51 = vrot.slane %v3044_v36, 7 }
 0x368   :  { %10999 = vmatprep.subr.bf16.mxu1 %v2816_v60  ;;  %v15559_v10 = vsel %vm2974_vm15, %v3022_v56, %v3033_v3  ;;  %v3273_v56 = vld [vmem:[#allocation3 + $0x178] sm:$0xff] }
 0x369   :  { %v15551_v12 = vsel %vm2974_vm15, %v3014_v52, %v3025_v30 }
 0x36a   :  { %10956 = vmatpush3.bf16.msra.mxu0 %v2825_v26  ;;  %v3047_v26 = vshll.u32 %v15538_v29, 16 }
 0x36b   :  { %11000 = vmatpush3.bf16.msra.mxu1 %v2816_v60  ;;  %10957 = vmatprep.subr.bf16.mxu0 %v2826_v0  ;;  %v15564_v60 = vld [vmem:[#allocation2 + $0x108] sm:$0xff] }
 0x36c   :  { %11001 = vmatprep.subr.bf16.mxu1 %v2817_v42  ;;  %v3049_v28 = vor.u32 %v3047_v26, %v3046_v51 }
 0x36e   :  { %10958 = vmatpush3.bf16.msra.mxu0 %v2826_v0  ;;  %v3052_v0 = vshrl.u32 %v15556_v1, 16  ;;  %v15593_v38 = vsel %vm2974_vm15, %v3038_v22, %v3049_v28 }
 0x36f   :  { %11002 = vmatpush3.bf16.msra.mxu1 %v2817_v42  ;;  %10959 = vmatprep.subr.bf16.mxu0 %v2827_v27  ;;  %v3271_v42 = vld [vmem:[#allocation3 + $0x168] sm:$0xff] }
 0x370   :  { %11003 = vmatprep.subr.bf16.mxu1 %v2818_v8  ;;  %v3054_v61 = vrot.slane %v3052_v0, 7 }
 0x372   :  { %10960 = vmatpush3.bf16.msra.mxu0 %v2827_v27  ;;  %v3041_v27 = vor.u32 %v3039_v11, %v3038_v22 }
 0x373   :  { %11004 = vmatpush3.bf16.msra.mxu1 %v2818_v8  ;;  %10961 = vmatprep.subr.bf16.mxu0 %v2828_v43  ;;  %v3060_v8 = vshrl.u32 %v15564_v60, 16 }
 0x374   :  { %11005 = vmatprep.subr.bf16.mxu1 %v2819_v33 }
 0x375   :  { %v3062_v54 = vrot.slane %v3060_v8, 7 }
 0x376   :  { %10962 = vmatpush3.bf16.msra.mxu0 %v2828_v43  ;;  %v15576_v43 = vld [vmem:[#allocation2 + $0x120] sm:$0xff] }
 0x377   :  { %11006 = vmatpush3.bf16.msra.mxu1 %v2819_v33  ;;  %11299 = vmatprep.subr.bf16.mxu0 %v4783_v46  ;;  %v3055_v33 = vshll.u32 %v15556_v1, 16  ;;  %v3068_v52 = vshrl.u32 %v15576_v43, 16  ;;  %v3071_v30 = vshll.u32 %v15576_v43, 16 }
 0x378   :  { %11035 = vmatprep.subr.bf16.mxu1 %v3266_v62 }
 0x379   :  { %10964 = vmatmul.mubr.bf16.vlgmr.msra.gmra.mrb[112].mxu0 %v15474_v34 }
 0x37a   :  { %11008 = vmatmul.mubr.bf16.vlgmr.msra.gmra.mrb[28].mxu1 %v2994_v18  ;;  %10967 = vmatprep.mubr.bf16.mxu0 %v15476_v37  ;;  %v15585_v18 = vsel %vm2974_vm15, %v3030_v7, %v3041_v27  ;;  %v3057_v7 = vor.u32 %v3055_v33, %v3054_v61  ;;  %v3581_v27 = vld [vmem:[#allocation3 + $0x1e0] sm:$0xff] }
 0x37b   :  { %11036 = vmatpush3.bf16.msra.mxu1 %v3266_v62  ;;  %11011 = vmatprep.mubr.bf16.mxu1 %v15511_v13  ;;  %v3063_v62 = vshll.u32 %v15564_v60, 16 }
 0x37c   :  { %11037 = vmatprep.subr.bf16.mxu1 %v3267_v39  ;;  %11300 = vmatpush3.bf16.msra.mxu0 %v4783_v46  ;;  %v15582_v46 = vld [vmem:[#allocation2 + $0x138] sm:$0xff] }
 0x37d   :  { %11301 = vmatprep.subr.bf16.mxu0 %v4784_v58 }
 0x37f   :  { %11038 = vmatpush3.bf16.msra.mxu1 %v3267_v39  ;;  %v15590_v39 = vld [vmem:[#allocation2 + $0x150] sm:$0xff] }
 0x380   :  { %11039 = vmatprep.subr.bf16.mxu1 %v3268_v15  ;;  %11302 = vmatpush3.bf16.msra.mxu0 %v4784_v58  ;;  %v17796_v58 = vshrl.u32 %v15582_v46, 16 }
 0x381   :  { %10968 = vmatmul.mubr.bf16.gmra.mrb[116].mxu0 %v15483_v63  ;;  %11303 = vmatprep.subr.bf16.mxu0 %v4785_v4 }
 0x382   :  { %11012 = vmatmul.mubr.bf16.gmra.mrb[32].mxu1 %v15525_v21  ;;  %10971 = vmatprep.mubr.bf16.mxu0 %v15488_v23  ;;  %v3078_v3 = vrot.slane %v17796_v58, 7  ;;  %v5145_v58 = vld [vmem:[#allocation3 + $0xe0] sm:$0xff]  ;;  %v4825_v23 = vrot.slane %v3031_v6, 1 }
 0x383   :  { %11015 = vmatprep.mubr.bf16.mxu1 %v15531_v9  ;;  %11040 = vmatpush3.bf16.msra.mxu1 %v3268_v15  ;;  %v17795_v15 = vshrl.u32 %v15590_v39, 16 }
 0x384   :  { %11041 = vmatprep.subr.bf16.mxu1 %v3269_v16  ;;  %11304 = vmatpush3.bf16.msra.mxu0 %v4785_v4  ;;  %v3065_v4 = vor.u32 %v3063_v62, %v3062_v54 }
 0x385   :  { %11305 = vmatprep.subr.bf16.mxu0 %v4786_v19 }
 0x386   :  { %v15622_v28 = vsel %vm2974_vm15, %v3054_v61, %v3065_v4 }
 0x387   :  { %11042 = vmatpush3.bf16.msra.mxu1 %v3269_v16  ;;  %v3070_v16 = vrot.slane %v3068_v52, 7 }
 0x388   :  { %11043 = vmatprep.subr.bf16.mxu1 %v3270_v2  ;;  %11306 = vmatpush3.bf16.msra.mxu0 %v4786_v19  ;;  %v4790_v19 = vld [vmem:[#allocation3 + $0x538] sm:$0xff] }
 0x389   :  { %10972 = vmatmul.mubr.bf16.gmra.mrb[120].mxu0 %v15508_v49  ;;  %11307 = vmatprep.subr.bf16.mxu0 %v4787_v50  ;;  %v3624_v22 = vor.u32 %v3071_v30, %v3070_v16 }
 0x38a   :  { %11016 = vmatmul.mubr.bf16.gmra.mrb[36].mxu1 %v15551_v12  ;;  %10975 = vmatprep.mubr.bf16.mxu0 %v15513_v31 }
 0x38b   :  { %11019 = vmatprep.mubr.bf16.mxu1 %v15559_v10  ;;  %11044 = vmatpush3.bf16.msra.mxu1 %v3270_v2  ;;  %v3079_v2 = vshll.u32 %v15582_v46, 16 }
 0x38c   :  { %11045 = vmatprep.subr.bf16.mxu1 %v3271_v42  ;;  %11308 = vmatpush3.bf16.msra.mxu0 %v4787_v50  ;;  %v15615_v50 = vrot.slane %v17795_v15, 7 }
 0x38d   :  { %11309 = vmatprep.subr.bf16.mxu0 %v4788_v20 }
 0x38f   :  { %11046 = vmatpush3.bf16.msra.mxu1 %v3271_v42  ;;  %v3087_v42 = vshll.u32 %v15590_v39, 16 }
 0x390   :  { %11047 = vmatprep.subr.bf16.mxu1 %v3272_v45  ;;  %11310 = vmatpush3.bf16.msra.mxu0 %v4788_v20  ;;  %v15619_v20 = vsel %vm2974_vm15, %v3046_v51, %v3057_v7  ;;  %v4801_v7 = vrot.slane %v3007_v57, 1 }
 0x391   :  { %10976 = vmatmul.mubr.bf16.gmra.mrb[124].mxu0 %v15536_v55  ;;  %11311 = vmatprep.subr.bf16.mxu0 %v4789_v25  ;;  %v3630_v15 = vor.u32 %v3087_v42, %v15615_v50 }
 0x392   :  { %11020 = vmatmul.mubr.bf16.gmra.mrb[40].mxu1 %v15585_v18  ;;  %10979 = vmatprep.mubr.bf16.mxu0 %v15538_v29  ;;  %v4805_v37 = vor.u32 %v4801_v7, %v3004_v41 }
 0x393   :  { %11023 = vmatprep.mubr.bf16.mxu1 %v15593_v38  ;;  %11048 = vmatpush3.bf16.msra.mxu1 %v3272_v45  ;;  %v15625_v45 = vsel %vm2974_vm15, %v3062_v54, %v3624_v22  ;;  %v15638_v61 = vsel %vm2974_vm15, %v3078_v3, %v3630_v15  ;;  %v4796_v54 = vrot.slane %v2999_v59, 1  ;;  %v3285_v15 = vrot.slane %v2991_v24, 1 }
 0x394   :  { %11049 = vmatprep.subr.bf16.mxu1 %v3273_v56  ;;  %11312 = vmatpush3.bf16.msra.mxu0 %v4789_v25  ;;  %v3627_v25 = vor.u32 %v3079_v2, %v3078_v3  ;;  %v5146_v3 = vld [vmem:[#allocation3 + $0xe8] sm:$0xff]  ;;  %v4829_v22 = vor.u32 %v4825_v23, %v3028_v44  ;;  %v4841_v44 = vrot.slane %v3047_v26, 1 }
 0x395   :  { %11313 = vmatprep.subr.bf16.mxu0 %v4790_v19  ;;  %v3286_v59 = vsel %vm3274_vm1, %v15490_v14, %v3285_v15  ;;  %v4817_v14 = vrot.slane %v3023_v35, 1  ;;  %v3583_v35 = vld [vmem:[#allocation3 + $0x1f0] sm:$0xff] }
 0x396   :  { %v15633_v51 = vsel %vm2974_vm15, %v3070_v16, %v3627_v25  ;;  %v3289_v16 = vor.u32 %v3285_v15, %v2988_v53  ;;  %v3582_v53 = vld [vmem:[#allocation3 + $0x1e8] sm:$0xff]  ;;  %v4833_v25 = vrot.slane %v3039_v11, 1  ;;  %v5149_v11 = vld [vmem:[#allocation3 + $0x100] sm:$0xff]  ;;  %v4849_v15 = vrot.slane %v3055_v33, 1 }
 0x397   :  { %11050 = vmatpush3.bf16.msra.mxu1 %v3273_v56  ;;  %v4797_v56 = vor.u32 %v4796_v54, %v2996_v32  ;;  %v4809_v32 = vrot.slane %v3015_v17, 1  ;;  %v4821_v17 = vor.u32 %v4817_v14, %v3020_v5  ;;  %v5148_v5 = vld [vmem:[#allocation3 + $0xf8] sm:$0xff]  ;;  %v15696_v33 = vrot.slane %v3063_v62, 1 }
 0x398   :  { %11314 = vmatpush3.bf16.msra.mxu0 %v4790_v19  ;;  %11079 = vmatprep.subr.bf16.mxu1 %v3581_v27  ;;  %v3294_v57 = vsel %vm3274_vm1, %v3289_v16, %v4796_v54  ;;  %v4834_v6 = vsel %vm3274_vm1, %v4829_v22, %v4833_v25  ;;  %v4837_v31 = vor.u32 %v4833_v25, %v3036_v47  ;;  %v5150_v47 = vld [vmem:[#allocation3 + $0x108] sm:$0xff]  ;;  %v3264_v22 = vld [vmem:[#allocation2 + $0x168] sm:$0x1] }
 0x399   :  { %10980 = vmatmul.mubr.bf16.gmra.mrb[128].mxu0 %v15556_v1  ;;  %11343 = vmatprep.subr.bf16.mxu0 %v5145_v58  ;;  %v4802_v4 = vsel %vm3274_vm1, %v4797_v56, %v4801_v7  ;;  %v4813_v24 = vor.u32 %v4809_v32, %v3012_v48  ;;  %v4810_v19 = vsel %vm3274_vm1, %v4805_v37, %v4809_v32  ;;  %v5147_v48 = vld [vmem:[#allocation3 + $0xf0] sm:$0xff]  ;;  %v3585_v56 = vld [vmem:[#allocation3 + $0x200] sm:$0xff]  ;;  %v5152_v37 = vld [vmem:[#allocation3 + $0x118] sm:$0xff] }
 0x39a   :  { %11024 = vmatmul.mubr.bf16.gmra.mrb[44].mxu1 %v15619_v20  ;;  %10983 = vmatprep.mubr.bf16.mxu0 %v15564_v60  ;;  %v4845_v54 = vor.u32 %v4841_v44, %v3044_v36  ;;  %v4842_v7 = vsel %vm3274_vm1, %v4837_v31, %v4841_v44  ;;  %v4853_v36 = vor.u32 %v4849_v15, %v3052_v0  ;;  %v15700_v32 = vld [vmem:[#allocation2 + $0x20] sm:$0xff]  ;;  %v3578_v25 = vld [vmem:[#allocation2 + $0x18] sm:$0x80]  ;;  %v18406_v44 = vshrl.u32 %v15590_v39, 16 }
 0x39b   :  { %11027 = vmatprep.mubr.bf16.mxu1 %v15622_v28  ;;  %v4818_v41 = vsel %vm3274_vm1, %v4813_v24, %v4817_v14  ;;  %v3587_v0 = vld [vmem:[#allocation3 + $0x210] sm:$0xff]  ;;  %v3361_v62 = vor.u32 %v15696_v33, %v3060_v8  ;;  %v3365_v24 = vrot.slane %v3071_v30, 1  ;;  %v3588_v14 = vld [vmem:[#allocation3 + $0x218] sm:$0xff]  ;;  %v3373_v8 = vrot.slane %v3079_v2, 1  ;;  %v3828_v30 = vld [vmem:[#allocation3 + $0x280] sm:$0xff] }
 0x39c   :  { %v4850_v26 = vsel %vm3274_vm1, %v4845_v54, %v4849_v15  ;;  %v4858_v16 = vsel %vm3274_vm1, %v4853_v36, %v15696_v33  ;;  %v5139_v2 = vld [vmem:[#allocation3 + $0x50] sm:$0xff]  ;;  %v3590_v31 = vshrl.u32 %v3578_v25, 16  ;;  %v15738_v36 = vld [vmem:[#allocation2 + $0xb0] sm:$0xff] }
 0x39e   :  { %v3592_v15 = vrot.slane %v3590_v31, 7 }
 0x3a1   :  { %10984 = vmatmul.mubr.bf16.gmra.mrb[132].mxu0 %v15576_v43 }
 0x3a2   :  { %11028 = vmatmul.mubr.bf16.gmra.mrb[48].mxu1 %v15625_v45  ;;  %10987 = vmatprep.mubr.bf16.mxu0 %v15582_v46 }
 0x3a3   :  { %11031 = vmatprep.mubr.bf16.mxu1 %v15633_v51 }
 0x3a9   :  { %10988 = vmatmul.mubr.bf16.gmra.mrb[136].mxu0 %v15590_v39 }
 0x3aa   :  { %11032 = vmatmul.mubr.bf16.gmra.mrb[52].mxu1 %v15638_v61  ;;  %11315 = vmatprep.mubr.bf16.mxu0 %v4802_v4 }
 0x3ab   :  { %11051 = vmatprep.mubr.bf16.mxu1 %v3286_v59  ;;  %v3586_v59 = vld [vmem:[#allocation3 + $0x208] sm:$0xff] }
 0x3b1   :  { %11316 = vmatmul.mubr.bf16.vlgmr.msra.gmra.mrb[140].mxu0 %v4810_v19 }
 0x3b2   :  { %11052 = vmatmul.mubr.bf16.vlgmr.msra.gmra.mrb[28].mxu1 %v3294_v57  ;;  %11344 = vmatpush3.bf16.msra.mxu0 %v5145_v58  ;;  %v4826_v58 = vsel %vm3274_vm1, %v4821_v17, %v4825_v23  ;;  %v5137_v57 = vld [vmem:[#allocation3 + $0x40] sm:$0xff]  ;;  %v3369_v17 = vor.u32 %v3365_v24, %v3068_v52  ;;  %v18405_v23 = vshrl.u32 %v15582_v46, 16 }
 0x3b3   :  { %11080 = vmatpush3.bf16.msra.mxu1 %v3581_v27  ;;  %11345 = vmatprep.subr.bf16.mxu0 %v5146_v3  ;;  %v3584_v27 = vld [vmem:[#allocation3 + $0x1f8] sm:$0xff] }
 0x3b4   :  { %11055 = vmatprep.mubr.bf16.mxu1 %v4802_v4  ;;  %11081 = vmatprep.subr.bf16.mxu1 %v3582_v53  ;;  %v5151_v4 = vld [vmem:[#allocation3 + $0x110] sm:$0xff] }
 0x3b5   :  { %11319 = vmatprep.mubr.bf16.mxu0 %v4818_v41 }
 0x3b6   :  { %11346 = vmatpush3.bf16.msra.mxu0 %v5146_v3  ;;  %v3366_v3 = vsel %vm3274_vm1, %v3361_v62, %v3365_v24  ;;  %v3830_v62 = vld [vmem:[#allocation3 + $0x290] sm:$0xff]  ;;  %v15750_v24 = vld [vmem:[#allocation2 + $0xf8] sm:$0xff] }
 0x3b7   :  { %11082 = vmatpush3.bf16.msra.mxu1 %v3582_v53  ;;  %11347 = vmatprep.subr.bf16.mxu0 %v5147_v48  ;;  %v15711_v53 = vld [vmem:[#allocation2 + $0x50] sm:$0xff] }
 0x3b8   :  { %11083 = vmatprep.subr.bf16.mxu1 %v3583_v35 }
 0x3b9   :  { %11320 = vmatmul.mubr.bf16.gmra.mrb[144].mxu0 %v4826_v58 }
 0x3ba   :  { %11056 = vmatmul.mubr.bf16.gmra.mrb[32].mxu1 %v4810_v19  ;;  %11348 = vmatpush3.bf16.msra.mxu0 %v5147_v48  ;;  %v15708_v19 = vld [vmem:[#allocation2 + $0x38] sm:$0xff]  ;;  %v3377_v48 = vor.u32 %v3373_v8, %v18405_v23 }
 0x3bb   :  { %11059 = vmatprep.mubr.bf16.mxu1 %v4818_v41  ;;  %11349 = vmatprep.subr.bf16.mxu0 %v5148_v5  ;;  %v5138_v41 = vld [vmem:[#allocation3 + $0x48] sm:$0xff] }
 0x3bc   :  { %11084 = vmatpush3.bf16.msra.mxu1 %v3583_v35  ;;  %11323 = vmatprep.mubr.bf16.mxu0 %v4834_v6  ;;  %v3381_v35 = vrot.slane %v3087_v42, 1  ;;  %v5140_v42 = vld [vmem:[#allocation3 + $0x58] sm:$0xff]  ;;  %v3833_v23 = vld [vmem:[#allocation3 + $0x2a8] sm:$0xff] }
 0x3bd   :  { %11085 = vmatprep.subr.bf16.mxu1 %v3584_v27 }
 0x3be   :  { %11350 = vmatpush3.bf16.msra.mxu0 %v5148_v5  ;;  %v15724_v5 = vld [vmem:[#allocation2 + $0x68] sm:$0xff]  ;;  %v3382_v52 = vsel %vm3274_vm1, %v3377_v48, %v3381_v35  ;;  %v5311_v48 = vshrl.u32 %v15708_v19, 16 }
 0x3bf   :  { %11351 = vmatprep.subr.bf16.mxu0 %v5149_v11 }
 0x3c0   :  { %11086 = vmatpush3.bf16.msra.mxu1 %v3584_v27  ;;  %v15727_v27 = vld [vmem:[#allocation2 + $0x80] sm:$0xff] }
 0x3c1   :  { %11087 = vmatprep.subr.bf16.mxu1 %v3585_v56  ;;  %11324 = vmatmul.mubr.bf16.gmra.mrb[148].mxu0 %v4842_v7 }
 0x3c2   :  { %11060 = vmatmul.mubr.bf16.gmra.mrb[36].mxu1 %v4826_v58  ;;  %11352 = vmatpush3.bf16.msra.mxu0 %v5149_v11  ;;  %v3374_v58 = vsel %vm3274_vm1, %v3369_v17, %v3373_v8  ;;  %v3385_v11 = vor.u32 %v3381_v35, %v18406_v44  ;;  %v5122_v8 = vld [vmem:[#allocation2 + $0x8] sm:$0x80]  ;;  %v15767_v17 = vld [vmem:[#allocation2 + $0x140] sm:$0xff] }
 0x3c3   :  { %11063 = vmatprep.mubr.bf16.mxu1 %v4834_v6  ;;  %11353 = vmatprep.subr.bf16.mxu0 %v5150_v47  ;;  %v3387_v6 = vshll.u32 %v3264_v22, 16  ;;  %v5319_v22 = vshrl.u32 %v15711_v53, 16 }
 0x3c4   :  { %11327 = vmatprep.mubr.bf16.mxu0 %v4850_v26  ;;  %11088 = vmatpush3.bf16.msra.mxu1 %v3585_v56  ;;  %v5141_v56 = vld [vmem:[#allocation3 + $0x60] sm:$0xff] }
 0x3c5   :  { %11089 = vmatprep.subr.bf16.mxu1 %v3586_v59  ;;  %v3389_v54 = vrot.slane %v3387_v6, 1  ;;  %v15780_v6 = vld [vmem:[#allocation2 + $0x158] sm:$0xff] }
 0x3c6   :  { %11354 = vmatpush3.bf16.msra.mxu0 %v5150_v47  ;;  %v15734_v47 = vld [vmem:[#allocation2 + $0x98] sm:$0xff] }
 0x3c7   :  { %11355 = vmatprep.subr.bf16.mxu0 %v5151_v4 }
 0x3c8   :  { %11090 = vmatpush3.bf16.msra.mxu1 %v3586_v59  ;;  %v5142_v59 = vld [vmem:[#allocation3 + $0x68] sm:$0xff] }
 0x3c9   :  { %11328 = vmatmul.mubr.bf16.gmra.mrb[152].mxu0 %v4858_v16  ;;  %11091 = vmatprep.subr.bf16.mxu1 %v3587_v0 }
 0x3ca   :  { %11064 = vmatmul.mubr.bf16.gmra.mrb[40].mxu1 %v4842_v7  ;;  %11356 = vmatpush3.bf16.msra.mxu0 %v5151_v4  ;;  %v3390_v7 = vsel %vm3274_vm1, %v3385_v11, %v3389_v54  ;;  %v5143_v4 = vld [vmem:[#allocation3 + $0x70] sm:$0xff]  ;;  %v5327_v11 = vshrl.u32 %v15724_v5, 16 }
 0x3cb   :  { %11067 = vmatprep.mubr.bf16.mxu1 %v4850_v26  ;;  %11357 = vmatprep.subr.bf16.mxu0 %v5152_v37  ;;  %v3595_v26 = vsel %vm2974_vm15, %v3592_v15, %v15494_v40  ;;  %v5144_v40 = vld [vmem:[#allocation3 + $0x78] sm:$0xff]  ;;  %v5335_v15 = vshrl.u32 %v15727_v27, 16 }
 0x3cc   :  { %11359 = vmatprep.mubr.bf16.mxu0 %v15700_v32  ;;  %11092 = vmatpush3.bf16.msra.mxu1 %v3587_v0  ;;  %v15744_v0 = vld [vmem:[#allocation2 + $0xe0] sm:$0xff] }
 0x3cd   :  { %11093 = vmatprep.subr.bf16.mxu1 %v3588_v14 }
 0x3ce   :  { %11358 = vmatpush3.bf16.msra.mxu0 %v5152_v37  ;;  %v3829_v37 = vld [vmem:[#allocation3 + $0x288] sm:$0xff] }
 0x3cf   :  { %11387 = vmatprep.subr.bf16.mxu0 %v5137_v57 }
 0x3d0   :  { %11094 = vmatpush3.bf16.msra.mxu1 %v3588_v14  ;;  %v15752_v14 = vld [vmem:[#allocation2 + $0x110] sm:$0xff] }
 0x3d1   :  { %11360 = vmatmul.mubr.bf16.vlgmr.msra.gmra.mrb[156].mxu0 %v15708_v19  ;;  %11123 = vmatprep.subr.bf16.mxu1 %v3828_v30 }
 0x3d2   :  { %11068 = vmatmul.mubr.bf16.gmra.mrb[44].mxu1 %v4858_v16  ;;  %11363 = vmatprep.mubr.bf16.mxu0 %v15711_v53  ;;  %v15742_v16 = vld [vmem:[#allocation2 + $0xc8] sm:$0xff] }
 0x3d3   :  { %11071 = vmatprep.mubr.bf16.mxu1 %v3366_v3  ;;  %11388 = vmatpush3.bf16.msra.mxu0 %v5137_v57  ;;  %v3831_v57 = vld [vmem:[#allocation3 + $0x298] sm:$0xff]  ;;  %v3832_v3 = vld [vmem:[#allocation3 + $0x2a0] sm:$0xff] }
 0x3d4   :  { %11389 = vmatprep.subr.bf16.mxu0 %v5138_v41 }
 0x3d7   :  { %11390 = vmatpush3.bf16.msra.mxu0 %v5138_v41  ;;  %v5306_v41 = vshll.u32 %v15700_v32, 16 }
 0x3d8   :  { %11391 = vmatprep.subr.bf16.mxu0 %v5139_v2 }
 0x3d9   :  { %11364 = vmatmul.mubr.bf16.gmra.mrb[160].mxu0 %v15724_v5 }
 0x3da   :  { %11072 = vmatmul.mubr.bf16.gmra.mrb[48].mxu1 %v3374_v58  ;;  %11367 = vmatprep.mubr.bf16.mxu0 %v15727_v27  ;;  %v5314_v58 = vshll.u32 %v15708_v19, 16 }
 0x3db   :  { %11075 = vmatprep.mubr.bf16.mxu1 %v3382_v52  ;;  %11392 = vmatpush3.bf16.msra.mxu0 %v5139_v2  ;;  %v3834_v2 = vld [vmem:[#allocation3 + $0x2b0] sm:$0xff]  ;;  %v5322_v52 = vshll.u32 %v15711_v53, 16  ;;  %v5902_v53 = vld [vmem:[#allocation3 + $0x228] sm:$0xff] }
 0x3dc   :  { %11393 = vmatprep.subr.bf16.mxu0 %v5140_v42 }
 0x3df   :  { %11394 = vmatpush3.bf16.msra.mxu0 %v5140_v42  ;;  %v3835_v42 = vld [vmem:[#allocation3 + $0x2b8] sm:$0xff] }
 0x3e0   :  { %11395 = vmatprep.subr.bf16.mxu0 %v5141_v56 }
 0x3e1   :  { %11368 = vmatmul.mubr.bf16.gmra.mrb[164].mxu0 %v15734_v47 }
 0x3e2   :  { %11076 = vmatmul.mubr.bf16.gmra.mrb[52].mxu1 %v3390_v7  ;;  %11371 = vmatprep.mubr.bf16.mxu0 %v15738_v36  ;;  %v5330_v7 = vshll.u32 %v15724_v5, 16 }
 0x3e3   :  { %11095 = vmatprep.mubr.bf16.mxu1 %v3595_v26  ;;  %11396 = vmatpush3.bf16.msra.mxu0 %v5141_v56  ;;  %v5329_v56 = vrot.slane %v5327_v11, 7 }
 0x3e4   :  { %11397 = vmatprep.subr.bf16.mxu0 %v5142_v59 }
 0x3e7   :  { %11398 = vmatpush3.bf16.msra.mxu0 %v5142_v59  ;;  %v5338_v59 = vshll.u32 %v15727_v27, 16 }
 0x3e8   :  { %11399 = vmatprep.subr.bf16.mxu0 %v5143_v4 }
 0x3e9   :  { %11372 = vmatmul.mubr.bf16.gmra.mrb[168].mxu0 %v15742_v16  ;;  %v5630_v19 = vrot.slane %v5338_v59, 1 }
 0x3ea   :  { %11096 = vmatmul.mubr.bf16.vlgmr.msra.gmra.mrb[28].mxu1 %v15511_v13  ;;  %11375 = vmatprep.mubr.bf16.mxu0 %v15744_v0  ;;  %v15756_v13 = vld [vmem:[#allocation3 + $0x180] sm:$0xff] }
 0x3eb   :  { %11124 = vmatpush3.bf16.msra.mxu1 %v3828_v30  ;;  %11099 = vmatprep.mubr.bf16.mxu1 %v15525_v21  ;;  %v5303_v21 = vshrl.u32 %v15700_v32, 16  ;;  %v15762_v30 = vld [vmem:[#allocation2 + $0x128] sm:$0xff] }
 0x3ec   :  { %11125 = vmatprep.subr.bf16.mxu1 %v3829_v37  ;;  %11400 = vmatpush3.bf16.msra.mxu0 %v5143_v4  ;;  %v4032_v32 = vld [vmem:[#allocation3 + $0x358] sm:$0xff] }
 0x3ed   :  { %11401 = vmatprep.subr.bf16.mxu0 %v5144_v40 }
 0x3ef   :  { %11126 = vmatpush3.bf16.msra.mxu1 %v3829_v37  ;;  %v15810_v37 = vld [vmem:[#allocation2 + $0x168] sm:$0xff] }
 0x3f0   :  { %11127 = vmatprep.subr.bf16.mxu1 %v3830_v62  ;;  %11402 = vmatpush3.bf16.msra.mxu0 %v5144_v40  ;;  %v5589_v40 = vld [vmem:[#allocation3 + $0x188] sm:$0xff] }
 0x3f1   :  { %11376 = vmatmul.mubr.bf16.gmra.mrb[172].mxu0 %v15750_v24  ;;  %11431 = vmatprep.subr.bf16.mxu0 %v15756_v13 }
 0x3f2   :  { %11100 = vmatmul.mubr.bf16.gmra.mrb[32].mxu1 %v15531_v9  ;;  %11379 = vmatprep.mubr.bf16.mxu0 %v15752_v14  ;;  %v5305_v9 = vrot.slane %v5303_v21, 7 }
 0x3f3   :  { %11103 = vmatprep.mubr.bf16.mxu1 %v15551_v12  ;;  %11128 = vmatpush3.bf16.msra.mxu1 %v3830_v62  ;;  %v5299_v12 = vshrl.u32 %v5122_v8, 16  ;;  %v5332_v62 = vor.u32 %v5330_v7, %v5329_v56 }
 0x3f4   :  { %11129 = vmatprep.subr.bf16.mxu1 %v3831_v57  ;;  %v5308_v35 = vor.u32 %v5306_v41, %v5305_v9 }
 0x3f5   :  { %v5301_v25 = vrot.slane %v5299_v12, 7  ;;  %v5590_v12 = vld [vmem:[#allocation3 + $0x190] sm:$0xff] }
 0x3f7   :  { %11130 = vmatpush3.bf16.msra.mxu1 %v3831_v57  ;;  %v5309_v31 = vsel %vm2974_vm15, %v5301_v25, %v5308_v35  ;;  %v17808_v57 = vshrl.u32 %v15734_v47, 16  ;;  %v17798_v25 = vshll.u32 %v15810_v37, 16 }
 0x3f8   :  { %11131 = vmatprep.subr.bf16.mxu1 %v3832_v3 }
 0x3f9   :  { %11380 = vmatmul.mubr.bf16.gmra.mrb[176].mxu0 %v15762_v30 }
 0x3fa   :  { %11104 = vmatmul.mubr.bf16.gmra.mrb[36].mxu1 %v15559_v10  ;;  %11383 = vmatprep.mubr.bf16.mxu0 %v15767_v17  ;;  %v5313_v10 = vrot.slane %v5311_v48, 7 }
 0x3fb   :  { %11107 = vmatprep.mubr.bf16.mxu1 %v15585_v18  ;;  %11132 = vmatpush3.bf16.msra.mxu1 %v3832_v3  ;;  %v5321_v18 = vrot.slane %v5319_v22, 7  ;;  %v17797_v3 = vshrl.u32 %v15810_v37, 16 }
 0x3fc   :  { %11133 = vmatprep.subr.bf16.mxu1 %v3833_v23  ;;  %v15790_v44 = vor.u32 %v5314_v58, %v5313_v10 }
 0x3fd   :  { %v5324_v54 = vor.u32 %v5322_v52, %v5321_v18  ;;  %v15832_v35 = vrot.slane %v17797_v3, 7 }
 0x3fe   :  { %v5317_v26 = vsel %vm2974_vm15, %v5305_v9, %v15790_v44  ;;  %v17803_v9 = vshrl.u32 %v15738_v36, 16 }
 0x3ff   :  { %11134 = vmatpush3.bf16.msra.mxu1 %v3833_v23  ;;  %v15808_v4 = vsel %vm2974_vm15, %v5313_v10, %v5324_v54  ;;  %v5345_v23 = vrot.slane %v17808_v57, 7  ;;  %v15851_v54 = vor.u32 %v17798_v25, %v15832_v35  ;;  %v17802_v25 = vshll.u32 %v15744_v0, 16  ;;  %v12953_v57 = vld [vmem:[#allocation2 + $0x78] sm:$0xff] }
 0x400   :  { %11135 = vmatprep.subr.bf16.mxu1 %v3834_v2 }
 0x401   :  { %11384 = vmatmul.mubr.bf16.gmra.mrb[180].mxu0 %v15780_v6 }
 0x402   :  { %11108 = vmatmul.mubr.bf16.gmra.mrb[40].mxu1 %v15593_v38  ;;  %11403 = vmatprep.mubr.bf16.mxu0 %v5309_v31  ;;  %v15797_v38 = vld [vmem:[#allocation3 + $0x320] sm:$0xff] }
 0x403   :  { %11111 = vmatprep.mubr.bf16.mxu1 %v15619_v20  ;;  %11136 = vmatpush3.bf16.msra.mxu1 %v3834_v2  ;;  %v5337_v20 = vrot.slane %v5335_v15, 7  ;;  %v5353_v2 = vrot.slane %v17803_v9, 7  ;;  %v12952_v9 = vld [vmem:[#allocation2 + $0x48] sm:$0xff] }
 0x404   :  { %11137 = vmatprep.subr.bf16.mxu1 %v3835_v42 }
 0x405   :  { %v5340_v8 = vor.u32 %v5338_v59, %v5337_v20 }
 0x407   :  { %11138 = vmatpush3.bf16.msra.mxu1 %v3835_v42  ;;  %v15839_v10 = vsel %vm2974_vm15, %v5329_v56, %v5340_v8  ;;  %v17799_v42 = vshrl.u32 %v15742_v16, 16  ;;  %v17800_v56 = vshrl.u32 %v15744_v0, 16 }
 0x408   :  { %11167 = vmatprep.subr.bf16.mxu1 %v15797_v38 }
 0x409   :  { %11404 = vmatmul.mubr.bf16.vlgmr.msra.gmra.mrb[156].mxu0 %v5317_v26  ;;  %v5592_v26 = vld [vmem:[#allocation3 + $0x1a0] sm:$0xff] }
 0x40a   :  { %11112 = vmatmul.mubr.bf16.gmra.mrb[44].mxu1 %v15622_v28  ;;  %11407 = vmatprep.mubr.bf16.mxu0 %v15808_v4  ;;  %v5346_v28 = vshll.u32 %v15734_v47, 16 }
 0x40b   :  { %11115 = vmatprep.mubr.bf16.mxu1 %v15625_v45  ;;  %11432 = vmatpush3.bf16.msra.mxu0 %v15756_v13  ;;  %v15828_v45 = vsel %vm2974_vm15, %v5321_v18, %v5332_v62  ;;  %v5354_v13 = vshll.u32 %v15738_v36, 16  ;;  %v5591_v18 = vld [vmem:[#allocation3 + $0x198] sm:$0xff]  ;;  %v3639_v62 = vsel %vm2974_vm15, %v15615_v50, %v15851_v54 }
 0x40c   :  { %11433 = vmatprep.subr.bf16.mxu0 %v5589_v40  ;;  %v5348_v31 = vor.u32 %v5346_v28, %v5345_v23 }
 0x40d   :  { %v5646_v27 = vrot.slane %v5354_v13, 1 }
 0x40e   :  { %v15863_v8 = vsel %vm2974_vm15, %v5337_v20, %v5348_v31  ;;  %v17804_v20 = vshrl.u32 %v15750_v24, 16  ;;  %v5594_v31 = vld [vmem:[#allocation3 + $0x1b0] sm:$0xff] }
 0x40f   :  { %11434 = vmatpush3.bf16.msra.mxu0 %v5589_v40  ;;  %v5361_v40 = vrot.slane %v17799_v42, 7  ;;  %v5593_v42 = vld [vmem:[#allocation3 + $0x1a8] sm:$0xff] }
 0x410   :  { %11435 = vmatprep.subr.bf16.mxu0 %v5590_v12 }
 0x411   :  { %11408 = vmatmul.mubr.bf16.gmra.mrb[160].mxu0 %v15828_v45 }
 0x412   :  { %11116 = vmatmul.mubr.bf16.gmra.mrb[48].mxu1 %v15633_v51  ;;  %11411 = vmatprep.mubr.bf16.mxu0 %v15839_v10  ;;  %v5356_v51 = vor.u32 %v5354_v13, %v5353_v2  ;;  %v15994_v13 = vld [vmem:[#allocation2 + $0x78] sm:$0xff] }
 0x413   :  { %11119 = vmatprep.mubr.bf16.mxu1 %v15638_v61  ;;  %11436 = vmatpush3.bf16.msra.mxu0 %v5590_v12  ;;  %v17801_v61 = vshll.u32 %v15742_v16, 16  ;;  %v5369_v12 = vrot.slane %v17800_v56, 7 }
 0x414   :  { %11437 = vmatprep.subr.bf16.mxu0 %v5591_v18  ;;  %v15866_v3 = vsel %vm2974_vm15, %v5345_v23, %v5356_v51  ;;  %v5377_v51 = vrot.slane %v17804_v20, 7 }
 0x415   :  { %v5364_v50 = vor.u32 %v17801_v61, %v5361_v40  ;;  %v5372_v23 = vor.u32 %v17802_v25, %v5369_v12  ;;  %v4026_v61 = vld [vmem:[#allocation3 + $0x328] sm:$0xff] }
 0x417   :  { %11438 = vmatpush3.bf16.msra.mxu0 %v5591_v18  ;;  %v17805_v18 = vshrl.u32 %v15752_v14, 16  ;;  %v15884_v56 = vsel %vm2974_vm15, %v5353_v2, %v5364_v50  ;;  %v15890_v25 = vsel %vm2974_vm15, %v5361_v40, %v5372_v23  ;;  %v17809_v2 = vshrl.u32 %v15762_v30, 16  ;;  %v4027_v40 = vld [vmem:[#allocation3 + $0x330] sm:$0xff] }
 0x418   :  { %11439 = vmatprep.subr.bf16.mxu0 %v5592_v26  ;;  %v17810_v50 = vshrl.u32 %v15767_v17, 16 }
 0x419   :  { %11412 = vmatmul.mubr.bf16.gmra.mrb[164].mxu0 %v15863_v8  ;;  %v5393_v23 = vrot.slane %v17809_v2, 7  ;;  %v5901_v2 = vld [vmem:[#allocation3 + $0x220] sm:$0xff] }
 0x41a   :  { %11120 = vmatmul.mubr.bf16.gmra.mrb[52].mxu1 %v3639_v62  ;;  %11415 = vmatprep.mubr.bf16.mxu0 %v15866_v3  ;;  %v17806_v62 = vshll.u32 %v15750_v24, 16 }
 0x41b   :  { %11139 = vmatprep.mubr.bf16.mxu1 %v15474_v34  ;;  %11440 = vmatpush3.bf16.msra.mxu0 %v5592_v26  ;;  %v5385_v34 = vrot.slane %v17805_v18, 7  ;;  %v17807_v26 = vshll.u32 %v15752_v14, 16  ;;  %v5394_v18 = vshll.u32 %v15762_v30, 16 }
 0x41c   :  { %11441 = vmatprep.subr.bf16.mxu0 %v5593_v42  ;;  %v5380_v20 = vor.u32 %v17806_v62, %v5377_v51  ;;  %v17811_v62 = vshll.u32 %v15767_v17, 16 }
 0x41f   :  { %11442 = vmatpush3.bf16.msra.mxu0 %v5593_v42  ;;  %v5595_v42 = vld [vmem:[#allocation3 + $0x1b8] sm:$0xff] }
 0x420   :  { %11443 = vmatprep.subr.bf16.mxu0 %v5594_v31 }
 0x421   :  { %11416 = vmatmul.mubr.bf16.gmra.mrb[168].mxu0 %v15884_v56 }
 0x422   :  { %11140 = vmatmul.mubr.bf16.vlgmr.msra.gmra.mrb[28].mxu1 %v12952_v9  ;;  %11419 = vmatprep.mubr.bf16.mxu0 %v15890_v25  ;;  %v5388_v9 = vor.u32 %v17807_v26, %v5385_v34 }
 0x423   :  { %11168 = vmatpush3.bf16.msra.mxu1 %v15797_v38  ;;  %11143 = vmatprep.mubr.bf16.mxu1 %v15483_v63  ;;  %v15906_v63 = vsel %vm2974_vm15, %v5369_v12, %v5380_v20  ;;  %v5401_v38 = vrot.slane %v17810_v50, 7  ;;  %v17812_v12 = vshrl.u32 %v15780_v6, 16  ;;  %v12954_v50 = vld [vmem:[#allocation2 + $0xa8] sm:$0xff] }
 0x424   :  { %11169 = vmatprep.subr.bf16.mxu1 %v4026_v61  ;;  %11444 = vmatpush3.bf16.msra.mxu0 %v5594_v31  ;;  %v15912_v26 = vsel %vm2974_vm15, %v5377_v51, %v5388_v9  ;;  %v4028_v31 = vld [vmem:[#allocation3 + $0x338] sm:$0xff]  ;;  %v4029_v51 = vld [vmem:[#allocation3 + $0x340] sm:$0xff] }
 0x425   :  { %11445 = vmatprep.subr.bf16.mxu0 %v5595_v42  ;;  %v5404_v20 = vor.u32 %v17811_v62, %v5401_v38  ;;  %v4030_v62 = vld [vmem:[#allocation3 + $0x348] sm:$0xff] }
 0x427   :  { %11170 = vmatpush3.bf16.msra.mxu1 %v4026_v61  ;;  %v5396_v61 = vor.u32 %v5394_v18, %v5393_v23 }
 0x428   :  { %11171 = vmatprep.subr.bf16.mxu1 %v4027_v40  ;;  %11446 = vmatpush3.bf16.msra.mxu0 %v5595_v42  ;;  %v5410_v42 = vshll.u32 %v15780_v6, 16 }
 0x429   :  { %11420 = vmatmul.mubr.bf16.gmra.mrb[172].mxu0 %v15906_v63  ;;  %11475 = vmatprep.subr.bf16.mxu0 %v5901_v2  ;;  %v15928_v9 = vsel %vm2974_vm15, %v5385_v34, %v5396_v61 }
 0x42a   :  { %11144 = vmatmul.mubr.bf16.gmra.mrb[32].mxu1 %v12953_v57  ;;  %11423 = vmatprep.mubr.bf16.mxu0 %v15912_v26  ;;  %v15924_v57 = vrot.slane %v17812_v12, 7 }
 0x42b   :  { %11147 = vmatprep.mubr.bf16.mxu1 %v15508_v49  ;;  %11172 = vmatpush3.bf16.msra.mxu1 %v4027_v40  ;;  %v15931_v49 = vsel %vm2974_vm15, %v5393_v23, %v5404_v20  ;;  %v5601_v40 = vrot.slane %v5306_v41, 1  ;;  %v5606_v41 = vrot.slane %v5314_v58, 1 }
 0x42c   :  { %11173 = vmatprep.subr.bf16.mxu1 %v4028_v31  ;;  %v5412_v12 = vor.u32 %v5410_v42, %v15924_v57 }
 0x42d   :  { %v5602_v34 = vor.u32 %v5601_v40, %v5303_v21  ;;  %v5610_v21 = vor.u32 %v5606_v41, %v5311_v48 }
 0x42e   :  { %v15946_v23 = vsel %vm2974_vm15, %v5401_v38, %v5412_v12  ;;  %v5903_v12 = vld [vmem:[#allocation3 + $0x230] sm:$0xff] }
 0x42f   :  { %11174 = vmatpush3.bf16.msra.mxu1 %v4028_v31  ;;  %v5607_v31 = vsel %vm3274_vm1, %v5602_v34, %v5606_v41  ;;  %v18408_v41 = vshrl.u32 %v15738_v36, 16 }
 0x430   :  { %11175 = vmatprep.subr.bf16.mxu1 %v4029_v51 }
 0x431   :  { %11424 = vmatmul.mubr.bf16.gmra.mrb[176].mxu0 %v15928_v9 }
 0x432   :  { %11148 = vmatmul.mubr.bf16.gmra.mrb[36].mxu1 %v12954_v50  ;;  %11427 = vmatprep.mubr.bf16.mxu0 %v15931_v49  ;;  %v4031_v50 = vld [vmem:[#allocation3 + $0x350] sm:$0xff] }
 0x433   :  { %11151 = vmatprep.mubr.bf16.mxu1 %v15536_v55  ;;  %11176 = vmatpush3.bf16.msra.mxu1 %v4029_v51  ;;  %v5614_v55 = vrot.slane %v5322_v52, 1 }
 0x434   :  { %11177 = vmatprep.subr.bf16.mxu1 %v4030_v62 }
 0x435   :  { %v5618_v58 = vor.u32 %v5614_v55, %v5319_v22  ;;  %v5615_v38 = vsel %vm3274_vm1, %v5610_v21, %v5614_v55  ;;  %v5634_v22 = vor.u32 %v5630_v19, %v5335_v15  ;;  %v18407_v15 = vshrl.u32 %v15734_v47, 16  ;;  %v5905_v47 = vld [vmem:[#allocation3 + $0x240] sm:$0xff] }
 0x437   :  { %11178 = vmatpush3.bf16.msra.mxu1 %v4030_v62  ;;  %v5622_v62 = vrot.slane %v5330_v7, 1  ;;  %v5638_v7 = vrot.slane %v5346_v28, 1 }
 0x438   :  { %11179 = vmatprep.subr.bf16.mxu1 %v4031_v50 }
 0x439   :  { %11428 = vmatmul.mubr.bf16.gmra.mrb[180].mxu0 %v15946_v23  ;;  %v5623_v52 = vsel %vm3274_vm1, %v5618_v58, %v5622_v62  ;;  %v5626_v48 = vor.u32 %v5622_v62, %v5327_v11  ;;  %v5904_v11 = vld [vmem:[#allocation3 + $0x238] sm:$0xff]  ;;  %v5642_v28 = vor.u32 %v5638_v7, %v18407_v15  ;;  %v4057_v62 = vshll.u32 %v15994_v13, 16 }
 0x43a   :  { %11152 = vmatmul.mubr.bf16.gmra.mrb[40].mxu1 %v15538_v29  ;;  %11447 = vmatprep.mubr.bf16.mxu0 %v5607_v31  ;;  %v15960_v29 = vld [vmem:[#allocation3 + $0x3c0] sm:$0xff] }
 0x43b   :  { %11155 = vmatprep.mubr.bf16.mxu1 %v15556_v1  ;;  %11180 = vmatpush3.bf16.msra.mxu1 %v4031_v50  ;;  %v4009_v1 = vld [vmem:[#allocation2 + $0x30] sm:$0xff]  ;;  %v5631_v59 = vsel %vm3274_vm1, %v5626_v48, %v5630_v19  ;;  %v18409_v50 = vshll.u32 %v15742_v16, 16  ;;  %v5647_v55 = vsel %vm3274_vm1, %v5642_v28, %v5646_v27  ;;  %v18410_v19 = vshrl.u32 %v15742_v16, 16  ;;  %v16022_v16 = vld [vmem:[#allocation2 + $0xa8] sm:$0xff] }
 0x43c   :  { %11181 = vmatprep.subr.bf16.mxu1 %v4032_v32  ;;  %v4036_v61 = vshll.u32 %v4009_v1, 16  ;;  %v4034_v20 = vshrl.u32 %v4009_v1, 16  ;;  %v18411_v48 = vshll.u32 %v15744_v0, 16 }
 0x43d   :  { %v5654_v31 = vrot.slane %v18409_v50, 1 }
 0x43e   :  { %v4038_v51 = vrot.slane %v4036_v61, 1 }
 0x43f   :  { %11182 = vmatpush3.bf16.msra.mxu1 %v4032_v32 }
 0x440   :  { %11211 = vmatprep.subr.bf16.mxu1 %v15960_v29  ;;  %v4039_v40 = vor.u32 %v4038_v51, %v4034_v20  ;;  %v18413_v20 = vshll.u32 %v15750_v24, 16 }
 0x441   :  { %11448 = vmatmul.mubr.bf16.vlgmr.msra.gmra.mrb[156].mxu0 %v5615_v38 }
 0x442   :  { %11156 = vmatmul.mubr.bf16.gmra.mrb[44].mxu1 %v15564_v60  ;;  %11451 = vmatprep.mubr.bf16.mxu0 %v5623_v52  ;;  %v15975_v60 = vld [vmem:[#allocation2 + $0x48] sm:$0xff]  ;;  %v5906_v52 = vld [vmem:[#allocation3 + $0x248] sm:$0xff]  ;;  %v5670_v51 = vrot.slane %v18413_v20, 1 }
 0x443   :  { %11159 = vmatprep.mubr.bf16.mxu1 %v15576_v43  ;;  %11476 = vmatpush3.bf16.msra.mxu0 %v5901_v2  ;;  %v5639_v43 = vsel %vm3274_vm1, %v5634_v22, %v5638_v7  ;;  %v4041_v5 = vshll.u32 %v15975_v60, 16  ;;  %v15986_v2 = vld [vmem:[#allocation2 + $0x60] sm:$0xff]  ;;  %v4045_v32 = vshrl.u32 %v15975_v60, 16  ;;  %v5662_v22 = vrot.slane %v18411_v48, 1  ;;  %v16012_v7 = vld [vmem:[#allocation2 + $0x90] sm:$0xff] }
 0x444   :  { %11477 = vmatprep.subr.bf16.mxu0 %v5902_v53  ;;  %v4053_v36 = vshrl.u32 %v15986_v2, 16  ;;  %v18416_v48 = vshrl.u32 %v15752_v14, 16 }
 0x445   :  { %v4043_v34 = vrot.slane %v4041_v5, 1 }
 0x447   :  { %11478 = vmatpush3.bf16.msra.mxu0 %v5902_v53  ;;  %v4044_v21 = vsel %vm3274_vm1, %v4039_v40, %v4043_v34  ;;  %v4047_v1 = vor.u32 %v4045_v32, %v4043_v34  ;;  %v5658_v53 = vor.u32 %v5654_v31, %v18410_v19  ;;  %v4061_v40 = vshrl.u32 %v15994_v13, 16 }
 0x448   :  { %11479 = vmatprep.subr.bf16.mxu0 %v5903_v12 }
 0x449   :  { %11452 = vmatmul.mubr.bf16.gmra.mrb[160].mxu0 %v5631_v59  ;;  %v18412_v59 = vshrl.u32 %v15744_v0, 16  ;;  %v5663_v28 = vsel %vm3274_vm1, %v5658_v53, %v5662_v22  ;;  %v4069_v0 = vshrl.u32 %v16012_v7, 16  ;;  %v4341_v53 = vld [vmem:[#allocation3 + $0x3d0] sm:$0xff] }
 0x44a   :  { %11160 = vmatmul.mubr.bf16.gmra.mrb[48].mxu1 %v15582_v46  ;;  %11455 = vmatprep.mubr.bf16.mxu0 %v5639_v43  ;;  %v5650_v46 = vor.u32 %v5646_v27, %v18408_v41  ;;  %v4065_v27 = vshll.u32 %v16012_v7, 16  ;;  %v4073_v41 = vshll.u32 %v16022_v16, 16 }
 0x44b   :  { %11163 = vmatprep.mubr.bf16.mxu1 %v15590_v39  ;;  %11480 = vmatpush3.bf16.msra.mxu0 %v5903_v12  ;;  %v4049_v39 = vshll.u32 %v15986_v2, 16  ;;  %v4059_v12 = vrot.slane %v4057_v62, 1  ;;  %v5666_v43 = vor.u32 %v5662_v22, %v18412_v59 }
 0x44c   :  { %11481 = vmatprep.subr.bf16.mxu0 %v5904_v11  ;;  %v5655_v58 = vsel %vm3274_vm1, %v5650_v46, %v5654_v31  ;;  %v4340_v46 = vld [vmem:[#allocation3 + $0x3c8] sm:$0xff]  ;;  %v4067_v31 = vrot.slane %v4065_v27, 1 }
 0x44d   :  { %v4051_v38 = vrot.slane %v4049_v39, 1  ;;  %v5671_v50 = vsel %vm3274_vm1, %v5666_v43, %v5670_v51 }
 0x44e   :  { %v4071_v19 = vor.u32 %v4069_v0, %v4067_v31 }
 0x44f   :  { %11482 = vmatpush3.bf16.msra.mxu0 %v5904_v11  ;;  %v4055_v61 = vor.u32 %v4053_v36, %v4051_v38  ;;  %v5907_v11 = vld [vmem:[#allocation3 + $0x250] sm:$0xff]  ;;  %v4052_v15 = vsel %vm3274_vm1, %v4047_v1, %v4051_v38  ;;  %v5908_v1 = vld [vmem:[#allocation3 + $0x258] sm:$0xff] }
 0x450   :  { %11483 = vmatprep.subr.bf16.mxu0 %v5905_v47 }
 0x451   :  { %11456 = vmatmul.mubr.bf16.gmra.mrb[164].mxu0 %v5647_v55  ;;  %v4060_v34 = vsel %vm3274_vm1, %v4055_v61, %v4059_v12  ;;  %v18414_v55 = vshrl.u32 %v15750_v24, 16  ;;  %v5686_v24 = vrot.slane %v5394_v18, 1  ;;  %v16051_v61 = vld [vmem:[#allocation2 + $0xd8] sm:$0xff] }
 0x452   :  { %11164 = vmatmul.mubr.bf16.gmra.mrb[52].mxu1 %v15810_v37  ;;  %11459 = vmatprep.mubr.bf16.mxu0 %v5655_v58  ;;  %v18415_v58 = vshll.u32 %v15752_v14, 16  ;;  %v17813_v18 = vshll.u32 %v16051_v61, 16 }
 0x453   :  { %11183 = vmatprep.mubr.bf16.mxu1 %v4044_v21  ;;  %11484 = vmatpush3.bf16.msra.mxu0 %v5905_v47  ;;  %v4063_v47 = vor.u32 %v4061_v40, %v4059_v12  ;;  %v5674_v21 = vor.u32 %v5670_v51, %v18414_v55  ;;  %v4077_v12 = vshrl.u32 %v16022_v16, 16  ;;  %v18418_v55 = vshrl.u32 %v15762_v30, 16 }
 0x454   :  { %11485 = vmatprep.subr.bf16.mxu0 %v5906_v52  ;;  %v5678_v38 = vrot.slane %v18415_v58, 1 }
 0x455   :  { %v4068_v43 = vsel %vm3274_vm1, %v4063_v47, %v4067_v31  ;;  %v16067_v31 = vld [vmem:[#allocation2 + $0xf0] sm:$0xff] }
 0x456   :  { %v5682_v22 = vor.u32 %v5678_v38, %v18416_v48  ;;  %v5679_v20 = vsel %vm3274_vm1, %v5674_v21, %v5678_v38  ;;  %v16069_v47 = vld [vmem:[#allocation3 + $0x2c0] sm:$0xff]  ;;  %v5690_v21 = vor.u32 %v5686_v24, %v18418_v55  ;;  %v4091_v38 = vrot.slane %v17813_v18, 1 }
 0x457   :  { %11486 = vmatpush3.bf16.msra.mxu0 %v5906_v52  ;;  %v16041_v52 = vld [vmem:[#allocation2 + $0xc0] sm:$0xff]  ;;  %v5587_v48 = vld [vmem:[#allocation2 + $0x170] sm:$0x1]  ;;  %v4097_v30 = vshll.u32 %v16067_v31, 16 }
 0x458   :  { %11487 = vmatprep.subr.bf16.mxu0 %v5907_v11  ;;  %v4081_v59 = vshll.u32 %v16041_v52, 16  ;;  %v4085_v51 = vshrl.u32 %v16041_v52, 16 }
 0x459   :  { %11460 = vmatmul.mubr.bf16.gmra.mrb[168].mxu0 %v5663_v28  ;;  %v4099_v18 = vrot.slane %v4097_v30, 1 }
 0x45a   :  { %11184 = vmatmul.mubr.bf16.vlgmr.msra.gmra.mrb[28].mxu1 %v4052_v15  ;;  %11463 = vmatprep.mubr.bf16.mxu0 %v5671_v50  ;;  %v5687_v15 = vsel %vm3274_vm1, %v5682_v22, %v5686_v24  ;;  %v16081_v22 = vld [vmem:[#allocation2 + $0x108] sm:$0xff]  ;;  %v5899_v24 = vld [vmem:[#allocation2 + $0x20] sm:$0x80] }
 0x45b   :  { %11212 = vmatpush3.bf16.msra.mxu1 %v15960_v29  ;;  %11187 = vmatprep.mubr.bf16.mxu1 %v4060_v34  ;;  %v4075_v29 = vrot.slane %v4073_v41, 1  ;;  %v4083_v34 = vrot.slane %v4081_v59, 1 }
 0x45c   :  { %11213 = vmatprep.subr.bf16.mxu1 %v4340_v46  ;;  %11488 = vmatpush3.bf16.msra.mxu0 %v5907_v11  ;;  %v4342_v11 = vld [vmem:[#allocation3 + $0x3d8] sm:$0xff] }
 0x45d   :  { %11489 = vmatprep.subr.bf16.mxu0 %v5908_v1  ;;  %v4076_v14 = vsel %vm3274_vm1, %v4071_v19, %v4075_v29  ;;  %v4079_v28 = vor.u32 %v4077_v12, %v4075_v29  ;;  %v4087_v58 = vor.u32 %v4085_v51, %v4083_v34  ;;  %v5702_v29 = vrot.slane %v5410_v42, 1 }
 0x45e   :  { %v4105_v42 = vshll.u32 %v16081_v22, 16 }
 0x45f   :  { %11214 = vmatpush3.bf16.msra.mxu1 %v4340_v46  ;;  %v18417_v46 = vshll.u32 %v15767_v17, 16 }
 0x460   :  { %11215 = vmatprep.subr.bf16.mxu1 %v4341_v53  ;;  %11490 = vmatpush3.bf16.msra.mxu0 %v5908_v1  ;;  %v18419_v1 = vshrl.u32 %v15767_v17, 16  ;;  %v5708_v17 = vshll.u32 %v5587_v48, 16  ;;  %v16102_v48 = vld [vmem:[#allocation2 + $0x120] sm:$0xff] }
 0x461   :  { %11464 = vmatmul.mubr.bf16.gmra.mrb[172].mxu0 %v5679_v20  ;;  %v5694_v50 = vrot.slane %v18417_v46, 1  ;;  %11519 = vmatprep.subr.bf16.mxu0 %v16069_v47  ;;  %v4093_v20 = vshrl.u32 %v16051_v61, 16  ;;  %v4092_v46 = vsel %vm3274_vm1, %v4087_v58, %v4091_v38 }
 0x462   :  { %11188 = vmatmul.mubr.bf16.gmra.mrb[32].mxu1 %v4068_v43  ;;  %11467 = vmatprep.mubr.bf16.mxu0 %v5687_v15  ;;  %v4084_v43 = vsel %vm3274_vm1, %v4079_v28, %v4083_v34  ;;  %v4101_v15 = vshrl.u32 %v16067_v31, 16  ;;  %v18420_v34 = vshrl.u32 %v15780_v6, 16  ;;  %v4345_v6 = vld [vmem:[#allocation3 + $0x3f0] sm:$0xff] }
 0x463   :  { %11191 = vmatprep.mubr.bf16.mxu1 %v4076_v14  ;;  %11216 = vmatpush3.bf16.msra.mxu1 %v4341_v53  ;;  %v5698_v19 = vor.u32 %v5694_v50, %v18419_v1  ;;  %v4343_v53 = vld [vmem:[#allocation3 + $0x3e0] sm:$0xff]  ;;  %v5695_v14 = vsel %vm3274_vm1, %v5690_v21, %v5694_v50  ;;  %v5910_v1 = vshrl.u32 %v5899_v24, 16  ;;  %v4095_v28 = vor.u32 %v4093_v20, %v4091_v38 }
 0x464   :  { %11217 = vmatprep.subr.bf16.mxu1 %v4342_v11  ;;  %v5706_v50 = vor.u32 %v5702_v29, %v18420_v34  ;;  %v5710_v21 = vrot.slane %v5708_v17, 1  ;;  %v4103_v58 = vor.u32 %v4101_v15, %v4099_v18  ;;  %v4109_v38 = vshrl.u32 %v16081_v22, 16 }
 0x465   :  { %v5703_v55 = vsel %vm3274_vm1, %v5698_v19, %v5702_v29  ;;  %v4107_v19 = vrot.slane %v4105_v42, 1  ;;  %v5912_v24 = vrot.slane %v5910_v1, 7  ;;  %v4100_v29 = vsel %vm3274_vm1, %v4095_v28, %v4099_v18  ;;  %v16121_v28 = vld [vmem:[#allocation2 + $0x150] sm:$0xff] }
 0x466   :  { %v5711_v17 = vsel %vm3274_vm1, %v5706_v50, %v5710_v21  ;;  %v4346_v50 = vld [vmem:[#allocation3 + $0x3f8] sm:$0xff]  ;;  %v17814_v21 = vshll.u32 %v16121_v28, 16 }
 0x467   :  { %11218 = vmatpush3.bf16.msra.mxu1 %v4342_v11  ;;  %v4344_v11 = vld [vmem:[#allocation3 + $0x3e8] sm:$0xff]  ;;  %v4111_v34 = vor.u32 %v4109_v38, %v4107_v19 }
 0x468   :  { %11219 = vmatprep.subr.bf16.mxu1 %v4343_v53 }
 0x469   :  { %11468 = vmatmul.mubr.bf16.gmra.mrb[176].mxu0 %v5695_v14  ;;  %v17816_v14 = vshll.u32 %v16102_v48, 16 }
 0x46a   :  { %11192 = vmatmul.mubr.bf16.gmra.mrb[36].mxu1 %v4084_v43  ;;  %11471 = vmatprep.mubr.bf16.mxu0 %v5703_v55  ;;  %v16104_v43 = vld [vmem:[#allocation2 + $0x138] sm:$0xff]  ;;  %v5915_v55 = vsel %vm2974_vm15, %v5912_v24, %v15790_v44 }
 0x46b   :  { %11195 = vmatprep.mubr.bf16.mxu1 %v4092_v46  ;;  %11220 = vmatpush3.bf16.msra.mxu1 %v4343_v53  ;;  %v4108_v46 = vsel %vm3274_vm1, %v4103_v58, %v4107_v19  ;;  %v4117_v53 = vshrl.u32 %v16102_v48, 16  ;;  %v17815_v1 = vshll.u32 %v16104_v43, 16  ;;  %v16119_v18 = vrot.slane %v17816_v14, 1  ;;  %v16131_v19 = vld [vmem:[#allocation3 + $0x460] sm:$0xff] }
 0x46c   :  { %11221 = vmatprep.subr.bf16.mxu1 %v4344_v11  ;;  %v17818_v24 = vshrl.u32 %v16104_v43, 16 }
 0x46d   :  { %v4119_v44 = vor.u32 %v4117_v53, %v16119_v18  ;;  %v4116_v58 = vsel %vm3274_vm1, %v4111_v34, %v16119_v18 }
 0x46f   :  { %11222 = vmatpush3.bf16.msra.mxu1 %v4344_v11  ;;  %v4123_v11 = vrot.slane %v17815_v1, 1 }
 0x470   :  { %11223 = vmatprep.subr.bf16.mxu1 %v4345_v6 }
 0x471   :  { %11472 = vmatmul.mubr.bf16.gmra.mrb[180].mxu0 %v5711_v17  ;;  %v16136_v17 = vsel %vm3274_vm1, %v4119_v44, %v4123_v11 }
 0x472   :  { %11196 = vmatmul.mubr.bf16.gmra.mrb[40].mxu1 %v4100_v29  ;;  %11491 = vmatprep.mubr.bf16.mxu0 %v5915_v55  ;;  %v17817_v29 = vshrl.u32 %v16121_v28, 16  ;;  %v4127_v55 = vor.u32 %v17818_v24, %v4123_v11 }
 0x473   :  { %11199 = vmatprep.mubr.bf16.mxu1 %v4108_v46  ;;  %11224 = vmatpush3.bf16.msra.mxu1 %v4345_v6  ;;  %v4131_v46 = vrot.slane %v17814_v21, 1  ;;  %v6148_v6 = vld [vmem:[#allocation3 + $0x2c8] sm:$0xff]  ;;  %v4023_v21 = vld [vmem:[#allocation2 + $0x180] sm:$0x1] }
 0x474   :  { %11225 = vmatprep.subr.bf16.mxu1 %v4346_v50  ;;  %v4145_v11 = vshll.u32 %v4023_v21, 16 }
 0x475   :  { %v16148_v34 = vor.u32 %v17817_v29, %v4131_v46  ;;  %v16154_v1 = vsel %vm3274_vm1, %v4127_v55, %v4131_v46  ;;  %v4351_v29 = vrot.slane %v4045_v32, 7  ;;  %v18422_v46 = vshrl.u32 %v15810_v37, 16  ;;  %v6151_v32 = vld [vmem:[#allocation3 + $0x2e0] sm:$0xff] }
 0x477   :  { %11226 = vmatpush3.bf16.msra.mxu1 %v4346_v50  ;;  %v18421_v50 = vshll.u32 %v15810_v37, 16  ;;  %v4352_v21 = vor.u32 %v4351_v29, %v4041_v5  ;;  %v6152_v37 = vld [vmem:[#allocation3 + $0x2e8] sm:$0xff] }
 0x478   :  { %11255 = vmatprep.subr.bf16.mxu1 %v16131_v19 }
 0x479   :  { %11492 = vmatmul.mubr.bf16.vlgmr.msra.gmra.mrb[156].mxu0 %v15808_v4  ;;  %v4139_v44 = vrot.slane %v18421_v50, 1  ;;  %v6149_v4 = vld [vmem:[#allocation3 + $0x2d0] sm:$0xff]  ;;  %v4147_v50 = vrot.slane %v4145_v11, 1 }
 0x47a   :  { %11200 = vmatmul.mubr.bf16.gmra.mrb[44].mxu1 %v4116_v58  ;;  %11495 = vmatprep.mubr.bf16.mxu0 %v15828_v45  ;;  %v4336_v58 = vld [vmem:[#allocation2 + $0x30] sm:$0x80] }
 0x47b   :  { %11203 = vmatprep.mubr.bf16.mxu1 %v16136_v17  ;;  %11520 = vmatpush3.bf16.msra.mxu0 %v16069_v47  ;;  %v4140_v45 = vsel %vm3274_vm1, %v16148_v34, %v4139_v44  ;;  %v4348_v14 = vshrl.u32 %v4336_v58, 16  ;;  %v6150_v47 = vld [vmem:[#allocation3 + $0x2d8] sm:$0xff]  ;;  %v4143_v55 = vor.u32 %v4139_v44, %v18422_v46  ;;  %v4363_v44 = vrot.slane %v4077_v12, 7  ;;  %v4588_v12 = vld [vmem:[#allocation3 + $0x470] sm:$0xff] }
 0x47c   :  { %11521 = vmatprep.subr.bf16.mxu0 %v6148_v6 }
 0x47d   :  { %v4350_v24 = vrot.slane %v4348_v14, 7  ;;  %v6153_v14 = vld [vmem:[#allocation3 + $0x2f0] sm:$0xff] }
 0x47f   :  { %11522 = vmatpush3.bf16.msra.mxu0 %v6148_v6  ;;  %v4354_v6 = vrot.slane %v4053_v36, 7  ;;  %v4353_v58 = vsel %vm2974_vm15, %v4350_v24, %v4352_v21  ;;  %v4360_v24 = vrot.slane %v4069_v0, 7  ;;  %v4364_v0 = vor.u32 %v4363_v44, %v4073_v41  ;;  %v4591_v21 = vld [vmem:[#allocation3 + $0x488] sm:$0xff] }
 0x480   :  { %11523 = vmatprep.subr.bf16.mxu0 %v6149_v4 }
 0x481   :  { %11496 = vmatmul.mubr.bf16.gmra.mrb[160].mxu0 %v15839_v10  ;;  %v4148_v10 = vsel %vm3274_vm1, %v4143_v55, %v4147_v50  ;;  %v4355_v5 = vor.u32 %v4354_v6, %v4049_v39  ;;  %v4361_v39 = vor.u32 %v4360_v24, %v4065_v27  ;;  %v4369_v27 = vrot.slane %v4093_v20, 7 }
 0x482   :  { %11204 = vmatmul.mubr.bf16.gmra.mrb[48].mxu1 %v16154_v1  ;;  %11499 = vmatprep.mubr.bf16.mxu0 %v15863_v8  ;;  %v4357_v8 = vrot.slane %v4061_v40, 7  ;;  %v18423_v20 = vshll.u32 %v16051_v61, 16  ;;  %v4375_v50 = vrot.slane %v4109_v38, 7  ;;  %v4592_v38 = vld [vmem:[#allocation3 + $0x490] sm:$0xff] }
 0x483   :  { %11207 = vmatprep.mubr.bf16.mxu1 %v4140_v45  ;;  %11524 = vmatpush3.bf16.msra.mxu0 %v6149_v4  ;;  %v4356_v40 = vsel %vm2974_vm15, %v4351_v29, %v4355_v5  ;;  %v4366_v29 = vrot.slane %v4085_v51, 7  ;;  %v16198_v4 = vld [vmem:[#allocation2 + $0x170] sm:$0xff]  ;;  %v18425_v5 = vshll.u32 %v16102_v48, 16 }
 0x484   :  { %11525 = vmatprep.subr.bf16.mxu0 %v6150_v47  ;;  %v4358_v36 = vor.u32 %v4357_v8, %v4057_v62  ;;  %v6154_v62 = vld [vmem:[#allocation3 + $0x2f8] sm:$0xff]  ;;  %v6343_v51 = vld [vmem:[#allocation3 + $0x360] sm:$0xff]  ;;  %v5953_v45 = vshrl.u32 %v16198_v4, 16  ;;  %v4370_v11 = vor.u32 %v4369_v27, %v18423_v20  ;;  %v5956_v55 = vshll.u32 %v16198_v4, 16 }
 0x485   :  { %v4367_v41 = vor.u32 %v4366_v29, %v4081_v59 }
 0x486   :  { %v16212_v59 = vrot.slane %v5953_v45, 7 }
 0x487   :  { %11526 = vmatpush3.bf16.msra.mxu0 %v6150_v47  ;;  %v4590_v47 = vld [vmem:[#allocation3 + $0x480] sm:$0xff]  ;;  %v4368_v46 = vsel %vm2974_vm15, %v4363_v44, %v4367_v41  ;;  %v16246_v44 = vld [vmem:[#allocation2 + $0x180] sm:$0xff] }
 0x488   :  { %11527 = vmatprep.subr.bf16.mxu0 %v6151_v32  ;;  %v4394_v41 = vshll.u32 %v16246_v44, 16 }
 0x489   :  { %11500 = vmatmul.mubr.bf16.gmra.mrb[164].mxu0 %v15866_v3  ;;  %v4359_v3 = vsel %vm2974_vm15, %v4354_v6, %v4358_v36  ;;  %v4376_v6 = vor.u32 %v4375_v50, %v4105_v42  ;;  %v4593_v42 = vld [vmem:[#allocation3 + $0x498] sm:$0xff] }
 0x48a   :  { %11208 = vmatmul.mubr.bf16.gmra.mrb[52].mxu1 %v4148_v10  ;;  %11503 = vmatprep.mubr.bf16.mxu0 %v15884_v56  ;;  %v4587_v56 = vld [vmem:[#allocation3 + $0x468] sm:$0xff] }
 0x48b   :  { %11227 = vmatprep.mubr.bf16.mxu1 %v4353_v58  ;;  %11528 = vmatpush3.bf16.msra.mxu0 %v6151_v32  ;;  %v16225_v32 = vor.u32 %v5956_v55, %v16212_v59  ;;  %v18424_v58 = vshrl.u32 %v16104_v43, 16 }
 0x48c   :  { %11529 = vmatprep.subr.bf16.mxu0 %v6152_v37 }
 0x48f   :  { %11530 = vmatpush3.bf16.msra.mxu0 %v6152_v37  ;;  %v12955_v37 = vld [vmem:[#allocation2 + $0x38] sm:$0xff] }
 0x490   :  { %11531 = vmatprep.subr.bf16.mxu0 %v6153_v14 }
 0x491   :  { %11504 = vmatmul.mubr.bf16.gmra.mrb[168].mxu0 %v15890_v25  ;;  %v4362_v25 = vsel %vm2974_vm15, %v4357_v8, %v4361_v39  ;;  %v4381_v8 = vrot.slane %v18424_v58, 7  ;;  %v12957_v39 = vld [vmem:[#allocation2 + $0x50] sm:$0xff] }
 0x492   :  { %11228 = vmatmul.mubr.bf16.vlgmr.msra.gmra.mrb[28].mxu1 %v4356_v40  ;;  %11507 = vmatprep.mubr.bf16.mxu0 %v15906_v63  ;;  %v4589_v63 = vld [vmem:[#allocation3 + $0x478] sm:$0xff]  ;;  %v18427_v40 = vshrl.u32 %v16121_v28, 16 }
 0x493   :  { %11256 = vmatpush3.bf16.msra.mxu1 %v16131_v19  ;;  %11231 = vmatprep.mubr.bf16.mxu1 %v4359_v3  ;;  %v4365_v19 = vsel %vm2974_vm15, %v4360_v24, %v4364_v0  ;;  %v12958_v0 = vld [vmem:[#allocation2 + $0x68] sm:$0xff] }
 0x494   :  { %11257 = vmatprep.subr.bf16.mxu1 %v4587_v56  ;;  %11532 = vmatpush3.bf16.msra.mxu0 %v6153_v14  ;;  %v4384_v24 = vrot.slane %v18427_v40, 7  ;;  %v12973_v40 = vld [vmem:[#allocation3 + $0x528] sm:$0xff] }
 0x495   :  { %11533 = vmatprep.subr.bf16.mxu0 %v6154_v62 }
 0x496   :  { %v4389_v20 = vsel %vm2974_vm15, %v4384_v24, %v15851_v54  ;;  %v12961_v54 = vld [vmem:[#allocation2 + $0xb0] sm:$0xff] }
 0x497   :  { %11258 = vmatpush3.bf16.msra.mxu1 %v4587_v56  ;;  %v12956_v56 = vld [vmem:[#allocation3 + $0x500] sm:$0xff] }
 0x498   :  { %11259 = vmatprep.subr.bf16.mxu1 %v4588_v12  ;;  %11534 = vmatpush3.bf16.msra.mxu0 %v6154_v62  ;;  %v6344_v62 = vld [vmem:[#allocation3 + $0x368] sm:$0xff] }
 0x499   :  { %11508 = vmatmul.mubr.bf16.gmra.mrb[172].mxu0 %v15912_v26  ;;  %11563 = vmatprep.subr.bf16.mxu0 %v6343_v51  ;;  %v4372_v26 = vrot.slane %v4101_v15, 7 }
 0x49a   :  { %11232 = vmatmul.mubr.bf16.gmra.mrb[32].mxu1 %v4362_v25  ;;  %11511 = vmatprep.mubr.bf16.mxu0 %v15928_v9  ;;  %v4371_v9 = vsel %vm2974_vm15, %v4366_v29, %v4370_v11  ;;  %v4391_v25 = vshrl.u32 %v16246_v44, 16  ;;  %v12959_v11 = vld [vmem:[#allocation2 + $0x80] sm:$0xff] }
 0x49b   :  { %11235 = vmatprep.mubr.bf16.mxu1 %v4365_v19  ;;  %11260 = vmatpush3.bf16.msra.mxu1 %v4588_v12  ;;  %v4373_v15 = vor.u32 %v4372_v26, %v4097_v30  ;;  %v4378_v30 = vrot.slane %v4117_v53, 7  ;;  %v4377_v10 = vsel %vm2974_vm15, %v4372_v26, %v4376_v6  ;;  %v18428_v12 = vshll.u32 %v16121_v28, 16  ;;  %v6345_v19 = vld [vmem:[#allocation3 + $0x370] sm:$0xff]  ;;  %v6347_v26 = vld [vmem:[#allocation3 + $0x380] sm:$0xff] }
 0x49c   :  { %11261 = vmatprep.subr.bf16.mxu1 %v4589_v63  ;;  %v12963_v6 = vld [vmem:[#allocation2 + $0xe0] sm:$0xff] }
 0x49d   :  { %v4379_v36 = vor.u32 %v4378_v30, %v18425_v5  ;;  %v4385_v29 = vor.u32 %v4384_v24, %v18428_v12  ;;  %v16278_v24 = vld [vmem:[#allocation2 + $0x80] sm:$0xff] }
 0x49f   :  { %11262 = vmatpush3.bf16.msra.mxu1 %v4589_v63  ;;  %v4380_v53 = vsel %vm2974_vm15, %v4375_v50, %v4379_v36  ;;  %v4393_v63 = vrot.slane %v4391_v25, 7  ;;  %v6348_v50 = vld [vmem:[#allocation3 + $0x388] sm:$0xff] }
 0x4a0   :  { %11263 = vmatprep.subr.bf16.mxu1 %v4590_v47  ;;  %v12972_v36 = vld [vmem:[#allocation2 + $0x158] sm:$0xff] }
 0x4a1   :  { %11512 = vmatmul.mubr.bf16.gmra.mrb[176].mxu0 %v15931_v49  ;;  %v4374_v49 = vsel %vm2974_vm15, %v4369_v27, %v4373_v15  ;;  %v4386_v27 = vsel %vm2974_vm15, %v4381_v8, %v4385_v29  ;;  %v6349_v15 = vld [vmem:[#allocation3 + $0x390] sm:$0xff]  ;;  %v16292_v29 = vld [vmem:[#allocation2 + $0x98] sm:$0xff] }
 0x4a2   :  { %11236 = vmatmul.mubr.bf16.gmra.mrb[36].mxu1 %v4368_v46  ;;  %11515 = vmatprep.mubr.bf16.mxu0 %v15946_v23  ;;  %v5959_v23 = vsel %vm2974_vm15, %v15924_v57, %v16225_v32  ;;  %v18426_v57 = vshll.u32 %v16104_v43, 16  ;;  %v4396_v46 = vor.u32 %v4394_v41, %v4393_v63  ;;  %v12975_v63 = vld [vmem:[#allocation3 + $0x538] sm:$0xff] }
 0x4a3   :  { %11239 = vmatprep.mubr.bf16.mxu1 %v4371_v9  ;;  %11264 = vmatpush3.bf16.msra.mxu1 %v4590_v47  ;;  %v6346_v47 = vld [vmem:[#allocation3 + $0x378] sm:$0xff] }
 0x4a4   :  { %11265 = vmatprep.subr.bf16.mxu1 %v4591_v21  ;;  %v4382_v14 = vor.u32 %v4381_v8, %v18426_v57  ;;  %v4397_v9 = vsel %vm2974_vm15, %v15832_v35, %v4396_v46  ;;  %v6350_v35 = vld [vmem:[#allocation3 + $0x398] sm:$0xff]  ;;  %v16268_v8 = vld [vmem:[#allocation2 + $0x50] sm:$0xff]  ;;  %v6387_v46 = vshrl.u32 %v16292_v29, 16 }
 0x4a5   :  { %v6359_v5 = vshll.u32 %v16268_v8, 16  ;;  %v16274_v57 = vld [vmem:[#allocation2 + $0x68] sm:$0xff] }
 0x4a6   :  { %v4383_v3 = vsel %vm2974_vm15, %v4378_v30, %v4382_v14  ;;  %v16265_v30 = vld [vmem:[#allocation3 + $0x400] sm:$0xff] }
 0x4a7   :  { %11266 = vmatpush3.bf16.msra.mxu1 %v4591_v21  ;;  %v12962_v21 = vld [vmem:[#allocation2 + $0xc8] sm:$0xff] }
 0x4a8   :  { %11267 = vmatprep.subr.bf16.mxu1 %v4592_v38 }
 0x4a9   :  { %11516 = vmatmul.mubr.bf16.gmra.mrb[180].mxu0 %v5959_v23  ;;  %v6328_v23 = vld [vmem:[#allocation2 + $0x38] sm:$0xff] }
 0x4aa   :  { %11240 = vmatmul.mubr.bf16.gmra.mrb[40].mxu1 %v4374_v49  ;;  %11535 = vmatprep.mubr.bf16.mxu0 %v12955_v37  ;;  %v12965_v49 = vld [vmem:[#allocation2 + $0xf8] sm:$0xff]  ;;  %v6354_v58 = vshll.u32 %v6328_v23, 16 }
 0x4ab   :  { %11243 = vmatprep.mubr.bf16.mxu1 %v4377_v10  ;;  %11268 = vmatpush3.bf16.msra.mxu1 %v4592_v38  ;;  %v12964_v38 = vld [vmem:[#allocation3 + $0x508] sm:$0xff]  ;;  %v12969_v10 = vld [vmem:[#allocation3 + $0x518] sm:$0xff] }
 0x4ac   :  { %11269 = vmatprep.subr.bf16.mxu1 %v4593_v42  ;;  %v6356_v37 = vrot.slane %v6354_v58, 1  ;;  %v6659_v58 = vld [vmem:[#allocation3 + $0x418] sm:$0xff] }
 0x4af   :  { %11270 = vmatpush3.bf16.msra.mxu1 %v4593_v42  ;;  %v12970_v42 = vld [vmem:[#allocation3 + $0x520] sm:$0xff] }
 0x4b0   :  { %12063 = vmatprep.subr.bf16.mxu1 %v12956_v56 }
 0x4b1   :  { %11536 = vmatmul.mubr.bf16.vlgmr.msra.gmra.mrb[156].mxu0 %v12957_v39  ;;  %v6375_v39 = vshll.u32 %v16278_v24, 16 }
 0x4b2   :  { %11244 = vmatmul.mubr.bf16.gmra.mrb[44].mxu1 %v4380_v53  ;;  %11539 = vmatprep.mubr.bf16.mxu0 %v12958_v0  ;;  %v6361_v53 = vrot.slane %v6359_v5, 1 }
 0x4b3   :  { %11247 = vmatprep.mubr.bf16.mxu1 %v4383_v3  ;;  %11564 = vmatpush3.bf16.msra.mxu0 %v6343_v51  ;;  %v12960_v51 = vld [vmem:[#allocation2 + $0x98] sm:$0xff]  ;;  %v6367_v3 = vshll.u32 %v16274_v57, 16 }
 0x4b4   :  { %11565 = vmatprep.subr.bf16.mxu0 %v6344_v62 }
 0x4b5   :  { %v6369_v0 = vrot.slane %v6367_v3, 1 }
 0x4b7   :  { %11566 = vmatpush3.bf16.msra.mxu0 %v6344_v62  ;;  %v12974_v62 = vld [vmem:[#allocation3 + $0x530] sm:$0xff] }
 0x4b8   :  { %11567 = vmatprep.subr.bf16.mxu0 %v6345_v19 }
 0x4b9   :  { %11540 = vmatmul.mubr.bf16.gmra.mrb[160].mxu0 %v12959_v11 }
 0x4ba   :  { %11248 = vmatmul.mubr.bf16.gmra.mrb[48].mxu1 %v4386_v27  ;;  %11543 = vmatprep.mubr.bf16.mxu0 %v12960_v51  ;;  %v6377_v27 = vrot.slane %v6375_v39, 1 }
 0x4bb   :  { %11251 = vmatprep.mubr.bf16.mxu1 %v4389_v20  ;;  %11568 = vmatpush3.bf16.msra.mxu0 %v6345_v19  ;;  %v17834_v20 = vshll.u32 %v16292_v29, 16 }
 0x4bc   :  { %11569 = vmatprep.subr.bf16.mxu0 %v6346_v47 }
 0x4bf   :  { %11570 = vmatpush3.bf16.msra.mxu0 %v6346_v47  ;;  %v6379_v47 = vshrl.u32 %v16278_v24, 16 }
 0x4c0   :  { %11571 = vmatprep.subr.bf16.mxu0 %v6347_v26 }
 0x4c1   :  { %11544 = vmatmul.mubr.bf16.gmra.mrb[164].mxu0 %v12961_v54  ;;  %v6657_v54 = vld [vmem:[#allocation3 + $0x408] sm:$0xff] }
 0x4c2   :  { %11252 = vmatmul.mubr.bf16.gmra.mrb[52].mxu1 %v4397_v9  ;;  %11547 = vmatprep.mubr.bf16.mxu0 %v12962_v21  ;;  %v6385_v9 = vrot.slane %v17834_v20, 1  ;;  %v16321_v21 = vld [vmem:[#allocation2 + $0xc8] sm:$0xff] }
 0x4c3   :  { %11271 = vmatprep.mubr.bf16.mxu1 %v15975_v60  ;;  %11572 = vmatpush3.bf16.msra.mxu0 %v6347_v26  ;;  %v12966_v60 = vld [vmem:[#allocation3 + $0x510] sm:$0xff] }
 0x4c4   :  { %11573 = vmatprep.subr.bf16.mxu0 %v6348_v50 }
 0x4c7   :  { %11574 = vmatpush3.bf16.msra.mxu0 %v6348_v50  ;;  %v6381_v50 = vor.u32 %v6379_v47, %v6377_v27 }
 0x4c8   :  { %11575 = vmatprep.subr.bf16.mxu0 %v6349_v15 }
 0x4c9   :  { %11548 = vmatmul.mubr.bf16.gmra.mrb[168].mxu0 %v12963_v6  ;;  %v16328_v6 = vld [vmem:[#allocation2 + $0xe0] sm:$0xff] }
 0x4ca   :  { %11272 = vmatmul.mubr.bf16.vlgmr.msra.gmra.mrb[28].mxu1 %v15986_v2  ;;  %11551 = vmatprep.mubr.bf16.mxu0 %v12965_v49  ;;  %v12967_v2 = vld [vmem:[#allocation2 + $0x110] sm:$0xff] }
 0x4cb   :  { %12071 = vmatpush3.bf16.msra.mxu1 %v12956_v56  ;;  %11275 = vmatprep.mubr.bf16.mxu1 %v15994_v13  ;;  %v12968_v13 = vld [vmem:[#allocation2 + $0x128] sm:$0xff] }
 0x4cc   :  { %12064 = vmatprep.subr.bf16.mxu1 %v12964_v38  ;;  %11576 = vmatpush3.bf16.msra.mxu0 %v6349_v15  ;;  %v6389_v15 = vor.u32 %v6387_v46, %v6385_v9 }
 0x4cd   :  { %11577 = vmatprep.subr.bf16.mxu0 %v6350_v35 }
 0x4cf   :  { %12072 = vmatpush3.bf16.msra.mxu1 %v12964_v38  ;;  %v16332_v38 = vsel %vm3274_vm1, %v6381_v50, %v6385_v9  ;;  %v4779_v9 = vld [vmem:[#allocation2 + $0x168] sm:$0xff] }
 0x4d0   :  { %12065 = vmatprep.subr.bf16.mxu1 %v12966_v60  ;;  %11578 = vmatpush3.bf16.msra.mxu0 %v6350_v35  ;;  %v6658_v35 = vld [vmem:[#allocation3 + $0x410] sm:$0xff] }
 0x4d1   :  { %11552 = vmatmul.mubr.bf16.gmra.mrb[172].mxu0 %v12967_v2  ;;  %11607 = vmatprep.subr.bf16.mxu0 %v16265_v30 }
 0x4d2   :  { %11276 = vmatmul.mubr.bf16.gmra.mrb[32].mxu1 %v16012_v7  ;;  %11555 = vmatprep.mubr.bf16.mxu0 %v12968_v13  ;;  %v6352_v7 = vshrl.u32 %v6328_v23, 16  ;;  %v12976_v23 = vld [vmem:[#allocation2 + $0x108] sm:$0xff]  ;;  %v17832_v13 = vshrl.u32 %v16321_v21, 16 }
 0x4d3   :  { %11279 = vmatprep.mubr.bf16.mxu1 %v16022_v16  ;;  %12073 = vmatpush3.bf16.msra.mxu1 %v12966_v60  ;;  %v12971_v16 = vld [vmem:[#allocation2 + $0x140] sm:$0xff]  ;;  %v4859_v2 = vshrl.u32 %v12976_v23, 16 }
 0x4d4   :  { %12066 = vmatprep.subr.bf16.mxu1 %v12969_v10  ;;  %v6357_v14 = vor.u32 %v6356_v37, %v6352_v7  ;;  %v6662_v23 = vld [vmem:[#allocation3 + $0x430] sm:$0xff] }
 0x4d5   :  { %v4861_v37 = vor.u32 %v4859_v2, %v15696_v33 }
 0x4d6   :  { %v6362_v56 = vsel %vm3274_vm1, %v6357_v14, %v6361_v53  ;;  %v16356_v14 = vld [vmem:[#allocation2 + $0x110] sm:$0xff] }
 0x4d7   :  { %12074 = vmatpush3.bf16.msra.mxu1 %v12969_v10 }
 0x4d8   :  { %12067 = vmatprep.subr.bf16.mxu1 %v12970_v42 }
 0x4d9   :  { %11556 = vmatmul.mubr.bf16.gmra.mrb[176].mxu0 %v12971_v16 }
 0x4da   :  { %11280 = vmatmul.mubr.bf16.gmra.mrb[36].mxu1 %v16041_v52  ;;  %11559 = vmatprep.mubr.bf16.mxu0 %v12972_v36  ;;  %v6363_v52 = vshrl.u32 %v16268_v8, 16  ;;  %v16354_v36 = vld [vmem:[#allocation2 + $0xf8] sm:$0xff] }
 0x4db   :  { %11283 = vmatprep.mubr.bf16.mxu1 %v16051_v61  ;;  %12075 = vmatpush3.bf16.msra.mxu1 %v12970_v42  ;;  %v6371_v61 = vshrl.u32 %v16274_v57, 16  ;;  %v12977_v42 = vld [vmem:[#allocation2 + $0x168] sm:$0xff]  ;;  %v17821_v33 = vshll.u32 %v16354_v36, 16 }
 0x4dc   :  { %12068 = vmatprep.subr.bf16.mxu1 %v12973_v40  ;;  %v6365_v12 = vor.u32 %v6363_v52, %v6361_v53  ;;  %v6660_v53 = vld [vmem:[#allocation3 + $0x420] sm:$0xff] }
 0x4dd   :  { %v6373_v19 = vor.u32 %v6371_v61, %v6369_v0 }
 0x4de   :  { %v16304_v11 = vsel %vm3274_vm1, %v6365_v12, %v6369_v0  ;;  %v17825_v12 = vshrl.u32 %v16354_v36, 16 }
 0x4df   :  { %12076 = vmatpush3.bf16.msra.mxu1 %v12973_v40  ;;  %v16308_v51 = vsel %vm3274_vm1, %v6373_v19, %v6377_v27  ;;  %v17820_v19 = vshll.u32 %v16356_v14, 16  ;;  %v6661_v27 = vld [vmem:[#allocation3 + $0x428] sm:$0xff] }
 0x4e0   :  { %12069 = vmatprep.subr.bf16.mxu1 %v12974_v62 }
 0x4e1   :  { %11560 = vmatmul.mubr.bf16.gmra.mrb[180].mxu0 %v16198_v4  ;;  %v16480_v4 = vld [vmem:[#allocation2 + $0x40] sm:$0xff] }
 0x4e2   :  { %11284 = vmatmul.mubr.bf16.gmra.mrb[40].mxu1 %v16067_v31  ;;  %11579 = vmatprep.mubr.bf16.mxu0 %v6362_v56  ;;  %v16298_v31 = vld [vmem:[#allocation2 + $0xb0] sm:$0xff]  ;;  %v17831_v56 = vshrl.u32 %v16328_v6, 16 }
 0x4e3   :  { %11287 = vmatprep.mubr.bf16.mxu1 %v16081_v22  ;;  %12077 = vmatpush3.bf16.msra.mxu1 %v12974_v62  ;;  %v16301_v22 = vld [vmem:[#allocation3 + $0x120] sm:$0xff]  ;;  %v17833_v26 = vshll.u32 %v16298_v31, 16  ;;  %v17835_v49 = vshrl.u32 %v16298_v31, 16  ;;  %v4866_v62 = vsel %vm3274_vm1, %v4861_v37, %v16119_v18  ;;  %v6417_v18 = vrot.slane %v17821_v33, 1  ;;  %v7457_v37 = vld [vmem:[#allocation3 + $0x128] sm:$0xff] }
 0x4e4   :  { %12070 = vmatprep.subr.bf16.mxu1 %v12975_v63 }
 0x4e5   :  { %v6421_v50 = vor.u32 %v17825_v12, %v6417_v18 }
 0x4e7   :  { %12078 = vmatpush3.bf16.msra.mxu1 %v12975_v63 }
 0x4e8   :  { %11739 = vmatprep.subr.bf16.mxu1 %v16301_v22 }
 0x4e9   :  { %11580 = vmatmul.mubr.bf16.vlgmr.msra.gmra.mrb[156].mxu0 %v16304_v11 }
 0x4ea   :  { %11288 = vmatmul.mubr.bf16.gmra.mrb[44].mxu1 %v16102_v48  ;;  %11583 = vmatprep.mubr.bf16.mxu0 %v16308_v51  ;;  %v6393_v48 = vrot.slane %v17833_v26, 1 }
 0x4eb   :  { %11291 = vmatprep.mubr.bf16.mxu1 %v16104_v43  ;;  %11608 = vmatpush3.bf16.msra.mxu0 %v16265_v30  ;;  %v17827_v43 = vshll.u32 %v16321_v21, 16  ;;  %v17826_v30 = vshll.u32 %v16328_v6, 16 }
 0x4ec   :  { %11609 = vmatprep.subr.bf16.mxu0 %v6657_v54  ;;  %v16336_v60 = vsel %vm3274_vm1, %v6389_v15, %v6393_v48  ;;  %v16347_v7 = vor.u32 %v17835_v49, %v6393_v48  ;;  %v6425_v15 = vrot.slane %v17820_v19, 1  ;;  %v4887_v48 = vshll.u32 %v4779_v9, 16 }
 0x4ed   :  { %v6401_v10 = vrot.slane %v17827_v43, 1 }
 0x4ef   :  { %11610 = vmatpush3.bf16.msra.mxu0 %v6657_v54  ;;  %v6405_v16 = vor.u32 %v17832_v13, %v6401_v10  ;;  %v6402_v40 = vsel %vm3274_vm1, %v16347_v7, %v6401_v10  ;;  %v16372_v54 = vld [vmem:[#allocation2 + $0x128] sm:$0xff]  ;;  %v17823_v10 = vshrl.u32 %v16356_v14, 16 }
 0x4f0   :  { %11611 = vmatprep.subr.bf16.mxu0 %v6658_v35 }
 0x4f1   :  { %11584 = vmatmul.mubr.bf16.gmra.mrb[160].mxu0 %v16332_v38 }
 0x4f2   :  { %11292 = vmatmul.mubr.bf16.gmra.mrb[48].mxu1 %v16121_v28  ;;  %11587 = vmatprep.mubr.bf16.mxu0 %v16336_v60  ;;  %v6409_v28 = vrot.slane %v17826_v30, 1 }
 0x4f3   :  { %11295 = vmatprep.mubr.bf16.mxu1 %v12977_v42  ;;  %11612 = vmatpush3.bf16.msra.mxu0 %v6658_v35  ;;  %v16378_v35 = vld [vmem:[#allocation2 + $0x140] sm:$0xff]  ;;  %v4891_v42 = vshrl.u32 %v4779_v9, 16 }
 0x4f4   :  { %11613 = vmatprep.subr.bf16.mxu0 %v6659_v58  ;;  %v6410_v0 = vsel %vm3274_vm1, %v6405_v16, %v6409_v28  ;;  %v6413_v63 = vor.u32 %v17831_v56, %v6409_v28  ;;  %v6426_v16 = vsel %vm3274_vm1, %v6421_v50, %v6425_v15  ;;  %v17822_v28 = vshrl.u32 %v16372_v54, 16 }
 0x4f5   :  { %v4897_v50 = vrot.slane %v4394_v41, 1  ;;  %v6668_v56 = vrot.slane %v6363_v52, 7 }
 0x4f6   :  { %v6418_v2 = vsel %vm3274_vm1, %v6413_v63, %v6417_v18  ;;  %v16395_v63 = vld [vmem:[#allocation2 + $0x158] sm:$0xff]  ;;  %v6663_v18 = vld [vmem:[#allocation3 + $0x438] sm:$0xff] }
 0x4f7   :  { %11614 = vmatpush3.bf16.msra.mxu0 %v6659_v58  ;;  %v17819_v58 = vshll.u32 %v16372_v54, 16  ;;  %v17828_v19 = vshll.u32 %v16395_v63, 16  ;;  %v6669_v52 = vor.u32 %v6668_v56, %v6359_v5  ;;  %v6674_v5 = vrot.slane %v6379_v47, 7 }
 0x4f8   :  { %11615 = vmatprep.subr.bf16.mxu0 %v6660_v53 }
 0x4f9   :  { %11588 = vmatmul.mubr.bf16.gmra.mrb[164].mxu0 %v6402_v40  ;;  %v4889_v40 = vrot.slane %v4887_v48, 1  ;;  %v6675_v47 = vor.u32 %v6674_v5, %v6375_v39  ;;  %v18450_v39 = vshrl.u32 %v16298_v31, 16 }
 0x4fa   :  { %11296 = vmatmul.mubr.bf16.gmra.mrb[52].mxu1 %v16246_v44  ;;  %11591 = vmatprep.mubr.bf16.mxu0 %v6410_v0  ;;  %v6429_v0 = vor.u32 %v17823_v10, %v6425_v15  ;;  %v6654_v44 = vld [vmem:[#allocation2 + $0x38] sm:$0x80] }
 0x4fb   :  { %11331 = vmatprep.mubr.bf16.mxu1 %v4866_v62  ;;  %11616 = vmatpush3.bf16.msra.mxu0 %v6660_v53  ;;  %v17824_v53 = vshll.u32 %v16378_v35, 16  ;;  %v16387_v62 = vpop.f32.mrb[112].mxu0  ;;  %v4890_v41 = vsel %vm3274_vm1, %v16148_v34, %v4889_v40  ;;  %v6449_v34 = vrot.slane %v17828_v19, 1 }
 0x4fc   :  { %11617 = vmatprep.subr.bf16.mxu0 %v6661_v27  ;;  %v16397_v9 = vpop.f32.mrb[113].mxu0 }
 0x4fd   :  { %v16401_v48 = vpop.f32.mrb[114].mxu0 }
 0x4ff   :  { %11618 = vmatpush3.bf16.msra.mxu0 %v6661_v27  ;;  %v6433_v27 = vrot.slane %v17819_v58, 1  ;;  %v16407_v58 = vpop.f32.mrb[115].mxu0 }
 0x500   :  { %11619 = vmatprep.subr.bf16.mxu0 %v6662_v23 }
 0x501   :  { %11592 = vmatmul.mubr.bf16.gmra.mrb[168].mxu0 %v6418_v2  ;;  %v6437_v15 = vor.u32 %v17822_v28, %v6433_v27  ;;  %v6441_v2 = vrot.slane %v17824_v53, 1  ;;  %v17830_v28 = vshrl.u32 %v16378_v35, 16  ;;  %v17829_v53 = vshrl.u32 %v16395_v63, 16 }
 0x502   :  { %11332 = vmatmul.mubr.bf16.vlgmr.msra.gmra.mrb[44].mxu1 %v16136_v17  ;;  %11595 = vmatprep.mubr.bf16.mxu0 %v6426_v16  ;;  %v4893_v17 = vor.u32 %v4891_v42, %v4889_v40  ;;  %v16410_v42 = vpop.f32.mrb[116].mxu0  ;;  %v6434_v16 = vsel %vm3274_vm1, %v6429_v0, %v6433_v27  ;;  %v16427_v40 = vld [vmem:[#allocation3 + $0x4a0] sm:$0xff]  ;;  %v4901_v27 = vor.u32 %v4897_v50, %v4391_v25 }
 0x503   :  { %11740 = vmatpush3.bf16.msra.mxu1 %v16301_v22  ;;  %11335 = vmatprep.mubr.bf16.mxu1 %v16154_v1  ;;  %v4781_v22 = vld [vmem:[#allocation2 + $0x198] sm:$0x1]  ;;  %v7458_v1 = vld [vmem:[#allocation3 + $0x130] sm:$0xff]  ;;  %v16416_v10 = vpop.f32.mrb[117].mxu0  ;;  %v6442_v30 = vsel %vm3274_vm1, %v6437_v15, %v6441_v2  ;;  %v6453_v15 = vor.u32 %v17829_v53, %v6449_v34  ;;  %v16453_v53 = vld [vmem:[#allocation2 + $0x28] sm:$0xff] }
 0x504   :  { %11741 = vmatprep.subr.bf16.mxu1 %v7457_v37  ;;  %11620 = vmatpush3.bf16.msra.mxu0 %v6662_v23  ;;  %v4903_v33 = vshll.u32 %v4781_v22, 16  ;;  %v4898_v23 = vsel %vm3274_vm1, %v4893_v17, %v4897_v50  ;;  %v16420_v12 = vpop.f32.mrb[118].mxu0 }
 0x505   :  { %11621 = vmatprep.subr.bf16.mxu0 %v6663_v18  ;;  %v16423_v43 = vpop.f32.mrb[119].mxu0 }
 0x506   :  { %18429 = vst [vmem:[#allocation75_spill] sm:$0xff] %v16423_v43  ;;  %v16429_v0 = vpop.f32.mrb[120].mxu0  ;;  %v4905_v17 = vrot.slane %v4903_v33, 1 }
 0x507   :  { %11742 = vmatpush3.bf16.msra.mxu1 %v7457_v37  ;;  %v7459_v37 = vld [vmem:[#allocation3 + $0x138] sm:$0xff]  ;;  %18430 = vst [vmem:[#allocation90_spill] sm:$0xff] %v16429_v0  ;;  %v16435_v22 = vpop.f32.mrb[121].mxu0  ;;  %v17837_v0 = vshll.u32 %v16453_v53, 16 }
 0x508   :  { %11743 = vmatprep.subr.bf16.mxu1 %v7458_v1  ;;  %11622 = vmatpush3.bf16.msra.mxu0 %v6663_v18  ;;  %v6445_v18 = vor.u32 %v17830_v28, %v6441_v2  ;;  %18431 = vst [vmem:[#allocation78_spill] sm:$0xff] %v16435_v22  ;;  %v6665_v28 = vshrl.u32 %v6654_v44, 16 }
 0x509   :  { %11596 = vmatmul.mubr.bf16.gmra.mrb[172].mxu0 %v6434_v16  ;;  %v6342_v16 = vld [vmem:[#allocation2 + $0x188] sm:$0x1]  ;;  %11651 = vmatprep.subr.bf16.mxu0 %v16427_v40 }
 0x50a   :  { %11336 = vmatmul.mubr.bf16.gmra.mrb[48].mxu1 %v4890_v41  ;;  %11599 = vmatprep.mubr.bf16.mxu0 %v6442_v30  ;;  %v6457_v41 = vrot.slane %v5956_v55, 1  ;;  %v4906_v30 = vsel %vm3274_vm1, %v4901_v27, %v4905_v17  ;;  %v6450_v50 = vsel %vm3274_vm1, %v6445_v18, %v6449_v34  ;;  %v6463_v2 = vshll.u32 %v6342_v16, 16 }
 0x50b   :  { %11744 = vmatpush3.bf16.msra.mxu1 %v7458_v1  ;;  %11339 = vmatprep.mubr.bf16.mxu1 %v4898_v23  ;;  %v16441_v1 = vpop.f32.mrb[122].mxu0  ;;  %v7452_v23 = vld [vmem:[#allocation3 + $0x80] sm:$0xff]  ;;  %v6667_v18 = vrot.slane %v6665_v28, 7 }
 0x50c   :  { %11745 = vmatprep.subr.bf16.mxu1 %v7459_v37  ;;  %18432 = vst [vmem:[#allocation86_spill] sm:$0xff] %v16441_v1  ;;  %v16444_v25 = vpop.f32.mrb[123].mxu0  ;;  %v6458_v55 = vsel %vm3274_vm1, %v6453_v15, %v6457_v41  ;;  %v6465_v27 = vrot.slane %v6463_v2, 1  ;;  %v16489_v2 = vld [vmem:[#allocation2 + $0x58] sm:$0xff] }
 0x50d   :  { %18433 = vst [vmem:[#allocation10_spill] sm:$0xff] %v16444_v25  ;;  %v16446_v33 = vpop.f32.mrb[124].mxu0  ;;  %v6670_v28 = vsel %vm2974_vm15, %v6667_v18, %v6669_v52  ;;  %v7454_v52 = vld [vmem:[#allocation3 + $0x90] sm:$0xff]  ;;  %v16599_v1 = vld [vmem:[#allocation2 + $0x118] sm:$0xff] }
 0x50e   :  { %18434 = vst [vmem:[#allocation88_spill] sm:$0xff] %v16446_v33  ;;  %v16450_v19 = vpop.f32.mrb[125].mxu0  ;;  %v16573_v33 = vld [vmem:[#allocation2 + $0xe8] sm:$0xff] }
 0x50f   :  { %11746 = vmatpush3.bf16.msra.mxu1 %v7459_v37  ;;  %18435 = vst [vmem:[#allocation85_spill] sm:$0xff] %v16450_v19  ;;  %v16457_v13 = vpop.f32.mrb[126].mxu0  ;;  %v6461_v37 = vor.u32 %v6457_v41, %v5953_v45 }
 0x510   :  { %11775 = vmatprep.subr.bf16.mxu1 %v7452_v23  ;;  %18436 = vst [vmem:[#allocation95_spill] sm:$0xff] %v16457_v13  ;;  %v16459_v26 = vpop.f32.mrb[127].mxu0 }
 0x511   :  { %18437 = vst [vmem:[#allocation87_spill] sm:$0xff] %v16459_v26  ;;  %11600 = vmatmul.mubr.bf16.gmra.mrb[176].mxu0 %v6450_v50  ;;  %v16461_v34 = vpop.f32.mrb[128].mxu0  ;;  %v6466_v50 = vsel %vm3274_vm1, %v6461_v37, %v6465_v27  ;;  %v18461_v26 = vshrl.u32 %v16354_v36, 16 }
 0x512   :  { %11340 = vmatmul.mubr.bf16.gmra.mrb[52].mxu1 %v4906_v30  ;;  %18438 = vst [vmem:[#allocation92_spill] sm:$0xff] %v16461_v34  ;;  %11603 = vmatprep.mubr.bf16.mxu0 %v6458_v55  ;;  %v16467_v17 = vpop.f32.mrb[129].mxu0  ;;  %v6671_v30 = vrot.slane %v6371_v61, 7  ;;  %v7453_v55 = vld [vmem:[#allocation3 + $0x88] sm:$0xff]  ;;  %v16566_v34 = vld [vmem:[#allocation2 + $0xd0] sm:$0xff] }
 0x513   :  { %11747 = vmatprep.mubr.msk.bf16.mxu1 %vm696_vm0, %v16453_v53  ;;  %18439 = vst [vmem:[#allocation89_spill] sm:$0xff] %v16467_v17  ;;  %v16471_v15 = vpop.f32.mrb[130].mxu0  ;;  %v6689_v13 = vrot.slane %v18461_v26, 7  ;;  %v6907_v26 = vld [vmem:[#allocation3 + $0x4c8] sm:$0xff] }
 0x514   :  { %18440 = vst [vmem:[#allocation91_spill] sm:$0xff] %v16471_v15  ;;  %v16473_v16 = vpop.f32.mrb[131].mxu0  ;;  %v6672_v37 = vor.u32 %v6671_v30, %v6367_v3  ;;  %v6677_v3 = vrot.slane %v6387_v46, 7  ;;  %v7455_v46 = vld [vmem:[#allocation3 + $0x98] sm:$0xff] }
 0x515   :  { %18441 = vst [vmem:[#allocation11_spill] sm:$0xff] %v16473_v16  ;;  %v16475_v44 = vpop.f32.mrb[132].mxu0 }
 0x516   :  { %18442 = vst [vmem:[#allocation12_spill] sm:$0xff] %v16475_v44  ;;  %v16482_v45 = vpop.f32.mrb[133].mxu0  ;;  %v18453_v44 = vshrl.u32 %v16321_v21, 16 }
 0x517   :  { %18443 = vst [vmem:[#allocation13_spill] sm:$0xff] %v16482_v45  ;;  %v16487_v41 = vpop.f32.mrb[134].mxu0 }
 0x518   :  { %18444 = vst [vmem:[#allocation30_spill] sm:$0xff] %v16487_v41  ;;  %v16491_v20 = vpop.f32.mrb[135].mxu0  ;;  %v16536_v41 = vld [vmem:[#allocation3 + $0x1c0] sm:$0xff]  ;;  %v6683_v16 = vrot.slane %v18453_v44, 7  ;;  %v6905_v44 = vld [vmem:[#allocation3 + $0x4b8] sm:$0xff] }
 0x519   :  { %18445 = vst [vmem:[#allocation31_spill] sm:$0xff] %v16491_v20  ;;  %11604 = vmatmul.mubr.bf16.gmra.mrb[180].mxu0 %v6466_v50  ;;  %v16495_v61 = vpop.f32.mrb[136].mxu0 }
 0x51a   :  { %11748 = vmatmul.mubr.msk.bf16.vlgmr.msra.gmra.mrb[56].mxu1 %vm696_vm0, %v16480_v4  ;;  %18446 = vst [vmem:[#allocation35_spill] sm:$0xff] %v16495_v61  ;;  %11623 = vmatprep.mubr.bf16.mxu0 %v6670_v28  ;;  %v16499_v27 = vpop.f32.mrb[137].mxu0  ;;  %v16510_v28 = vld [vmem:[#allocation2 + $0x70] sm:$0xff]  ;;  %v16517_v61 = vld [vmem:[#allocation2 + $0x88] sm:$0xff] }
 0x51b   :  { %11776 = vmatpush3.bf16.msra.mxu1 %v7452_v23  ;;  %18447 = vst [vmem:[#allocation36_spill] sm:$0xff] %v16499_v27  ;;  %11751 = vmatprep.mubr.msk.bf16.mxu1 %vm696_vm0, %v16489_v2  ;;  %v16505_v18 = vpop.f32.mrb[138].mxu0  ;;  %v6673_v23 = vsel %vm2974_vm15, %v6668_v56, %v6672_v37  ;;  %v6676_v27 = vsel %vm2974_vm15, %v6671_v30, %v6675_v47  ;;  %v6903_v56 = vld [vmem:[#allocation3 + $0x4a8] sm:$0xff]  ;;  %v18451_v30 = vshll.u32 %v16292_v29, 16  ;;  %v18452_v47 = vshll.u32 %v16298_v31, 16 }
 0x51c   :  { %11777 = vmatprep.subr.bf16.mxu1 %v7453_v55  ;;  %18448 = vst [vmem:[#allocation47_spill] sm:$0xff] %v16505_v18  ;;  %v16507_v50 = vpop.f32.mrb[139].mxu0  ;;  %v6680_v18 = vrot.slane %v18450_v39, 7 }
 0x51d   :  { %18449 = vst [vmem:[#allocation28_spill] sm:$0xff] %v16507_v50  ;;  %v16514_v49 = vpop.f32.mrb[140].mxu0  ;;  %v6678_v37 = vor.u32 %v6677_v3, %v18451_v30 }
 0x51e   :  { %v16521_v20 = vpop.f32.mrb[141].mxu0  ;;  %v6681_v39 = vor.u32 %v6680_v18, %v18452_v47  ;;  %v16546_v47 = vld [vmem:[#allocation2 + $0xb8] sm:$0xff] }
 0x51f   :  { %11778 = vmatpush3.bf16.msra.mxu1 %v7453_v55  ;;  %v16523_v50 = vpop.f32.mrb[142].mxu0  ;;  %v6679_v45 = vsel %vm2974_vm15, %v6674_v5, %v6678_v37  ;;  %v18460_v37 = vshll.u32 %v16328_v6, 16 }
 0x520   :  { %11779 = vmatprep.subr.bf16.mxu1 %v7454_v52  ;;  %v16527_v55 = vpop.f32.mrb[143].mxu0  ;;  %v6682_v30 = vsel %vm2974_vm15, %v6677_v3, %v6681_v39 }
 0x521   :  { %11624 = vmatmul.mubr.bf16.vlgmr.msra.gmra.mrb[156].mxu0 %v6673_v23  ;;  %v6904_v23 = vld [vmem:[#allocation3 + $0x4b0] sm:$0xff]  ;;  %v16543_v15 = vpop.f32.mrb[144].mxu0 }
 0x522   :  { %11752 = vmatmul.mubr.msk.bf16.gmra.mrb[60].mxu1 %vm696_vm0, %v16510_v28  ;;  %11627 = vmatprep.mubr.bf16.mxu0 %v6676_v27  ;;  %v16539_v27 = vld [vmem:[#allocation2 + $0xa0] sm:$0xff]  ;;  %18454 = vst [vmem:[#allocation25_spill] sm:$0xff] %v16543_v15  ;;  %v16550_v17 = vpop.f32.mrb[145].mxu0  ;;  %v7668_v15 = vshll.u32 %v16489_v2, 16 }
 0x523   :  { %11755 = vmatprep.mubr.msk.bf16.mxu1 %vm696_vm0, %v16517_v61  ;;  %11780 = vmatpush3.bf16.msra.mxu1 %v7454_v52  ;;  %18456 = vst [vmem:[#allocation53_spill] sm:$0xff] %v16550_v17  ;;  %v16553_v5 = vpop.f32.mrb[146].mxu0  ;;  %v16649_v17 = vld [vmem:[#allocation2 + $0x160] sm:$0xff] }
 0x524   :  { %11652 = vmatpush3.bf16.msra.mxu0 %v16427_v40  ;;  %11781 = vmatprep.subr.bf16.mxu1 %v7455_v46  ;;  %v18455_v40 = vshrl.u32 %v16328_v6, 16  ;;  %18457 = vst [vmem:[#allocation27_spill] sm:$0xff] %v16553_v5  ;;  %v16557_v3 = vpop.f32.mrb[147].mxu0  ;;  %v16631_v5 = vld [vmem:[#allocation2 + $0x188] sm:$0xff] }
 0x525   :  { %11653 = vmatprep.subr.bf16.mxu0 %v6903_v56  ;;  %18458 = vst [vmem:[#allocation38_spill] sm:$0xff] %v16557_v3  ;;  %v17839_v43 = vshll.u32 %v16631_v5, 16 }
 0x526   :  { %v6686_v52 = vrot.slane %v18455_v40, 7  ;;  %v6906_v40 = vld [vmem:[#allocation3 + $0x4c0] sm:$0xff] }
 0x527   :  { %11782 = vmatpush3.bf16.msra.mxu1 %v7455_v46 }
 0x528   :  { %11654 = vmatpush3.bf16.msra.mxu0 %v6903_v56  ;;  %11811 = vmatprep.subr.bf16.mxu1 %v16536_v41  ;;  %v18459_v56 = vshll.u32 %v16321_v21, 16  ;;  %v6687_v39 = vor.u32 %v6686_v52, %v18460_v37 }
 0x529   :  { %11655 = vmatprep.subr.bf16.mxu0 %v6904_v23  ;;  %11628 = vmatmul.mubr.bf16.gmra.mrb[160].mxu0 %v6679_v45 }
 0x52a   :  { %11756 = vmatmul.mubr.msk.bf16.gmra.mrb[64].mxu1 %vm696_vm0, %v16539_v27  ;;  %11631 = vmatprep.mubr.bf16.mxu0 %v6682_v30  ;;  %v6684_v46 = vor.u32 %v6683_v16, %v18459_v56  ;;  %v16570_v30 = vpop.f32.mrb[148].mxu0  ;;  %v6688_v19 = vsel %vm2974_vm15, %v6683_v16, %v6687_v39  ;;  %v18463_v56 = vshrl.u32 %v16356_v14, 16  ;;  %v18467_v16 = vshll.u32 %v16354_v36, 16 }
 0x52b   :  { %11759 = vmatprep.mubr.msk.bf16.mxu1 %vm696_vm0, %v16546_v47  ;;  %18462 = vst [vmem:[#allocation71_spill] sm:$0xff] %v16570_v30 }
 0x52c   :  { %11656 = vmatpush3.bf16.msra.mxu0 %v6904_v23  ;;  %v6685_v45 = vsel %vm2974_vm15, %v6680_v18, %v6684_v46  ;;  %v6692_v25 = vrot.slane %v18463_v56, 7  ;;  %v16577_v23 = vpop.f32.mrb[149].mxu0  ;;  %v6690_v46 = vor.u32 %v6689_v13, %v18467_v16  ;;  %v6908_v56 = vld [vmem:[#allocation3 + $0x4d0] sm:$0xff]  ;;  %v18471_v16 = vshrl.u32 %v16378_v35, 16 }
 0x52d   :  { %11657 = vmatprep.subr.bf16.mxu0 %v6905_v44  ;;  %18464 = vst [vmem:[#allocation40_spill] sm:$0xff] %v16577_v23  ;;  %v16579_v37 = vpop.f32.mrb[150].mxu0  ;;  %v18469_v23 = vshrl.u32 %v16372_v54, 16 }
 0x52e   :  { %18465 = vst [vmem:[#allocation37_spill] sm:$0xff] %v16579_v37  ;;  %v16583_v18 = vpop.f32.mrb[151].mxu0  ;;  %v16592_v37 = vld [vmem:[#allocation2 + $0x100] sm:$0xff]  ;;  %v6698_v22 = vrot.slane %v18471_v16, 7 }
 0x52f   :  { %18466 = vst [vmem:[#allocation77_spill] sm:$0xff] %v16583_v18  ;;  %v6695_v18 = vrot.slane %v18469_v23, 7 }
 0x530   :  { %11658 = vmatpush3.bf16.msra.mxu0 %v6905_v44  ;;  %v18468_v44 = vshll.u32 %v16356_v14, 16 }
 0x531   :  { %11659 = vmatprep.subr.bf16.mxu0 %v6906_v40  ;;  %11632 = vmatmul.mubr.bf16.gmra.mrb[164].mxu0 %v6685_v45  ;;  %v6691_v45 = vsel %vm2974_vm15, %v6686_v52, %v6690_v46  ;;  %v6909_v52 = vld [vmem:[#allocation3 + $0x4d8] sm:$0xff] }
 0x532   :  { %11760 = vmatmul.mubr.msk.bf16.gmra.mrb[68].mxu1 %vm696_vm0, %v16566_v34  ;;  %11635 = vmatprep.mubr.bf16.mxu0 %v6688_v19  ;;  %v6693_v39 = vor.u32 %v6692_v25, %v18468_v44  ;;  %v16596_v19 = vpop.f32.mrb[152].mxu0 }
 0x533   :  { %11763 = vmatprep.mubr.msk.bf16.mxu1 %vm696_vm0, %v16573_v33  ;;  %18470 = vst [vmem:[#allocation39_spill] sm:$0xff] %v16596_v19 }
 0x534   :  { %11660 = vmatpush3.bf16.msra.mxu0 %v6906_v40  ;;  %v6694_v30 = vsel %vm2974_vm15, %v6689_v13, %v6693_v39  ;;  %v16603_v40 = vpop.f32.mrb[153].mxu0  ;;  %v18475_v13 = vshll.u32 %v16372_v54, 16  ;;  %v18476_v39 = vshll.u32 %v16378_v35, 16 }
 0x535   :  { %11661 = vmatprep.subr.bf16.mxu0 %v6907_v26  ;;  %18472 = vst [vmem:[#allocation26_spill] sm:$0xff] %v16603_v40  ;;  %v16605_v44 = vpop.f32.mrb[154].mxu0 }
 0x536   :  { %18473 = vst [vmem:[#allocation50_spill] sm:$0xff] %v16605_v44  ;;  %v16609_v23 = vpop.f32.mrb[155].mxu0  ;;  %v6696_v46 = vor.u32 %v6695_v18, %v18475_v13  ;;  %v6699_v16 = vor.u32 %v6698_v22, %v18476_v39  ;;  %v16618_v44 = vld [vmem:[#allocation3 + $0x540] sm:$0xff]  ;;  %v16629_v39 = vld [vmem:[#allocation2 + $0x148] sm:$0xff] }
 0x537   :  { %18474 = vst [vmem:[#allocation93_spill] sm:$0xff] %v16609_v23  ;;  %v16621_v23 = vld [vmem:[#allocation2 + $0x130] sm:$0xff] }
 0x538   :  { %11662 = vmatpush3.bf16.msra.mxu0 %v6907_v26  ;;  %v17836_v26 = vshrl.u32 %v16453_v53, 16  ;;  %v6697_v40 = vsel %vm2974_vm15, %v6692_v25, %v6696_v46  ;;  %v6700_v3 = vsel %vm2974_vm15, %v6695_v18, %v6699_v16  ;;  %v7658_v25 = vshrl.u32 %v16480_v4, 16 }
 0x539   :  { %11663 = vmatprep.subr.bf16.mxu0 %v6908_v56  ;;  %11636 = vmatmul.mubr.bf16.gmra.mrb[168].mxu0 %v6691_v45  ;;  %v7437_v45 = vld [vmem:[#allocation2 + $0x10] sm:$0x80]  ;;  %v18478_v18 = vshll.u32 %v16395_v63, 16  ;;  %v17838_v16 = vshrl.u32 %v16631_v5, 16 }
 0x53a   :  { %11764 = vmatmul.mubr.msk.bf16.gmra.mrb[72].mxu1 %vm696_vm0, %v16592_v37  ;;  %11639 = vmatprep.mubr.bf16.mxu0 %v6694_v30  ;;  %v18477_v30 = vshrl.u32 %v16395_v63, 16  ;;  %v7653_v13 = vrot.slane %v17836_v26, 7  ;;  %v7660_v26 = vrot.slane %v7658_v25, 7 }
 0x53b   :  { %11767 = vmatprep.mubr.msk.bf16.mxu1 %vm696_vm0, %v16599_v1 }
 0x53c   :  { %11664 = vmatpush3.bf16.msra.mxu0 %v6908_v56  ;;  %v6701_v19 = vrot.slane %v18477_v30, 7  ;;  %v7648_v56 = vshrl.u32 %v7437_v45, 16 }
 0x53d   :  { %11665 = vmatprep.subr.bf16.mxu0 %v6909_v52 }
 0x53e   :  { %v6702_v46 = vor.u32 %v6701_v19, %v18478_v18  ;;  %v7650_v45 = vrot.slane %v7648_v56, 7  ;;  %v6710_v18 = vrot.slane %v17838_v16, 7  ;;  %v17841_v16 = vshrl.u32 %v16510_v28, 16 }
 0x540   :  { %11666 = vmatpush3.bf16.msra.mxu0 %v6909_v52  ;;  %v7656_v52 = vor.u32 %v17837_v0, %v7653_v13  ;;  %v6706_v0 = vsel %vm2974_vm15, %v6701_v19, %v16225_v32  ;;  %v6713_v32 = vor.u32 %v17839_v43, %v6710_v18  ;;  %v17842_v19 = vshrl.u32 %v16517_v61, 16 }
 0x541   :  { %11695 = vmatprep.subr.bf16.mxu0 %v16618_v44  ;;  %11640 = vmatmul.mubr.bf16.gmra.mrb[172].mxu0 %v6697_v40  ;;  %v17840_v40 = vshrl.u32 %v16489_v2, 16  ;;  %v17844_v18 = vshll.u32 %v16517_v61, 16 }
 0x542   :  { %11768 = vmatmul.mubr.msk.bf16.gmra.mrb[76].mxu1 %vm696_vm0, %v16621_v23  ;;  %11643 = vmatprep.mubr.bf16.mxu0 %v6700_v3  ;;  %v6703_v3 = vsel %vm2974_vm15, %v6698_v22, %v6702_v46  ;;  %v7657_v56 = vsel %vm2974_vm15, %v7650_v45, %v7656_v52  ;;  %v18479_v22 = vshll.u32 %v16480_v4, 16  ;;  %v7674_v45 = vrot.slane %v17841_v16, 7 }
 0x543   :  { %11771 = vmatprep.mubr.msk.bf16.mxu1 %vm696_vm0, %v16629_v39  ;;  %v7667_v30 = vrot.slane %v17840_v40, 7  ;;  %v7952_v40 = vld [vmem:[#allocation3 + $0x1c8] sm:$0xff] }
 0x544   :  { %v16664_v46 = vor.u32 %v18479_v22, %v7660_v26  ;;  %v6714_v22 = vsel %vm2974_vm15, %v16212_v59, %v6713_v32  ;;  %v17843_v59 = vshrl.u32 %v16539_v27, 16  ;;  %v17845_v32 = vshrl.u32 %v16546_v47, 16 }
 0x545   :  { %v7670_v52 = vor.u32 %v7668_v15, %v7667_v30 }
 0x547   :  { %v16684_v43 = vsel %vm2974_vm15, %v7660_v26, %v7670_v52  ;;  %v7953_v26 = vld [vmem:[#allocation3 + $0x1d0] sm:$0xff]  ;;  %v7688_v52 = vrot.slane %v17843_v59, 7  ;;  %v7099_v59 = vld [vmem:[#allocation3 + $0x548] sm:$0xff] }
 0x549   :  { %11644 = vmatmul.mubr.bf16.gmra.mrb[176].mxu0 %v6703_v3  ;;  %v7675_v3 = vshll.u32 %v16510_v28, 16 }
 0x54a   :  { %11772 = vmatmul.mubr.msk.bf16.gmra.mrb[80].mxu1 %vm696_vm0, %v16649_v17  ;;  %11647 = vmatprep.mubr.bf16.mxu0 %v6706_v0  ;;  %v7664_v0 = vsel %vm2974_vm15, %v7653_v13, %v16664_v46 }
 0x54b   :  { %11783 = vmatprep.mubr.msk.bf16.mxu1 %vm696_vm0, %v7657_v56  ;;  %v7681_v56 = vrot.slane %v17842_v19, 7  ;;  %v7677_v16 = vor.u32 %v7675_v3, %v7674_v45 }
 0x54d   :  { %v7684_v13 = vor.u32 %v17844_v18, %v7681_v56  ;;  %v7954_v18 = vld [vmem:[#allocation3 + $0x1d8] sm:$0xff] }
 0x54f   :  { %v16707_v19 = vsel %vm2974_vm15, %v7674_v45, %v7684_v13  ;;  %v7100_v45 = vld [vmem:[#allocation3 + $0x550] sm:$0xff]  ;;  %v16722_v13 = vld [vmem:[#allocation3 + $0x260] sm:$0xff] }
 0x551   :  { %11648 = vmatmul.mubr.bf16.gmra.mrb[180].mxu0 %v6714_v22  ;;  %v17846_v22 = vshll.u32 %v16539_v27, 16 }
 0x552   :  { %11784 = vmatmul.mubr.msk.bf16.vlgmr.msra.gmra.mrb[56].mxu1 %vm696_vm0, %v7664_v0  ;;  %11667 = vmatprep.mubr.bf16.mxu0 %v16268_v8  ;;  %v16701_v0 = vsel %vm2974_vm15, %v7667_v30, %v7677_v16  ;;  %v7695_v8 = vrot.slane %v17845_v32, 7 }
 0x553   :  { %11812 = vmatpush3.bf16.msra.mxu1 %v16536_v41  ;;  %11787 = vmatprep.mubr.msk.bf16.mxu1 %vm696_vm0, %v16684_v43  ;;  %v17847_v41 = vshll.u32 %v16546_v47, 16  ;;  %v7691_v16 = vor.u32 %v17846_v22, %v7688_v52 }
 0x554   :  { %11813 = vmatprep.subr.bf16.mxu1 %v7952_v40 }
 0x555   :  { %v7698_v30 = vor.u32 %v17847_v41, %v7695_v8  ;;  %v16728_v22 = vsel %vm2974_vm15, %v7681_v56, %v7691_v16  ;;  %v7101_v56 = vld [vmem:[#allocation3 + $0x558] sm:$0xff] }
 0x557   :  { %11814 = vmatpush3.bf16.msra.mxu1 %v7952_v40  ;;  %v17849_v40 = vshrl.u32 %v16566_v34, 16 }
 0x558   :  { %11815 = vmatprep.subr.bf16.mxu1 %v7953_v26 }
 0x559   :  { %11668 = vmatmul.mubr.bf16.vlgmr.msra.gmra.mrb[156].mxu0 %v16274_v57  ;;  %v17848_v57 = vshrl.u32 %v16573_v33, 16  ;;  %v7702_v32 = vrot.slane %v17849_v40, 7 }
 0x55a   :  { %11788 = vmatmul.mubr.msk.bf16.gmra.mrb[60].mxu1 %vm696_vm0, %v16701_v0  ;;  %11671 = vmatprep.mubr.bf16.mxu0 %v16278_v24  ;;  %v17850_v24 = vshll.u32 %v16566_v34, 16 }
 0x55b   :  { %11791 = vmatprep.mubr.msk.bf16.mxu1 %vm696_vm0, %v16707_v19  ;;  %11816 = vmatpush3.bf16.msra.mxu1 %v7953_v26  ;;  %v7709_v41 = vrot.slane %v17848_v57, 7  ;;  %v17851_v26 = vshll.u32 %v16573_v33, 16  ;;  %v17853_v57 = vshrl.u32 %v16592_v37, 16 }
 0x55c   :  { %11696 = vmatpush3.bf16.msra.mxu0 %v16618_v44  ;;  %11817 = vmatprep.subr.bf16.mxu1 %v7954_v18  ;;  %v16734_v44 = vsel %vm2974_vm15, %v7688_v52, %v7698_v30  ;;  %v7705_v16 = vor.u32 %v17850_v24, %v7702_v32  ;;  %v17854_v30 = vshll.u32 %v16592_v37, 16  ;;  %v17855_v24 = vshll.u32 %v16599_v1, 16 }
 0x55d   :  { %11697 = vmatprep.subr.bf16.mxu0 %v7099_v59  ;;  %v7716_v52 = vrot.slane %v17853_v57, 7 }
 0x55e   :  { %v16753_v40 = vsel %vm2974_vm15, %v7695_v8, %v7705_v16  ;;  %v17857_v16 = vshrl.u32 %v16621_v23, 16 }
 0x55f   :  { %11818 = vmatpush3.bf16.msra.mxu1 %v7954_v18  ;;  %v7712_v18 = vor.u32 %v17851_v26, %v7709_v41  ;;  %v7719_v8 = vor.u32 %v17854_v30, %v7716_v52  ;;  %v7738_v30 = vshll.u32 %v16629_v39, 16 }
 0x560   :  { %11698 = vmatpush3.bf16.msra.mxu0 %v7099_v59  ;;  %11847 = vmatprep.subr.bf16.mxu1 %v16722_v13  ;;  %v17852_v59 = vshrl.u32 %v16599_v1, 16 }
 0x561   :  { %11699 = vmatprep.subr.bf16.mxu0 %v7100_v45  ;;  %11672 = vmatmul.mubr.bf16.gmra.mrb[160].mxu0 %v16292_v29  ;;  %v7102_v29 = vld [vmem:[#allocation3 + $0x560] sm:$0xff]  ;;  %v16759_v26 = vsel %vm2974_vm15, %v7702_v32, %v7712_v18  ;;  %v7730_v18 = vrot.slane %v17857_v16, 7  ;;  %v16777_v57 = vsel %vm2974_vm15, %v7709_v41, %v7719_v8  ;;  %v7742_v8 = vshrl.u32 %v16649_v17, 16 }
 0x562   :  { %11792 = vmatmul.mubr.msk.bf16.gmra.mrb[64].mxu1 %vm696_vm0, %v16728_v22  ;;  %11675 = vmatprep.mubr.bf16.mxu0 %v16298_v31  ;;  %v7723_v31 = vrot.slane %v17852_v59, 7  ;;  %v7731_v59 = vshll.u32 %v16621_v23, 16 }
 0x563   :  { %11795 = vmatprep.mubr.msk.bf16.mxu1 %vm696_vm0, %v16734_v44 }
 0x564   :  { %11700 = vmatpush3.bf16.msra.mxu0 %v7100_v45  ;;  %v7103_v45 = vld [vmem:[#allocation3 + $0x568] sm:$0xff]  ;;  %v7726_v32 = vor.u32 %v17855_v24, %v7723_v31  ;;  %v7733_v41 = vor.u32 %v7731_v59, %v7730_v18 }
 0x565   :  { %11701 = vmatprep.subr.bf16.mxu0 %v7101_v56 }
 0x566   :  { %v16783_v24 = vsel %vm2974_vm15, %v7716_v52, %v7726_v32  ;;  %v16802_v32 = vsel %vm2974_vm15, %v7723_v31, %v7733_v41  ;;  %v18481_v31 = vshrl.u32 %v16453_v53, 16  ;;  %v18482_v41 = vshll.u32 %v16480_v4, 16 }
 0x567   :  { %v18484_v4 = vshll.u32 %v16517_v61, 16 }
 0x568   :  { %11702 = vmatpush3.bf16.msra.mxu0 %v7101_v56  ;;  %v17856_v56 = vshrl.u32 %v16629_v39, 16 }
 0x569   :  { %11703 = vmatprep.subr.bf16.mxu0 %v7102_v29  ;;  %11676 = vmatmul.mubr.bf16.gmra.mrb[164].mxu0 %v16321_v21  ;;  %v7104_v21 = vld [vmem:[#allocation3 + $0x570] sm:$0xff] }
 0x56a   :  { %11796 = vmatmul.mubr.msk.bf16.gmra.mrb[68].mxu1 %vm696_vm0, %v16753_v40  ;;  %11679 = vmatprep.mubr.bf16.mxu0 %v16328_v6  ;;  %v7737_v6 = vrot.slane %v17856_v56, 7 }
 0x56b   :  { %11799 = vmatprep.mubr.msk.bf16.mxu1 %vm696_vm0, %v16759_v26 }
 0x56c   :  { %11704 = vmatpush3.bf16.msra.mxu0 %v7102_v29  ;;  %v7105_v29 = vld [vmem:[#allocation3 + $0x578] sm:$0xff]  ;;  %v7740_v52 = vor.u32 %v7738_v30, %v7737_v6 }
 0x56d   :  { %11705 = vmatprep.subr.bf16.mxu0 %v7103_v45 }
 0x56e   :  { %v16805_v56 = vsel %vm2974_vm15, %v7730_v18, %v7740_v52 }
 0x570   :  { %11706 = vmatpush3.bf16.msra.mxu0 %v7103_v45  ;;  %v7745_v45 = vshll.u32 %v16649_v17, 16 }
 0x571   :  { %11707 = vmatprep.subr.bf16.mxu0 %v7104_v21  ;;  %11680 = vmatmul.mubr.bf16.gmra.mrb[168].mxu0 %v16354_v36  ;;  %v16798_v36 = vrot.slane %v7742_v8, 7 }
 0x572   :  { %11800 = vmatmul.mubr.msk.bf16.gmra.mrb[72].mxu1 %vm696_vm0, %v16777_v57  ;;  %11683 = vmatprep.mubr.bf16.mxu0 %v16356_v14  ;;  %v18480_v14 = vshll.u32 %v16453_v53, 16  ;;  %v7973_v53 = vrot.slane %v7668_v15, 1  ;;  %v18485_v15 = vshrl.u32 %v16510_v28, 16  ;;  %v18488_v28 = vshll.u32 %v16546_v47, 16 }
 0x573   :  { %11803 = vmatprep.mubr.msk.bf16.mxu1 %vm696_vm0, %v16783_v24 }
 0x574   :  { %11708 = vmatpush3.bf16.msra.mxu0 %v7104_v21  ;;  %v7960_v16 = vrot.slane %v18480_v14, 1  ;;  %v7747_v21 = vor.u32 %v7745_v45, %v16798_v36 }
 0x575   :  { %11709 = vmatprep.subr.bf16.mxu0 %v7105_v29 }
 0x576   :  { %v7961_v18 = vor.u32 %v7960_v16, %v18481_v31  ;;  %v18483_v16 = vshrl.u32 %v16489_v2, 16 }
 0x578   :  { %11710 = vmatpush3.bf16.msra.mxu0 %v7105_v29  ;;  %v7965_v29 = vrot.slane %v18482_v41, 1 }
 0x579   :  { %11684 = vmatmul.mubr.bf16.gmra.mrb[172].mxu0 %v16372_v54  ;;  %v16823_v54 = vsel %vm2974_vm15, %v7737_v6, %v7747_v21  ;;  %v7977_v6 = vor.u32 %v7973_v53, %v18483_v16  ;;  %v7981_v21 = vrot.slane %v7675_v3, 1  ;;  %v18486_v3 = vshrl.u32 %v16517_v61, 16  ;;  %v7089_v16 = vld [vmem:[#allocation2 + $0xe0] sm:$0xff] }
 0x57a   :  { %11804 = vmatmul.mubr.msk.bf16.gmra.mrb[76].mxu1 %vm696_vm0, %v16802_v32  ;;  %11687 = vmatprep.mubr.bf16.mxu0 %v16378_v35  ;;  %v7966_v52 = vsel %vm3274_vm1, %v7961_v18, %v7965_v29  ;;  %v12978_v35 = vld [vmem:[#allocation2 + $0x170] sm:$0xff]  ;;  %v7969_v14 = vor.u32 %v7965_v29, %v7658_v25  ;;  %v8289_v18 = vld [vmem:[#allocation3 + $0x268] sm:$0xff]  ;;  %v7989_v25 = vrot.slane %v18484_v4, 1  ;;  %v18487_v29 = vshll.u32 %v16539_v27, 16 }
 0x57b   :  { %11807 = vmatprep.mubr.msk.bf16.mxu1 %vm696_vm0, %v16805_v56  ;;  %v7982_v31 = vsel %vm3274_vm1, %v7977_v6, %v7981_v21  ;;  %v7985_v2 = vor.u32 %v7981_v21, %v18485_v15  ;;  %v8005_v61 = vrot.slane %v18488_v28, 1  ;;  %v8291_v6 = vld [vmem:[#allocation3 + $0x278] sm:$0xff]  ;;  %v18489_v21 = vshrl.u32 %v16539_v27, 16  ;;  %v7090_v15 = vld [vmem:[#allocation2 + $0xf8] sm:$0xff] }
 0x57c   :  { %v7993_v41 = vor.u32 %v7989_v25, %v18486_v3 }
 0x581   :  { %11688 = vmatmul.mubr.bf16.gmra.mrb[176].mxu0 %v16395_v63  ;;  %v7974_v63 = vsel %vm3274_vm1, %v7969_v14, %v7973_v53  ;;  %v8290_v14 = vld [vmem:[#allocation3 + $0x270] sm:$0xff]  ;;  %v7990_v53 = vsel %vm3274_vm1, %v7985_v2, %v7989_v25  ;;  %v7154_v2 = vshll.u32 %v7089_v16, 16 }
 0x582   :  { %11808 = vmatmul.mubr.msk.bf16.gmra.mrb[80].mxu1 %vm696_vm0, %v16823_v54  ;;  %11691 = vmatprep.mubr.bf16.mxu0 %v12978_v35  ;;  %v7088_v35 = vld [vmem:[#allocation2 + $0xc8] sm:$0xff] }
 0x583   :  { %11819 = vmatprep.mubr.msk.bf16.mxu1 %vm696_vm0, %v7966_v52  ;;  %v7997_v52 = vrot.slane %v18487_v29, 1  ;;  %v7150_v3 = vshrl.u32 %v7088_v35, 16  ;;  %v7158_v29 = vshrl.u32 %v7089_v16, 16  ;;  %v7091_v16 = vld [vmem:[#allocation2 + $0x110] sm:$0xff] }
 0x589   :  { %11692 = vmatmul.mubr.bf16.gmra.mrb[180].mxu0 %v16631_v5 }
 0x58a   :  { %11820 = vmatmul.mubr.msk.bf16.vlgmr.msra.gmra.mrb[56].mxu1 %vm696_vm0, %v7974_v63  ;;  %11711 = vmatprep.mubr.bf16.mxu0 %v16304_v11  ;;  %v7146_v11 = vshll.u32 %v7088_v35, 16  ;;  %v8001_v63 = vor.u32 %v7997_v52, %v18489_v21 }
 0x58b   :  { %11848 = vmatpush3.bf16.msra.mxu1 %v16722_v13  ;;  %11823 = vmatprep.mubr.msk.bf16.mxu1 %vm696_vm0, %v7982_v31  ;;  %v7998_v13 = vsel %vm3274_vm1, %v7993_v41, %v7997_v52  ;;  %v16867_v41 = vld [vmem:[#allocation3 + $0x300] sm:$0xff]  ;;  %v7156_v52 = vrot.slane %v7154_v2, 1 }
 0x58c   :  { %11849 = vmatprep.subr.bf16.mxu1 %v8289_v18  ;;  %v7148_v31 = vrot.slane %v7146_v11, 1  ;;  %v18493_v11 = vshrl.u32 %v16566_v34, 16 }
 0x58d   :  { %v7160_v28 = vor.u32 %v7158_v29, %v7156_v52 }
 0x58e   :  { %v7149_v27 = vsel %vm3274_vm1, %v16347_v7, %v7148_v31  ;;  %v7152_v35 = vor.u32 %v7150_v3, %v7148_v31  ;;  %v7166_v3 = vshrl.u32 %v7090_v15, 16 }
 0x58f   :  { %11850 = vmatpush3.bf16.msra.mxu1 %v8289_v18  ;;  %v18490_v18 = vshrl.u32 %v16546_v47, 16 }
 0x590   :  { %11851 = vmatprep.subr.bf16.mxu1 %v8290_v14  ;;  %v7157_v2 = vsel %vm3274_vm1, %v7152_v35, %v7156_v52 }
 0x591   :  { %11712 = vmatmul.mubr.bf16.vlgmr.msra.gmra.mrb[156].mxu0 %v16308_v51  ;;  %v8009_v4 = vor.u32 %v8005_v61, %v18490_v18  ;;  %v18491_v51 = vshll.u32 %v16566_v34, 16  ;;  %v7092_v18 = vld [vmem:[#allocation2 + $0x128] sm:$0xff] }
 0x592   :  { %11824 = vmatmul.mubr.msk.bf16.gmra.mrb[60].mxu1 %vm696_vm0, %v7990_v53  ;;  %11715 = vmatprep.mubr.bf16.mxu0 %v16332_v38  ;;  %v8006_v38 = vsel %vm3274_vm1, %v8001_v63, %v8005_v61  ;;  %v7162_v53 = vshll.u32 %v7090_v15, 16 }
 0x593   :  { %11827 = vmatprep.mubr.msk.bf16.mxu1 %vm696_vm0, %v7998_v13  ;;  %v8013_v25 = vrot.slane %v18491_v51, 1  ;;  %11852 = vmatpush3.bf16.msra.mxu1 %v8290_v14  ;;  %v18492_v14 = vshll.u32 %v16573_v33, 16 }
 0x594   :  { %11853 = vmatprep.subr.bf16.mxu1 %v8291_v6  ;;  %v7164_v61 = vrot.slane %v7162_v53, 1  ;;  %v7178_v53 = vshll.u32 %v7092_v18, 16 }
 0x595   :  { %v8014_v47 = vsel %vm3274_vm1, %v8009_v4, %v8013_v25  ;;  %v8021_v13 = vrot.slane %v18492_v14, 1  ;;  %v8017_v7 = vor.u32 %v8013_v25, %v18493_v11  ;;  %v7174_v11 = vshrl.u32 %v7091_v16, 16 }
 0x597   :  { %11854 = vmatpush3.bf16.msra.mxu1 %v8291_v6  ;;  %v18494_v6 = vshrl.u32 %v16573_v33, 16  ;;  %v8022_v29 = vsel %vm3274_vm1, %v8017_v7, %v8021_v13  ;;  %v7165_v33 = vsel %vm3274_vm1, %v7160_v28, %v7164_v61  ;;  %v7093_v7 = vld [vmem:[#allocation2 + $0x140] sm:$0xff]  ;;  %v7180_v28 = vrot.slane %v7178_v53, 1 }
 0x598   :  { %11883 = vmatprep.subr.bf16.mxu1 %v16867_v41 }
 0x599   :  { %11716 = vmatmul.mubr.bf16.gmra.mrb[160].mxu0 %v16336_v60  ;;  %v8025_v21 = vor.u32 %v8021_v13, %v18494_v6  ;;  %v18495_v60 = vshll.u32 %v16592_v37, 16 }
 0x59a   :  { %11828 = vmatmul.mubr.msk.bf16.gmra.mrb[64].mxu1 %vm696_vm0, %v8006_v38  ;;  %11719 = vmatprep.mubr.bf16.mxu0 %v7149_v27  ;;  %v7170_v38 = vshll.u32 %v7091_v16, 16  ;;  %v7182_v16 = vshrl.u32 %v7092_v18, 16 }
 0x59b   :  { %11831 = vmatprep.mubr.msk.bf16.mxu1 %vm696_vm0, %v8014_v47  ;;  %v8029_v63 = vrot.slane %v18495_v60, 1 }
 0x59c   :  { %v7172_v35 = vrot.slane %v7170_v38, 1  ;;  %v7184_v38 = vor.u32 %v7182_v16, %v7180_v28 }
 0x59d   :  { %v11273_v31 = vpop.f32.mrb[28].mxu1 }
 0x59e   :  { %v12079_v4 = vadd.f32 %v11273_v31, %v16387_v62  ;;  %v4628_v51 = vpop.f32.mrb[29].mxu1  ;;  %v8030_v62 = vsel %vm3274_vm1, %v8025_v21, %v8029_v63  ;;  %v7176_v6 = vor.u32 %v7174_v11, %v7172_v35  ;;  %v18498_v21 = vshrl.u32 %v16599_v1, 16 }
 0x59f   :  { %v12081_v34 = vadd.f32 %v4628_v51, %v16397_v9  ;;  %v11274_v25 = vpop.f32.mrb[30].mxu1 }
 0x5a0   :  { %v12083_v27 = vadd.f32 %v11274_v25, %v16401_v48  ;;  %v12080_v47 = vadd.f32 %v12079_v4, %v16514_v49  ;;  %v4631_v14 = vpop.f32.mrb[31].mxu1  ;;  %v7168_v48 = vor.u32 %v7166_v3, %v7164_v61  ;;  %v18496_v49 = vshll.u32 %v16599_v1, 16  ;;  %v16909_v61 = vld [vmem:[#allocation2 + $0x158] sm:$0xff]  ;;  %v18499_v25 = vld [vmem:[#allocation25_spill] sm:$0xff] }
 0x5a1   :  { %v12085_v52 = vadd.f32 %v4631_v14, %v16407_v58  ;;  %v12082_v15 = vadd.f32 %v12081_v34, %v16521_v20  ;;  %11720 = vmatmul.mubr.bf16.gmra.mrb[164].mxu0 %v7157_v2  ;;  %v18497_v58 = vshrl.u32 %v16592_v37, 16  ;;  %v7194_v51 = vshll.u32 %v16909_v61, 16  ;;  %v18501_v14 = vld [vmem:[#allocation53_spill] sm:$0xff] }
 0x5a2   :  { %5096 = vst [vmem:[%s17642_s5 + $0x30] sm:$0xff] %v12080_v47  ;;  %v12084_v9 = vadd.f32 %v12083_v27, %v16523_v50  ;;  %11832 = vmatmul.mubr.msk.bf16.gmra.mrb[68].mxu1 %vm696_vm0, %v8022_v29  ;;  %v8037_v13 = vrot.slane %v18496_v49, 1  ;;  %11723 = vmatprep.mubr.bf16.mxu0 %v7165_v33  ;;  %v7173_v4 = vsel %vm3274_vm1, %v7168_v48, %v7172_v35  ;;  %v18500_v27 = vld [vmem:[#allocation75_spill] sm:$0xff]  ;;  %v7095_v35 = vld [vmem:[#allocation2 + $0x170] sm:$0xff] }
 0x5a3   :  { %5094 = vst [vmem:[%s17642_s5] sm:$0xff] %v12082_v15  ;;  %v12086_v20 = vadd.f32 %v12085_v52, %v16527_v55  ;;  %11835 = vmatprep.mubr.msk.bf16.mxu1 %vm696_vm0, %v8030_v62  ;;  %v8033_v50 = vor.u32 %v8029_v63, %v18497_v58  ;;  %v8045_v55 = vrot.slane %v7731_v59, 1  ;;  %v7186_v63 = vshll.u32 %v7093_v7, 16  ;;  %v18504_v49 = vld [vmem:[#allocation38_spill] sm:$0xff] }
 0x5a4   :  { %5097 = vst [vmem:[%s17642_s5 + $0x48] sm:$0xff] %v12084_v9  ;;  %v8041_v60 = vor.u32 %v8037_v13, %v18498_v21  ;;  %v7190_v59 = vshrl.u32 %v7093_v7, 16  ;;  %v7181_v53 = vsel %vm3274_vm1, %v7176_v6, %v7180_v28  ;;  %v18503_v15 = vshrl.u32 %v16621_v23, 16  ;;  %v8286_v21 = vld [vmem:[#allocation2 + $0x28] sm:$0x80] }
 0x5a5   :  { %5095 = vst [vmem:[%s17642_s5 + $0x18] sm:$0xff] %v12086_v20  ;;  %v11277_v37 = vpop.f32.mrb[32].mxu1  ;;  %v8038_v3 = vsel %vm3274_vm1, %v8033_v50, %v8037_v13  ;;  %v7188_v11 = vrot.slane %v7186_v63, 1  ;;  %v7196_v48 = vrot.slane %v7194_v51, 1  ;;  %v18505_v7 = vshrl.u32 %v16629_v39, 16 }
 0x5a6   :  { %v12087_v18 = vadd.f32 %v11277_v37, %v16410_v42  ;;  %v4644_v31 = vpop.f32.mrb[33].mxu1  ;;  %v8046_v42 = vsel %vm3274_vm1, %v8041_v60, %v8045_v55  ;;  %v8049_v9 = vor.u32 %v8045_v55, %v18503_v15  ;;  %v8061_v58 = vrot.slane %v7745_v45, 1  ;;  %v7950_v50 = vld [vmem:[#allocation2 + $0x178] sm:$0x1]  ;;  %v18506_v60 = vld [vmem:[#allocation90_spill] sm:$0xff] }
 0x5a7   :  { %v12089_v2 = vadd.f32 %v4644_v31, %v16416_v10  ;;  %v11278_v1 = vpop.f32.mrb[34].mxu1  ;;  %v8053_v10 = vrot.slane %v7738_v30, 1  ;;  %v7192_v13 = vor.u32 %v7190_v59, %v7188_v11  ;;  %v7189_v16 = vsel %vm3274_vm1, %v7184_v38, %v7188_v11  ;;  %v18507_v31 = vld [vmem:[#allocation78_spill] sm:$0xff] }
 0x5a8   :  { %v12091_v34 = vadd.f32 %v11278_v1, %v16420_v12  ;;  %v12088_v29 = vadd.f32 %v12087_v18, %v18499_v25  ;;  %v4647_v33 = vpop.f32.mrb[35].mxu1  ;;  %v18502_v12 = vld [vmem:[#allocation27_spill] sm:$0xff]  ;;  %v7202_v6 = vshll.u32 %v7095_v35, 16  ;;  %v7198_v45 = vshrl.u32 %v16909_v61, 16  ;;  %v18508_v59 = vld [vmem:[#allocation86_spill] sm:$0xff] }
 0x5a9   :  { %v12093_v47 = vadd.f32 %v4647_v33, %v18500_v27  ;;  %v12090_v62 = vadd.f32 %v12089_v2, %v18501_v14  ;;  %11724 = vmatmul.mubr.bf16.gmra.mrb[168].mxu0 %v7173_v4  ;;  %v8057_v20 = vor.u32 %v8053_v10, %v18505_v7  ;;  %v8054_v63 = vsel %vm3274_vm1, %v8049_v9, %v8053_v10  ;;  %v18511_v27 = vld [vmem:[#allocation40_spill] sm:$0xff]  ;;  %v18512_v14 = vld [vmem:[#allocation37_spill] sm:$0xff] }
 0x5aa   :  { %5100 = vst [vmem:[%s17642_s5 + $0x90] sm:$0xff] %v12088_v29  ;;  %v12092_v52 = vadd.f32 %v12091_v34, %v18502_v12  ;;  %11836 = vmatmul.mubr.msk.bf16.gmra.mrb[72].mxu1 %vm696_vm0, %v8038_v3  ;;  %11727 = vmatprep.mubr.bf16.mxu0 %v7181_v53  ;;  %v8067_v18 = vshll.u32 %v7950_v50, 16  ;;  %v7197_v2 = vsel %vm3274_vm1, %v7192_v13, %v7196_v48  ;;  %v7206_v3 = vshrl.u32 %v7095_v35, 16  ;;  %v18509_v34 = vld [vmem:[#allocation71_spill] sm:$0xff]  ;;  %v18510_v53 = vld [vmem:[#allocation10_spill] sm:$0xff]  ;;  %v18513_v12 = vld [vmem:[#allocation77_spill] sm:$0xff] }
 0x5ab   :  { %5098 = vst [vmem:[%s17642_s5 + $0x60] sm:$0xff] %v12090_v62  ;;  %v12094_v30 = vadd.f32 %v12093_v47, %v18504_v49  ;;  %11839 = vmatprep.mubr.msk.bf16.mxu1 %vm696_vm0, %v8046_v42  ;;  %v8062_v1 = vsel %vm3274_vm1, %v8057_v20, %v8061_v58  ;;  %v8293_v33 = vshrl.u32 %v8286_v21, 16  ;;  %v7204_v61 = vrot.slane %v7202_v6, 1  ;;  %v18515_v13 = vld [vmem:[#allocation88_spill] sm:$0xff]  ;;  %v18516_v50 = vld [vmem:[#allocation85_spill] sm:$0xff] }
 0x5ac   :  { %5101 = vst [vmem:[%s17642_s5 + $0xa8] sm:$0xff] %v12092_v52  ;;  %v7200_v11 = vor.u32 %v7198_v45, %v7196_v48  ;;  %v8065_v10 = vor.u32 %v8061_v58, %v7742_v8  ;;  %v8069_v15 = vrot.slane %v8067_v18, 1  ;;  %v18514_v35 = vshll.u32 %v16631_v5, 16  ;;  %v7097_v8 = vld [vmem:[#allocation2 + $0x1a0] sm:$0x1] }
 0x5ad   :  { %5099 = vst [vmem:[%s17642_s5 + $0x78] sm:$0xff] %v12094_v30  ;;  %v11281_v28 = vpop.f32.mrb[36].mxu1  ;;  %v7208_v9 = vor.u32 %v7206_v3, %v7204_v61  ;;  %v8295_v48 = vrot.slane %v8293_v33, 7  ;;  %v18521_v3 = vld [vmem:[#allocation50_spill] sm:$0xff] }
 0x5ae   :  { %v12095_v55 = vadd.f32 %v11281_v28, %v18506_v60  ;;  %v4660_v37 = vpop.f32.mrb[37].mxu1  ;;  %v7212_v49 = vrot.slane %v18514_v35, 1  ;;  %v7205_v58 = vsel %vm3274_vm1, %v7200_v11, %v7204_v61  ;;  %v8070_v6 = vsel %vm3274_vm1, %v8065_v10, %v8069_v15  ;;  %v18525_v61 = vld [vmem:[#allocation89_spill] sm:$0xff] }
 0x5af   :  { %v12097_v4 = vadd.f32 %v4660_v37, %v18507_v31  ;;  %v11282_v51 = vpop.f32.mrb[38].mxu1  ;;  %v7218_v60 = vshll.u32 %v7097_v8, 16  ;;  %v8298_v31 = vsel %vm2974_vm15, %v8295_v48, %v16664_v46  ;;  %v18523_v46 = vshrl.u32 %v16631_v5, 16  ;;  %v8560_v5 = vld [vmem:[#allocation3 + $0x310] sm:$0xff]  ;;  %v18530_v48 = vld [vmem:[#allocation30_spill] sm:$0xff] }
 0x5b0   :  { %v12099_v38 = vadd.f32 %v11282_v51, %v18508_v59  ;;  %v12096_v25 = vadd.f32 %v12095_v55, %v18509_v34  ;;  %v4663_v29 = vpop.f32.mrb[39].mxu1  ;;  %v7213_v21 = vsel %vm3274_vm1, %v7208_v9, %v7212_v49  ;;  %v18517_v55 = vld [vmem:[#allocation95_spill] sm:$0xff]  ;;  %v18529_v9 = vld [vmem:[#allocation13_spill] sm:$0xff] }
 0x5b1   :  { %v12101_v42 = vadd.f32 %v4663_v29, %v18510_v53  ;;  %v12098_v47 = vadd.f32 %v12097_v4, %v18511_v27  ;;  %11728 = vmatmul.mubr.bf16.gmra.mrb[172].mxu0 %v7189_v16  ;;  %v18519_v4 = vld [vmem:[#allocation87_spill] sm:$0xff]  ;;  %v7220_v29 = vrot.slane %v7218_v60, 1  ;;  %v8778_v27 = vld [vmem:[#allocation3 + $0x3a0] sm:$0xff] }
 0x5b2   :  { %5104 = vst [vmem:[%s17642_s5 + $0xf0] sm:$0xff] %v12096_v25  ;;  %v12100_v62 = vadd.f32 %v12099_v38, %v18512_v14  ;;  %11840 = vmatmul.mubr.msk.bf16.gmra.mrb[76].mxu1 %vm696_vm0, %v8054_v63  ;;  %11731 = vmatprep.mubr.bf16.mxu0 %v7197_v2  ;;  %v18518_v63 = vld [vmem:[#allocation39_spill] sm:$0xff]  ;;  %v18520_v2 = vld [vmem:[#allocation26_spill] sm:$0xff]  ;;  %v18522_v38 = vld [vmem:[#allocation93_spill] sm:$0xff]  ;;  %v7216_v25 = vor.u32 %v7212_v49, %v18523_v46 }
 0x5b3   :  { %5102 = vst [vmem:[%s17642_s5 + $0xc0] sm:$0xff] %v12098_v47  ;;  %v12102_v52 = vadd.f32 %v12101_v42, %v18513_v12  ;;  %11843 = vmatprep.mubr.msk.bf16.mxu1 %vm696_vm0, %v8062_v1  ;;  %v8559_v53 = vld [vmem:[#allocation3 + $0x308] sm:$0xff]  ;;  %v8561_v42 = vld [vmem:[#allocation3 + $0x318] sm:$0xff]  ;;  %v18528_v12 = vld [vmem:[#allocation12_spill] sm:$0xff] }
 0x5b4   :  { %5105 = vst [vmem:[%s17642_s5 + $0x108] sm:$0xff] %v12100_v62  ;;  %v7221_v33 = vsel %vm3274_vm1, %v7216_v25, %v7220_v29  ;;  %v12986_v46 = vld [vmem:[#allocation2 + $0xe8] sm:$0xff]  ;;  %v12987_v25 = vld [vmem:[#allocation2 + $0x100] sm:$0xff] }
 0x5b5   :  { %5103 = vst [vmem:[%s17642_s5 + $0xd8] sm:$0xff] %v12102_v52  ;;  %v11285_v30 = vpop.f32.mrb[40].mxu1  ;;  %v8763_v29 = vld [vmem:[#allocation2 + $0x40] sm:$0xff] }
 0x5b6   :  { %v12103_v7 = vadd.f32 %v11285_v30, %v18515_v13  ;;  %v4676_v20 = vpop.f32.mrb[41].mxu1  ;;  %v17056_v30 = vld [vmem:[#allocation2 + $0x178] sm:$0xff] }
 0x5b7   :  { %v12105_v28 = vadd.f32 %v4676_v20, %v18516_v50  ;;  %v11286_v16 = vpop.f32.mrb[42].mxu1 }
 0x5b8   :  { %v12107_v37 = vadd.f32 %v11286_v16, %v18517_v55  ;;  %v12104_v45 = vadd.f32 %v12103_v7, %v18518_v63  ;;  %v4679_v18 = vpop.f32.mrb[43].mxu1  ;;  %v8336_v7 = vshrl.u32 %v17056_v30, 16  ;;  %v18533_v16 = vld [vmem:[#allocation36_spill] sm:$0xff] }
 0x5b9   :  { %v12109_v51 = vadd.f32 %v4679_v18, %v18519_v4  ;;  %v12106_v1 = vadd.f32 %v12105_v28, %v18520_v2  ;;  %11732 = vmatmul.mubr.bf16.gmra.mrb[176].mxu0 %v7205_v58  ;;  %v18532_v58 = vld [vmem:[#allocation35_spill] sm:$0xff]  ;;  %v18535_v63 = vld [vmem:[#allocation28_spill] sm:$0xff] }
 0x5ba   :  { %5108 = vst [vmem:[%s17642_s5 + $0x150] sm:$0xff] %v12104_v45  ;;  %v12108_v59 = vadd.f32 %v12107_v37, %v18521_v3  ;;  %11844 = vmatmul.mubr.msk.bf16.gmra.mrb[80].mxu1 %vm696_vm0, %v8070_v6  ;;  %11735 = vmatprep.mubr.bf16.mxu0 %v7213_v21  ;;  %v17077_v60 = vrot.slane %v8336_v7, 7  ;;  %v12979_v4 = vld [vmem:[#allocation2 + $0x40] sm:$0xff]  ;;  %v12982_v3 = vld [vmem:[#allocation2 + $0x88] sm:$0xff] }
 0x5bb   :  { %5106 = vst [vmem:[%s17642_s5 + $0x120] sm:$0xff] %v12106_v1  ;;  %v12110_v34 = vadd.f32 %v12109_v51, %v18522_v38  ;;  %11855 = vmatprep.mubr.msk.bf16.mxu1 %vm696_vm0, %v8298_v31  ;;  %v12980_v51 = vld [vmem:[#allocation2 + $0x58] sm:$0xff]  ;;  %v8780_v2 = vld [vmem:[#allocation3 + $0x3b0] sm:$0xff]  ;;  %v8781_v1 = vld [vmem:[#allocation3 + $0x3b8] sm:$0xff] }
 0x5bc   :  { %5109 = vst [vmem:[%s17642_s5 + $0x168] sm:$0xff] %v12108_v59  ;;  %v9115_v59 = vld [vmem:[#allocation3 + $0x440] sm:$0xff]  ;;  %v12984_v38 = vld [vmem:[#allocation2 + $0xb8] sm:$0xff] }
 0x5bd   :  { %5107 = vst [vmem:[%s17642_s5 + $0x138] sm:$0xff] %v12110_v34  ;;  %v12985_v34 = vld [vmem:[#allocation2 + $0xd0] sm:$0xff] }
 0x5c1   :  { %11736 = vmatmul.mubr.bf16.gmra.mrb[180].mxu0 %v7221_v33  ;;  %v12988_v33 = vld [vmem:[#allocation2 + $0x118] sm:$0xff] }
 0x5c2   :  { %11856 = vmatmul.mubr.msk.bf16.vlgmr.msra.gmra.mrb[56].mxu1 %vm696_vm0, %v16684_v43 }
 0x5c3   :  { %11884 = vmatpush3.bf16.msra.mxu1 %v16867_v41  ;;  %11859 = vmatprep.mubr.msk.bf16.mxu1 %vm696_vm0, %v16701_v0  ;;  %v18524_v0 = vld [vmem:[#allocation92_spill] sm:$0xff] }
 0x5c4   :  { %11885 = vmatprep.subr.bf16.mxu1 %v8559_v53 }
 0x5c7   :  { %11886 = vmatpush3.bf16.msra.mxu1 %v8559_v53  ;;  %v8785_v53 = vshll.u32 %v8763_v29, 16 }
 0x5c8   :  { %11887 = vmatprep.subr.bf16.mxu1 %v8560_v5 }
 0x5ca   :  { %11860 = vmatmul.mubr.msk.bf16.gmra.mrb[60].mxu1 %vm696_vm0, %v16707_v19 }
 0x5cb   :  { %11863 = vmatprep.mubr.msk.bf16.mxu1 %vm696_vm0, %v16728_v22  ;;  %11888 = vmatpush3.bf16.msra.mxu1 %v8560_v5  ;;  %v18526_v22 = vld [vmem:[#allocation91_spill] sm:$0xff] }
 0x5cc   :  { %11889 = vmatprep.subr.bf16.mxu1 %v8561_v42  ;;  %v17119_v5 = vld [vmem:[#allocation2 + $0x58] sm:$0xff] }
 0x5cf   :  { %11890 = vmatpush3.bf16.msra.mxu1 %v8561_v42  ;;  %v8783_v42 = vshrl.u32 %v8763_v29, 16 }
 0x5d0   :  { %11919 = vmatprep.subr.bf16.mxu1 %v8778_v27 }
 0x5d2   :  { %11864 = vmatmul.mubr.msk.bf16.gmra.mrb[64].mxu1 %vm696_vm0, %v16734_v44  ;;  %v18527_v44 = vld [vmem:[#allocation11_spill] sm:$0xff] }
 0x5d3   :  { %11867 = vmatprep.mubr.msk.bf16.mxu1 %vm696_vm0, %v16753_v40 }
 0x5d5   :  { %v11333_v43 = vpop.f32.mrb[44].mxu1 }
 0x5d6   :  { %v12111_v41 = vadd.f32 %v11333_v43, %v18524_v0  ;;  %v5019_v47 = vpop.f32.mrb[45].mxu1  ;;  %v8790_v43 = vshll.u32 %v17119_v5, 16  ;;  %v17126_v0 = vld [vmem:[#allocation2 + $0x70] sm:$0xff] }
 0x5d7   :  { %v12112_v19 = vadd.f32 %v5019_v47, %v18525_v61  ;;  %v11334_v14 = vpop.f32.mrb[46].mxu1  ;;  %v8798_v61 = vshll.u32 %v17126_v0, 16 }
 0x5d8   :  { %5112 = vst [vmem:[%s17642_s5 + $0x1b0] sm:$0xff] %v12111_v41  ;;  %v12113_v62 = vadd.f32 %v11334_v14, %v18526_v22  ;;  %v5022_v11 = vpop.f32.mrb[47].mxu1  ;;  %v8792_v47 = vrot.slane %v8790_v43, 1  ;;  %v8802_v22 = vshrl.u32 %v17126_v0, 16 }
 0x5d9   :  { %5110 = vst [vmem:[%s17642_s5 + $0x180] sm:$0xff] %v12112_v19  ;;  %v12114_v40 = vadd.f32 %v5022_v11, %v18527_v44  ;;  %v8794_v19 = vshrl.u32 %v17119_v5, 16  ;;  %v17144_v11 = vld [vmem:[#allocation2 + $0xa0] sm:$0xff] }
 0x5da   :  { %5113 = vst [vmem:[%s17642_s5 + $0x1c8] sm:$0xff] %v12113_v62  ;;  %11868 = vmatmul.mubr.msk.bf16.gmra.mrb[68].mxu1 %vm696_vm0, %v16759_v26 }
 0x5db   :  { %5111 = vst [vmem:[%s17642_s5 + $0x198] sm:$0xff] %v12114_v40  ;;  %11871 = vmatprep.mubr.msk.bf16.mxu1 %vm696_vm0, %v16777_v57  ;;  %v18531_v57 = vld [vmem:[#allocation31_spill] sm:$0xff]  ;;  %v8796_v62 = vor.u32 %v8794_v19, %v8792_v47 }
 0x5dd   :  { %v11337_v10 = vpop.f32.mrb[48].mxu1 }
 0x5de   :  { %v12115_v52 = vadd.f32 %v11337_v10, %v18528_v12  ;;  %v5035_v15 = vpop.f32.mrb[49].mxu1  ;;  %v17150_v10 = vld [vmem:[#allocation2 + $0xb8] sm:$0xff]  ;;  %v8814_v12 = vshll.u32 %v17144_v11, 16 }
 0x5df   :  { %v12116_v35 = vadd.f32 %v5035_v15, %v18529_v9  ;;  %v11338_v49 = vpop.f32.mrb[50].mxu1 }
 0x5e0   :  { %5116 = vst [vmem:[%s17642_s5 + $0x210] sm:$0xff] %v12115_v52  ;;  %v12117_v26 = vadd.f32 %v11338_v49, %v18530_v48  ;;  %v5038_v8 = vpop.f32.mrb[51].mxu1  ;;  %v8822_v49 = vshll.u32 %v17150_v10, 16  ;;  %v9116_v48 = vld [vmem:[#allocation3 + $0x448] sm:$0xff] }
 0x5e1   :  { %5114 = vst [vmem:[%s17642_s5 + $0x1e0] sm:$0xff] %v12116_v35  ;;  %v12118_v13 = vadd.f32 %v5038_v8, %v18531_v57  ;;  %v8818_v35 = vshrl.u32 %v17144_v11, 16  ;;  %v17170_v57 = vld [vmem:[#allocation2 + $0xd0] sm:$0xff] }
 0x5e2   :  { %5117 = vst [vmem:[%s17642_s5 + $0x228] sm:$0xff] %v12117_v26  ;;  %11872 = vmatmul.mubr.msk.bf16.gmra.mrb[72].mxu1 %vm696_vm0, %v16783_v24  ;;  %v8339_v24 = vshll.u32 %v17056_v30, 16  ;;  %v8816_v26 = vrot.slane %v8814_v12, 1 }
 0x5e3   :  { %5115 = vst [vmem:[%s17642_s5 + $0x1f8] sm:$0xff] %v12118_v13  ;;  %11875 = vmatprep.mubr.msk.bf16.mxu1 %vm696_vm0, %v16802_v32  ;;  %v18534_v32 = vld [vmem:[#allocation47_spill] sm:$0xff] }
 0x5e4   :  { %v17101_v18 = vor.u32 %v8339_v24, %v17077_v60  ;;  %v8820_v13 = vor.u32 %v8818_v35, %v8816_v26 }
 0x5e5   :  { %v11341_v20 = vpop.f32.mrb[52].mxu1 }
 0x5e6   :  { %v12119_v50 = vadd.f32 %v11341_v20, %v18532_v58  ;;  %v5051_v28 = vpop.f32.mrb[53].mxu1  ;;  %v8342_v31 = vsel %vm2974_vm15, %v16798_v36, %v17101_v18  ;;  %v12983_v36 = vld [vmem:[#allocation2 + $0xa0] sm:$0xff]  ;;  %v8824_v20 = vrot.slane %v8822_v49, 1  ;;  %v17176_v58 = vld [vmem:[#allocation2 + $0xe8] sm:$0xff] }
 0x5e7   :  { %v12120_v6 = vadd.f32 %v5051_v28, %v18533_v16  ;;  %v11342_v21 = vpop.f32.mrb[54].mxu1  ;;  %v8830_v28 = vshll.u32 %v17170_v57, 16 }
 0x5e8   :  { %5120 = vst [vmem:[%s17642_s5 + $0x270] sm:$0xff] %v12119_v50  ;;  %v12121_v55 = vadd.f32 %v11342_v21, %v18534_v32  ;;  %v5054_v37 = vpop.f32.mrb[55].mxu1  ;;  %v9117_v50 = vld [vmem:[#allocation3 + $0x450] sm:$0xff]  ;;  %v17184_v21 = vsel %vm3274_vm1, %v8820_v13, %v8824_v20  ;;  %v8834_v32 = vshrl.u32 %v17170_v57, 16 }
 0x5e9   :  { %5118 = vst [vmem:[%s17642_s5 + $0x240] sm:$0xff] %v12120_v6  ;;  %v12122_v45 = vadd.f32 %v5054_v37, %v18535_v63  ;;  %v8826_v6 = vshrl.u32 %v17150_v10, 16  ;;  %v9118_v37 = vld [vmem:[#allocation3 + $0x458] sm:$0xff]  ;;  %v8832_v63 = vrot.slane %v8830_v28, 1 }
 0x5ea   :  { %5121 = vst [vmem:[%s17642_s5 + $0x288] sm:$0xff] %v12121_v55  ;;  %11876 = vmatmul.mubr.msk.bf16.gmra.mrb[76].mxu1 %vm696_vm0, %v16805_v56  ;;  %v8779_v56 = vld [vmem:[#allocation3 + $0x3a8] sm:$0xff]  ;;  %v8838_v55 = vshll.u32 %v17176_v58, 16 }
 0x5eb   :  { %5119 = vst [vmem:[%s17642_s5 + $0x258] sm:$0xff] %v12122_v45  ;;  %11879 = vmatprep.mubr.msk.bf16.mxu1 %vm696_vm0, %v16823_v54  ;;  %v12981_v54 = vld [vmem:[#allocation2 + $0x70] sm:$0xff]  ;;  %v8828_v45 = vor.u32 %v8826_v6, %v8824_v20 }
 0x5f2   :  { %11880 = vmatmul.mubr.msk.bf16.gmra.mrb[80].mxu1 %vm696_vm0, %v8342_v31  ;;  %v17196_v31 = vld [vmem:[#allocation2 + $0x100] sm:$0xff] }
 0x5f3   :  { %11891 = vmatprep.mubr.msk.bf16.mxu1 %vm696_vm0, %v12979_v4  ;;  %v8836_v4 = vor.u32 %v8834_v32, %v8832_v63 }
 0x5fa   :  { %11892 = vmatmul.mubr.msk.bf16.vlgmr.msra.gmra.mrb[56].mxu1 %vm696_vm0, %v12980_v51  ;;  %v17202_v51 = vld [vmem:[#allocation2 + $0x118] sm:$0xff] }
 0x5fb   :  { %11920 = vmatpush3.bf16.msra.mxu1 %v8778_v27  ;;  %11895 = vmatprep.mubr.msk.bf16.mxu1 %vm696_vm0, %v12981_v54  ;;  %v8787_v27 = vrot.slane %v8785_v53, 1  ;;  %v17204_v54 = vld [vmem:[#allocation3 + $0x4e0] sm:$0xff]  ;;  %v17231_v53 = vld [vmem:[#allocation2 + $0x148] sm:$0xff] }
 0x5fc   :  { %11921 = vmatprep.subr.bf16.mxu1 %v8779_v56  ;;  %v8874_v20 = vshrl.u32 %v17231_v53, 16 }
 0x5fd   :  { %v8788_v41 = vor.u32 %v8787_v27, %v8783_v42 }
 0x5ff   :  { %11922 = vmatpush3.bf16.msra.mxu1 %v8779_v56  ;;  %v8793_v14 = vsel %vm3274_vm1, %v8788_v41, %v8792_v47  ;;  %v8840_v56 = vrot.slane %v8838_v55, 1  ;;  %v8858_v41 = vshrl.u32 %v17202_v51, 16 }
 0x600   :  { %11923 = vmatprep.subr.bf16.mxu1 %v8780_v2 }
 0x602   :  { %11896 = vmatmul.mubr.msk.bf16.gmra.mrb[60].mxu1 %vm696_vm0, %v12982_v3  ;;  %v8842_v3 = vshrl.u32 %v17176_v58, 16 }
 0x603   :  { %11899 = vmatprep.mubr.msk.bf16.mxu1 %vm696_vm0, %v12983_v36  ;;  %11924 = vmatpush3.bf16.msra.mxu1 %v8780_v2  ;;  %v8846_v2 = vshll.u32 %v17196_v31, 16  ;;  %v17212_v36 = vsel %vm3274_vm1, %v8836_v4, %v8840_v56 }
 0x604   :  { %11925 = vmatprep.subr.bf16.mxu1 %v8781_v1 }
 0x607   :  { %11926 = vmatpush3.bf16.msra.mxu1 %v8781_v1  ;;  %v17208_v1 = vsel %vm3274_vm1, %v8828_v45, %v8832_v63 }
 0x608   :  { %11955 = vmatprep.subr.bf16.mxu1 %v9115_v59 }
 0x60a   :  { %11900 = vmatmul.mubr.msk.bf16.gmra.mrb[64].mxu1 %vm696_vm0, %v12984_v38  ;;  %v8854_v38 = vshll.u32 %v17202_v51, 16 }
 0x60b   :  { %11903 = vmatprep.mubr.msk.bf16.mxu1 %vm696_vm0, %v12985_v34  ;;  %v8848_v34 = vrot.slane %v8846_v2, 1 }
 0x612   :  { %11904 = vmatmul.mubr.msk.bf16.gmra.mrb[68].mxu1 %vm696_vm0, %v12986_v46  ;;  %v8844_v46 = vor.u32 %v8842_v3, %v8840_v56  ;;  %v8888_v56 = vrot.slane %v8339_v24, 1 }
 0x613   :  { %11907 = vmatprep.mubr.msk.bf16.mxu1 %vm696_vm0, %v12987_v25  ;;  %v17225_v25 = vld [vmem:[#allocation2 + $0x130] sm:$0xff] }
 0x614   :  { %v8862_v42 = vshll.u32 %v17225_v25, 16  ;;  %v17235_v27 = vsel %vm3274_vm1, %v8844_v46, %v8848_v34  ;;  %v9113_v46 = vld [vmem:[#allocation2 + $0x40] sm:$0x80]  ;;  %v17292_v24 = vor.u32 %v8888_v56, %v8336_v7 }
 0x61a   :  { %11908 = vmatmul.mubr.msk.bf16.gmra.mrb[72].mxu1 %vm696_vm0, %v12988_v33  ;;  %v8856_v33 = vrot.slane %v8854_v38, 1 }
 0x61b   :  { %11911 = vmatprep.mubr.msk.bf16.mxu1 %vm696_vm0, %v16621_v23  ;;  %v17130_v23 = vld [vmem:[#allocation2 + $0x88] sm:$0xff] }
 0x61c   :  { %v8810_v15 = vshrl.u32 %v17130_v23, 16 }
 0x622   :  { %11912 = vmatmul.mubr.msk.bf16.gmra.mrb[76].mxu1 %vm696_vm0, %v16629_v39  ;;  %v8806_v39 = vshll.u32 %v17130_v23, 16 }
 0x623   :  { %11915 = vmatprep.mubr.msk.bf16.mxu1 %vm696_vm0, %v16649_v17  ;;  %v8800_v17 = vrot.slane %v8798_v61, 1 }
 0x624   :  { %v8808_v40 = vrot.slane %v8806_v39, 1 }
 0x625   :  { %v8804_v44 = vor.u32 %v8802_v22, %v8800_v17  ;;  %v17154_v52 = vsel %vm3274_vm1, %v8796_v62, %v8800_v17  ;;  %v8870_v17 = vshll.u32 %v17231_v53, 16  ;;  %v8864_v62 = vrot.slane %v8862_v42, 1 }
 0x626   :  { %v8812_v8 = vor.u32 %v8810_v15, %v8808_v40 }
 0x627   :  { %v17158_v9 = vsel %vm3274_vm1, %v8804_v44, %v8808_v40  ;;  %v8860_v44 = vor.u32 %v8858_v41, %v8856_v33  ;;  %v17251_v40 = vld [vmem:[#allocation2 + $0x160] sm:$0xff] }
 0x628   :  { %v17180_v16 = vsel %vm3274_vm1, %v8812_v8, %v8816_v26  ;;  %v8872_v26 = vrot.slane %v8870_v17, 1  ;;  %v8878_v8 = vshll.u32 %v17251_v40, 16 }
 0x629   :  { %v17259_v13 = vsel %vm3274_vm1, %v8860_v44, %v8864_v62  ;;  %v9120_v44 = vshrl.u32 %v9113_v46, 16  ;;  %v9129_v46 = vrot.slane %v8810_v15, 7 }
 0x62a   :  { %11916 = vmatmul.mubr.msk.bf16.gmra.mrb[80].mxu1 %vm696_vm0, %v17056_v30  ;;  %v8880_v63 = vrot.slane %v8878_v8, 1  ;;  %v8876_v45 = vor.u32 %v8874_v20, %v8872_v26 }
 0x62b   :  { %11927 = vmatprep.mubr.msk.bf16.mxu1 %vm696_vm0, %v8793_v14  ;;  %v8866_v14 = vshrl.u32 %v17225_v25, 16 }
 0x632   :  { %11928 = vmatmul.mubr.msk.bf16.vlgmr.msra.gmra.mrb[56].mxu1 %vm696_vm0, %v17154_v52 }
 0x633   :  { %11956 = vmatpush3.bf16.msra.mxu1 %v9115_v59  ;;  %11931 = vmatprep.mubr.msk.bf16.mxu1 %vm696_vm0, %v17158_v9  ;;  %v8850_v59 = vshrl.u32 %v17196_v31, 16 }
 0x634   :  { %11957 = vmatprep.subr.bf16.mxu1 %v9116_v48 }
 0x635   :  { %v8852_v29 = vor.u32 %v8850_v59, %v8848_v34  ;;  %v8777_v34 = vld [vmem:[#allocation2 + $0x190] sm:$0x1] }
 0x637   :  { %11958 = vmatpush3.bf16.msra.mxu1 %v9116_v48  ;;  %v17239_v47 = vsel %vm3274_vm1, %v8852_v29, %v8856_v33  ;;  %v8868_v48 = vor.u32 %v8866_v14, %v8864_v62  ;;  %v17279_v29 = vsel %vm3274_vm1, %v8876_v45, %v8880_v63  ;;  %v8894_v33 = vshll.u32 %v8777_v34, 16 }
 0x638   :  { %11959 = vmatprep.subr.bf16.mxu1 %v9117_v50 }
 0x63a   :  { %11932 = vmatmul.mubr.msk.bf16.gmra.mrb[60].mxu1 %vm696_vm0, %v17180_v16 }
 0x63b   :  { %11935 = vmatprep.mubr.msk.bf16.mxu1 %vm696_vm0, %v17184_v21  ;;  %11960 = vmatpush3.bf16.msra.mxu1 %v9117_v50  ;;  %v17263_v50 = vsel %vm3274_vm1, %v8868_v48, %v8872_v26  ;;  %v9123_v48 = vrot.slane %v8794_v19, 7  ;;  %v8896_v26 = vrot.slane %v8894_v33, 1 }
 0x63c   :  { %11961 = vmatprep.subr.bf16.mxu1 %v9118_v37 }
 0x63d   :  { %v9124_v45 = vor.u32 %v9123_v48, %v8790_v43  ;;  %v8897_v19 = vsel %vm3274_vm1, %v17292_v24, %v8896_v26  ;;  %v9130_v43 = vor.u32 %v9129_v46, %v8806_v39  ;;  %v9135_v26 = vrot.slane %v8826_v6, 7  ;;  %v9387_v6 = vld [vmem:[#allocation3 + $0x4f0] sm:$0xff] }
 0x63f   :  { %11962 = vmatpush3.bf16.msra.mxu1 %v9118_v37  ;;  %v8882_v37 = vshrl.u32 %v17251_v40, 16 }
 0x640   :  { %11991 = vmatprep.subr.bf16.mxu1 %v17204_v54 }
 0x641   :  { %v8884_v4 = vor.u32 %v8882_v37, %v8880_v63  ;;  %v9122_v63 = vrot.slane %v9120_v44, 7  ;;  %v9132_v44 = vrot.slane %v8818_v35, 7 }
 0x642   :  { %11936 = vmatmul.mubr.msk.bf16.gmra.mrb[64].mxu1 %vm696_vm0, %v17208_v1 }
 0x643   :  { %11939 = vmatprep.mubr.msk.bf16.mxu1 %vm696_vm0, %v17212_v36  ;;  %v17282_v62 = vsel %vm3274_vm1, %v8884_v4, %v8888_v56  ;;  %v9126_v4 = vrot.slane %v8802_v22, 7  ;;  %v9125_v34 = vsel %vm2974_vm15, %v9122_v63, %v9124_v45  ;;  %v9386_v63 = vld [vmem:[#allocation3 + $0x4e8] sm:$0xff]  ;;  %v9133_v35 = vor.u32 %v9132_v44, %v8814_v12 }
 0x644   :  { %v9138_v12 = vrot.slane %v8834_v32, 7 }
 0x645   :  { %v9127_v7 = vor.u32 %v9126_v4, %v8798_v61  ;;  %v9131_v39 = vsel %vm2974_vm15, %v9126_v4, %v9130_v43 }
 0x646   :  { %v9139_v32 = vor.u32 %v9138_v12, %v8830_v28 }
 0x647   :  { %v9128_v33 = vsel %vm2974_vm15, %v9123_v48, %v9127_v7  ;;  %v9136_v48 = vor.u32 %v9135_v26, %v8822_v49  ;;  %v9141_v7 = vrot.slane %v8842_v3, 7  ;;  %v17358_v3 = vld [vmem:[#allocation3 + $0x580] sm:$0xff] }
 0x648   :  { %v9140_v28 = vsel %vm2974_vm15, %v9135_v26, %v9139_v32 }
 0x649   :  { %v9142_v43 = vor.u32 %v9141_v7, %v8838_v55 }
 0x64a   :  { %11940 = vmatmul.mubr.msk.bf16.gmra.mrb[68].mxu1 %vm696_vm0, %v17235_v27 }
 0x64b   :  { %11943 = vmatprep.mubr.msk.bf16.mxu1 %vm696_vm0, %v17239_v47 }
 0x652   :  { %11944 = vmatmul.mubr.msk.bf16.gmra.mrb[72].mxu1 %vm696_vm0, %v17259_v13 }
 0x653   :  { %11947 = vmatprep.mubr.msk.bf16.mxu1 %vm696_vm0, %v17263_v50 }
 0x65a   :  { %11948 = vmatmul.mubr.msk.bf16.gmra.mrb[76].mxu1 %vm696_vm0, %v17279_v29 }
 0x65b   :  { %11951 = vmatprep.mubr.msk.bf16.mxu1 %vm696_vm0, %v17282_v62 }
 0x662   :  { %11952 = vmatmul.mubr.msk.bf16.gmra.mrb[80].mxu1 %vm696_vm0, %v8897_v19  ;;  %v9134_v19 = vsel %vm2974_vm15, %v9129_v46, %v9133_v35  ;;  %v9388_v46 = vld [vmem:[#allocation3 + $0x4f8] sm:$0xff] }
 0x663   :  { %11963 = vmatprep.mubr.msk.bf16.mxu1 %vm696_vm0, %v9125_v34  ;;  %v9137_v34 = vsel %vm2974_vm15, %v9132_v44, %v9136_v48  ;;  %v9143_v44 = vsel %vm2974_vm15, %v9138_v12, %v9142_v43  ;;  %v9150_v48 = vrot.slane %v8866_v14, 7  ;;  %v9156_v12 = vrot.slane %v8882_v37, 7 }
 0x664   :  { %v11713_v56 = vpop.f32.mrb[156].mxu0 }
 0x665   :  { %7411 = vst [vmem:[%s17642_s5 + $0x38] sm:$0xff] %v11713_v56  ;;  %v7270_v22 = vpop.f32.mrb[157].mxu0  ;;  %v9151_v14 = vor.u32 %v9150_v48, %v8862_v42  ;;  %v9157_v37 = vor.u32 %v9156_v12, %v8878_v8 }
 0x666   :  { %7409 = vst [vmem:[%s17642_s5 + $0x8] sm:$0xff] %v7270_v22  ;;  %v11714_v15 = vpop.f32.mrb[158].mxu0 }
 0x667   :  { %7412 = vst [vmem:[%s17642_s5 + $0x50] sm:$0xff] %v11714_v15  ;;  %v7273_v61 = vpop.f32.mrb[159].mxu0 }
 0x668   :  { %7410 = vst [vmem:[%s17642_s5 + $0x20] sm:$0xff] %v7273_v61  ;;  %v9147_v61 = vrot.slane %v8858_v41, 7 }
 0x66a   :  { %11964 = vmatmul.mubr.msk.bf16.vlgmr.msra.gmra.mrb[56].mxu1 %vm696_vm0, %v9128_v33  ;;  %v9144_v33 = vrot.slane %v8850_v59, 7 }
 0x66b   :  { %11992 = vmatpush3.bf16.msra.mxu1 %v17204_v54  ;;  %11967 = vmatprep.mubr.msk.bf16.mxu1 %vm696_vm0, %v9131_v39  ;;  %v9148_v39 = vor.u32 %v9147_v61, %v8854_v38 }
 0x66c   :  { %11993 = vmatprep.subr.bf16.mxu1 %v9386_v63  ;;  %v11717_v45 = vpop.f32.mrb[160].mxu0  ;;  %v9145_v59 = vor.u32 %v9144_v33, %v8846_v2 }
 0x66d   :  { %7415 = vst [vmem:[%s17642_s5 + $0x98] sm:$0xff] %v11717_v45  ;;  %v7286_v4 = vpop.f32.mrb[161].mxu0  ;;  %v9149_v38 = vsel %vm2974_vm15, %v9144_v33, %v9148_v39  ;;  %v9153_v45 = vrot.slane %v8874_v20, 7  ;;  %v9608_v39 = vld [vmem:[#allocation3 + $0x598] sm:$0xff] }
 0x66e   :  { %7413 = vst [vmem:[%s17642_s5 + $0x68] sm:$0xff] %v7286_v4  ;;  %v11718_v54 = vpop.f32.mrb[162].mxu0  ;;  %v9146_v35 = vsel %vm2974_vm15, %v9141_v7, %v9145_v59  ;;  %v9606_v59 = vld [vmem:[#allocation3 + $0x588] sm:$0xff] }
 0x66f   :  { %11994 = vmatpush3.bf16.msra.mxu1 %v9386_v63  ;;  %7416 = vst [vmem:[%s17642_s5 + $0xb0] sm:$0xff] %v11718_v54  ;;  %v7289_v49 = vpop.f32.mrb[163].mxu0  ;;  %v9158_v43 = vsel %vm2974_vm15, %v9153_v45, %v9157_v37 }
 0x670   :  { %11995 = vmatprep.subr.bf16.mxu1 %v9387_v6  ;;  %7414 = vst [vmem:[%s17642_s5 + $0x80] sm:$0xff] %v7289_v49  ;;  %v17422_v49 = vld [vmem:[#allocation2 + $0x190] sm:$0xff] }
 0x671   :  { %v9166_v8 = vshll.u32 %v17422_v49, 16 }
 0x672   :  { %11968 = vmatmul.mubr.msk.bf16.gmra.mrb[60].mxu1 %vm696_vm0, %v9134_v19  ;;  %v9152_v19 = vsel %vm2974_vm15, %v9147_v61, %v9151_v14 }
 0x673   :  { %11971 = vmatprep.mubr.msk.bf16.mxu1 %vm696_vm0, %v9137_v34  ;;  %11996 = vmatpush3.bf16.msra.mxu1 %v9387_v6  ;;  %v9154_v6 = vor.u32 %v9153_v45, %v8870_v17  ;;  %v9163_v34 = vshrl.u32 %v17422_v49, 16 }
 0x674   :  { %11997 = vmatprep.subr.bf16.mxu1 %v9388_v46  ;;  %v11721_v56 = vpop.f32.mrb[164].mxu0 }
 0x675   :  { %7419 = vst [vmem:[%s17642_s5 + $0xf8] sm:$0xff] %v11721_v56  ;;  %v7302_v22 = vpop.f32.mrb[165].mxu0  ;;  %v9155_v17 = vsel %vm2974_vm15, %v9150_v48, %v9154_v6  ;;  %v9165_v56 = vrot.slane %v9163_v34, 7 }
 0x676   :  { %7417 = vst [vmem:[%s17642_s5 + $0xc8] sm:$0xff] %v7302_v22  ;;  %v11722_v15 = vpop.f32.mrb[166].mxu0 }
 0x677   :  { %11998 = vmatpush3.bf16.msra.mxu1 %v9388_v46  ;;  %7420 = vst [vmem:[%s17642_s5 + $0x110] sm:$0xff] %v11722_v15  ;;  %v7305_v55 = vpop.f32.mrb[167].mxu0  ;;  %v9161_v15 = vsel %vm2974_vm15, %v9156_v12, %v17101_v18 }
 0x678   :  { %12027 = vmatprep.subr.bf16.mxu1 %v17358_v3  ;;  %7418 = vst [vmem:[%s17642_s5 + $0xe0] sm:$0xff] %v7305_v55 }
 0x67a   :  { %11972 = vmatmul.mubr.msk.bf16.gmra.mrb[64].mxu1 %vm696_vm0, %v9140_v28  ;;  %v9168_v28 = vor.u32 %v9166_v8, %v9165_v56 }
 0x67b   :  { %11975 = vmatprep.mubr.msk.bf16.mxu1 %vm696_vm0, %v9143_v44 }
 0x67c   :  { %v11725_v26 = vpop.f32.mrb[168].mxu0  ;;  %v9169_v44 = vsel %vm2974_vm15, %v17077_v60, %v9168_v28  ;;  %v9607_v60 = vld [vmem:[#allocation3 + $0x590] sm:$0xff] }
 0x67d   :  { %7423 = vst [vmem:[%s17642_s5 + $0x158] sm:$0xff] %v11725_v26  ;;  %v7318_v41 = vpop.f32.mrb[169].mxu0 }
 0x67e   :  { %7421 = vst [vmem:[%s17642_s5 + $0x128] sm:$0xff] %v7318_v41  ;;  %v11726_v63 = vpop.f32.mrb[170].mxu0 }
 0x67f   :  { %7424 = vst [vmem:[%s17642_s5 + $0x170] sm:$0xff] %v11726_v63  ;;  %v7321_v2 = vpop.f32.mrb[171].mxu0 }
 0x680   :  { %7422 = vst [vmem:[%s17642_s5 + $0x140] sm:$0xff] %v7321_v2 }
 0x682   :  { %11976 = vmatmul.mubr.msk.bf16.gmra.mrb[68].mxu1 %vm696_vm0, %v9146_v35 }
 0x683   :  { %11979 = vmatprep.mubr.msk.bf16.mxu1 %vm696_vm0, %v9149_v38 }
 0x684   :  { %v11729_v4 = vpop.f32.mrb[172].mxu0 }
 0x685   :  { %7427 = vst [vmem:[%s17642_s5 + $0x1b8] sm:$0xff] %v11729_v4  ;;  %v7334_v20 = vpop.f32.mrb[173].mxu0 }
 0x686   :  { %7425 = vst [vmem:[%s17642_s5 + $0x188] sm:$0xff] %v7334_v20  ;;  %v11730_v54 = vpop.f32.mrb[174].mxu0 }
 0x687   :  { %7428 = vst [vmem:[%s17642_s5 + $0x1d0] sm:$0xff] %v11730_v54  ;;  %v7337_v42 = vpop.f32.mrb[175].mxu0 }
 0x688   :  { %7426 = vst [vmem:[%s17642_s5 + $0x1a0] sm:$0xff] %v7337_v42 }
 0x68a   :  { %11980 = vmatmul.mubr.msk.bf16.gmra.mrb[72].mxu1 %vm696_vm0, %v9152_v19 }
 0x68b   :  { %11983 = vmatprep.mubr.msk.bf16.mxu1 %vm696_vm0, %v9155_v17 }
 0x68c   :  { %v11733_v7 = vpop.f32.mrb[176].mxu0 }
 0x68d   :  { %7431 = vst [vmem:[%s17642_s5 + $0x218] sm:$0xff] %v11733_v7  ;;  %v7350_v46 = vpop.f32.mrb[177].mxu0 }
 0x68e   :  { %7429 = vst [vmem:[%s17642_s5 + $0x1e8] sm:$0xff] %v7350_v46  ;;  %v11734_v32 = vpop.f32.mrb[178].mxu0 }
 0x68f   :  { %7432 = vst [vmem:[%s17642_s5 + $0x230] sm:$0xff] %v11734_v32  ;;  %v7353_v22 = vpop.f32.mrb[179].mxu0 }
 0x690   :  { %7430 = vst [vmem:[%s17642_s5 + $0x200] sm:$0xff] %v7353_v22 }
 0x692   :  { %11984 = vmatmul.mubr.msk.bf16.gmra.mrb[76].mxu1 %vm696_vm0, %v9158_v43 }
 0x693   :  { %11987 = vmatprep.mubr.msk.bf16.mxu1 %vm696_vm0, %v9161_v15 }
 0x694   :  { %v11737_v33 = vpop.f32.mrb[180].mxu0 }
 0x695   :  { %7435 = vst [vmem:[%s17642_s5 + $0x278] sm:$0xff] %v11737_v33  ;;  %v7366_v55 = vpop.f32.mrb[181].mxu0 }
 0x696   :  { %7433 = vst [vmem:[%s17642_s5 + $0x248] sm:$0xff] %v7366_v55  ;;  %v11738_v18 = vpop.f32.mrb[182].mxu0 }
 0x697   :  { %7436 = vst [vmem:[%s17642_s5 + $0x290] sm:$0xff] %v11738_v18  ;;  %v7369_v61 = vpop.f32.mrb[183].mxu0 }
 0x698   :  { %7434 = vst [vmem:[%s17642_s5 + $0x260] sm:$0xff] %v7369_v61 }
 0x69a   :  { %11988 = vmatmul.mubr.msk.bf16.gmra.mrb[80].mxu1 %vm696_vm0, %v9169_v44 }
 0x69b   :  { %11999 = vmatprep.mubr.msk.bf16.mxu1 %vm696_vm0, %v17119_v5  ;;  %v9604_v5 = vld [vmem:[#allocation2 + $0x1a8] sm:$0x1] }
 0x6a2   :  { %12000 = vmatmul.mubr.msk.bf16.vlgmr.msra.gmra.mrb[56].mxu1 %vm696_vm0, %v17126_v0  ;;  %v9721_v0 = vshll.u32 %v9604_v5, 16 }
 0x6a3   :  { %12028 = vmatpush3.bf16.msra.mxu1 %v17358_v3  ;;  %12003 = vmatprep.mubr.msk.bf16.mxu1 %vm696_vm0, %v17130_v23 }
 0x6a4   :  { %12029 = vmatprep.subr.bf16.mxu1 %v9606_v59 }
 0x6a7   :  { %12030 = vmatpush3.bf16.msra.mxu1 %v9606_v59 }
 0x6a8   :  { %12031 = vmatprep.subr.bf16.mxu1 %v9607_v60 }
 0x6aa   :  { %12004 = vmatmul.mubr.msk.bf16.gmra.mrb[60].mxu1 %vm696_vm0, %v17144_v11 }
 0x6ab   :  { %12007 = vmatprep.mubr.msk.bf16.mxu1 %vm696_vm0, %v17150_v10  ;;  %12032 = vmatpush3.bf16.msra.mxu1 %v9607_v60  ;;  %v9723_v10 = vrot.slane %v9721_v0, 1 }
 0x6ac   :  { %12033 = vmatprep.subr.bf16.mxu1 %v9608_v39 }
 0x6af   :  { %12034 = vmatpush3.bf16.msra.mxu1 %v9608_v39 }
 0x6b2   :  { %12008 = vmatmul.mubr.msk.bf16.gmra.mrb[64].mxu1 %vm696_vm0, %v17170_v57 }
 0x6b3   :  { %12011 = vmatprep.mubr.msk.bf16.mxu1 %vm696_vm0, %v17176_v58 }
 0x6ba   :  { %12012 = vmatmul.mubr.msk.bf16.gmra.mrb[68].mxu1 %vm696_vm0, %v17196_v31 }
 0x6bb   :  { %12015 = vmatprep.mubr.msk.bf16.mxu1 %vm696_vm0, %v17202_v51 }
 0x6c2   :  { %12016 = vmatmul.mubr.msk.bf16.gmra.mrb[72].mxu1 %vm696_vm0, %v17225_v25 }
 0x6c3   :  { %12019 = vmatprep.mubr.msk.bf16.mxu1 %vm696_vm0, %v17231_v53 }
 0x6ca   :  { %12020 = vmatmul.mubr.msk.bf16.gmra.mrb[76].mxu1 %vm696_vm0, %v17251_v40 }
 0x6cb   :  { %12023 = vmatprep.mubr.msk.bf16.mxu1 %vm696_vm0, %v17056_v30  ;;  %v9715_v30 = vrot.slane %v9166_v8, 1 }
 0x6cd   :  { %v9716_v23 = vsel %vm3274_vm1, %v17292_v24, %v9715_v30  ;;  %v9719_v11 = vor.u32 %v9715_v30, %v9163_v34 }
 0x6d2   :  { %12024 = vmatmul.mubr.msk.bf16.gmra.mrb[80].mxu1 %vm696_vm0, %v17422_v49 }
 0x6d3   :  { %12035 = vmatprep.mubr.msk.bf16.mxu1 %vm696_vm0, %v17154_v52  ;;  %v9724_v52 = vsel %vm3274_vm1, %v9719_v11, %v9723_v10 }
 0x6da   :  { %12036 = vmatmul.mubr.msk.bf16.vlgmr.msra.gmra.mrb[56].mxu1 %vm696_vm0, %v17158_v9 }
 0x6db   :  { %12039 = vmatprep.mubr.msk.bf16.mxu1 %vm696_vm0, %v17180_v16 }
 0x6e2   :  { %12040 = vmatmul.mubr.msk.bf16.gmra.mrb[60].mxu1 %vm696_vm0, %v17184_v21 }
 0x6e3   :  { %12043 = vmatprep.mubr.msk.bf16.mxu1 %vm696_vm0, %v17208_v1 }
 0x6ea   :  { %12044 = vmatmul.mubr.msk.bf16.gmra.mrb[64].mxu1 %vm696_vm0, %v17212_v36 }
 0x6eb   :  { %12047 = vmatprep.mubr.msk.bf16.mxu1 %vm696_vm0, %v17235_v27 }
 0x6f2   :  { %12048 = vmatmul.mubr.msk.bf16.gmra.mrb[68].mxu1 %vm696_vm0, %v17239_v47 }
 0x6f3   :  { %12051 = vmatprep.mubr.msk.bf16.mxu1 %vm696_vm0, %v17259_v13 }
 0x6fa   :  { %12052 = vmatmul.mubr.msk.bf16.gmra.mrb[72].mxu1 %vm696_vm0, %v17263_v50 }
 0x6fb   :  { %12055 = vmatprep.mubr.msk.bf16.mxu1 %vm696_vm0, %v17279_v29 }
 0x702   :  { %12056 = vmatmul.mubr.msk.bf16.gmra.mrb[76].mxu1 %vm696_vm0, %v17282_v62 }
 0x703   :  { %12059 = vmatprep.mubr.msk.bf16.mxu1 %vm696_vm0, %v9716_v23 }
 0x70a   :  { %12060 = vmatmul.mubr.msk.bf16.gmra.mrb[80].mxu1 %vm696_vm0, %v9724_v52 }
 0x7ad   :  { %v12037_v9 = vpop.f32.mrb[56].mxu1 }
 0x7ae   :  { %9942 = vst.msk [vmem:[%s17642_s5 + $0x40] sm:$0xff] %vm696_vm0, %v12037_v9  ;;  %v9801_v57 = vpop.f32.mrb[57].mxu1 }
 0x7af   :  { %9940 = vst.msk [vmem:[%s17642_s5 + $0x10] sm:$0xff] %vm696_vm0, %v9801_v57  ;;  %v12038_v58 = vpop.f32.mrb[58].mxu1 }
 0x7b0   :  { %9943 = vst.msk [vmem:[%s17642_s5 + $0x58] sm:$0xff] %vm696_vm0, %v12038_v58  ;;  %v9804_v16 = vpop.f32.mrb[59].mxu1 }
 0x7b1   :  { %9941 = vst.msk [vmem:[%s17642_s5 + $0x28] sm:$0xff] %vm696_vm0, %v9804_v16 }
 0x7b5   :  { %v12041_v21 = vpop.f32.mrb[60].mxu1 }
 0x7b6   :  { %9946 = vst.msk [vmem:[%s17642_s5 + $0xa0] sm:$0xff] %vm696_vm0, %v12041_v21  ;;  %v9817_v31 = vpop.f32.mrb[61].mxu1 }
 0x7b7   :  { %9944 = vst.msk [vmem:[%s17642_s5 + $0x70] sm:$0xff] %vm696_vm0, %v9817_v31  ;;  %v12042_v51 = vpop.f32.mrb[62].mxu1 }
 0x7b8   :  { %9947 = vst.msk [vmem:[%s17642_s5 + $0xb8] sm:$0xff] %vm696_vm0, %v12042_v51  ;;  %v9820_v1 = vpop.f32.mrb[63].mxu1 }
 0x7b9   :  { %9945 = vst.msk [vmem:[%s17642_s5 + $0x88] sm:$0xff] %vm696_vm0, %v9820_v1 }
 0x7bd   :  { %v12045_v36 = vpop.f32.mrb[64].mxu1 }
 0x7be   :  { %9950 = vst.msk [vmem:[%s17642_s5 + $0x100] sm:$0xff] %vm696_vm0, %v12045_v36  ;;  %v9833_v25 = vpop.f32.mrb[65].mxu1 }
 0x7bf   :  { %9948 = vst.msk [vmem:[%s17642_s5 + $0xd0] sm:$0xff] %vm696_vm0, %v9833_v25  ;;  %v12046_v53 = vpop.f32.mrb[66].mxu1 }
 0x7c0   :  { %9951 = vst.msk [vmem:[%s17642_s5 + $0x118] sm:$0xff] %vm696_vm0, %v12046_v53  ;;  %v9836_v27 = vpop.f32.mrb[67].mxu1 }
 0x7c1   :  { %9949 = vst.msk [vmem:[%s17642_s5 + $0xe8] sm:$0xff] %vm696_vm0, %v9836_v27 }
 0x7c5   :  { %v12049_v47 = vpop.f32.mrb[68].mxu1 }
 0x7c6   :  { %9954 = vst.msk [vmem:[%s17642_s5 + $0x160] sm:$0xff] %vm696_vm0, %v12049_v47  ;;  %v9849_v40 = vpop.f32.mrb[69].mxu1 }
 0x7c7   :  { %9952 = vst.msk [vmem:[%s17642_s5 + $0x130] sm:$0xff] %vm696_vm0, %v9849_v40  ;;  %v12050_v13 = vpop.f32.mrb[70].mxu1 }
 0x7c8   :  { %9955 = vst.msk [vmem:[%s17642_s5 + $0x178] sm:$0xff] %vm696_vm0, %v12050_v13  ;;  %v9852_v50 = vpop.f32.mrb[71].mxu1 }
 0x7c9   :  { %9953 = vst.msk [vmem:[%s17642_s5 + $0x148] sm:$0xff] %vm696_vm0, %v9852_v50 }
 0x7cd   :  { %v12053_v29 = vpop.f32.mrb[72].mxu1 }
 0x7ce   :  { %9958 = vst.msk [vmem:[%s17642_s5 + $0x1c0] sm:$0xff] %vm696_vm0, %v12053_v29  ;;  %v9865_v62 = vpop.f32.mrb[73].mxu1 }
 0x7cf   :  { %9956 = vst.msk [vmem:[%s17642_s5 + $0x190] sm:$0xff] %vm696_vm0, %v9865_v62  ;;  %v12054_v24 = vpop.f32.mrb[74].mxu1 }
 0x7d0   :  { %9959 = vst.msk [vmem:[%s17642_s5 + $0x1d8] sm:$0xff] %vm696_vm0, %v12054_v24  ;;  %v9868_v3 = vpop.f32.mrb[75].mxu1 }
 0x7d1   :  { %9957 = vst.msk [vmem:[%s17642_s5 + $0x1a8] sm:$0xff] %vm696_vm0, %v9868_v3 }
 0x7d5   :  { %v12057_v26 = vpop.f32.mrb[76].mxu1 }
 0x7d6   :  { %9962 = vst.msk [vmem:[%s17642_s5 + $0x220] sm:$0xff] %vm696_vm0, %v12057_v26  ;;  %v9881_v41 = vpop.f32.mrb[77].mxu1 }
 0x7d7   :  { %9960 = vst.msk [vmem:[%s17642_s5 + $0x1f0] sm:$0xff] %vm696_vm0, %v9881_v41  ;;  %v12058_v63 = vpop.f32.mrb[78].mxu1 }
 0x7d8   :  { %9963 = vst.msk [vmem:[%s17642_s5 + $0x238] sm:$0xff] %vm696_vm0, %v12058_v63  ;;  %v9884_v35 = vpop.f32.mrb[79].mxu1 }
 0x7d9   :  { %9961 = vst.msk [vmem:[%s17642_s5 + $0x208] sm:$0xff] %vm696_vm0, %v9884_v35 }
 0x7dd   :  { %v12061_v48 = vpop.f32.mrb[80].mxu1 }
 0x7de   :  { %9966 = vst.msk [vmem:[%s17642_s5 + $0x280] sm:$0xff] %vm696_vm0, %v12061_v48  ;;  %v9897_v2 = vpop.f32.mrb[81].mxu1 }
 0x7df   :  { %9964 = vst.msk [vmem:[%s17642_s5 + $0x250] sm:$0xff] %vm696_vm0, %v9897_v2  ;;  %v12062_v38 = vpop.f32.mrb[82].mxu1 }
 0x7e0   :  { %9967 = vst.msk [vmem:[%s17642_s5 + $0x298] sm:$0xff] %vm696_vm0, %v12062_v38  ;;  %v9900_v45 = vpop.f32.mrb[83].mxu1 }
 0x7e1   :  { %9965 = vst.msk [vmem:[%s17642_s5 + $0x268] sm:$0xff] %vm696_vm0, %v9900_v45 }
 0x7e2   :  { %9972 = vsyncmov [#allocation4] }
 0x7e5   :  { %s9973_s24 = vpop.sfrf %9972 }
 0x7e6   :  { %p10234_p8 = scmp.ne.s32.totalorder %s9973_s24, 0 }
 0x7e8   :  { %9977 = shalt.err (%p10234_p8)  }

</bundles_post_ra>
